<compile_context>
chip_gen: v7x
topology: tpu7x:2x2x1
jax: 0.10.0
libtpu: 0.0.40
codegen_flags: <defaults>
</compile_context>

<pallas_src>
import jax
import jax.numpy as jnp
from jax.experimental import pallas as pl
from jax.experimental.pallas import tpu as pltpu

# ----------------------------- model config --------------------------------
IMG = 32                    # input image size (H = W)
PATCH = 8                   # patch size
GRID = IMG // PATCH         # 4x4 token grid
TOK = GRID * GRID           # 16 tokens
PDIM = PATCH * PATCH * 3    # 192 flattened patch dim
E = 32                      # encoder embed dim
HEADS = 2                   # encoder heads
MLP_DIM = 64                # MLP hidden
PROMPT_DIM = 32             # prompt / decoder embed dim
DEC_HEADS = 2               # decoder heads
NUM_MASK_TOKENS = 4         # SAM: 3 multimask + 1
NUM_TOKENS = 1 + NUM_MASK_TOKENS
UP1 = PROMPT_DIM // 4       # 8  channels after first 2x upscale
UP2 = PROMPT_DIM // 8       # 4  channels after second 2x upscale
MASK_RES = 4 * GRID         # 16 low-res mask resolution


# --------------------- helpers used INSIDE the kernel -----------------------
def _lin(x, w, b):
    """y = x @ w + b on VMEM-resident values (MXU, f32 accumulation)."""
    return jnp.dot(x, w, preferred_element_type=jnp.float32) + b


def _ln(x, g, b, eps=1e-6):
    """LayerNorm over the last (channel) dim, f32 accumulation."""
    xv = x.astype(jnp.float32)
    mu = jnp.mean(xv, axis=-1, keepdims=True)
    var = jnp.mean((xv - mu) ** 2, axis=-1, keepdims=True)
    return (xv - mu) * jax.lax.rsqrt(var + eps) * g + b


def _mha_proj(q, k, v, n_heads, proj_w, proj_b):
    """Multi-head attention fused with the output projection.

    Each head's output is projected with the matching row block of proj_w and
    summed, so no lane-axis concatenation and no head split/merge transposes
    are needed.  Contractions are expressed via dot_general on the last axes
    (no .T feeding the MXU).
    """
    _, e_ = q.shape
    hd = e_ // n_heads
    scale = 1.0 / (hd ** 0.5)
    acc = None
    for h in range(n_heads):
        qh = q[:, h * hd:(h + 1) * hd]
        kh = k[:, h * hd:(h + 1) * hd]
        vh = v[:, h * hd:(h + 1) * hd]
        s = jax.lax.dot_general(qh, kh, (((1,), (1,)), ((), ())),
                                preferred_element_type=jnp.float32) * scale
        s = s - jnp.max(s, axis=-1, keepdims=True)
        p = jnp.exp(s)
        p = p / jnp.sum(p, axis=-1, keepdims=True)
        oh = jnp.dot(p, vh, preferred_element_type=jnp.float32)
        ph = jnp.dot(oh, proj_w[h * hd:(h + 1) * hd, :],
                     preferred_element_type=jnp.float32)
        acc = ph if acc is None else acc + ph
    return acc + proj_b


# ----------------------------- weight name lists ----------------------------
ENC_NAMES = (
    "patch_w", "patch_b", "pos_embed",
    "ln1_g", "ln1_b", "qkv_w", "qkv_b", "proj_w", "proj_b",
    "ln2_g", "ln2_b", "mlp1_w", "mlp1_b", "mlp2_w", "mlp2_b",
    "neck_w", "neck_b", "neck_ln_g", "neck_ln_b",
)

DEC_NAMES = (
    "image_pe", "no_mask", "tokens_init",
    "sa_qkv_w", "sa_qkv_b", "sa_proj_w", "sa_proj_b", "dln1_g", "dln1_b",
    "ca_q_w", "ca_q_b", "ca_k_w", "ca_k_b", "ca_v_w", "ca_v_b",
    "ca_proj_w", "ca_proj_b", "dln2_g", "dln2_b",
    "dmlp1_w", "dmlp1_b", "dmlp2_w", "dmlp2_b", "dln3_g", "dln3_b",
    "i2t_q_w", "i2t_q_b", "i2t_k_w", "i2t_k_b", "i2t_v_w", "i2t_v_b",
    "i2t_proj_w", "i2t_proj_b", "dln4_g", "dln4_b",
    "up1_w", "up1_b", "up_ln_g", "up_ln_b", "up2_w", "up2_b",
    "hyp_w1", "hyp_b1", "hyp_w2", "hyp_b2", "hyp_w3", "hyp_b3",
)

FUSED_NAMES = ENC_NAMES + DEC_NAMES


# ----------------------------- fused SAM kernel -----------------------------
def sam_kernel(*refs):
    patch_ref = refs[0]
    w = {name: refs[1 + i] for i, name in enumerate(FUSED_NAMES)}
    out_ref = refs[1 + len(FUSED_NAMES)]
    C = PROMPT_DIM

    # ---------------- image encoder ----------------
    # patch-embed conv as matmul + positional embedding
    x = _lin(patch_ref[0].astype(jnp.float32), w["patch_w"][...], w["patch_b"][...])
    x = x + w["pos_embed"][...]

    # single ViT block (LN -> QKV -> MHA+proj -> residual -> LN -> MLP -> residual)
    # TODO(synk): real SAM ViT encoder stacks 12-32 blocks with windowed attention;
    # a single global-attention block is used in this synthetic mini-SAM.
    h = _ln(x, w["ln1_g"][...], w["ln1_b"][...])
    qkv = _lin(h, w["qkv_w"][...], w["qkv_b"][...])
    q, k, v = qkv[:, :E], qkv[:, E:2 * E], qkv[:, 2 * E:]
    x = x + _mha_proj(q, k, v, HEADS, w["proj_w"][...], w["proj_b"][...])
    h = _ln(x, w["ln2_g"][...], w["ln2_b"][...])
    h = jax.nn.gelu(_lin(h, w["mlp1_w"][...], w["mlp1_b"][...]))
    x = x + _lin(h, w["mlp2_w"][...], w["mlp2_b"][...])

    # neck: 1x1 conv + LayerNorm2d (channels-last)
    img = _lin(x, w["neck_w"][...], w["neck_b"][...])
    img = _ln(img, w["neck_ln_g"][...], w["neck_ln_b"][...])      # (TOK, C)

    # ---------------- mask decoder ----------------
    # dense (no-mask) prompt embedding + image positional encoding, added once.
    # TODO(synk): SAM re-adds positional encodings inside each TwoWayTransformer
    # layer; here the PE is added once up front.
    src = img + w["no_mask"][...] + w["image_pe"][...]
    tokens = w["tokens_init"][...].astype(jnp.float32)            # (5, C)

    # token self-attention
    qkv = _lin(tokens, w["sa_qkv_w"][...], w["sa_qkv_b"][...])
    q, k, v = qkv[:, :C], qkv[:, C:2 * C], qkv[:, 2 * C:]
    tokens = _ln(tokens + _mha_proj(q, k, v, DEC_HEADS,
                                    w["sa_proj_w"][...], w["sa_proj_b"][...]),
                 w["dln1_g"][...], w["dln1_b"][...])

    # cross-attention: tokens -> image
    q = _lin(tokens, w["ca_q_w"][...], w["ca_q_b"][...])
    k = _lin(src, w["ca_k_w"][...], w["ca_k_b"][...])
    v = _lin(src, w["ca_v_w"][...], w["ca_v_b"][...])
    tokens = _ln(tokens + _mha_proj(q, k, v, DEC_HEADS,
                                    w["ca_proj_w"][...], w["ca_proj_b"][...]),
                 w["dln2_g"][...], w["dln2_b"][...])

    # MLP on tokens
    h = jnp.maximum(_lin(tokens, w["dmlp1_w"][...], w["dmlp1_b"][...]), 0.0)
    tokens = _ln(tokens + _lin(h, w["dmlp2_w"][...], w["dmlp2_b"][...]),
                 w["dln3_g"][...], w["dln3_b"][...])

    # cross-attention: image -> tokens (updates the image embedding)
    q = _lin(src, w["i2t_q_w"][...], w["i2t_q_b"][...])
    k = _lin(tokens, w["i2t_k_w"][...], w["i2t_k_b"][...])
    v = _lin(tokens, w["i2t_v_w"][...], w["i2t_v_b"][...])
    src = _ln(src + _mha_proj(q, k, v, DEC_HEADS,
                              w["i2t_proj_w"][...], w["i2t_proj_b"][...]),
              w["dln4_g"][...], w["dln4_b"][...])

    # hypernetwork MLPs (stacked weights, unrolled over the 4 mask tokens).
    row_ids = jax.lax.broadcasted_iota(jnp.int32, (NUM_MASK_TOKENS, UP2), 0)
    hyper_in = jnp.zeros((NUM_MASK_TOKENS, UP2), jnp.float32)
    for i in range(NUM_MASK_TOKENS):
        t = tokens[1 + i:2 + i, :]                                   # (1, C)
        h = jnp.maximum(jnp.dot(t, w["hyp_w1"][i],
                                preferred_element_type=jnp.float32)
                        + w["hyp_b1"][i], 0.0)
        h = jnp.maximum(jnp.dot(h, w["hyp_w2"][i],
                                preferred_element_type=jnp.float32)
                        + w["hyp_b2"][i], 0.0)
        h = jnp.dot(h, w["hyp_w3"][i],
                    preferred_element_type=jnp.float32) + w["hyp_b3"][i]  # (1, UP2)
        hyper_in = hyper_in + (row_ids == i).astype(jnp.float32) * h      # row i

    # output upscaling: ConvTranspose2d(k=2, s=2) expressed as per-pixel linear.
    # The pixel-shuffle spatial permutation is applied OUTSIDE the kernel on the
    # tiny (4, 256) result; in here everything stays 2-D and lane-friendly.
    y1 = _lin(src, w["up1_w"][...], w["up1_b"][...])    # (16, 4*UP1), cols = (d, c)
    z_d = []
    for d in range(4):                                  # d = first 2x2 sub-pixel
        c0 = _ln(y1[:, d * UP1:(d + 1) * UP1], w["up_ln_g"][...], w["up_ln_b"][...])
        a0 = jax.nn.gelu(c0)
        z_d.append(jax.nn.gelu(_lin(a0, w["up2_w"][...], w["up2_b"][...])))  # (16, 4*UP2)

    # Rows ordered (e, d, pos) so a single dot yields the whole (4, 256) mask block.
    z2 = jnp.concatenate([z_d[d][:, e * UP2:(e + 1) * UP2]
                          for e in range(4) for d in range(4)], axis=0)      # (256, UP2)
    masks = jax.lax.dot_general(hyper_in, z2, (((1,), (1,)), ((), ())),
                                preferred_element_type=jnp.float32)          # (4, 256)
    # TODO(synk): iou_prediction_head omitted — Network.forward only consumes masks.
    out_ref[0] = masks.astype(out_ref.dtype)


# ----------------------------- parameters ----------------------------------
def init_params(key):
    keys = iter(jax.random.split(key, 64))
    n = lambda shape, s=0.02: s * jax.random.normal(next(keys), shape, jnp.float32)
    z = lambda shape: jnp.zeros(shape, jnp.float32)
    o = lambda shape: jnp.ones(shape, jnp.float32)
    p = {}
    # image encoder
    p["patch_w"] = n((PDIM, E)); p["patch_b"] = z((E,))
    p["pos_embed"] = n((1, TOK, E))
    p["ln1_g"] = o((E,)); p["ln1_b"] = z((E,))
    p["qkv_w"] = n((E, 3 * E)); p["qkv_b"] = z((3 * E,))
    p["proj_w"] = n((E, E)); p["proj_b"] = z((E,))
    p["ln2_g"] = o((E,)); p["ln2_b"] = z((E,))
    p["mlp1_w"] = n((E, MLP_DIM)); p["mlp1_b"] = z((MLP_DIM,))
    p["mlp2_w"] = n((MLP_DIM, E)); p["mlp2_b"] = z((E,))
    p["neck_w"] = n((E, PROMPT_DIM)); p["neck_b"] = z((PROMPT_DIM,))
    p["neck_ln_g"] = o((PROMPT_DIM,)); p["neck_ln_b"] = z((PROMPT_DIM,))
    # prompt encoder
    p["no_mask_embed"] = n((PROMPT_DIM,))
    p["image_pe"] = n((TOK, PROMPT_DIM))
    # mask decoder
    p["iou_token"] = n((1, PROMPT_DIM))
    p["mask_tokens"] = n((NUM_MASK_TOKENS, PROMPT_DIM))
    p["sa_qkv_w"] = n((PROMPT_DIM, 3 * PROMPT_DIM)); p["sa_qkv_b"] = z((3 * PROMPT_DIM,))
    p["sa_proj_w"] = n((PROMPT_DIM, PROMPT_DIM)); p["sa_proj_b"] = z((PROMPT_DIM,))
    p["dln1_g"] = o((PROMPT_DIM,)); p["dln1_b"] = z((PROMPT_DIM,))
    for pre in ("ca", "i2t"):
        for nm in ("q", "k", "v", "proj"):
            p[f"{pre}_{nm}_w"] = n((PROMPT_DIM, PROMPT_DIM))
            p[f"{pre}_{nm}_b"] = z((PROMPT_DIM,))
    p["dln2_g"] = o((PROMPT_DIM,)); p["dln2_b"] = z((PROMPT_DIM,))
    p["dmlp1_w"] = n((PROMPT_DIM, MLP_DIM)); p["dmlp1_b"] = z((MLP_DIM,))
    p["dmlp2_w"] = n((MLP_DIM, PROMPT_DIM)); p["dmlp2_b"] = z((PROMPT_DIM,))
    p["dln3_g"] = o((PROMPT_DIM,)); p["dln3_b"] = z((PROMPT_DIM,))
    p["dln4_g"] = o((PROMPT_DIM,)); p["dln4_b"] = z((PROMPT_DIM,))
    # output upscaling (ConvTranspose2d k=2 s=2 expressed as per-pixel linear)
    p["up1_w"] = n((PROMPT_DIM, UP1 * 4)); p["up1_b"] = z((UP1 * 4,))
    p["up_ln_g"] = o((UP1,)); p["up_ln_b"] = z((UP1,))
    p["up2_w"] = n((UP1, UP2 * 4)); p["up2_b"] = z((UP2 * 4,))
    # hypernetwork MLPs (one per mask token)
    for i in range(NUM_MASK_TOKENS):
        p[f"hyp{i}_w1"] = n((PROMPT_DIM, PROMPT_DIM)); p[f"hyp{i}_b1"] = z((PROMPT_DIM,))
        p[f"hyp{i}_w2"] = n((PROMPT_DIM, PROMPT_DIM)); p[f"hyp{i}_b2"] = z((PROMPT_DIM,))
        p[f"hyp{i}_w3"] = n((PROMPT_DIM, UP2)); p[f"hyp{i}_b3"] = z((UP2,))
    return p


# ----------------------------- wrappers -------------------------------------
def _rep_spec(arr):
    """Full-array block replicated across the batch grid axis (fetched once)."""
    nd = arr.ndim
    return pl.BlockSpec(arr.shape, lambda b, _nd=nd: (0,) * _nd)


def _r1(a):
    return a.reshape(1, -1)


def _enc_arrays(p):
    return {
        "patch_w": p["patch_w"], "patch_b": _r1(p["patch_b"]),
        "pos_embed": p["pos_embed"].reshape(TOK, E),
        "ln1_g": _r1(p["ln1_g"]), "ln1_b": _r1(p["ln1_b"]),
        "qkv_w": p["qkv_w"], "qkv_b": _r1(p["qkv_b"]),
        "proj_w": p["proj_w"], "proj_b": _r1(p["proj_b"]),
        "ln2_g": _r1(p["ln2_g"]), "ln2_b": _r1(p["ln2_b"]),
        "mlp1_w": p["mlp1_w"], "mlp1_b": _r1(p["mlp1_b"]),
        "mlp2_w": p["mlp2_w"], "mlp2_b": _r1(p["mlp2_b"]),
        "neck_w": p["neck_w"], "neck_b": _r1(p["neck_b"]),
        "neck_ln_g": _r1(p["neck_ln_g"]), "neck_ln_b": _r1(p["neck_ln_b"]),
    }


def _dec_arrays(p):
    a = {
        "image_pe": p["image_pe"],
        "no_mask": _r1(p["no_mask_embed"]),
        "tokens_init": jnp.concatenate([p["iou_token"], p["mask_tokens"]], axis=0),
        "sa_qkv_w": p["sa_qkv_w"], "sa_qkv_b": _r1(p["sa_qkv_b"]),
        "sa_proj_w": p["sa_proj_w"], "sa_proj_b": _r1(p["sa_proj_b"]),
        "dln1_g": _r1(p["dln1_g"]), "dln1_b": _r1(p["dln1_b"]),
        "dln2_g": _r1(p["dln2_g"]), "dln2_b": _r1(p["dln2_b"]),
        "dln3_g": _r1(p["dln3_g"]), "dln3_b": _r1(p["dln3_b"]),
        "dln4_g": _r1(p["dln4_g"]), "dln4_b": _r1(p["dln4_b"]),
        "dmlp1_w": p["dmlp1_w"], "dmlp1_b": _r1(p["dmlp1_b"]),
        "dmlp2_w": p["dmlp2_w"], "dmlp2_b": _r1(p["dmlp2_b"]),
        "up1_w": p["up1_w"], "up1_b": _r1(p["up1_b"]),
        "up_ln_g": _r1(p["up_ln_g"]), "up_ln_b": _r1(p["up_ln_b"]),
        "up2_w": p["up2_w"], "up2_b": _r1(p["up2_b"]),
        # hypernet weights stacked per mask token; biases stored (T, 1, D) so that
        # ref[i] yields a 2-D (1, D) slab inside the kernel.
        "hyp_w1": jnp.stack([p[f"hyp{i}_w1"] for i in range(NUM_MASK_TOKENS)]),
        "hyp_b1": jnp.stack([p[f"hyp{i}_b1"] for i in range(NUM_MASK_TOKENS)])[:, None, :],
        "hyp_w2": jnp.stack([p[f"hyp{i}_w2"] for i in range(NUM_MASK_TOKENS)]),
        "hyp_b2": jnp.stack([p[f"hyp{i}_b2"] for i in range(NUM_MASK_TOKENS)])[:, None, :],
        "hyp_w3": jnp.stack([p[f"hyp{i}_w3"] for i in range(NUM_MASK_TOKENS)]),
        "hyp_b3": jnp.stack([p[f"hyp{i}_b3"] for i in range(NUM_MASK_TOKENS)])[:, None, :],
    }
    for pre in ("ca", "i2t"):
        for nm in ("q", "k", "v", "proj"):
            a[f"{pre}_{nm}_w"] = p[f"{pre}_{nm}_w"]
            a[f"{pre}_{nm}_b"] = _r1(p[f"{pre}_{nm}_b"])
    return a


def sam_low_res_masks(p, x_nchw):
    """Fused encoder + decoder: one pallas_call, one grid step per batch elem."""
    B = x_nchw.shape[0]
    # NCHW -> NHWC -> flattened non-overlapping patches (cheap one-time glue)
    x = jnp.transpose(x_nchw, (0, 2, 3, 1))
    x = x.reshape(B, GRID, PATCH, GRID, PATCH, 3)
    patches = jnp.transpose(x, (0, 1, 3, 2, 4, 5)).reshape(B, TOK, PDIM)

    arrs = {**_enc_arrays(p), **_dec_arrays(p)}
    ws = [arrs[n] for n in FUSED_NAMES]
    in_specs = ([pl.BlockSpec((1, TOK, PDIM), lambda b: (b, 0, 0))]
                + [_rep_spec(a) for a in ws])
    out = pl.pallas_call(
        sam_kernel,
        out_shape=jax.ShapeDtypeStruct((B, NUM_MASK_TOKENS, MASK_RES * MASK_RES),
                                       jnp.float32),
        grid=(B,),
        in_specs=in_specs,
        out_specs=pl.BlockSpec((1, NUM_MASK_TOKENS, MASK_RES * MASK_RES),
                               lambda b: (b, 0, 0)),
        compiler_params=pltpu.CompilerParams(dimension_semantics=("parallel",)),
    )(patches, *ws)

    # Undo the kernel's (e, d, pos) column ordering — this is exactly the pixel
    # shuffle of the two ConvTranspose2d(k=2, s=2) stages (tiny XLA glue).
    m = out.reshape(B, NUM_MASK_TOKENS, 2, 2, 2, 2, GRID, GRID)
    m = jnp.transpose(m, (0, 1, 6, 4, 2, 7, 5, 3))
    return m.reshape(B, NUM_MASK_TOKENS, MASK_RES, MASK_RES)


def sam_forward(params, x, multimask_output=False):
    """Mini-SAM forward; mirrors Network.forward(x) returning {'sal','final'}."""
    B = x.shape[0]
    image_size = x.shape[-1]
    low_res_masks = sam_low_res_masks(params, x)
    if multimask_output:
        masks = low_res_masks[:, 1:]
    else:
        masks = low_res_masks[:, 0:1]
    # TODO(synk): jax.image.resize(bilinear) edge behavior differs slightly from
    # PyTorch F.interpolate(align_corners=False); kept as XLA glue.
    masks = jax.image.resize(masks, (B, masks.shape[1], image_size, image_size),
                             method="bilinear")
    return {"sal": masks, "final": masks}


# ----------------------------- main -----------------------------------------
if __name__ == "__main__":
    key = jax.random.PRNGKey(0)
    kx, kp = jax.random.split(key)
    B = 2
    x = jax.random.normal(kx, (B, 3, IMG, IMG), jnp.float32)   # NCHW like PyTorch
    params = init_params(kp)

    fwd = jax.jit(lambda p_, x_: sam_forward(p_, x_, multimask_output=False))
    out = fwd(params, x)
    jax.block_until_ready(out["final"])

    assert out["final"].shape == (B, 1, IMG, IMG)
    assert out["sal"].shape == (B, 1, IMG, IMG)
    assert bool(jnp.all(jnp.isfinite(out["final"])))
    print("KERNEL_OK")
</pallas_src>

<mosaic_0001>
module attributes {stable_mosaic.version = 11 : i64} {
  func.func @sam_kernel(%arg0: i32, %arg1: memref<1x16x192xf32, #tpu.memory_space<vmem>>, %arg2: memref<192x32xf32, #tpu.memory_space<vmem>>, %arg3: memref<1x32xf32, #tpu.memory_space<vmem>>, %arg4: memref<16x32xf32, #tpu.memory_space<vmem>>, %arg5: memref<1x32xf32, #tpu.memory_space<vmem>>, %arg6: memref<1x32xf32, #tpu.memory_space<vmem>>, %arg7: memref<32x96xf32, #tpu.memory_space<vmem>>, %arg8: memref<1x96xf32, #tpu.memory_space<vmem>>, %arg9: memref<32x32xf32, #tpu.memory_space<vmem>>, %arg10: memref<1x32xf32, #tpu.memory_space<vmem>>, %arg11: memref<1x32xf32, #tpu.memory_space<vmem>>, %arg12: memref<1x32xf32, #tpu.memory_space<vmem>>, %arg13: memref<32x64xf32, #tpu.memory_space<vmem>>, %arg14: memref<1x64xf32, #tpu.memory_space<vmem>>, %arg15: memref<64x32xf32, #tpu.memory_space<vmem>>, %arg16: memref<1x32xf32, #tpu.memory_space<vmem>>, %arg17: memref<32x32xf32, #tpu.memory_space<vmem>>, %arg18: memref<1x32xf32, #tpu.memory_space<vmem>>, %arg19: memref<1x32xf32, #tpu.memory_space<vmem>>, %arg20: memref<1x32xf32, #tpu.memory_space<vmem>>, %arg21: memref<16x32xf32, #tpu.memory_space<vmem>>, %arg22: memref<1x32xf32, #tpu.memory_space<vmem>>, %arg23: memref<5x32xf32, #tpu.memory_space<vmem>>, %arg24: memref<32x96xf32, #tpu.memory_space<vmem>>, %arg25: memref<1x96xf32, #tpu.memory_space<vmem>>, %arg26: memref<32x32xf32, #tpu.memory_space<vmem>>, %arg27: memref<1x32xf32, #tpu.memory_space<vmem>>, %arg28: memref<1x32xf32, #tpu.memory_space<vmem>>, %arg29: memref<1x32xf32, #tpu.memory_space<vmem>>, %arg30: memref<32x32xf32, #tpu.memory_space<vmem>>, %arg31: memref<1x32xf32, #tpu.memory_space<vmem>>, %arg32: memref<32x32xf32, #tpu.memory_space<vmem>>, %arg33: memref<1x32xf32, #tpu.memory_space<vmem>>, %arg34: memref<32x32xf32, #tpu.memory_space<vmem>>, %arg35: memref<1x32xf32, #tpu.memory_space<vmem>>, %arg36: memref<32x32xf32, #tpu.memory_space<vmem>>, %arg37: memref<1x32xf32, #tpu.memory_space<vmem>>, %arg38: memref<1x32xf32, #tpu.memory_space<vmem>>, %arg39: memref<1x32xf32, #tpu.memory_space<vmem>>, %arg40: memref<32x64xf32, #tpu.memory_space<vmem>>, %arg41: memref<1x64xf32, #tpu.memory_space<vmem>>, %arg42: memref<64x32xf32, #tpu.memory_space<vmem>>, %arg43: memref<1x32xf32, #tpu.memory_space<vmem>>, %arg44: memref<1x32xf32, #tpu.memory_space<vmem>>, %arg45: memref<1x32xf32, #tpu.memory_space<vmem>>, %arg46: memref<32x32xf32, #tpu.memory_space<vmem>>, %arg47: memref<1x32xf32, #tpu.memory_space<vmem>>, %arg48: memref<32x32xf32, #tpu.memory_space<vmem>>, %arg49: memref<1x32xf32, #tpu.memory_space<vmem>>, %arg50: memref<32x32xf32, #tpu.memory_space<vmem>>, %arg51: memref<1x32xf32, #tpu.memory_space<vmem>>, %arg52: memref<32x32xf32, #tpu.memory_space<vmem>>, %arg53: memref<1x32xf32, #tpu.memory_space<vmem>>, %arg54: memref<1x32xf32, #tpu.memory_space<vmem>>, %arg55: memref<1x32xf32, #tpu.memory_space<vmem>>, %arg56: memref<32x32xf32, #tpu.memory_space<vmem>>, %arg57: memref<1x32xf32, #tpu.memory_space<vmem>>, %arg58: memref<1x8xf32, #tpu.memory_space<vmem>>, %arg59: memref<1x8xf32, #tpu.memory_space<vmem>>, %arg60: memref<8x16xf32, #tpu.memory_space<vmem>>, %arg61: memref<1x16xf32, #tpu.memory_space<vmem>>, %arg62: memref<4x32x32xf32, #tpu.memory_space<vmem>>, %arg63: memref<4x1x32xf32, #tpu.memory_space<vmem>>, %arg64: memref<4x32x32xf32, #tpu.memory_space<vmem>>, %arg65: memref<4x1x32xf32, #tpu.memory_space<vmem>>, %arg66: memref<4x32x4xf32, #tpu.memory_space<vmem>>, %arg67: memref<4x1x4xf32, #tpu.memory_space<vmem>>, %arg68: memref<1x4x256xf32, #tpu.memory_space<vmem>>) attributes {dimension_semantics = [#tpu.dimension_semantics<parallel>], iteration_bounds = array<i64: 2>, scalar_prefetch = 0 : i64, scratch_operands = 0 : i64, tpu.core_type = #tpu.core_type<tc>, window_params = [{transform_indices = @transform_0, window_bounds = array<i64: 1, 16, 192>}, {pipeline_mode = #tpu.pipeline_mode<synchronous>, transform_indices = @transform_1, window_bounds = array<i64: 192, 32>}, {pipeline_mode = #tpu.pipeline_mode<synchronous>, transform_indices = @transform_2, window_bounds = array<i64: 1, 32>}, {pipeline_mode = #tpu.pipeline_mode<synchronous>, transform_indices = @transform_3, window_bounds = array<i64: 16, 32>}, {pipeline_mode = #tpu.pipeline_mode<synchronous>, transform_indices = @transform_4, window_bounds = array<i64: 1, 32>}, {pipeline_mode = #tpu.pipeline_mode<synchronous>, transform_indices = @transform_5, window_bounds = array<i64: 1, 32>}, {pipeline_mode = #tpu.pipeline_mode<synchronous>, transform_indices = @transform_6, window_bounds = array<i64: 32, 96>}, {pipeline_mode = #tpu.pipeline_mode<synchronous>, transform_indices = @transform_7, window_bounds = array<i64: 1, 96>}, {pipeline_mode = #tpu.pipeline_mode<synchronous>, transform_indices = @transform_8, window_bounds = array<i64: 32, 32>}, {pipeline_mode = #tpu.pipeline_mode<synchronous>, transform_indices = @transform_9, window_bounds = array<i64: 1, 32>}, {pipeline_mode = #tpu.pipeline_mode<synchronous>, transform_indices = @transform_10, window_bounds = array<i64: 1, 32>}, {pipeline_mode = #tpu.pipeline_mode<synchronous>, transform_indices = @transform_11, window_bounds = array<i64: 1, 32>}, {pipeline_mode = #tpu.pipeline_mode<synchronous>, transform_indices = @transform_12, window_bounds = array<i64: 32, 64>}, {pipeline_mode = #tpu.pipeline_mode<synchronous>, transform_indices = @transform_13, window_bounds = array<i64: 1, 64>}, {pipeline_mode = #tpu.pipeline_mode<synchronous>, transform_indices = @transform_14, window_bounds = array<i64: 64, 32>}, {pipeline_mode = #tpu.pipeline_mode<synchronous>, transform_indices = @transform_15, window_bounds = array<i64: 1, 32>}, {pipeline_mode = #tpu.pipeline_mode<synchronous>, transform_indices = @transform_16, window_bounds = array<i64: 32, 32>}, {pipeline_mode = #tpu.pipeline_mode<synchronous>, transform_indices = @transform_17, window_bounds = array<i64: 1, 32>}, {pipeline_mode = #tpu.pipeline_mode<synchronous>, transform_indices = @transform_18, window_bounds = array<i64: 1, 32>}, {pipeline_mode = #tpu.pipeline_mode<synchronous>, transform_indices = @transform_19, window_bounds = array<i64: 1, 32>}, {pipeline_mode = #tpu.pipeline_mode<synchronous>, transform_indices = @transform_20, window_bounds = array<i64: 16, 32>}, {pipeline_mode = #tpu.pipeline_mode<synchronous>, transform_indices = @transform_21, window_bounds = array<i64: 1, 32>}, {pipeline_mode = #tpu.pipeline_mode<synchronous>, transform_indices = @transform_22, window_bounds = array<i64: 5, 32>}, {pipeline_mode = #tpu.pipeline_mode<synchronous>, transform_indices = @transform_23, window_bounds = array<i64: 32, 96>}, {pipeline_mode = #tpu.pipeline_mode<synchronous>, transform_indices = @transform_24, window_bounds = array<i64: 1, 96>}, {pipeline_mode = #tpu.pipeline_mode<synchronous>, transform_indices = @transform_25, window_bounds = array<i64: 32, 32>}, {pipeline_mode = #tpu.pipeline_mode<synchronous>, transform_indices = @transform_26, window_bounds = array<i64: 1, 32>}, {pipeline_mode = #tpu.pipeline_mode<synchronous>, transform_indices = @transform_27, window_bounds = array<i64: 1, 32>}, {pipeline_mode = #tpu.pipeline_mode<synchronous>, transform_indices = @transform_28, window_bounds = array<i64: 1, 32>}, {pipeline_mode = #tpu.pipeline_mode<synchronous>, transform_indices = @transform_29, window_bounds = array<i64: 32, 32>}, {pipeline_mode = #tpu.pipeline_mode<synchronous>, transform_indices = @transform_30, window_bounds = array<i64: 1, 32>}, {pipeline_mode = #tpu.pipeline_mode<synchronous>, transform_indices = @transform_31, window_bounds = array<i64: 32, 32>}, {pipeline_mode = #tpu.pipeline_mode<synchronous>, transform_indices = @transform_32, window_bounds = array<i64: 1, 32>}, {pipeline_mode = #tpu.pipeline_mode<synchronous>, transform_indices = @transform_33, window_bounds = array<i64: 32, 32>}, {pipeline_mode = #tpu.pipeline_mode<synchronous>, transform_indices = @transform_34, window_bounds = array<i64: 1, 32>}, {pipeline_mode = #tpu.pipeline_mode<synchronous>, transform_indices = @transform_35, window_bounds = array<i64: 32, 32>}, {pipeline_mode = #tpu.pipeline_mode<synchronous>, transform_indices = @transform_36, window_bounds = array<i64: 1, 32>}, {pipeline_mode = #tpu.pipeline_mode<synchronous>, transform_indices = @transform_37, window_bounds = array<i64: 1, 32>}, {pipeline_mode = #tpu.pipeline_mode<synchronous>, transform_indices = @transform_38, window_bounds = array<i64: 1, 32>}, {pipeline_mode = #tpu.pipeline_mode<synchronous>, transform_indices = @transform_39, window_bounds = array<i64: 32, 64>}, {pipeline_mode = #tpu.pipeline_mode<synchronous>, transform_indices = @transform_40, window_bounds = array<i64: 1, 64>}, {pipeline_mode = #tpu.pipeline_mode<synchronous>, transform_indices = @transform_41, window_bounds = array<i64: 64, 32>}, {pipeline_mode = #tpu.pipeline_mode<synchronous>, transform_indices = @transform_42, window_bounds = array<i64: 1, 32>}, {pipeline_mode = #tpu.pipeline_mode<synchronous>, transform_indices = @transform_43, window_bounds = array<i64: 1, 32>}, {pipeline_mode = #tpu.pipeline_mode<synchronous>, transform_indices = @transform_44, window_bounds = array<i64: 1, 32>}, {pipeline_mode = #tpu.pipeline_mode<synchronous>, transform_indices = @transform_45, window_bounds = array<i64: 32, 32>}, {pipeline_mode = #tpu.pipeline_mode<synchronous>, transform_indices = @transform_46, window_bounds = array<i64: 1, 32>}, {pipeline_mode = #tpu.pipeline_mode<synchronous>, transform_indices = @transform_47, window_bounds = array<i64: 32, 32>}, {pipeline_mode = #tpu.pipeline_mode<synchronous>, transform_indices = @transform_48, window_bounds = array<i64: 1, 32>}, {pipeline_mode = #tpu.pipeline_mode<synchronous>, transform_indices = @transform_49, window_bounds = array<i64: 32, 32>}, {pipeline_mode = #tpu.pipeline_mode<synchronous>, transform_indices = @transform_50, window_bounds = array<i64: 1, 32>}, {pipeline_mode = #tpu.pipeline_mode<synchronous>, transform_indices = @transform_51, window_bounds = array<i64: 32, 32>}, {pipeline_mode = #tpu.pipeline_mode<synchronous>, transform_indices = @transform_52, window_bounds = array<i64: 1, 32>}, {pipeline_mode = #tpu.pipeline_mode<synchronous>, transform_indices = @transform_53, window_bounds = array<i64: 1, 32>}, {pipeline_mode = #tpu.pipeline_mode<synchronous>, transform_indices = @transform_54, window_bounds = array<i64: 1, 32>}, {pipeline_mode = #tpu.pipeline_mode<synchronous>, transform_indices = @transform_55, window_bounds = array<i64: 32, 32>}, {pipeline_mode = #tpu.pipeline_mode<synchronous>, transform_indices = @transform_56, window_bounds = array<i64: 1, 32>}, {pipeline_mode = #tpu.pipeline_mode<synchronous>, transform_indices = @transform_57, window_bounds = array<i64: 1, 8>}, {pipeline_mode = #tpu.pipeline_mode<synchronous>, transform_indices = @transform_58, window_bounds = array<i64: 1, 8>}, {pipeline_mode = #tpu.pipeline_mode<synchronous>, transform_indices = @transform_59, window_bounds = array<i64: 8, 16>}, {pipeline_mode = #tpu.pipeline_mode<synchronous>, transform_indices = @transform_60, window_bounds = array<i64: 1, 16>}, {pipeline_mode = #tpu.pipeline_mode<synchronous>, transform_indices = @transform_61, window_bounds = array<i64: 4, 32, 32>}, {pipeline_mode = #tpu.pipeline_mode<synchronous>, transform_indices = @transform_62, window_bounds = array<i64: 4, 1, 32>}, {pipeline_mode = #tpu.pipeline_mode<synchronous>, transform_indices = @transform_63, window_bounds = array<i64: 4, 32, 32>}, {pipeline_mode = #tpu.pipeline_mode<synchronous>, transform_indices = @transform_64, window_bounds = array<i64: 4, 1, 32>}, {pipeline_mode = #tpu.pipeline_mode<synchronous>, transform_indices = @transform_65, window_bounds = array<i64: 4, 32, 4>}, {pipeline_mode = #tpu.pipeline_mode<synchronous>, transform_indices = @transform_66, window_bounds = array<i64: 4, 1, 4>}, {transform_indices = @transform_67, window_bounds = array<i64: 1, 4, 256>}]} {
    %c0 = arith.constant 0 : index
    %c0_0 = arith.constant 0 : index
    %c0_1 = arith.constant 0 : index
    %0 = vector.load %arg1[%c0, %c0_0, %c0_1] : memref<1x16x192xf32, #tpu.memory_space<vmem>>, vector<1x16x192xf32>
    %1 = vector.shape_cast %0 : vector<1x16x192xf32> to vector<16x192xf32>
    %c0_2 = arith.constant 0 : index
    %c0_3 = arith.constant 0 : index
    %2 = vector.load %arg2[%c0_2, %c0_3] : memref<192x32xf32, #tpu.memory_space<vmem>>, vector<192x32xf32>
    %c0_4 = arith.constant 0 : index
    %c0_5 = arith.constant 0 : index
    %3 = vector.load %arg3[%c0_4, %c0_5] : memref<1x32xf32, #tpu.memory_space<vmem>>, vector<1x32xf32>
    %cst = arith.constant dense<0.000000e+00> : vector<16x32xf32>
    %4 = tpu.matmul %1, %2, %cst {dimension_numbers = #tpu.dot_dimension_numbers<[1], [0], [0], [1], [0, 0, 1, 1], [], []>} : vector<16x192xf32>, vector<192x32xf32>, vector<16x32xf32> -> vector<16x32xf32>
    %5 = vector.broadcast %3 : vector<1x32xf32> to vector<16x32xf32>
    %6 = arith.addf %4, %5 : vector<16x32xf32>
    %c0_6 = arith.constant 0 : index
    %c0_7 = arith.constant 0 : index
    %7 = vector.load %arg4[%c0_6, %c0_7] : memref<16x32xf32, #tpu.memory_space<vmem>>, vector<16x32xf32>
    %8 = arith.addf %6, %7 : vector<16x32xf32>
    %c0_8 = arith.constant 0 : index
    %c0_9 = arith.constant 0 : index
    %9 = vector.load %arg5[%c0_8, %c0_9] : memref<1x32xf32, #tpu.memory_space<vmem>>, vector<1x32xf32>
    %c0_10 = arith.constant 0 : index
    %c0_11 = arith.constant 0 : index
    %10 = vector.load %arg6[%c0_10, %c0_11] : memref<1x32xf32, #tpu.memory_space<vmem>>, vector<1x32xf32>
    %cst_12 = arith.constant dense<0.000000e+00> : vector<16xf32>
    %11 = vector.multi_reduction <add>, %8, %cst_12 [1] : vector<16x32xf32> to vector<16xf32>
    %12 = vector.shape_cast %11 : vector<16xf32> to vector<16x1xf32>
    %cst_13 = arith.constant 3.200000e+01 : f32
    %13 = vector.broadcast %cst_13 : f32 to vector<16x1xf32>
    %14 = arith.divf %12, %13 : vector<16x1xf32>
    %15 = vector.broadcast %14 : vector<16x1xf32> to vector<16x32xf32>
    %16 = arith.subf %8, %15 : vector<16x32xf32>
    %17 = arith.mulf %16, %16 : vector<16x32xf32>
    %cst_14 = arith.constant dense<0.000000e+00> : vector<16xf32>
    %18 = vector.multi_reduction <add>, %17, %cst_14 [1] : vector<16x32xf32> to vector<16xf32>
    %19 = vector.shape_cast %18 : vector<16xf32> to vector<16x1xf32>
    %cst_15 = arith.constant 3.200000e+01 : f32
    %20 = vector.broadcast %cst_15 : f32 to vector<16x1xf32>
    %21 = arith.divf %19, %20 : vector<16x1xf32>
    %22 = vector.broadcast %14 : vector<16x1xf32> to vector<16x32xf32>
    %23 = arith.subf %8, %22 : vector<16x32xf32>
    %cst_16 = arith.constant 9.99999997E-7 : f32
    %24 = vector.broadcast %cst_16 : f32 to vector<16x1xf32>
    %25 = arith.addf %21, %24 : vector<16x1xf32>
    %26 = math.rsqrt %25 : vector<16x1xf32>
    %27 = vector.broadcast %26 : vector<16x1xf32> to vector<16x32xf32>
    %28 = arith.mulf %23, %27 : vector<16x32xf32>
    %29 = vector.broadcast %9 : vector<1x32xf32> to vector<16x32xf32>
    %30 = arith.mulf %28, %29 : vector<16x32xf32>
    %31 = vector.broadcast %10 : vector<1x32xf32> to vector<16x32xf32>
    %32 = arith.addf %30, %31 : vector<16x32xf32>
    %c0_17 = arith.constant 0 : index
    %c0_18 = arith.constant 0 : index
    %33 = vector.load %arg7[%c0_17, %c0_18] : memref<32x96xf32, #tpu.memory_space<vmem>>, vector<32x96xf32>
    %c0_19 = arith.constant 0 : index
    %c0_20 = arith.constant 0 : index
    %34 = vector.load %arg8[%c0_19, %c0_20] : memref<1x96xf32, #tpu.memory_space<vmem>>, vector<1x96xf32>
    %cst_21 = arith.constant dense<0.000000e+00> : vector<16x96xf32>
    %35 = tpu.matmul %32, %33, %cst_21 {dimension_numbers = #tpu.dot_dimension_numbers<[1], [0], [0], [1], [0, 0, 1, 1], [], []>} : vector<16x32xf32>, vector<32x96xf32>, vector<16x96xf32> -> vector<16x96xf32>
    %36 = vector.broadcast %34 : vector<1x96xf32> to vector<16x96xf32>
    %37 = arith.addf %35, %36 : vector<16x96xf32>
    %38 = vector.extract_strided_slice %37 {offsets = [0, 0], sizes = [16, 32], strides = [1, 1]} : vector<16x96xf32> to vector<16x32xf32>
    %39 = vector.extract_strided_slice %37 {offsets = [0, 32], sizes = [16, 32], strides = [1, 1]} : vector<16x96xf32> to vector<16x32xf32>
    %40 = vector.extract_strided_slice %37 {offsets = [0, 64], sizes = [16, 32], strides = [1, 1]} : vector<16x96xf32> to vector<16x32xf32>
    %c0_22 = arith.constant 0 : index
    %c0_23 = arith.constant 0 : index
    %41 = vector.load %arg9[%c0_22, %c0_23] : memref<32x32xf32, #tpu.memory_space<vmem>>, vector<32x32xf32>
    %c0_24 = arith.constant 0 : index
    %c0_25 = arith.constant 0 : index
    %42 = vector.load %arg10[%c0_24, %c0_25] : memref<1x32xf32, #tpu.memory_space<vmem>>, vector<1x32xf32>
    %43 = vector.extract_strided_slice %38 {offsets = [0, 0], sizes = [16, 16], strides = [1, 1]} : vector<16x32xf32> to vector<16x16xf32>
    %44 = vector.extract_strided_slice %39 {offsets = [0, 0], sizes = [16, 16], strides = [1, 1]} : vector<16x32xf32> to vector<16x16xf32>
    %45 = vector.extract_strided_slice %40 {offsets = [0, 0], sizes = [16, 16], strides = [1, 1]} : vector<16x32xf32> to vector<16x16xf32>
    %cst_26 = arith.constant dense<0.000000e+00> : vector<16x16xf32>
    %46 = tpu.matmul %43, %44, %cst_26 {dimension_numbers = #tpu.dot_dimension_numbers<[1], [1], [0], [0], [0, 0, 1, 0], [], []>} : vector<16x16xf32>, vector<16x16xf32>, vector<16x16xf32> -> vector<16x16xf32>
    %cst_27 = arith.constant 2.500000e-01 : f32
    %47 = vector.broadcast %cst_27 : f32 to vector<16x16xf32>
    %48 = arith.mulf %46, %47 : vector<16x16xf32>
    %cst_28 = arith.constant dense<0xFF800000> : vector<16xf32>
    %49 = vector.multi_reduction <maximumf>, %48, %cst_28 [1] : vector<16x16xf32> to vector<16xf32>
    %50 = vector.shape_cast %49 : vector<16xf32> to vector<16x1xf32>
    %51 = vector.broadcast %50 : vector<16x1xf32> to vector<16x16xf32>
    %52 = arith.subf %48, %51 : vector<16x16xf32>
    %53 = math.exp %52 : vector<16x16xf32>
    %cst_29 = arith.constant dense<0.000000e+00> : vector<16xf32>
    %54 = vector.multi_reduction <add>, %53, %cst_29 [1] : vector<16x16xf32> to vector<16xf32>
    %55 = vector.shape_cast %54 : vector<16xf32> to vector<16x1xf32>
    %56 = vector.broadcast %55 : vector<16x1xf32> to vector<16x16xf32>
    %57 = arith.divf %53, %56 : vector<16x16xf32>
    %cst_30 = arith.constant dense<0.000000e+00> : vector<16x16xf32>
    %58 = tpu.matmul %57, %45, %cst_30 {dimension_numbers = #tpu.dot_dimension_numbers<[1], [0], [0], [1], [0, 0, 1, 1], [], []>} : vector<16x16xf32>, vector<16x16xf32>, vector<16x16xf32> -> vector<16x16xf32>
    %59 = vector.extract_strided_slice %41 {offsets = [0, 0], sizes = [16, 32], strides = [1, 1]} : vector<32x32xf32> to vector<16x32xf32>
    %cst_31 = arith.constant dense<0.000000e+00> : vector<16x32xf32>
    %60 = tpu.matmul %58, %59, %cst_31 {dimension_numbers = #tpu.dot_dimension_numbers<[1], [0], [0], [1], [0, 0, 1, 1], [], []>} : vector<16x16xf32>, vector<16x32xf32>, vector<16x32xf32> -> vector<16x32xf32>
    %61 = vector.extract_strided_slice %38 {offsets = [0, 16], sizes = [16, 16], strides = [1, 1]} : vector<16x32xf32> to vector<16x16xf32>
    %62 = vector.extract_strided_slice %39 {offsets = [0, 16], sizes = [16, 16], strides = [1, 1]} : vector<16x32xf32> to vector<16x16xf32>
    %63 = vector.extract_strided_slice %40 {offsets = [0, 16], sizes = [16, 16], strides = [1, 1]} : vector<16x32xf32> to vector<16x16xf32>
    %cst_32 = arith.constant dense<0.000000e+00> : vector<16x16xf32>
    %64 = tpu.matmul %61, %62, %cst_32 {dimension_numbers = #tpu.dot_dimension_numbers<[1], [1], [0], [0], [0, 0, 1, 0], [], []>} : vector<16x16xf32>, vector<16x16xf32>, vector<16x16xf32> -> vector<16x16xf32>
    %cst_33 = arith.constant 2.500000e-01 : f32
    %65 = vector.broadcast %cst_33 : f32 to vector<16x16xf32>
    %66 = arith.mulf %64, %65 : vector<16x16xf32>
    %cst_34 = arith.constant dense<0xFF800000> : vector<16xf32>
    %67 = vector.multi_reduction <maximumf>, %66, %cst_34 [1] : vector<16x16xf32> to vector<16xf32>
    %68 = vector.shape_cast %67 : vector<16xf32> to vector<16x1xf32>
    %69 = vector.broadcast %68 : vector<16x1xf32> to vector<16x16xf32>
    %70 = arith.subf %66, %69 : vector<16x16xf32>
    %71 = math.exp %70 : vector<16x16xf32>
    %cst_35 = arith.constant dense<0.000000e+00> : vector<16xf32>
    %72 = vector.multi_reduction <add>, %71, %cst_35 [1] : vector<16x16xf32> to vector<16xf32>
    %73 = vector.shape_cast %72 : vector<16xf32> to vector<16x1xf32>
    %74 = vector.broadcast %73 : vector<16x1xf32> to vector<16x16xf32>
    %75 = arith.divf %71, %74 : vector<16x16xf32>
    %cst_36 = arith.constant dense<0.000000e+00> : vector<16x16xf32>
    %76 = tpu.matmul %75, %63, %cst_36 {dimension_numbers = #tpu.dot_dimension_numbers<[1], [0], [0], [1], [0, 0, 1, 1], [], []>} : vector<16x16xf32>, vector<16x16xf32>, vector<16x16xf32> -> vector<16x16xf32>
    %77 = vector.extract_strided_slice %41 {offsets = [16, 0], sizes = [16, 32], strides = [1, 1]} : vector<32x32xf32> to vector<16x32xf32>
    %cst_37 = arith.constant dense<0.000000e+00> : vector<16x32xf32>
    %78 = tpu.matmul %76, %77, %cst_37 {dimension_numbers = #tpu.dot_dimension_numbers<[1], [0], [0], [1], [0, 0, 1, 1], [], []>} : vector<16x16xf32>, vector<16x32xf32>, vector<16x32xf32> -> vector<16x32xf32>
    %79 = arith.addf %60, %78 : vector<16x32xf32>
    %80 = vector.broadcast %42 : vector<1x32xf32> to vector<16x32xf32>
    %81 = arith.addf %79, %80 : vector<16x32xf32>
    %82 = arith.addf %8, %81 : vector<16x32xf32>
    %c0_38 = arith.constant 0 : index
    %c0_39 = arith.constant 0 : index
    %83 = vector.load %arg11[%c0_38, %c0_39] : memref<1x32xf32, #tpu.memory_space<vmem>>, vector<1x32xf32>
    %c0_40 = arith.constant 0 : index
    %c0_41 = arith.constant 0 : index
    %84 = vector.load %arg12[%c0_40, %c0_41] : memref<1x32xf32, #tpu.memory_space<vmem>>, vector<1x32xf32>
    %cst_42 = arith.constant dense<0.000000e+00> : vector<16xf32>
    %85 = vector.multi_reduction <add>, %82, %cst_42 [1] : vector<16x32xf32> to vector<16xf32>
    %86 = vector.shape_cast %85 : vector<16xf32> to vector<16x1xf32>
    %cst_43 = arith.constant 3.200000e+01 : f32
    %87 = vector.broadcast %cst_43 : f32 to vector<16x1xf32>
    %88 = arith.divf %86, %87 : vector<16x1xf32>
    %89 = vector.broadcast %88 : vector<16x1xf32> to vector<16x32xf32>
    %90 = arith.subf %82, %89 : vector<16x32xf32>
    %91 = arith.mulf %90, %90 : vector<16x32xf32>
    %cst_44 = arith.constant dense<0.000000e+00> : vector<16xf32>
    %92 = vector.multi_reduction <add>, %91, %cst_44 [1] : vector<16x32xf32> to vector<16xf32>
    %93 = vector.shape_cast %92 : vector<16xf32> to vector<16x1xf32>
    %cst_45 = arith.constant 3.200000e+01 : f32
    %94 = vector.broadcast %cst_45 : f32 to vector<16x1xf32>
    %95 = arith.divf %93, %94 : vector<16x1xf32>
    %96 = vector.broadcast %88 : vector<16x1xf32> to vector<16x32xf32>
    %97 = arith.subf %82, %96 : vector<16x32xf32>
    %cst_46 = arith.constant 9.99999997E-7 : f32
    %98 = vector.broadcast %cst_46 : f32 to vector<16x1xf32>
    %99 = arith.addf %95, %98 : vector<16x1xf32>
    %100 = math.rsqrt %99 : vector<16x1xf32>
    %101 = vector.broadcast %100 : vector<16x1xf32> to vector<16x32xf32>
    %102 = arith.mulf %97, %101 : vector<16x32xf32>
    %103 = vector.broadcast %83 : vector<1x32xf32> to vector<16x32xf32>
    %104 = arith.mulf %102, %103 : vector<16x32xf32>
    %105 = vector.broadcast %84 : vector<1x32xf32> to vector<16x32xf32>
    %106 = arith.addf %104, %105 : vector<16x32xf32>
    %c0_47 = arith.constant 0 : index
    %c0_48 = arith.constant 0 : index
    %107 = vector.load %arg13[%c0_47, %c0_48] : memref<32x64xf32, #tpu.memory_space<vmem>>, vector<32x64xf32>
    %c0_49 = arith.constant 0 : index
    %c0_50 = arith.constant 0 : index
    %108 = vector.load %arg14[%c0_49, %c0_50] : memref<1x64xf32, #tpu.memory_space<vmem>>, vector<1x64xf32>
    %cst_51 = arith.constant dense<0.000000e+00> : vector<16x64xf32>
    %109 = tpu.matmul %106, %107, %cst_51 {dimension_numbers = #tpu.dot_dimension_numbers<[1], [0], [0], [1], [0, 0, 1, 1], [], []>} : vector<16x32xf32>, vector<32x64xf32>, vector<16x64xf32> -> vector<16x64xf32>
    %110 = vector.broadcast %108 : vector<1x64xf32> to vector<16x64xf32>
    %111 = arith.addf %109, %110 : vector<16x64xf32>
    %112 = arith.mulf %111, %111 : vector<16x64xf32>
    %113 = arith.mulf %111, %112 : vector<16x64xf32>
    %cst_52 = arith.constant 4.471500e-02 : f32
    %114 = vector.broadcast %cst_52 : f32 to vector<16x64xf32>
    %115 = arith.mulf %114, %113 : vector<16x64xf32>
    %116 = arith.addf %111, %115 : vector<16x64xf32>
    %cst_53 = arith.constant 0.797884583 : f32
    %117 = vector.broadcast %cst_53 : f32 to vector<16x64xf32>
    %118 = arith.mulf %117, %116 : vector<16x64xf32>
    %119 = math.tanh %118 : vector<16x64xf32>
    %cst_54 = arith.constant 1.000000e+00 : f32
    %120 = vector.broadcast %cst_54 : f32 to vector<16x64xf32>
    %121 = arith.addf %120, %119 : vector<16x64xf32>
    %cst_55 = arith.constant 5.000000e-01 : f32
    %122 = vector.broadcast %cst_55 : f32 to vector<16x64xf32>
    %123 = arith.mulf %122, %121 : vector<16x64xf32>
    %124 = arith.mulf %111, %123 : vector<16x64xf32>
    %c0_56 = arith.constant 0 : index
    %c0_57 = arith.constant 0 : index
    %125 = vector.load %arg15[%c0_56, %c0_57] : memref<64x32xf32, #tpu.memory_space<vmem>>, vector<64x32xf32>
    %c0_58 = arith.constant 0 : index
    %c0_59 = arith.constant 0 : index
    %126 = vector.load %arg16[%c0_58, %c0_59] : memref<1x32xf32, #tpu.memory_space<vmem>>, vector<1x32xf32>
    %cst_60 = arith.constant dense<0.000000e+00> : vector<16x32xf32>
    %127 = tpu.matmul %124, %125, %cst_60 {dimension_numbers = #tpu.dot_dimension_numbers<[1], [0], [0], [1], [0, 0, 1, 1], [], []>} : vector<16x64xf32>, vector<64x32xf32>, vector<16x32xf32> -> vector<16x32xf32>
    %128 = vector.broadcast %126 : vector<1x32xf32> to vector<16x32xf32>
    %129 = arith.addf %127, %128 : vector<16x32xf32>
    %130 = arith.addf %82, %129 : vector<16x32xf32>
    %c0_61 = arith.constant 0 : index
    %c0_62 = arith.constant 0 : index
    %131 = vector.load %arg17[%c0_61, %c0_62] : memref<32x32xf32, #tpu.memory_space<vmem>>, vector<32x32xf32>
    %c0_63 = arith.constant 0 : index
    %c0_64 = arith.constant 0 : index
    %132 = vector.load %arg18[%c0_63, %c0_64] : memref<1x32xf32, #tpu.memory_space<vmem>>, vector<1x32xf32>
    %cst_65 = arith.constant dense<0.000000e+00> : vector<16x32xf32>
    %133 = tpu.matmul %130, %131, %cst_65 {dimension_numbers = #tpu.dot_dimension_numbers<[1], [0], [0], [1], [0, 0, 1, 1], [], []>} : vector<16x32xf32>, vector<32x32xf32>, vector<16x32xf32> -> vector<16x32xf32>
    %134 = vector.broadcast %132 : vector<1x32xf32> to vector<16x32xf32>
    %135 = arith.addf %133, %134 : vector<16x32xf32>
    %c0_66 = arith.constant 0 : index
    %c0_67 = arith.constant 0 : index
    %136 = vector.load %arg19[%c0_66, %c0_67] : memref<1x32xf32, #tpu.memory_space<vmem>>, vector<1x32xf32>
    %c0_68 = arith.constant 0 : index
    %c0_69 = arith.constant 0 : index
    %137 = vector.load %arg20[%c0_68, %c0_69] : memref<1x32xf32, #tpu.memory_space<vmem>>, vector<1x32xf32>
    %cst_70 = arith.constant dense<0.000000e+00> : vector<16xf32>
    %138 = vector.multi_reduction <add>, %135, %cst_70 [1] : vector<16x32xf32> to vector<16xf32>
    %139 = vector.shape_cast %138 : vector<16xf32> to vector<16x1xf32>
    %cst_71 = arith.constant 3.200000e+01 : f32
    %140 = vector.broadcast %cst_71 : f32 to vector<16x1xf32>
    %141 = arith.divf %139, %140 : vector<16x1xf32>
    %142 = vector.broadcast %141 : vector<16x1xf32> to vector<16x32xf32>
    %143 = arith.subf %135, %142 : vector<16x32xf32>
    %144 = arith.mulf %143, %143 : vector<16x32xf32>
    %cst_72 = arith.constant dense<0.000000e+00> : vector<16xf32>
    %145 = vector.multi_reduction <add>, %144, %cst_72 [1] : vector<16x32xf32> to vector<16xf32>
    %146 = vector.shape_cast %145 : vector<16xf32> to vector<16x1xf32>
    %cst_73 = arith.constant 3.200000e+01 : f32
    %147 = vector.broadcast %cst_73 : f32 to vector<16x1xf32>
    %148 = arith.divf %146, %147 : vector<16x1xf32>
    %149 = vector.broadcast %141 : vector<16x1xf32> to vector<16x32xf32>
    %150 = arith.subf %135, %149 : vector<16x32xf32>
    %cst_74 = arith.constant 9.99999997E-7 : f32
    %151 = vector.broadcast %cst_74 : f32 to vector<16x1xf32>
    %152 = arith.addf %148, %151 : vector<16x1xf32>
    %153 = math.rsqrt %152 : vector<16x1xf32>
    %154 = vector.broadcast %153 : vector<16x1xf32> to vector<16x32xf32>
    %155 = arith.mulf %150, %154 : vector<16x32xf32>
    %156 = vector.broadcast %136 : vector<1x32xf32> to vector<16x32xf32>
    %157 = arith.mulf %155, %156 : vector<16x32xf32>
    %158 = vector.broadcast %137 : vector<1x32xf32> to vector<16x32xf32>
    %159 = arith.addf %157, %158 : vector<16x32xf32>
    %c0_75 = arith.constant 0 : index
    %c0_76 = arith.constant 0 : index
    %160 = vector.load %arg22[%c0_75, %c0_76] : memref<1x32xf32, #tpu.memory_space<vmem>>, vector<1x32xf32>
    %161 = vector.broadcast %160 : vector<1x32xf32> to vector<16x32xf32>
    %162 = arith.addf %159, %161 : vector<16x32xf32>
    %c0_77 = arith.constant 0 : index
    %c0_78 = arith.constant 0 : index
    %163 = vector.load %arg21[%c0_77, %c0_78] : memref<16x32xf32, #tpu.memory_space<vmem>>, vector<16x32xf32>
    %164 = arith.addf %162, %163 : vector<16x32xf32>
    %c0_79 = arith.constant 0 : index
    %c0_80 = arith.constant 0 : index
    %165 = vector.load %arg23[%c0_79, %c0_80] : memref<5x32xf32, #tpu.memory_space<vmem>>, vector<5x32xf32>
    %c0_81 = arith.constant 0 : index
    %c0_82 = arith.constant 0 : index
    %166 = vector.load %arg24[%c0_81, %c0_82] : memref<32x96xf32, #tpu.memory_space<vmem>>, vector<32x96xf32>
    %c0_83 = arith.constant 0 : index
    %c0_84 = arith.constant 0 : index
    %167 = vector.load %arg25[%c0_83, %c0_84] : memref<1x96xf32, #tpu.memory_space<vmem>>, vector<1x96xf32>
    %cst_85 = arith.constant dense<0.000000e+00> : vector<5x96xf32>
    %168 = tpu.matmul %165, %166, %cst_85 {dimension_numbers = #tpu.dot_dimension_numbers<[1], [0], [0], [1], [0, 0, 1, 1], [], []>} : vector<5x32xf32>, vector<32x96xf32>, vector<5x96xf32> -> vector<5x96xf32>
    %169 = vector.broadcast %167 : vector<1x96xf32> to vector<5x96xf32>
    %170 = arith.addf %168, %169 : vector<5x96xf32>
    %171 = vector.extract_strided_slice %170 {offsets = [0, 0], sizes = [5, 32], strides = [1, 1]} : vector<5x96xf32> to vector<5x32xf32>
    %172 = vector.extract_strided_slice %170 {offsets = [0, 32], sizes = [5, 32], strides = [1, 1]} : vector<5x96xf32> to vector<5x32xf32>
    %173 = vector.extract_strided_slice %170 {offsets = [0, 64], sizes = [5, 32], strides = [1, 1]} : vector<5x96xf32> to vector<5x32xf32>
    %c0_86 = arith.constant 0 : index
    %c0_87 = arith.constant 0 : index
    %174 = vector.load %arg26[%c0_86, %c0_87] : memref<32x32xf32, #tpu.memory_space<vmem>>, vector<32x32xf32>
    %c0_88 = arith.constant 0 : index
    %c0_89 = arith.constant 0 : index
    %175 = vector.load %arg27[%c0_88, %c0_89] : memref<1x32xf32, #tpu.memory_space<vmem>>, vector<1x32xf32>
    %176 = vector.extract_strided_slice %171 {offsets = [0, 0], sizes = [5, 16], strides = [1, 1]} : vector<5x32xf32> to vector<5x16xf32>
    %177 = vector.extract_strided_slice %172 {offsets = [0, 0], sizes = [5, 16], strides = [1, 1]} : vector<5x32xf32> to vector<5x16xf32>
    %178 = vector.extract_strided_slice %173 {offsets = [0, 0], sizes = [5, 16], strides = [1, 1]} : vector<5x32xf32> to vector<5x16xf32>
    %cst_90 = arith.constant dense<0.000000e+00> : vector<5x5xf32>
    %179 = tpu.matmul %176, %177, %cst_90 {dimension_numbers = #tpu.dot_dimension_numbers<[1], [1], [0], [0], [0, 0, 1, 0], [], []>} : vector<5x16xf32>, vector<5x16xf32>, vector<5x5xf32> -> vector<5x5xf32>
    %cst_91 = arith.constant 2.500000e-01 : f32
    %180 = vector.broadcast %cst_91 : f32 to vector<5x5xf32>
    %181 = arith.mulf %179, %180 : vector<5x5xf32>
    %cst_92 = arith.constant dense<0xFF800000> : vector<5xf32>
    %182 = vector.multi_reduction <maximumf>, %181, %cst_92 [1] : vector<5x5xf32> to vector<5xf32>
    %183 = vector.shape_cast %182 : vector<5xf32> to vector<5x1xf32>
    %184 = vector.broadcast %183 : vector<5x1xf32> to vector<5x5xf32>
    %185 = arith.subf %181, %184 : vector<5x5xf32>
    %186 = math.exp %185 : vector<5x5xf32>
    %cst_93 = arith.constant dense<0.000000e+00> : vector<5xf32>
    %187 = vector.multi_reduction <add>, %186, %cst_93 [1] : vector<5x5xf32> to vector<5xf32>
    %188 = vector.shape_cast %187 : vector<5xf32> to vector<5x1xf32>
    %189 = vector.broadcast %188 : vector<5x1xf32> to vector<5x5xf32>
    %190 = arith.divf %186, %189 : vector<5x5xf32>
    %cst_94 = arith.constant dense<0.000000e+00> : vector<5x16xf32>
    %191 = tpu.matmul %190, %178, %cst_94 {dimension_numbers = #tpu.dot_dimension_numbers<[1], [0], [0], [1], [0, 0, 1, 1], [], []>} : vector<5x5xf32>, vector<5x16xf32>, vector<5x16xf32> -> vector<5x16xf32>
    %192 = vector.extract_strided_slice %174 {offsets = [0, 0], sizes = [16, 32], strides = [1, 1]} : vector<32x32xf32> to vector<16x32xf32>
    %cst_95 = arith.constant dense<0.000000e+00> : vector<5x32xf32>
    %193 = tpu.matmul %191, %192, %cst_95 {dimension_numbers = #tpu.dot_dimension_numbers<[1], [0], [0], [1], [0, 0, 1, 1], [], []>} : vector<5x16xf32>, vector<16x32xf32>, vector<5x32xf32> -> vector<5x32xf32>
    %194 = vector.extract_strided_slice %171 {offsets = [0, 16], sizes = [5, 16], strides = [1, 1]} : vector<5x32xf32> to vector<5x16xf32>
    %195 = vector.extract_strided_slice %172 {offsets = [0, 16], sizes = [5, 16], strides = [1, 1]} : vector<5x32xf32> to vector<5x16xf32>
    %196 = vector.extract_strided_slice %173 {offsets = [0, 16], sizes = [5, 16], strides = [1, 1]} : vector<5x32xf32> to vector<5x16xf32>
    %cst_96 = arith.constant dense<0.000000e+00> : vector<5x5xf32>
    %197 = tpu.matmul %194, %195, %cst_96 {dimension_numbers = #tpu.dot_dimension_numbers<[1], [1], [0], [0], [0, 0, 1, 0], [], []>} : vector<5x16xf32>, vector<5x16xf32>, vector<5x5xf32> -> vector<5x5xf32>
    %cst_97 = arith.constant 2.500000e-01 : f32
    %198 = vector.broadcast %cst_97 : f32 to vector<5x5xf32>
    %199 = arith.mulf %197, %198 : vector<5x5xf32>
    %cst_98 = arith.constant dense<0xFF800000> : vector<5xf32>
    %200 = vector.multi_reduction <maximumf>, %199, %cst_98 [1] : vector<5x5xf32> to vector<5xf32>
    %201 = vector.shape_cast %200 : vector<5xf32> to vector<5x1xf32>
    %202 = vector.broadcast %201 : vector<5x1xf32> to vector<5x5xf32>
    %203 = arith.subf %199, %202 : vector<5x5xf32>
    %204 = math.exp %203 : vector<5x5xf32>
    %cst_99 = arith.constant dense<0.000000e+00> : vector<5xf32>
    %205 = vector.multi_reduction <add>, %204, %cst_99 [1] : vector<5x5xf32> to vector<5xf32>
    %206 = vector.shape_cast %205 : vector<5xf32> to vector<5x1xf32>
    %207 = vector.broadcast %206 : vector<5x1xf32> to vector<5x5xf32>
    %208 = arith.divf %204, %207 : vector<5x5xf32>
    %cst_100 = arith.constant dense<0.000000e+00> : vector<5x16xf32>
    %209 = tpu.matmul %208, %196, %cst_100 {dimension_numbers = #tpu.dot_dimension_numbers<[1], [0], [0], [1], [0, 0, 1, 1], [], []>} : vector<5x5xf32>, vector<5x16xf32>, vector<5x16xf32> -> vector<5x16xf32>
    %210 = vector.extract_strided_slice %174 {offsets = [16, 0], sizes = [16, 32], strides = [1, 1]} : vector<32x32xf32> to vector<16x32xf32>
    %cst_101 = arith.constant dense<0.000000e+00> : vector<5x32xf32>
    %211 = tpu.matmul %209, %210, %cst_101 {dimension_numbers = #tpu.dot_dimension_numbers<[1], [0], [0], [1], [0, 0, 1, 1], [], []>} : vector<5x16xf32>, vector<16x32xf32>, vector<5x32xf32> -> vector<5x32xf32>
    %212 = arith.addf %193, %211 : vector<5x32xf32>
    %213 = vector.broadcast %175 : vector<1x32xf32> to vector<5x32xf32>
    %214 = arith.addf %212, %213 : vector<5x32xf32>
    %215 = arith.addf %165, %214 : vector<5x32xf32>
    %c0_102 = arith.constant 0 : index
    %c0_103 = arith.constant 0 : index
    %216 = vector.load %arg28[%c0_102, %c0_103] : memref<1x32xf32, #tpu.memory_space<vmem>>, vector<1x32xf32>
    %c0_104 = arith.constant 0 : index
    %c0_105 = arith.constant 0 : index
    %217 = vector.load %arg29[%c0_104, %c0_105] : memref<1x32xf32, #tpu.memory_space<vmem>>, vector<1x32xf32>
    %cst_106 = arith.constant dense<0.000000e+00> : vector<5xf32>
    %218 = vector.multi_reduction <add>, %215, %cst_106 [1] : vector<5x32xf32> to vector<5xf32>
    %219 = vector.shape_cast %218 : vector<5xf32> to vector<5x1xf32>
    %cst_107 = arith.constant 3.200000e+01 : f32
    %220 = vector.broadcast %cst_107 : f32 to vector<5x1xf32>
    %221 = arith.divf %219, %220 : vector<5x1xf32>
    %222 = vector.broadcast %221 : vector<5x1xf32> to vector<5x32xf32>
    %223 = arith.subf %215, %222 : vector<5x32xf32>
    %224 = arith.mulf %223, %223 : vector<5x32xf32>
    %cst_108 = arith.constant dense<0.000000e+00> : vector<5xf32>
    %225 = vector.multi_reduction <add>, %224, %cst_108 [1] : vector<5x32xf32> to vector<5xf32>
    %226 = vector.shape_cast %225 : vector<5xf32> to vector<5x1xf32>
    %cst_109 = arith.constant 3.200000e+01 : f32
    %227 = vector.broadcast %cst_109 : f32 to vector<5x1xf32>
    %228 = arith.divf %226, %227 : vector<5x1xf32>
    %229 = vector.broadcast %221 : vector<5x1xf32> to vector<5x32xf32>
    %230 = arith.subf %215, %229 : vector<5x32xf32>
    %cst_110 = arith.constant 9.99999997E-7 : f32
    %231 = vector.broadcast %cst_110 : f32 to vector<5x1xf32>
    %232 = arith.addf %228, %231 : vector<5x1xf32>
    %233 = math.rsqrt %232 : vector<5x1xf32>
    %234 = vector.broadcast %233 : vector<5x1xf32> to vector<5x32xf32>
    %235 = arith.mulf %230, %234 : vector<5x32xf32>
    %236 = vector.broadcast %216 : vector<1x32xf32> to vector<5x32xf32>
    %237 = arith.mulf %235, %236 : vector<5x32xf32>
    %238 = vector.broadcast %217 : vector<1x32xf32> to vector<5x32xf32>
    %239 = arith.addf %237, %238 : vector<5x32xf32>
    %c0_111 = arith.constant 0 : index
    %c0_112 = arith.constant 0 : index
    %240 = vector.load %arg30[%c0_111, %c0_112] : memref<32x32xf32, #tpu.memory_space<vmem>>, vector<32x32xf32>
    %c0_113 = arith.constant 0 : index
    %c0_114 = arith.constant 0 : index
    %241 = vector.load %arg31[%c0_113, %c0_114] : memref<1x32xf32, #tpu.memory_space<vmem>>, vector<1x32xf32>
    %cst_115 = arith.constant dense<0.000000e+00> : vector<5x32xf32>
    %242 = tpu.matmul %239, %240, %cst_115 {dimension_numbers = #tpu.dot_dimension_numbers<[1], [0], [0], [1], [0, 0, 1, 1], [], []>} : vector<5x32xf32>, vector<32x32xf32>, vector<5x32xf32> -> vector<5x32xf32>
    %243 = vector.broadcast %241 : vector<1x32xf32> to vector<5x32xf32>
    %244 = arith.addf %242, %243 : vector<5x32xf32>
    %c0_116 = arith.constant 0 : index
    %c0_117 = arith.constant 0 : index
    %245 = vector.load %arg32[%c0_116, %c0_117] : memref<32x32xf32, #tpu.memory_space<vmem>>, vector<32x32xf32>
    %c0_118 = arith.constant 0 : index
    %c0_119 = arith.constant 0 : index
    %246 = vector.load %arg33[%c0_118, %c0_119] : memref<1x32xf32, #tpu.memory_space<vmem>>, vector<1x32xf32>
    %cst_120 = arith.constant dense<0.000000e+00> : vector<16x32xf32>
    %247 = tpu.matmul %164, %245, %cst_120 {dimension_numbers = #tpu.dot_dimension_numbers<[1], [0], [0], [1], [0, 0, 1, 1], [], []>} : vector<16x32xf32>, vector<32x32xf32>, vector<16x32xf32> -> vector<16x32xf32>
    %248 = vector.broadcast %246 : vector<1x32xf32> to vector<16x32xf32>
    %249 = arith.addf %247, %248 : vector<16x32xf32>
    %c0_121 = arith.constant 0 : index
    %c0_122 = arith.constant 0 : index
    %250 = vector.load %arg34[%c0_121, %c0_122] : memref<32x32xf32, #tpu.memory_space<vmem>>, vector<32x32xf32>
    %c0_123 = arith.constant 0 : index
    %c0_124 = arith.constant 0 : index
    %251 = vector.load %arg35[%c0_123, %c0_124] : memref<1x32xf32, #tpu.memory_space<vmem>>, vector<1x32xf32>
    %cst_125 = arith.constant dense<0.000000e+00> : vector<16x32xf32>
    %252 = tpu.matmul %164, %250, %cst_125 {dimension_numbers = #tpu.dot_dimension_numbers<[1], [0], [0], [1], [0, 0, 1, 1], [], []>} : vector<16x32xf32>, vector<32x32xf32>, vector<16x32xf32> -> vector<16x32xf32>
    %253 = vector.broadcast %251 : vector<1x32xf32> to vector<16x32xf32>
    %254 = arith.addf %252, %253 : vector<16x32xf32>
    %c0_126 = arith.constant 0 : index
    %c0_127 = arith.constant 0 : index
    %255 = vector.load %arg36[%c0_126, %c0_127] : memref<32x32xf32, #tpu.memory_space<vmem>>, vector<32x32xf32>
    %c0_128 = arith.constant 0 : index
    %c0_129 = arith.constant 0 : index
    %256 = vector.load %arg37[%c0_128, %c0_129] : memref<1x32xf32, #tpu.memory_space<vmem>>, vector<1x32xf32>
    %257 = vector.extract_strided_slice %244 {offsets = [0, 0], sizes = [5, 16], strides = [1, 1]} : vector<5x32xf32> to vector<5x16xf32>
    %258 = vector.extract_strided_slice %249 {offsets = [0, 0], sizes = [16, 16], strides = [1, 1]} : vector<16x32xf32> to vector<16x16xf32>
    %259 = vector.extract_strided_slice %254 {offsets = [0, 0], sizes = [16, 16], strides = [1, 1]} : vector<16x32xf32> to vector<16x16xf32>
    %cst_130 = arith.constant dense<0.000000e+00> : vector<5x16xf32>
    %260 = tpu.matmul %257, %258, %cst_130 {dimension_numbers = #tpu.dot_dimension_numbers<[1], [1], [0], [0], [0, 0, 1, 0], [], []>} : vector<5x16xf32>, vector<16x16xf32>, vector<5x16xf32> -> vector<5x16xf32>
    %cst_131 = arith.constant 2.500000e-01 : f32
    %261 = vector.broadcast %cst_131 : f32 to vector<5x16xf32>
    %262 = arith.mulf %260, %261 : vector<5x16xf32>
    %cst_132 = arith.constant dense<0xFF800000> : vector<5xf32>
    %263 = vector.multi_reduction <maximumf>, %262, %cst_132 [1] : vector<5x16xf32> to vector<5xf32>
    %264 = vector.shape_cast %263 : vector<5xf32> to vector<5x1xf32>
    %265 = vector.broadcast %264 : vector<5x1xf32> to vector<5x16xf32>
    %266 = arith.subf %262, %265 : vector<5x16xf32>
    %267 = math.exp %266 : vector<5x16xf32>
    %cst_133 = arith.constant dense<0.000000e+00> : vector<5xf32>
    %268 = vector.multi_reduction <add>, %267, %cst_133 [1] : vector<5x16xf32> to vector<5xf32>
    %269 = vector.shape_cast %268 : vector<5xf32> to vector<5x1xf32>
    %270 = vector.broadcast %269 : vector<5x1xf32> to vector<5x16xf32>
    %271 = arith.divf %267, %270 : vector<5x16xf32>
    %cst_134 = arith.constant dense<0.000000e+00> : vector<5x16xf32>
    %272 = tpu.matmul %271, %259, %cst_134 {dimension_numbers = #tpu.dot_dimension_numbers<[1], [0], [0], [1], [0, 0, 1, 1], [], []>} : vector<5x16xf32>, vector<16x16xf32>, vector<5x16xf32> -> vector<5x16xf32>
    %273 = vector.extract_strided_slice %255 {offsets = [0, 0], sizes = [16, 32], strides = [1, 1]} : vector<32x32xf32> to vector<16x32xf32>
    %cst_135 = arith.constant dense<0.000000e+00> : vector<5x32xf32>
    %274 = tpu.matmul %272, %273, %cst_135 {dimension_numbers = #tpu.dot_dimension_numbers<[1], [0], [0], [1], [0, 0, 1, 1], [], []>} : vector<5x16xf32>, vector<16x32xf32>, vector<5x32xf32> -> vector<5x32xf32>
    %275 = vector.extract_strided_slice %244 {offsets = [0, 16], sizes = [5, 16], strides = [1, 1]} : vector<5x32xf32> to vector<5x16xf32>
    %276 = vector.extract_strided_slice %249 {offsets = [0, 16], sizes = [16, 16], strides = [1, 1]} : vector<16x32xf32> to vector<16x16xf32>
    %277 = vector.extract_strided_slice %254 {offsets = [0, 16], sizes = [16, 16], strides = [1, 1]} : vector<16x32xf32> to vector<16x16xf32>
    %cst_136 = arith.constant dense<0.000000e+00> : vector<5x16xf32>
    %278 = tpu.matmul %275, %276, %cst_136 {dimension_numbers = #tpu.dot_dimension_numbers<[1], [1], [0], [0], [0, 0, 1, 0], [], []>} : vector<5x16xf32>, vector<16x16xf32>, vector<5x16xf32> -> vector<5x16xf32>
    %cst_137 = arith.constant 2.500000e-01 : f32
    %279 = vector.broadcast %cst_137 : f32 to vector<5x16xf32>
    %280 = arith.mulf %278, %279 : vector<5x16xf32>
    %cst_138 = arith.constant dense<0xFF800000> : vector<5xf32>
    %281 = vector.multi_reduction <maximumf>, %280, %cst_138 [1] : vector<5x16xf32> to vector<5xf32>
    %282 = vector.shape_cast %281 : vector<5xf32> to vector<5x1xf32>
    %283 = vector.broadcast %282 : vector<5x1xf32> to vector<5x16xf32>
    %284 = arith.subf %280, %283 : vector<5x16xf32>
    %285 = math.exp %284 : vector<5x16xf32>
    %cst_139 = arith.constant dense<0.000000e+00> : vector<5xf32>
    %286 = vector.multi_reduction <add>, %285, %cst_139 [1] : vector<5x16xf32> to vector<5xf32>
    %287 = vector.shape_cast %286 : vector<5xf32> to vector<5x1xf32>
    %288 = vector.broadcast %287 : vector<5x1xf32> to vector<5x16xf32>
    %289 = arith.divf %285, %288 : vector<5x16xf32>
    %cst_140 = arith.constant dense<0.000000e+00> : vector<5x16xf32>
    %290 = tpu.matmul %289, %277, %cst_140 {dimension_numbers = #tpu.dot_dimension_numbers<[1], [0], [0], [1], [0, 0, 1, 1], [], []>} : vector<5x16xf32>, vector<16x16xf32>, vector<5x16xf32> -> vector<5x16xf32>
    %291 = vector.extract_strided_slice %255 {offsets = [16, 0], sizes = [16, 32], strides = [1, 1]} : vector<32x32xf32> to vector<16x32xf32>
    %cst_141 = arith.constant dense<0.000000e+00> : vector<5x32xf32>
    %292 = tpu.matmul %290, %291, %cst_141 {dimension_numbers = #tpu.dot_dimension_numbers<[1], [0], [0], [1], [0, 0, 1, 1], [], []>} : vector<5x16xf32>, vector<16x32xf32>, vector<5x32xf32> -> vector<5x32xf32>
    %293 = arith.addf %274, %292 : vector<5x32xf32>
    %294 = vector.broadcast %256 : vector<1x32xf32> to vector<5x32xf32>
    %295 = arith.addf %293, %294 : vector<5x32xf32>
    %296 = arith.addf %239, %295 : vector<5x32xf32>
    %c0_142 = arith.constant 0 : index
    %c0_143 = arith.constant 0 : index
    %297 = vector.load %arg38[%c0_142, %c0_143] : memref<1x32xf32, #tpu.memory_space<vmem>>, vector<1x32xf32>
    %c0_144 = arith.constant 0 : index
    %c0_145 = arith.constant 0 : index
    %298 = vector.load %arg39[%c0_144, %c0_145] : memref<1x32xf32, #tpu.memory_space<vmem>>, vector<1x32xf32>
    %cst_146 = arith.constant dense<0.000000e+00> : vector<5xf32>
    %299 = vector.multi_reduction <add>, %296, %cst_146 [1] : vector<5x32xf32> to vector<5xf32>
    %300 = vector.shape_cast %299 : vector<5xf32> to vector<5x1xf32>
    %cst_147 = arith.constant 3.200000e+01 : f32
    %301 = vector.broadcast %cst_147 : f32 to vector<5x1xf32>
    %302 = arith.divf %300, %301 : vector<5x1xf32>
    %303 = vector.broadcast %302 : vector<5x1xf32> to vector<5x32xf32>
    %304 = arith.subf %296, %303 : vector<5x32xf32>
    %305 = arith.mulf %304, %304 : vector<5x32xf32>
    %cst_148 = arith.constant dense<0.000000e+00> : vector<5xf32>
    %306 = vector.multi_reduction <add>, %305, %cst_148 [1] : vector<5x32xf32> to vector<5xf32>
    %307 = vector.shape_cast %306 : vector<5xf32> to vector<5x1xf32>
    %cst_149 = arith.constant 3.200000e+01 : f32
    %308 = vector.broadcast %cst_149 : f32 to vector<5x1xf32>
    %309 = arith.divf %307, %308 : vector<5x1xf32>
    %310 = vector.broadcast %302 : vector<5x1xf32> to vector<5x32xf32>
    %311 = arith.subf %296, %310 : vector<5x32xf32>
    %cst_150 = arith.constant 9.99999997E-7 : f32
    %312 = vector.broadcast %cst_150 : f32 to vector<5x1xf32>
    %313 = arith.addf %309, %312 : vector<5x1xf32>
    %314 = math.rsqrt %313 : vector<5x1xf32>
    %315 = vector.broadcast %314 : vector<5x1xf32> to vector<5x32xf32>
    %316 = arith.mulf %311, %315 : vector<5x32xf32>
    %317 = vector.broadcast %297 : vector<1x32xf32> to vector<5x32xf32>
    %318 = arith.mulf %316, %317 : vector<5x32xf32>
    %319 = vector.broadcast %298 : vector<1x32xf32> to vector<5x32xf32>
    %320 = arith.addf %318, %319 : vector<5x32xf32>
    %c0_151 = arith.constant 0 : index
    %c0_152 = arith.constant 0 : index
    %321 = vector.load %arg40[%c0_151, %c0_152] : memref<32x64xf32, #tpu.memory_space<vmem>>, vector<32x64xf32>
    %c0_153 = arith.constant 0 : index
    %c0_154 = arith.constant 0 : index
    %322 = vector.load %arg41[%c0_153, %c0_154] : memref<1x64xf32, #tpu.memory_space<vmem>>, vector<1x64xf32>
    %cst_155 = arith.constant dense<0.000000e+00> : vector<5x64xf32>
    %323 = tpu.matmul %320, %321, %cst_155 {dimension_numbers = #tpu.dot_dimension_numbers<[1], [0], [0], [1], [0, 0, 1, 1], [], []>} : vector<5x32xf32>, vector<32x64xf32>, vector<5x64xf32> -> vector<5x64xf32>
    %324 = vector.broadcast %322 : vector<1x64xf32> to vector<5x64xf32>
    %325 = arith.addf %323, %324 : vector<5x64xf32>
    %cst_156 = arith.constant 0.000000e+00 : f32
    %326 = vector.broadcast %cst_156 : f32 to vector<5x64xf32>
    %327 = arith.maximumf %325, %326 : vector<5x64xf32>
    %c0_157 = arith.constant 0 : index
    %c0_158 = arith.constant 0 : index
    %328 = vector.load %arg42[%c0_157, %c0_158] : memref<64x32xf32, #tpu.memory_space<vmem>>, vector<64x32xf32>
    %c0_159 = arith.constant 0 : index
    %c0_160 = arith.constant 0 : index
    %329 = vector.load %arg43[%c0_159, %c0_160] : memref<1x32xf32, #tpu.memory_space<vmem>>, vector<1x32xf32>
    %cst_161 = arith.constant dense<0.000000e+00> : vector<5x32xf32>
    %330 = tpu.matmul %327, %328, %cst_161 {dimension_numbers = #tpu.dot_dimension_numbers<[1], [0], [0], [1], [0, 0, 1, 1], [], []>} : vector<5x64xf32>, vector<64x32xf32>, vector<5x32xf32> -> vector<5x32xf32>
    %331 = vector.broadcast %329 : vector<1x32xf32> to vector<5x32xf32>
    %332 = arith.addf %330, %331 : vector<5x32xf32>
    %333 = arith.addf %320, %332 : vector<5x32xf32>
    %c0_162 = arith.constant 0 : index
    %c0_163 = arith.constant 0 : index
    %334 = vector.load %arg44[%c0_162, %c0_163] : memref<1x32xf32, #tpu.memory_space<vmem>>, vector<1x32xf32>
    %c0_164 = arith.constant 0 : index
    %c0_165 = arith.constant 0 : index
    %335 = vector.load %arg45[%c0_164, %c0_165] : memref<1x32xf32, #tpu.memory_space<vmem>>, vector<1x32xf32>
    %cst_166 = arith.constant dense<0.000000e+00> : vector<5xf32>
    %336 = vector.multi_reduction <add>, %333, %cst_166 [1] : vector<5x32xf32> to vector<5xf32>
    %337 = vector.shape_cast %336 : vector<5xf32> to vector<5x1xf32>
    %cst_167 = arith.constant 3.200000e+01 : f32
    %338 = vector.broadcast %cst_167 : f32 to vector<5x1xf32>
    %339 = arith.divf %337, %338 : vector<5x1xf32>
    %340 = vector.broadcast %339 : vector<5x1xf32> to vector<5x32xf32>
    %341 = arith.subf %333, %340 : vector<5x32xf32>
    %342 = arith.mulf %341, %341 : vector<5x32xf32>
    %cst_168 = arith.constant dense<0.000000e+00> : vector<5xf32>
    %343 = vector.multi_reduction <add>, %342, %cst_168 [1] : vector<5x32xf32> to vector<5xf32>
    %344 = vector.shape_cast %343 : vector<5xf32> to vector<5x1xf32>
    %cst_169 = arith.constant 3.200000e+01 : f32
    %345 = vector.broadcast %cst_169 : f32 to vector<5x1xf32>
    %346 = arith.divf %344, %345 : vector<5x1xf32>
    %347 = vector.broadcast %339 : vector<5x1xf32> to vector<5x32xf32>
    %348 = arith.subf %333, %347 : vector<5x32xf32>
    %cst_170 = arith.constant 9.99999997E-7 : f32
    %349 = vector.broadcast %cst_170 : f32 to vector<5x1xf32>
    %350 = arith.addf %346, %349 : vector<5x1xf32>
    %351 = math.rsqrt %350 : vector<5x1xf32>
    %352 = vector.broadcast %351 : vector<5x1xf32> to vector<5x32xf32>
    %353 = arith.mulf %348, %352 : vector<5x32xf32>
    %354 = vector.broadcast %334 : vector<1x32xf32> to vector<5x32xf32>
    %355 = arith.mulf %353, %354 : vector<5x32xf32>
    %356 = vector.broadcast %335 : vector<1x32xf32> to vector<5x32xf32>
    %357 = arith.addf %355, %356 : vector<5x32xf32>
    %c0_171 = arith.constant 0 : index
    %c0_172 = arith.constant 0 : index
    %358 = vector.load %arg46[%c0_171, %c0_172] : memref<32x32xf32, #tpu.memory_space<vmem>>, vector<32x32xf32>
    %c0_173 = arith.constant 0 : index
    %c0_174 = arith.constant 0 : index
    %359 = vector.load %arg47[%c0_173, %c0_174] : memref<1x32xf32, #tpu.memory_space<vmem>>, vector<1x32xf32>
    %cst_175 = arith.constant dense<0.000000e+00> : vector<16x32xf32>
    %360 = tpu.matmul %164, %358, %cst_175 {dimension_numbers = #tpu.dot_dimension_numbers<[1], [0], [0], [1], [0, 0, 1, 1], [], []>} : vector<16x32xf32>, vector<32x32xf32>, vector<16x32xf32> -> vector<16x32xf32>
    %361 = vector.broadcast %359 : vector<1x32xf32> to vector<16x32xf32>
    %362 = arith.addf %360, %361 : vector<16x32xf32>
    %c0_176 = arith.constant 0 : index
    %c0_177 = arith.constant 0 : index
    %363 = vector.load %arg48[%c0_176, %c0_177] : memref<32x32xf32, #tpu.memory_space<vmem>>, vector<32x32xf32>
    %c0_178 = arith.constant 0 : index
    %c0_179 = arith.constant 0 : index
    %364 = vector.load %arg49[%c0_178, %c0_179] : memref<1x32xf32, #tpu.memory_space<vmem>>, vector<1x32xf32>
    %cst_180 = arith.constant dense<0.000000e+00> : vector<5x32xf32>
    %365 = tpu.matmul %357, %363, %cst_180 {dimension_numbers = #tpu.dot_dimension_numbers<[1], [0], [0], [1], [0, 0, 1, 1], [], []>} : vector<5x32xf32>, vector<32x32xf32>, vector<5x32xf32> -> vector<5x32xf32>
    %366 = vector.broadcast %364 : vector<1x32xf32> to vector<5x32xf32>
    %367 = arith.addf %365, %366 : vector<5x32xf32>
    %c0_181 = arith.constant 0 : index
    %c0_182 = arith.constant 0 : index
    %368 = vector.load %arg50[%c0_181, %c0_182] : memref<32x32xf32, #tpu.memory_space<vmem>>, vector<32x32xf32>
    %c0_183 = arith.constant 0 : index
    %c0_184 = arith.constant 0 : index
    %369 = vector.load %arg51[%c0_183, %c0_184] : memref<1x32xf32, #tpu.memory_space<vmem>>, vector<1x32xf32>
    %cst_185 = arith.constant dense<0.000000e+00> : vector<5x32xf32>
    %370 = tpu.matmul %357, %368, %cst_185 {dimension_numbers = #tpu.dot_dimension_numbers<[1], [0], [0], [1], [0, 0, 1, 1], [], []>} : vector<5x32xf32>, vector<32x32xf32>, vector<5x32xf32> -> vector<5x32xf32>
    %371 = vector.broadcast %369 : vector<1x32xf32> to vector<5x32xf32>
    %372 = arith.addf %370, %371 : vector<5x32xf32>
    %c0_186 = arith.constant 0 : index
    %c0_187 = arith.constant 0 : index
    %373 = vector.load %arg52[%c0_186, %c0_187] : memref<32x32xf32, #tpu.memory_space<vmem>>, vector<32x32xf32>
    %c0_188 = arith.constant 0 : index
    %c0_189 = arith.constant 0 : index
    %374 = vector.load %arg53[%c0_188, %c0_189] : memref<1x32xf32, #tpu.memory_space<vmem>>, vector<1x32xf32>
    %375 = vector.extract_strided_slice %362 {offsets = [0, 0], sizes = [16, 16], strides = [1, 1]} : vector<16x32xf32> to vector<16x16xf32>
    %376 = vector.extract_strided_slice %367 {offsets = [0, 0], sizes = [5, 16], strides = [1, 1]} : vector<5x32xf32> to vector<5x16xf32>
    %377 = vector.extract_strided_slice %372 {offsets = [0, 0], sizes = [5, 16], strides = [1, 1]} : vector<5x32xf32> to vector<5x16xf32>
    %cst_190 = arith.constant dense<0.000000e+00> : vector<16x5xf32>
    %378 = tpu.matmul %375, %376, %cst_190 {dimension_numbers = #tpu.dot_dimension_numbers<[1], [1], [0], [0], [0, 0, 1, 0], [], []>} : vector<16x16xf32>, vector<5x16xf32>, vector<16x5xf32> -> vector<16x5xf32>
    %cst_191 = arith.constant 2.500000e-01 : f32
    %379 = vector.broadcast %cst_191 : f32 to vector<16x5xf32>
    %380 = arith.mulf %378, %379 : vector<16x5xf32>
    %cst_192 = arith.constant dense<0xFF800000> : vector<16xf32>
    %381 = vector.multi_reduction <maximumf>, %380, %cst_192 [1] : vector<16x5xf32> to vector<16xf32>
    %382 = vector.shape_cast %381 : vector<16xf32> to vector<16x1xf32>
    %383 = vector.broadcast %382 : vector<16x1xf32> to vector<16x5xf32>
    %384 = arith.subf %380, %383 : vector<16x5xf32>
    %385 = math.exp %384 : vector<16x5xf32>
    %cst_193 = arith.constant dense<0.000000e+00> : vector<16xf32>
    %386 = vector.multi_reduction <add>, %385, %cst_193 [1] : vector<16x5xf32> to vector<16xf32>
    %387 = vector.shape_cast %386 : vector<16xf32> to vector<16x1xf32>
    %388 = vector.broadcast %387 : vector<16x1xf32> to vector<16x5xf32>
    %389 = arith.divf %385, %388 : vector<16x5xf32>
    %cst_194 = arith.constant dense<0.000000e+00> : vector<16x16xf32>
    %390 = tpu.matmul %389, %377, %cst_194 {dimension_numbers = #tpu.dot_dimension_numbers<[1], [0], [0], [1], [0, 0, 1, 1], [], []>} : vector<16x5xf32>, vector<5x16xf32>, vector<16x16xf32> -> vector<16x16xf32>
    %391 = vector.extract_strided_slice %373 {offsets = [0, 0], sizes = [16, 32], strides = [1, 1]} : vector<32x32xf32> to vector<16x32xf32>
    %cst_195 = arith.constant dense<0.000000e+00> : vector<16x32xf32>
    %392 = tpu.matmul %390, %391, %cst_195 {dimension_numbers = #tpu.dot_dimension_numbers<[1], [0], [0], [1], [0, 0, 1, 1], [], []>} : vector<16x16xf32>, vector<16x32xf32>, vector<16x32xf32> -> vector<16x32xf32>
    %393 = vector.extract_strided_slice %362 {offsets = [0, 16], sizes = [16, 16], strides = [1, 1]} : vector<16x32xf32> to vector<16x16xf32>
    %394 = vector.extract_strided_slice %367 {offsets = [0, 16], sizes = [5, 16], strides = [1, 1]} : vector<5x32xf32> to vector<5x16xf32>
    %395 = vector.extract_strided_slice %372 {offsets = [0, 16], sizes = [5, 16], strides = [1, 1]} : vector<5x32xf32> to vector<5x16xf32>
    %cst_196 = arith.constant dense<0.000000e+00> : vector<16x5xf32>
    %396 = tpu.matmul %393, %394, %cst_196 {dimension_numbers = #tpu.dot_dimension_numbers<[1], [1], [0], [0], [0, 0, 1, 0], [], []>} : vector<16x16xf32>, vector<5x16xf32>, vector<16x5xf32> -> vector<16x5xf32>
    %cst_197 = arith.constant 2.500000e-01 : f32
    %397 = vector.broadcast %cst_197 : f32 to vector<16x5xf32>
    %398 = arith.mulf %396, %397 : vector<16x5xf32>
    %cst_198 = arith.constant dense<0xFF800000> : vector<16xf32>
    %399 = vector.multi_reduction <maximumf>, %398, %cst_198 [1] : vector<16x5xf32> to vector<16xf32>
    %400 = vector.shape_cast %399 : vector<16xf32> to vector<16x1xf32>
    %401 = vector.broadcast %400 : vector<16x1xf32> to vector<16x5xf32>
    %402 = arith.subf %398, %401 : vector<16x5xf32>
    %403 = math.exp %402 : vector<16x5xf32>
    %cst_199 = arith.constant dense<0.000000e+00> : vector<16xf32>
    %404 = vector.multi_reduction <add>, %403, %cst_199 [1] : vector<16x5xf32> to vector<16xf32>
    %405 = vector.shape_cast %404 : vector<16xf32> to vector<16x1xf32>
    %406 = vector.broadcast %405 : vector<16x1xf32> to vector<16x5xf32>
    %407 = arith.divf %403, %406 : vector<16x5xf32>
    %cst_200 = arith.constant dense<0.000000e+00> : vector<16x16xf32>
    %408 = tpu.matmul %407, %395, %cst_200 {dimension_numbers = #tpu.dot_dimension_numbers<[1], [0], [0], [1], [0, 0, 1, 1], [], []>} : vector<16x5xf32>, vector<5x16xf32>, vector<16x16xf32> -> vector<16x16xf32>
    %409 = vector.extract_strided_slice %373 {offsets = [16, 0], sizes = [16, 32], strides = [1, 1]} : vector<32x32xf32> to vector<16x32xf32>
    %cst_201 = arith.constant dense<0.000000e+00> : vector<16x32xf32>
    %410 = tpu.matmul %408, %409, %cst_201 {dimension_numbers = #tpu.dot_dimension_numbers<[1], [0], [0], [1], [0, 0, 1, 1], [], []>} : vector<16x16xf32>, vector<16x32xf32>, vector<16x32xf32> -> vector<16x32xf32>
    %411 = arith.addf %392, %410 : vector<16x32xf32>
    %412 = vector.broadcast %374 : vector<1x32xf32> to vector<16x32xf32>
    %413 = arith.addf %411, %412 : vector<16x32xf32>
    %414 = arith.addf %164, %413 : vector<16x32xf32>
    %c0_202 = arith.constant 0 : index
    %c0_203 = arith.constant 0 : index
    %415 = vector.load %arg54[%c0_202, %c0_203] : memref<1x32xf32, #tpu.memory_space<vmem>>, vector<1x32xf32>
    %c0_204 = arith.constant 0 : index
    %c0_205 = arith.constant 0 : index
    %416 = vector.load %arg55[%c0_204, %c0_205] : memref<1x32xf32, #tpu.memory_space<vmem>>, vector<1x32xf32>
    %cst_206 = arith.constant dense<0.000000e+00> : vector<16xf32>
    %417 = vector.multi_reduction <add>, %414, %cst_206 [1] : vector<16x32xf32> to vector<16xf32>
    %418 = vector.shape_cast %417 : vector<16xf32> to vector<16x1xf32>
    %cst_207 = arith.constant 3.200000e+01 : f32
    %419 = vector.broadcast %cst_207 : f32 to vector<16x1xf32>
    %420 = arith.divf %418, %419 : vector<16x1xf32>
    %421 = vector.broadcast %420 : vector<16x1xf32> to vector<16x32xf32>
    %422 = arith.subf %414, %421 : vector<16x32xf32>
    %423 = arith.mulf %422, %422 : vector<16x32xf32>
    %cst_208 = arith.constant dense<0.000000e+00> : vector<16xf32>
    %424 = vector.multi_reduction <add>, %423, %cst_208 [1] : vector<16x32xf32> to vector<16xf32>
    %425 = vector.shape_cast %424 : vector<16xf32> to vector<16x1xf32>
    %cst_209 = arith.constant 3.200000e+01 : f32
    %426 = vector.broadcast %cst_209 : f32 to vector<16x1xf32>
    %427 = arith.divf %425, %426 : vector<16x1xf32>
    %428 = vector.broadcast %420 : vector<16x1xf32> to vector<16x32xf32>
    %429 = arith.subf %414, %428 : vector<16x32xf32>
    %cst_210 = arith.constant 9.99999997E-7 : f32
    %430 = vector.broadcast %cst_210 : f32 to vector<16x1xf32>
    %431 = arith.addf %427, %430 : vector<16x1xf32>
    %432 = math.rsqrt %431 : vector<16x1xf32>
    %433 = vector.broadcast %432 : vector<16x1xf32> to vector<16x32xf32>
    %434 = arith.mulf %429, %433 : vector<16x32xf32>
    %435 = vector.broadcast %415 : vector<1x32xf32> to vector<16x32xf32>
    %436 = arith.mulf %434, %435 : vector<16x32xf32>
    %437 = vector.broadcast %416 : vector<1x32xf32> to vector<16x32xf32>
    %438 = arith.addf %436, %437 : vector<16x32xf32>
    %439 = tpu.iota {dimensions = array<i32: 0>} : vector<4x4xi32>
    %cst_211 = arith.constant 0.000000e+00 : f32
    %440 = vector.broadcast %cst_211 : f32 to vector<4x4xf32>
    %441 = vector.extract_strided_slice %357 {offsets = [1, 0], sizes = [1, 32], strides = [1, 1]} : vector<5x32xf32> to vector<1x32xf32>
    %c0_212 = arith.constant 0 : index
    %c0_213 = arith.constant 0 : index
    %c0_214 = arith.constant 0 : index
    %442 = vector.load %arg62[%c0_212, %c0_213, %c0_214] : memref<4x32x32xf32, #tpu.memory_space<vmem>>, vector<1x32x32xf32>
    %443 = vector.shape_cast %442 : vector<1x32x32xf32> to vector<32x32xf32>
    %cst_215 = arith.constant dense<0.000000e+00> : vector<1x32xf32>
    %444 = tpu.matmul %441, %443, %cst_215 {dimension_numbers = #tpu.dot_dimension_numbers<[1], [0], [0], [1], [0, 0, 1, 1], [], []>} : vector<1x32xf32>, vector<32x32xf32>, vector<1x32xf32> -> vector<1x32xf32>
    %c0_216 = arith.constant 0 : index
    %c0_217 = arith.constant 0 : index
    %c0_218 = arith.constant 0 : index
    %445 = vector.load %arg63[%c0_216, %c0_217, %c0_218] : memref<4x1x32xf32, #tpu.memory_space<vmem>>, vector<1x1x32xf32>
    %446 = vector.shape_cast %445 : vector<1x1x32xf32> to vector<1x32xf32>
    %447 = arith.addf %444, %446 : vector<1x32xf32>
    %cst_219 = arith.constant 0.000000e+00 : f32
    %448 = vector.broadcast %cst_219 : f32 to vector<1x32xf32>
    %449 = arith.maximumf %447, %448 : vector<1x32xf32>
    %c0_220 = arith.constant 0 : index
    %c0_221 = arith.constant 0 : index
    %c0_222 = arith.constant 0 : index
    %450 = vector.load %arg64[%c0_220, %c0_221, %c0_222] : memref<4x32x32xf32, #tpu.memory_space<vmem>>, vector<1x32x32xf32>
    %451 = vector.shape_cast %450 : vector<1x32x32xf32> to vector<32x32xf32>
    %cst_223 = arith.constant dense<0.000000e+00> : vector<1x32xf32>
    %452 = tpu.matmul %449, %451, %cst_223 {dimension_numbers = #tpu.dot_dimension_numbers<[1], [0], [0], [1], [0, 0, 1, 1], [], []>} : vector<1x32xf32>, vector<32x32xf32>, vector<1x32xf32> -> vector<1x32xf32>
    %c0_224 = arith.constant 0 : index
    %c0_225 = arith.constant 0 : index
    %c0_226 = arith.constant 0 : index
    %453 = vector.load %arg65[%c0_224, %c0_225, %c0_226] : memref<4x1x32xf32, #tpu.memory_space<vmem>>, vector<1x1x32xf32>
    %454 = vector.shape_cast %453 : vector<1x1x32xf32> to vector<1x32xf32>
    %455 = arith.addf %452, %454 : vector<1x32xf32>
    %cst_227 = arith.constant 0.000000e+00 : f32
    %456 = vector.broadcast %cst_227 : f32 to vector<1x32xf32>
    %457 = arith.maximumf %455, %456 : vector<1x32xf32>
    %c0_228 = arith.constant 0 : index
    %c0_229 = arith.constant 0 : index
    %c0_230 = arith.constant 0 : index
    %458 = vector.load %arg66[%c0_228, %c0_229, %c0_230] : memref<4x32x4xf32, #tpu.memory_space<vmem>>, vector<1x32x4xf32>
    %459 = vector.shape_cast %458 : vector<1x32x4xf32> to vector<32x4xf32>
    %cst_231 = arith.constant dense<0.000000e+00> : vector<1x4xf32>
    %460 = tpu.matmul %457, %459, %cst_231 {dimension_numbers = #tpu.dot_dimension_numbers<[1], [0], [0], [1], [0, 0, 1, 1], [], []>} : vector<1x32xf32>, vector<32x4xf32>, vector<1x4xf32> -> vector<1x4xf32>
    %c0_232 = arith.constant 0 : index
    %c0_233 = arith.constant 0 : index
    %c0_234 = arith.constant 0 : index
    %461 = vector.load %arg67[%c0_232, %c0_233, %c0_234] : memref<4x1x4xf32, #tpu.memory_space<vmem>>, vector<1x1x4xf32>
    %462 = vector.shape_cast %461 : vector<1x1x4xf32> to vector<1x4xf32>
    %463 = arith.addf %460, %462 : vector<1x4xf32>
    %c0_i32 = arith.constant 0 : i32
    %464 = vector.broadcast %c0_i32 : i32 to vector<4x4xi32>
    %465 = arith.cmpi eq, %439, %464 : vector<4x4xi32>
    %466 = arith.extui %465 : vector<4x4xi1> to vector<4x4xi32>
    %467 = arith.sitofp %466 : vector<4x4xi32> to vector<4x4xf32>
    %468 = vector.broadcast %463 : vector<1x4xf32> to vector<4x4xf32>
    %469 = arith.mulf %467, %468 : vector<4x4xf32>
    %470 = arith.addf %440, %469 : vector<4x4xf32>
    %471 = vector.extract_strided_slice %357 {offsets = [2, 0], sizes = [1, 32], strides = [1, 1]} : vector<5x32xf32> to vector<1x32xf32>
    %c1 = arith.constant 1 : index
    %c0_235 = arith.constant 0 : index
    %c0_236 = arith.constant 0 : index
    %472 = vector.load %arg62[%c1, %c0_235, %c0_236] : memref<4x32x32xf32, #tpu.memory_space<vmem>>, vector<1x32x32xf32>
    %473 = vector.shape_cast %472 : vector<1x32x32xf32> to vector<32x32xf32>
    %cst_237 = arith.constant dense<0.000000e+00> : vector<1x32xf32>
    %474 = tpu.matmul %471, %473, %cst_237 {dimension_numbers = #tpu.dot_dimension_numbers<[1], [0], [0], [1], [0, 0, 1, 1], [], []>} : vector<1x32xf32>, vector<32x32xf32>, vector<1x32xf32> -> vector<1x32xf32>
    %c1_238 = arith.constant 1 : index
    %c0_239 = arith.constant 0 : index
    %c0_240 = arith.constant 0 : index
    %475 = vector.load %arg63[%c1_238, %c0_239, %c0_240] : memref<4x1x32xf32, #tpu.memory_space<vmem>>, vector<1x1x32xf32>
    %476 = vector.shape_cast %475 : vector<1x1x32xf32> to vector<1x32xf32>
    %477 = arith.addf %474, %476 : vector<1x32xf32>
    %cst_241 = arith.constant 0.000000e+00 : f32
    %478 = vector.broadcast %cst_241 : f32 to vector<1x32xf32>
    %479 = arith.maximumf %477, %478 : vector<1x32xf32>
    %c1_242 = arith.constant 1 : index
    %c0_243 = arith.constant 0 : index
    %c0_244 = arith.constant 0 : index
    %480 = vector.load %arg64[%c1_242, %c0_243, %c0_244] : memref<4x32x32xf32, #tpu.memory_space<vmem>>, vector<1x32x32xf32>
    %481 = vector.shape_cast %480 : vector<1x32x32xf32> to vector<32x32xf32>
    %cst_245 = arith.constant dense<0.000000e+00> : vector<1x32xf32>
    %482 = tpu.matmul %479, %481, %cst_245 {dimension_numbers = #tpu.dot_dimension_numbers<[1], [0], [0], [1], [0, 0, 1, 1], [], []>} : vector<1x32xf32>, vector<32x32xf32>, vector<1x32xf32> -> vector<1x32xf32>
    %c1_246 = arith.constant 1 : index
    %c0_247 = arith.constant 0 : index
    %c0_248 = arith.constant 0 : index
    %483 = vector.load %arg65[%c1_246, %c0_247, %c0_248] : memref<4x1x32xf32, #tpu.memory_space<vmem>>, vector<1x1x32xf32>
    %484 = vector.shape_cast %483 : vector<1x1x32xf32> to vector<1x32xf32>
    %485 = arith.addf %482, %484 : vector<1x32xf32>
    %cst_249 = arith.constant 0.000000e+00 : f32
    %486 = vector.broadcast %cst_249 : f32 to vector<1x32xf32>
    %487 = arith.maximumf %485, %486 : vector<1x32xf32>
    %c1_250 = arith.constant 1 : index
    %c0_251 = arith.constant 0 : index
    %c0_252 = arith.constant 0 : index
    %488 = vector.load %arg66[%c1_250, %c0_251, %c0_252] : memref<4x32x4xf32, #tpu.memory_space<vmem>>, vector<1x32x4xf32>
    %489 = vector.shape_cast %488 : vector<1x32x4xf32> to vector<32x4xf32>
    %cst_253 = arith.constant dense<0.000000e+00> : vector<1x4xf32>
    %490 = tpu.matmul %487, %489, %cst_253 {dimension_numbers = #tpu.dot_dimension_numbers<[1], [0], [0], [1], [0, 0, 1, 1], [], []>} : vector<1x32xf32>, vector<32x4xf32>, vector<1x4xf32> -> vector<1x4xf32>
    %c1_254 = arith.constant 1 : index
    %c0_255 = arith.constant 0 : index
    %c0_256 = arith.constant 0 : index
    %491 = vector.load %arg67[%c1_254, %c0_255, %c0_256] : memref<4x1x4xf32, #tpu.memory_space<vmem>>, vector<1x1x4xf32>
    %492 = vector.shape_cast %491 : vector<1x1x4xf32> to vector<1x4xf32>
    %493 = arith.addf %490, %492 : vector<1x4xf32>
    %c1_i32 = arith.constant 1 : i32
    %494 = vector.broadcast %c1_i32 : i32 to vector<4x4xi32>
    %495 = arith.cmpi eq, %439, %494 : vector<4x4xi32>
    %496 = arith.extui %495 : vector<4x4xi1> to vector<4x4xi32>
    %497 = arith.sitofp %496 : vector<4x4xi32> to vector<4x4xf32>
    %498 = vector.broadcast %493 : vector<1x4xf32> to vector<4x4xf32>
    %499 = arith.mulf %497, %498 : vector<4x4xf32>
    %500 = arith.addf %470, %499 : vector<4x4xf32>
    %501 = vector.extract_strided_slice %357 {offsets = [3, 0], sizes = [1, 32], strides = [1, 1]} : vector<5x32xf32> to vector<1x32xf32>
    %c2 = arith.constant 2 : index
    %c0_257 = arith.constant 0 : index
    %c0_258 = arith.constant 0 : index
    %502 = vector.load %arg62[%c2, %c0_257, %c0_258] : memref<4x32x32xf32, #tpu.memory_space<vmem>>, vector<1x32x32xf32>
    %503 = vector.shape_cast %502 : vector<1x32x32xf32> to vector<32x32xf32>
    %cst_259 = arith.constant dense<0.000000e+00> : vector<1x32xf32>
    %504 = tpu.matmul %501, %503, %cst_259 {dimension_numbers = #tpu.dot_dimension_numbers<[1], [0], [0], [1], [0, 0, 1, 1], [], []>} : vector<1x32xf32>, vector<32x32xf32>, vector<1x32xf32> -> vector<1x32xf32>
    %c2_260 = arith.constant 2 : index
    %c0_261 = arith.constant 0 : index
    %c0_262 = arith.constant 0 : index
    %505 = vector.load %arg63[%c2_260, %c0_261, %c0_262] : memref<4x1x32xf32, #tpu.memory_space<vmem>>, vector<1x1x32xf32>
    %506 = vector.shape_cast %505 : vector<1x1x32xf32> to vector<1x32xf32>
    %507 = arith.addf %504, %506 : vector<1x32xf32>
    %cst_263 = arith.constant 0.000000e+00 : f32
    %508 = vector.broadcast %cst_263 : f32 to vector<1x32xf32>
    %509 = arith.maximumf %507, %508 : vector<1x32xf32>
    %c2_264 = arith.constant 2 : index
    %c0_265 = arith.constant 0 : index
    %c0_266 = arith.constant 0 : index
    %510 = vector.load %arg64[%c2_264, %c0_265, %c0_266] : memref<4x32x32xf32, #tpu.memory_space<vmem>>, vector<1x32x32xf32>
    %511 = vector.shape_cast %510 : vector<1x32x32xf32> to vector<32x32xf32>
    %cst_267 = arith.constant dense<0.000000e+00> : vector<1x32xf32>
    %512 = tpu.matmul %509, %511, %cst_267 {dimension_numbers = #tpu.dot_dimension_numbers<[1], [0], [0], [1], [0, 0, 1, 1], [], []>} : vector<1x32xf32>, vector<32x32xf32>, vector<1x32xf32> -> vector<1x32xf32>
    %c2_268 = arith.constant 2 : index
    %c0_269 = arith.constant 0 : index
    %c0_270 = arith.constant 0 : index
    %513 = vector.load %arg65[%c2_268, %c0_269, %c0_270] : memref<4x1x32xf32, #tpu.memory_space<vmem>>, vector<1x1x32xf32>
    %514 = vector.shape_cast %513 : vector<1x1x32xf32> to vector<1x32xf32>
    %515 = arith.addf %512, %514 : vector<1x32xf32>
    %cst_271 = arith.constant 0.000000e+00 : f32
    %516 = vector.broadcast %cst_271 : f32 to vector<1x32xf32>
    %517 = arith.maximumf %515, %516 : vector<1x32xf32>
    %c2_272 = arith.constant 2 : index
    %c0_273 = arith.constant 0 : index
    %c0_274 = arith.constant 0 : index
    %518 = vector.load %arg66[%c2_272, %c0_273, %c0_274] : memref<4x32x4xf32, #tpu.memory_space<vmem>>, vector<1x32x4xf32>
    %519 = vector.shape_cast %518 : vector<1x32x4xf32> to vector<32x4xf32>
    %cst_275 = arith.constant dense<0.000000e+00> : vector<1x4xf32>
    %520 = tpu.matmul %517, %519, %cst_275 {dimension_numbers = #tpu.dot_dimension_numbers<[1], [0], [0], [1], [0, 0, 1, 1], [], []>} : vector<1x32xf32>, vector<32x4xf32>, vector<1x4xf32> -> vector<1x4xf32>
    %c2_276 = arith.constant 2 : index
    %c0_277 = arith.constant 0 : index
    %c0_278 = arith.constant 0 : index
    %521 = vector.load %arg67[%c2_276, %c0_277, %c0_278] : memref<4x1x4xf32, #tpu.memory_space<vmem>>, vector<1x1x4xf32>
    %522 = vector.shape_cast %521 : vector<1x1x4xf32> to vector<1x4xf32>
    %523 = arith.addf %520, %522 : vector<1x4xf32>
    %c2_i32 = arith.constant 2 : i32
    %524 = vector.broadcast %c2_i32 : i32 to vector<4x4xi32>
    %525 = arith.cmpi eq, %439, %524 : vector<4x4xi32>
    %526 = arith.extui %525 : vector<4x4xi1> to vector<4x4xi32>
    %527 = arith.sitofp %526 : vector<4x4xi32> to vector<4x4xf32>
    %528 = vector.broadcast %523 : vector<1x4xf32> to vector<4x4xf32>
    %529 = arith.mulf %527, %528 : vector<4x4xf32>
    %530 = arith.addf %500, %529 : vector<4x4xf32>
    %531 = vector.extract_strided_slice %357 {offsets = [4, 0], sizes = [1, 32], strides = [1, 1]} : vector<5x32xf32> to vector<1x32xf32>
    %c3 = arith.constant 3 : index
    %c0_279 = arith.constant 0 : index
    %c0_280 = arith.constant 0 : index
    %532 = vector.load %arg62[%c3, %c0_279, %c0_280] : memref<4x32x32xf32, #tpu.memory_space<vmem>>, vector<1x32x32xf32>
    %533 = vector.shape_cast %532 : vector<1x32x32xf32> to vector<32x32xf32>
    %cst_281 = arith.constant dense<0.000000e+00> : vector<1x32xf32>
    %534 = tpu.matmul %531, %533, %cst_281 {dimension_numbers = #tpu.dot_dimension_numbers<[1], [0], [0], [1], [0, 0, 1, 1], [], []>} : vector<1x32xf32>, vector<32x32xf32>, vector<1x32xf32> -> vector<1x32xf32>
    %c3_282 = arith.constant 3 : index
    %c0_283 = arith.constant 0 : index
    %c0_284 = arith.constant 0 : index
    %535 = vector.load %arg63[%c3_282, %c0_283, %c0_284] : memref<4x1x32xf32, #tpu.memory_space<vmem>>, vector<1x1x32xf32>
    %536 = vector.shape_cast %535 : vector<1x1x32xf32> to vector<1x32xf32>
    %537 = arith.addf %534, %536 : vector<1x32xf32>
    %cst_285 = arith.constant 0.000000e+00 : f32
    %538 = vector.broadcast %cst_285 : f32 to vector<1x32xf32>
    %539 = arith.maximumf %537, %538 : vector<1x32xf32>
    %c3_286 = arith.constant 3 : index
    %c0_287 = arith.constant 0 : index
    %c0_288 = arith.constant 0 : index
    %540 = vector.load %arg64[%c3_286, %c0_287, %c0_288] : memref<4x32x32xf32, #tpu.memory_space<vmem>>, vector<1x32x32xf32>
    %541 = vector.shape_cast %540 : vector<1x32x32xf32> to vector<32x32xf32>
    %cst_289 = arith.constant dense<0.000000e+00> : vector<1x32xf32>
    %542 = tpu.matmul %539, %541, %cst_289 {dimension_numbers = #tpu.dot_dimension_numbers<[1], [0], [0], [1], [0, 0, 1, 1], [], []>} : vector<1x32xf32>, vector<32x32xf32>, vector<1x32xf32> -> vector<1x32xf32>
    %c3_290 = arith.constant 3 : index
    %c0_291 = arith.constant 0 : index
    %c0_292 = arith.constant 0 : index
    %543 = vector.load %arg65[%c3_290, %c0_291, %c0_292] : memref<4x1x32xf32, #tpu.memory_space<vmem>>, vector<1x1x32xf32>
    %544 = vector.shape_cast %543 : vector<1x1x32xf32> to vector<1x32xf32>
    %545 = arith.addf %542, %544 : vector<1x32xf32>
    %cst_293 = arith.constant 0.000000e+00 : f32
    %546 = vector.broadcast %cst_293 : f32 to vector<1x32xf32>
    %547 = arith.maximumf %545, %546 : vector<1x32xf32>
    %c3_294 = arith.constant 3 : index
    %c0_295 = arith.constant 0 : index
    %c0_296 = arith.constant 0 : index
    %548 = vector.load %arg66[%c3_294, %c0_295, %c0_296] : memref<4x32x4xf32, #tpu.memory_space<vmem>>, vector<1x32x4xf32>
    %549 = vector.shape_cast %548 : vector<1x32x4xf32> to vector<32x4xf32>
    %cst_297 = arith.constant dense<0.000000e+00> : vector<1x4xf32>
    %550 = tpu.matmul %547, %549, %cst_297 {dimension_numbers = #tpu.dot_dimension_numbers<[1], [0], [0], [1], [0, 0, 1, 1], [], []>} : vector<1x32xf32>, vector<32x4xf32>, vector<1x4xf32> -> vector<1x4xf32>
    %c3_298 = arith.constant 3 : index
    %c0_299 = arith.constant 0 : index
    %c0_300 = arith.constant 0 : index
    %551 = vector.load %arg67[%c3_298, %c0_299, %c0_300] : memref<4x1x4xf32, #tpu.memory_space<vmem>>, vector<1x1x4xf32>
    %552 = vector.shape_cast %551 : vector<1x1x4xf32> to vector<1x4xf32>
    %553 = arith.addf %550, %552 : vector<1x4xf32>
    %c3_i32 = arith.constant 3 : i32
    %554 = vector.broadcast %c3_i32 : i32 to vector<4x4xi32>
    %555 = arith.cmpi eq, %439, %554 : vector<4x4xi32>
    %556 = arith.extui %555 : vector<4x4xi1> to vector<4x4xi32>
    %557 = arith.sitofp %556 : vector<4x4xi32> to vector<4x4xf32>
    %558 = vector.broadcast %553 : vector<1x4xf32> to vector<4x4xf32>
    %559 = arith.mulf %557, %558 : vector<4x4xf32>
    %560 = arith.addf %530, %559 : vector<4x4xf32>
    %c0_301 = arith.constant 0 : index
    %c0_302 = arith.constant 0 : index
    %561 = vector.load %arg56[%c0_301, %c0_302] : memref<32x32xf32, #tpu.memory_space<vmem>>, vector<32x32xf32>
    %c0_303 = arith.constant 0 : index
    %c0_304 = arith.constant 0 : index
    %562 = vector.load %arg57[%c0_303, %c0_304] : memref<1x32xf32, #tpu.memory_space<vmem>>, vector<1x32xf32>
    %cst_305 = arith.constant dense<0.000000e+00> : vector<16x32xf32>
    %563 = tpu.matmul %438, %561, %cst_305 {dimension_numbers = #tpu.dot_dimension_numbers<[1], [0], [0], [1], [0, 0, 1, 1], [], []>} : vector<16x32xf32>, vector<32x32xf32>, vector<16x32xf32> -> vector<16x32xf32>
    %564 = vector.broadcast %562 : vector<1x32xf32> to vector<16x32xf32>
    %565 = arith.addf %563, %564 : vector<16x32xf32>
    %566 = vector.extract_strided_slice %565 {offsets = [0, 0], sizes = [16, 8], strides = [1, 1]} : vector<16x32xf32> to vector<16x8xf32>
    %c0_306 = arith.constant 0 : index
    %c0_307 = arith.constant 0 : index
    %567 = vector.load %arg58[%c0_306, %c0_307] : memref<1x8xf32, #tpu.memory_space<vmem>>, vector<1x8xf32>
    %c0_308 = arith.constant 0 : index
    %c0_309 = arith.constant 0 : index
    %568 = vector.load %arg59[%c0_308, %c0_309] : memref<1x8xf32, #tpu.memory_space<vmem>>, vector<1x8xf32>
    %cst_310 = arith.constant dense<0.000000e+00> : vector<16xf32>
    %569 = vector.multi_reduction <add>, %566, %cst_310 [1] : vector<16x8xf32> to vector<16xf32>
    %570 = vector.shape_cast %569 : vector<16xf32> to vector<16x1xf32>
    %cst_311 = arith.constant 8.000000e+00 : f32
    %571 = vector.broadcast %cst_311 : f32 to vector<16x1xf32>
    %572 = arith.divf %570, %571 : vector<16x1xf32>
    %573 = vector.broadcast %572 : vector<16x1xf32> to vector<16x8xf32>
    %574 = arith.subf %566, %573 : vector<16x8xf32>
    %575 = arith.mulf %574, %574 : vector<16x8xf32>
    %cst_312 = arith.constant dense<0.000000e+00> : vector<16xf32>
    %576 = vector.multi_reduction <add>, %575, %cst_312 [1] : vector<16x8xf32> to vector<16xf32>
    %577 = vector.shape_cast %576 : vector<16xf32> to vector<16x1xf32>
    %cst_313 = arith.constant 8.000000e+00 : f32
    %578 = vector.broadcast %cst_313 : f32 to vector<16x1xf32>
    %579 = arith.divf %577, %578 : vector<16x1xf32>
    %580 = vector.broadcast %572 : vector<16x1xf32> to vector<16x8xf32>
    %581 = arith.subf %566, %580 : vector<16x8xf32>
    %cst_314 = arith.constant 9.99999997E-7 : f32
    %582 = vector.broadcast %cst_314 : f32 to vector<16x1xf32>
    %583 = arith.addf %579, %582 : vector<16x1xf32>
    %584 = math.rsqrt %583 : vector<16x1xf32>
    %585 = vector.broadcast %584 : vector<16x1xf32> to vector<16x8xf32>
    %586 = arith.mulf %581, %585 : vector<16x8xf32>
    %587 = vector.broadcast %567 : vector<1x8xf32> to vector<16x8xf32>
    %588 = arith.mulf %586, %587 : vector<16x8xf32>
    %589 = vector.broadcast %568 : vector<1x8xf32> to vector<16x8xf32>
    %590 = arith.addf %588, %589 : vector<16x8xf32>
    %591 = arith.mulf %590, %590 : vector<16x8xf32>
    %592 = arith.mulf %590, %591 : vector<16x8xf32>
    %cst_315 = arith.constant 4.471500e-02 : f32
    %593 = vector.broadcast %cst_315 : f32 to vector<16x8xf32>
    %594 = arith.mulf %593, %592 : vector<16x8xf32>
    %595 = arith.addf %590, %594 : vector<16x8xf32>
    %cst_316 = arith.constant 0.797884583 : f32
    %596 = vector.broadcast %cst_316 : f32 to vector<16x8xf32>
    %597 = arith.mulf %596, %595 : vector<16x8xf32>
    %598 = math.tanh %597 : vector<16x8xf32>
    %cst_317 = arith.constant 1.000000e+00 : f32
    %599 = vector.broadcast %cst_317 : f32 to vector<16x8xf32>
    %600 = arith.addf %599, %598 : vector<16x8xf32>
    %cst_318 = arith.constant 5.000000e-01 : f32
    %601 = vector.broadcast %cst_318 : f32 to vector<16x8xf32>
    %602 = arith.mulf %601, %600 : vector<16x8xf32>
    %603 = arith.mulf %590, %602 : vector<16x8xf32>
    %c0_319 = arith.constant 0 : index
    %c0_320 = arith.constant 0 : index
    %604 = vector.load %arg60[%c0_319, %c0_320] : memref<8x16xf32, #tpu.memory_space<vmem>>, vector<8x16xf32>
    %c0_321 = arith.constant 0 : index
    %c0_322 = arith.constant 0 : index
    %605 = vector.load %arg61[%c0_321, %c0_322] : memref<1x16xf32, #tpu.memory_space<vmem>>, vector<1x16xf32>
    %cst_323 = arith.constant dense<0.000000e+00> : vector<16x16xf32>
    %606 = tpu.matmul %603, %604, %cst_323 {dimension_numbers = #tpu.dot_dimension_numbers<[1], [0], [0], [1], [0, 0, 1, 1], [], []>} : vector<16x8xf32>, vector<8x16xf32>, vector<16x16xf32> -> vector<16x16xf32>
    %607 = vector.broadcast %605 : vector<1x16xf32> to vector<16x16xf32>
    %608 = arith.addf %606, %607 : vector<16x16xf32>
    %609 = arith.mulf %608, %608 : vector<16x16xf32>
    %610 = arith.mulf %608, %609 : vector<16x16xf32>
    %cst_324 = arith.constant 4.471500e-02 : f32
    %611 = vector.broadcast %cst_324 : f32 to vector<16x16xf32>
    %612 = arith.mulf %611, %610 : vector<16x16xf32>
    %613 = arith.addf %608, %612 : vector<16x16xf32>
    %cst_325 = arith.constant 0.797884583 : f32
    %614 = vector.broadcast %cst_325 : f32 to vector<16x16xf32>
    %615 = arith.mulf %614, %613 : vector<16x16xf32>
    %616 = math.tanh %615 : vector<16x16xf32>
    %cst_326 = arith.constant 1.000000e+00 : f32
    %617 = vector.broadcast %cst_326 : f32 to vector<16x16xf32>
    %618 = arith.addf %617, %616 : vector<16x16xf32>
    %cst_327 = arith.constant 5.000000e-01 : f32
    %619 = vector.broadcast %cst_327 : f32 to vector<16x16xf32>
    %620 = arith.mulf %619, %618 : vector<16x16xf32>
    %621 = arith.mulf %608, %620 : vector<16x16xf32>
    %622 = vector.extract_strided_slice %565 {offsets = [0, 8], sizes = [16, 8], strides = [1, 1]} : vector<16x32xf32> to vector<16x8xf32>
    %c0_328 = arith.constant 0 : index
    %c0_329 = arith.constant 0 : index
    %623 = vector.load %arg58[%c0_328, %c0_329] : memref<1x8xf32, #tpu.memory_space<vmem>>, vector<1x8xf32>
    %c0_330 = arith.constant 0 : index
    %c0_331 = arith.constant 0 : index
    %624 = vector.load %arg59[%c0_330, %c0_331] : memref<1x8xf32, #tpu.memory_space<vmem>>, vector<1x8xf32>
    %cst_332 = arith.constant dense<0.000000e+00> : vector<16xf32>
    %625 = vector.multi_reduction <add>, %622, %cst_332 [1] : vector<16x8xf32> to vector<16xf32>
    %626 = vector.shape_cast %625 : vector<16xf32> to vector<16x1xf32>
    %cst_333 = arith.constant 8.000000e+00 : f32
    %627 = vector.broadcast %cst_333 : f32 to vector<16x1xf32>
    %628 = arith.divf %626, %627 : vector<16x1xf32>
    %629 = vector.broadcast %628 : vector<16x1xf32> to vector<16x8xf32>
    %630 = arith.subf %622, %629 : vector<16x8xf32>
    %631 = arith.mulf %630, %630 : vector<16x8xf32>
    %cst_334 = arith.constant dense<0.000000e+00> : vector<16xf32>
    %632 = vector.multi_reduction <add>, %631, %cst_334 [1] : vector<16x8xf32> to vector<16xf32>
    %633 = vector.shape_cast %632 : vector<16xf32> to vector<16x1xf32>
    %cst_335 = arith.constant 8.000000e+00 : f32
    %634 = vector.broadcast %cst_335 : f32 to vector<16x1xf32>
    %635 = arith.divf %633, %634 : vector<16x1xf32>
    %636 = vector.broadcast %628 : vector<16x1xf32> to vector<16x8xf32>
    %637 = arith.subf %622, %636 : vector<16x8xf32>
    %cst_336 = arith.constant 9.99999997E-7 : f32
    %638 = vector.broadcast %cst_336 : f32 to vector<16x1xf32>
    %639 = arith.addf %635, %638 : vector<16x1xf32>
    %640 = math.rsqrt %639 : vector<16x1xf32>
    %641 = vector.broadcast %640 : vector<16x1xf32> to vector<16x8xf32>
    %642 = arith.mulf %637, %641 : vector<16x8xf32>
    %643 = vector.broadcast %623 : vector<1x8xf32> to vector<16x8xf32>
    %644 = arith.mulf %642, %643 : vector<16x8xf32>
    %645 = vector.broadcast %624 : vector<1x8xf32> to vector<16x8xf32>
    %646 = arith.addf %644, %645 : vector<16x8xf32>
    %647 = arith.mulf %646, %646 : vector<16x8xf32>
    %648 = arith.mulf %646, %647 : vector<16x8xf32>
    %cst_337 = arith.constant 4.471500e-02 : f32
    %649 = vector.broadcast %cst_337 : f32 to vector<16x8xf32>
    %650 = arith.mulf %649, %648 : vector<16x8xf32>
    %651 = arith.addf %646, %650 : vector<16x8xf32>
    %cst_338 = arith.constant 0.797884583 : f32
    %652 = vector.broadcast %cst_338 : f32 to vector<16x8xf32>
    %653 = arith.mulf %652, %651 : vector<16x8xf32>
    %654 = math.tanh %653 : vector<16x8xf32>
    %cst_339 = arith.constant 1.000000e+00 : f32
    %655 = vector.broadcast %cst_339 : f32 to vector<16x8xf32>
    %656 = arith.addf %655, %654 : vector<16x8xf32>
    %cst_340 = arith.constant 5.000000e-01 : f32
    %657 = vector.broadcast %cst_340 : f32 to vector<16x8xf32>
    %658 = arith.mulf %657, %656 : vector<16x8xf32>
    %659 = arith.mulf %646, %658 : vector<16x8xf32>
    %c0_341 = arith.constant 0 : index
    %c0_342 = arith.constant 0 : index
    %660 = vector.load %arg60[%c0_341, %c0_342] : memref<8x16xf32, #tpu.memory_space<vmem>>, vector<8x16xf32>
    %c0_343 = arith.constant 0 : index
    %c0_344 = arith.constant 0 : index
    %661 = vector.load %arg61[%c0_343, %c0_344] : memref<1x16xf32, #tpu.memory_space<vmem>>, vector<1x16xf32>
    %cst_345 = arith.constant dense<0.000000e+00> : vector<16x16xf32>
    %662 = tpu.matmul %659, %660, %cst_345 {dimension_numbers = #tpu.dot_dimension_numbers<[1], [0], [0], [1], [0, 0, 1, 1], [], []>} : vector<16x8xf32>, vector<8x16xf32>, vector<16x16xf32> -> vector<16x16xf32>
    %663 = vector.broadcast %661 : vector<1x16xf32> to vector<16x16xf32>
    %664 = arith.addf %662, %663 : vector<16x16xf32>
    %665 = arith.mulf %664, %664 : vector<16x16xf32>
    %666 = arith.mulf %664, %665 : vector<16x16xf32>
    %cst_346 = arith.constant 4.471500e-02 : f32
    %667 = vector.broadcast %cst_346 : f32 to vector<16x16xf32>
    %668 = arith.mulf %667, %666 : vector<16x16xf32>
    %669 = arith.addf %664, %668 : vector<16x16xf32>
    %cst_347 = arith.constant 0.797884583 : f32
    %670 = vector.broadcast %cst_347 : f32 to vector<16x16xf32>
    %671 = arith.mulf %670, %669 : vector<16x16xf32>
    %672 = math.tanh %671 : vector<16x16xf32>
    %cst_348 = arith.constant 1.000000e+00 : f32
    %673 = vector.broadcast %cst_348 : f32 to vector<16x16xf32>
    %674 = arith.addf %673, %672 : vector<16x16xf32>
    %cst_349 = arith.constant 5.000000e-01 : f32
    %675 = vector.broadcast %cst_349 : f32 to vector<16x16xf32>
    %676 = arith.mulf %675, %674 : vector<16x16xf32>
    %677 = arith.mulf %664, %676 : vector<16x16xf32>
    %678 = vector.extract_strided_slice %565 {offsets = [0, 16], sizes = [16, 8], strides = [1, 1]} : vector<16x32xf32> to vector<16x8xf32>
    %c0_350 = arith.constant 0 : index
    %c0_351 = arith.constant 0 : index
    %679 = vector.load %arg58[%c0_350, %c0_351] : memref<1x8xf32, #tpu.memory_space<vmem>>, vector<1x8xf32>
    %c0_352 = arith.constant 0 : index
    %c0_353 = arith.constant 0 : index
    %680 = vector.load %arg59[%c0_352, %c0_353] : memref<1x8xf32, #tpu.memory_space<vmem>>, vector<1x8xf32>
    %cst_354 = arith.constant dense<0.000000e+00> : vector<16xf32>
    %681 = vector.multi_reduction <add>, %678, %cst_354 [1] : vector<16x8xf32> to vector<16xf32>
    %682 = vector.shape_cast %681 : vector<16xf32> to vector<16x1xf32>
    %cst_355 = arith.constant 8.000000e+00 : f32
    %683 = vector.broadcast %cst_355 : f32 to vector<16x1xf32>
    %684 = arith.divf %682, %683 : vector<16x1xf32>
    %685 = vector.broadcast %684 : vector<16x1xf32> to vector<16x8xf32>
    %686 = arith.subf %678, %685 : vector<16x8xf32>
    %687 = arith.mulf %686, %686 : vector<16x8xf32>
    %cst_356 = arith.constant dense<0.000000e+00> : vector<16xf32>
    %688 = vector.multi_reduction <add>, %687, %cst_356 [1] : vector<16x8xf32> to vector<16xf32>
    %689 = vector.shape_cast %688 : vector<16xf32> to vector<16x1xf32>
    %cst_357 = arith.constant 8.000000e+00 : f32
    %690 = vector.broadcast %cst_357 : f32 to vector<16x1xf32>
    %691 = arith.divf %689, %690 : vector<16x1xf32>
    %692 = vector.broadcast %684 : vector<16x1xf32> to vector<16x8xf32>
    %693 = arith.subf %678, %692 : vector<16x8xf32>
    %cst_358 = arith.constant 9.99999997E-7 : f32
    %694 = vector.broadcast %cst_358 : f32 to vector<16x1xf32>
    %695 = arith.addf %691, %694 : vector<16x1xf32>
    %696 = math.rsqrt %695 : vector<16x1xf32>
    %697 = vector.broadcast %696 : vector<16x1xf32> to vector<16x8xf32>
    %698 = arith.mulf %693, %697 : vector<16x8xf32>
    %699 = vector.broadcast %679 : vector<1x8xf32> to vector<16x8xf32>
    %700 = arith.mulf %698, %699 : vector<16x8xf32>
    %701 = vector.broadcast %680 : vector<1x8xf32> to vector<16x8xf32>
    %702 = arith.addf %700, %701 : vector<16x8xf32>
    %703 = arith.mulf %702, %702 : vector<16x8xf32>
    %704 = arith.mulf %702, %703 : vector<16x8xf32>
    %cst_359 = arith.constant 4.471500e-02 : f32
    %705 = vector.broadcast %cst_359 : f32 to vector<16x8xf32>
    %706 = arith.mulf %705, %704 : vector<16x8xf32>
    %707 = arith.addf %702, %706 : vector<16x8xf32>
    %cst_360 = arith.constant 0.797884583 : f32
    %708 = vector.broadcast %cst_360 : f32 to vector<16x8xf32>
    %709 = arith.mulf %708, %707 : vector<16x8xf32>
    %710 = math.tanh %709 : vector<16x8xf32>
    %cst_361 = arith.constant 1.000000e+00 : f32
    %711 = vector.broadcast %cst_361 : f32 to vector<16x8xf32>
    %712 = arith.addf %711, %710 : vector<16x8xf32>
    %cst_362 = arith.constant 5.000000e-01 : f32
    %713 = vector.broadcast %cst_362 : f32 to vector<16x8xf32>
    %714 = arith.mulf %713, %712 : vector<16x8xf32>
    %715 = arith.mulf %702, %714 : vector<16x8xf32>
    %c0_363 = arith.constant 0 : index
    %c0_364 = arith.constant 0 : index
    %716 = vector.load %arg60[%c0_363, %c0_364] : memref<8x16xf32, #tpu.memory_space<vmem>>, vector<8x16xf32>
    %c0_365 = arith.constant 0 : index
    %c0_366 = arith.constant 0 : index
    %717 = vector.load %arg61[%c0_365, %c0_366] : memref<1x16xf32, #tpu.memory_space<vmem>>, vector<1x16xf32>
    %cst_367 = arith.constant dense<0.000000e+00> : vector<16x16xf32>
    %718 = tpu.matmul %715, %716, %cst_367 {dimension_numbers = #tpu.dot_dimension_numbers<[1], [0], [0], [1], [0, 0, 1, 1], [], []>} : vector<16x8xf32>, vector<8x16xf32>, vector<16x16xf32> -> vector<16x16xf32>
    %719 = vector.broadcast %717 : vector<1x16xf32> to vector<16x16xf32>
    %720 = arith.addf %718, %719 : vector<16x16xf32>
    %721 = arith.mulf %720, %720 : vector<16x16xf32>
    %722 = arith.mulf %720, %721 : vector<16x16xf32>
    %cst_368 = arith.constant 4.471500e-02 : f32
    %723 = vector.broadcast %cst_368 : f32 to vector<16x16xf32>
    %724 = arith.mulf %723, %722 : vector<16x16xf32>
    %725 = arith.addf %720, %724 : vector<16x16xf32>
    %cst_369 = arith.constant 0.797884583 : f32
    %726 = vector.broadcast %cst_369 : f32 to vector<16x16xf32>
    %727 = arith.mulf %726, %725 : vector<16x16xf32>
    %728 = math.tanh %727 : vector<16x16xf32>
    %cst_370 = arith.constant 1.000000e+00 : f32
    %729 = vector.broadcast %cst_370 : f32 to vector<16x16xf32>
    %730 = arith.addf %729, %728 : vector<16x16xf32>
    %cst_371 = arith.constant 5.000000e-01 : f32
    %731 = vector.broadcast %cst_371 : f32 to vector<16x16xf32>
    %732 = arith.mulf %731, %730 : vector<16x16xf32>
    %733 = arith.mulf %720, %732 : vector<16x16xf32>
    %734 = vector.extract_strided_slice %565 {offsets = [0, 24], sizes = [16, 8], strides = [1, 1]} : vector<16x32xf32> to vector<16x8xf32>
    %c0_372 = arith.constant 0 : index
    %c0_373 = arith.constant 0 : index
    %735 = vector.load %arg58[%c0_372, %c0_373] : memref<1x8xf32, #tpu.memory_space<vmem>>, vector<1x8xf32>
    %c0_374 = arith.constant 0 : index
    %c0_375 = arith.constant 0 : index
    %736 = vector.load %arg59[%c0_374, %c0_375] : memref<1x8xf32, #tpu.memory_space<vmem>>, vector<1x8xf32>
    %cst_376 = arith.constant dense<0.000000e+00> : vector<16xf32>
    %737 = vector.multi_reduction <add>, %734, %cst_376 [1] : vector<16x8xf32> to vector<16xf32>
    %738 = vector.shape_cast %737 : vector<16xf32> to vector<16x1xf32>
    %cst_377 = arith.constant 8.000000e+00 : f32
    %739 = vector.broadcast %cst_377 : f32 to vector<16x1xf32>
    %740 = arith.divf %738, %739 : vector<16x1xf32>
    %741 = vector.broadcast %740 : vector<16x1xf32> to vector<16x8xf32>
    %742 = arith.subf %734, %741 : vector<16x8xf32>
    %743 = arith.mulf %742, %742 : vector<16x8xf32>
    %cst_378 = arith.constant dense<0.000000e+00> : vector<16xf32>
    %744 = vector.multi_reduction <add>, %743, %cst_378 [1] : vector<16x8xf32> to vector<16xf32>
    %745 = vector.shape_cast %744 : vector<16xf32> to vector<16x1xf32>
    %cst_379 = arith.constant 8.000000e+00 : f32
    %746 = vector.broadcast %cst_379 : f32 to vector<16x1xf32>
    %747 = arith.divf %745, %746 : vector<16x1xf32>
    %748 = vector.broadcast %740 : vector<16x1xf32> to vector<16x8xf32>
    %749 = arith.subf %734, %748 : vector<16x8xf32>
    %cst_380 = arith.constant 9.99999997E-7 : f32
    %750 = vector.broadcast %cst_380 : f32 to vector<16x1xf32>
    %751 = arith.addf %747, %750 : vector<16x1xf32>
    %752 = math.rsqrt %751 : vector<16x1xf32>
    %753 = vector.broadcast %752 : vector<16x1xf32> to vector<16x8xf32>
    %754 = arith.mulf %749, %753 : vector<16x8xf32>
    %755 = vector.broadcast %735 : vector<1x8xf32> to vector<16x8xf32>
    %756 = arith.mulf %754, %755 : vector<16x8xf32>
    %757 = vector.broadcast %736 : vector<1x8xf32> to vector<16x8xf32>
    %758 = arith.addf %756, %757 : vector<16x8xf32>
    %759 = arith.mulf %758, %758 : vector<16x8xf32>
    %760 = arith.mulf %758, %759 : vector<16x8xf32>
    %cst_381 = arith.constant 4.471500e-02 : f32
    %761 = vector.broadcast %cst_381 : f32 to vector<16x8xf32>
    %762 = arith.mulf %761, %760 : vector<16x8xf32>
    %763 = arith.addf %758, %762 : vector<16x8xf32>
    %cst_382 = arith.constant 0.797884583 : f32
    %764 = vector.broadcast %cst_382 : f32 to vector<16x8xf32>
    %765 = arith.mulf %764, %763 : vector<16x8xf32>
    %766 = math.tanh %765 : vector<16x8xf32>
    %cst_383 = arith.constant 1.000000e+00 : f32
    %767 = vector.broadcast %cst_383 : f32 to vector<16x8xf32>
    %768 = arith.addf %767, %766 : vector<16x8xf32>
    %cst_384 = arith.constant 5.000000e-01 : f32
    %769 = vector.broadcast %cst_384 : f32 to vector<16x8xf32>
    %770 = arith.mulf %769, %768 : vector<16x8xf32>
    %771 = arith.mulf %758, %770 : vector<16x8xf32>
    %c0_385 = arith.constant 0 : index
    %c0_386 = arith.constant 0 : index
    %772 = vector.load %arg60[%c0_385, %c0_386] : memref<8x16xf32, #tpu.memory_space<vmem>>, vector<8x16xf32>
    %c0_387 = arith.constant 0 : index
    %c0_388 = arith.constant 0 : index
    %773 = vector.load %arg61[%c0_387, %c0_388] : memref<1x16xf32, #tpu.memory_space<vmem>>, vector<1x16xf32>
    %cst_389 = arith.constant dense<0.000000e+00> : vector<16x16xf32>
    %774 = tpu.matmul %771, %772, %cst_389 {dimension_numbers = #tpu.dot_dimension_numbers<[1], [0], [0], [1], [0, 0, 1, 1], [], []>} : vector<16x8xf32>, vector<8x16xf32>, vector<16x16xf32> -> vector<16x16xf32>
    %775 = vector.broadcast %773 : vector<1x16xf32> to vector<16x16xf32>
    %776 = arith.addf %774, %775 : vector<16x16xf32>
    %777 = arith.mulf %776, %776 : vector<16x16xf32>
    %778 = arith.mulf %776, %777 : vector<16x16xf32>
    %cst_390 = arith.constant 4.471500e-02 : f32
    %779 = vector.broadcast %cst_390 : f32 to vector<16x16xf32>
    %780 = arith.mulf %779, %778 : vector<16x16xf32>
    %781 = arith.addf %776, %780 : vector<16x16xf32>
    %cst_391 = arith.constant 0.797884583 : f32
    %782 = vector.broadcast %cst_391 : f32 to vector<16x16xf32>
    %783 = arith.mulf %782, %781 : vector<16x16xf32>
    %784 = math.tanh %783 : vector<16x16xf32>
    %cst_392 = arith.constant 1.000000e+00 : f32
    %785 = vector.broadcast %cst_392 : f32 to vector<16x16xf32>
    %786 = arith.addf %785, %784 : vector<16x16xf32>
    %cst_393 = arith.constant 5.000000e-01 : f32
    %787 = vector.broadcast %cst_393 : f32 to vector<16x16xf32>
    %788 = arith.mulf %787, %786 : vector<16x16xf32>
    %789 = arith.mulf %776, %788 : vector<16x16xf32>
    %790 = vector.extract_strided_slice %621 {offsets = [0, 0], sizes = [16, 4], strides = [1, 1]} : vector<16x16xf32> to vector<16x4xf32>
    %791 = vector.extract_strided_slice %677 {offsets = [0, 0], sizes = [16, 4], strides = [1, 1]} : vector<16x16xf32> to vector<16x4xf32>
    %792 = vector.extract_strided_slice %733 {offsets = [0, 0], sizes = [16, 4], strides = [1, 1]} : vector<16x16xf32> to vector<16x4xf32>
    %793 = vector.extract_strided_slice %789 {offsets = [0, 0], sizes = [16, 4], strides = [1, 1]} : vector<16x16xf32> to vector<16x4xf32>
    %794 = vector.extract_strided_slice %621 {offsets = [0, 4], sizes = [16, 4], strides = [1, 1]} : vector<16x16xf32> to vector<16x4xf32>
    %795 = vector.extract_strided_slice %677 {offsets = [0, 4], sizes = [16, 4], strides = [1, 1]} : vector<16x16xf32> to vector<16x4xf32>
    %796 = vector.extract_strided_slice %733 {offsets = [0, 4], sizes = [16, 4], strides = [1, 1]} : vector<16x16xf32> to vector<16x4xf32>
    %797 = vector.extract_strided_slice %789 {offsets = [0, 4], sizes = [16, 4], strides = [1, 1]} : vector<16x16xf32> to vector<16x4xf32>
    %798 = vector.extract_strided_slice %621 {offsets = [0, 8], sizes = [16, 4], strides = [1, 1]} : vector<16x16xf32> to vector<16x4xf32>
    %799 = vector.extract_strided_slice %677 {offsets = [0, 8], sizes = [16, 4], strides = [1, 1]} : vector<16x16xf32> to vector<16x4xf32>
    %800 = vector.extract_strided_slice %733 {offsets = [0, 8], sizes = [16, 4], strides = [1, 1]} : vector<16x16xf32> to vector<16x4xf32>
    %801 = vector.extract_strided_slice %789 {offsets = [0, 8], sizes = [16, 4], strides = [1, 1]} : vector<16x16xf32> to vector<16x4xf32>
    %802 = vector.extract_strided_slice %621 {offsets = [0, 12], sizes = [16, 4], strides = [1, 1]} : vector<16x16xf32> to vector<16x4xf32>
    %803 = vector.extract_strided_slice %677 {offsets = [0, 12], sizes = [16, 4], strides = [1, 1]} : vector<16x16xf32> to vector<16x4xf32>
    %804 = vector.extract_strided_slice %733 {offsets = [0, 12], sizes = [16, 4], strides = [1, 1]} : vector<16x16xf32> to vector<16x4xf32>
    %805 = vector.extract_strided_slice %789 {offsets = [0, 12], sizes = [16, 4], strides = [1, 1]} : vector<16x16xf32> to vector<16x4xf32>
    %806 = tpu.concatenate %790, %791, %792, %793, %794, %795, %796, %797, %798, %799, %800, %801, %802, %803, %804, %805 in 0 : vector<16x4xf32>, vector<16x4xf32>, vector<16x4xf32>, vector<16x4xf32>, vector<16x4xf32>, vector<16x4xf32>, vector<16x4xf32>, vector<16x4xf32>, vector<16x4xf32>, vector<16x4xf32>, vector<16x4xf32>, vector<16x4xf32>, vector<16x4xf32>, vector<16x4xf32>, vector<16x4xf32>, vector<16x4xf32> -> vector<256x4xf32>
    %cst_394 = arith.constant dense<0.000000e+00> : vector<4x256xf32>
    %807 = tpu.matmul %560, %806, %cst_394 {dimension_numbers = #tpu.dot_dimension_numbers<[1], [1], [0], [0], [0, 0, 1, 0], [], []>} : vector<4x4xf32>, vector<256x4xf32>, vector<4x256xf32> -> vector<4x256xf32>
    %c0_395 = arith.constant 0 : index
    %c0_396 = arith.constant 0 : index
    %c0_397 = arith.constant 0 : index
    %808 = vector.load %arg68[%c0_395, %c0_396, %c0_397] : memref<1x4x256xf32, #tpu.memory_space<vmem>>, vector<1x4x256xf32>
    %809 = vector.shape_cast %808 : vector<1x4x256xf32> to vector<4x256xf32>
    %810 = vector.shape_cast %807 : vector<4x256xf32> to vector<1x4x256xf32>
    tpu.vector_store %arg68[%c0_395, %c0_396, %c0_397], %810 {strides = array<i32>} : memref<1x4x256xf32, #tpu.memory_space<vmem>>, vector<1x4x256xf32>,
    return
  }
  func.func @transform_0(%arg0: i32) -> (i32, i32, i32) {
    %c0_i32 = arith.constant 0 : i32
    %c0_i32_0 = arith.constant 0 : i32
    %c0_i32_1 = arith.constant 0 : i32
    return %arg0, %c0_i32, %c0_i32_0 : i32, i32, i32
  }
  func.func @transform_1(%arg0: i32) -> (i32, i32) {
    %c0_i32 = arith.constant 0 : i32
    %c0_i32_0 = arith.constant 0 : i32
    %c0_i32_1 = arith.constant 0 : i32
    return %c0_i32, %c0_i32_0 : i32, i32
  }
  func.func @transform_2(%arg0: i32) -> (i32, i32) {
    %c0_i32 = arith.constant 0 : i32
    %c0_i32_0 = arith.constant 0 : i32
    %c0_i32_1 = arith.constant 0 : i32
    return %c0_i32, %c0_i32_0 : i32, i32
  }
  func.func @transform_3(%arg0: i32) -> (i32, i32) {
    %c0_i32 = arith.constant 0 : i32
    %c0_i32_0 = arith.constant 0 : i32
    %c0_i32_1 = arith.constant 0 : i32
    return %c0_i32, %c0_i32_0 : i32, i32
  }
  func.func @transform_4(%arg0: i32) -> (i32, i32) {
    %c0_i32 = arith.constant 0 : i32
    %c0_i32_0 = arith.constant 0 : i32
    %c0_i32_1 = arith.constant 0 : i32
    return %c0_i32, %c0_i32_0 : i32, i32
  }
  func.func @transform_5(%arg0: i32) -> (i32, i32) {
    %c0_i32 = arith.constant 0 : i32
    %c0_i32_0 = arith.constant 0 : i32
    %c0_i32_1 = arith.constant 0 : i32
    return %c0_i32, %c0_i32_0 : i32, i32
  }
  func.func @transform_6(%arg0: i32) -> (i32, i32) {
    %c0_i32 = arith.constant 0 : i32
    %c0_i32_0 = arith.constant 0 : i32
    %c0_i32_1 = arith.constant 0 : i32
    return %c0_i32, %c0_i32_0 : i32, i32
  }
  func.func @transform_7(%arg0: i32) -> (i32, i32) {
    %c0_i32 = arith.constant 0 : i32
    %c0_i32_0 = arith.constant 0 : i32
    %c0_i32_1 = arith.constant 0 : i32
    return %c0_i32, %c0_i32_0 : i32, i32
  }
  func.func @transform_8(%arg0: i32) -> (i32, i32) {
    %c0_i32 = arith.constant 0 : i32
    %c0_i32_0 = arith.constant 0 : i32
    %c0_i32_1 = arith.constant 0 : i32
    return %c0_i32, %c0_i32_0 : i32, i32
  }
  func.func @transform_9(%arg0: i32) -> (i32, i32) {
    %c0_i32 = arith.constant 0 : i32
    %c0_i32_0 = arith.constant 0 : i32
    %c0_i32_1 = arith.constant 0 : i32
    return %c0_i32, %c0_i32_0 : i32, i32
  }
  func.func @transform_10(%arg0: i32) -> (i32, i32) {
    %c0_i32 = arith.constant 0 : i32
    %c0_i32_0 = arith.constant 0 : i32
    %c0_i32_1 = arith.constant 0 : i32
    return %c0_i32, %c0_i32_0 : i32, i32
  }
  func.func @transform_11(%arg0: i32) -> (i32, i32) {
    %c0_i32 = arith.constant 0 : i32
    %c0_i32_0 = arith.constant 0 : i32
    %c0_i32_1 = arith.constant 0 : i32
    return %c0_i32, %c0_i32_0 : i32, i32
  }
  func.func @transform_12(%arg0: i32) -> (i32, i32) {
    %c0_i32 = arith.constant 0 : i32
    %c0_i32_0 = arith.constant 0 : i32
    %c0_i32_1 = arith.constant 0 : i32
    return %c0_i32, %c0_i32_0 : i32, i32
  }
  func.func @transform_13(%arg0: i32) -> (i32, i32) {
    %c0_i32 = arith.constant 0 : i32
    %c0_i32_0 = arith.constant 0 : i32
    %c0_i32_1 = arith.constant 0 : i32
    return %c0_i32, %c0_i32_0 : i32, i32
  }
  func.func @transform_14(%arg0: i32) -> (i32, i32) {
    %c0_i32 = arith.constant 0 : i32
    %c0_i32_0 = arith.constant 0 : i32
    %c0_i32_1 = arith.constant 0 : i32
    return %c0_i32, %c0_i32_0 : i32, i32
  }
  func.func @transform_15(%arg0: i32) -> (i32, i32) {
    %c0_i32 = arith.constant 0 : i32
    %c0_i32_0 = arith.constant 0 : i32
    %c0_i32_1 = arith.constant 0 : i32
    return %c0_i32, %c0_i32_0 : i32, i32
  }
  func.func @transform_16(%arg0: i32) -> (i32, i32) {
    %c0_i32 = arith.constant 0 : i32
    %c0_i32_0 = arith.constant 0 : i32
    %c0_i32_1 = arith.constant 0 : i32
    return %c0_i32, %c0_i32_0 : i32, i32
  }
  func.func @transform_17(%arg0: i32) -> (i32, i32) {
    %c0_i32 = arith.constant 0 : i32
    %c0_i32_0 = arith.constant 0 : i32
    %c0_i32_1 = arith.constant 0 : i32
    return %c0_i32, %c0_i32_0 : i32, i32
  }
  func.func @transform_18(%arg0: i32) -> (i32, i32) {
    %c0_i32 = arith.constant 0 : i32
    %c0_i32_0 = arith.constant 0 : i32
    %c0_i32_1 = arith.constant 0 : i32
    return %c0_i32, %c0_i32_0 : i32, i32
  }
  func.func @transform_19(%arg0: i32) -> (i32, i32) {
    %c0_i32 = arith.constant 0 : i32
    %c0_i32_0 = arith.constant 0 : i32
    %c0_i32_1 = arith.constant 0 : i32
    return %c0_i32, %c0_i32_0 : i32, i32
  }
  func.func @transform_20(%arg0: i32) -> (i32, i32) {
    %c0_i32 = arith.constant 0 : i32
    %c0_i32_0 = arith.constant 0 : i32
    %c0_i32_1 = arith.constant 0 : i32
    return %c0_i32, %c0_i32_0 : i32, i32
  }
  func.func @transform_21(%arg0: i32) -> (i32, i32) {
    %c0_i32 = arith.constant 0 : i32
    %c0_i32_0 = arith.constant 0 : i32
    %c0_i32_1 = arith.constant 0 : i32
    return %c0_i32, %c0_i32_0 : i32, i32
  }
  func.func @transform_22(%arg0: i32) -> (i32, i32) {
    %c0_i32 = arith.constant 0 : i32
    %c0_i32_0 = arith.constant 0 : i32
    %c0_i32_1 = arith.constant 0 : i32
    return %c0_i32, %c0_i32_0 : i32, i32
  }
  func.func @transform_23(%arg0: i32) -> (i32, i32) {
    %c0_i32 = arith.constant 0 : i32
    %c0_i32_0 = arith.constant 0 : i32
    %c0_i32_1 = arith.constant 0 : i32
    return %c0_i32, %c0_i32_0 : i32, i32
  }
  func.func @transform_24(%arg0: i32) -> (i32, i32) {
    %c0_i32 = arith.constant 0 : i32
    %c0_i32_0 = arith.constant 0 : i32
    %c0_i32_1 = arith.constant 0 : i32
    return %c0_i32, %c0_i32_0 : i32, i32
  }
  func.func @transform_25(%arg0: i32) -> (i32, i32) {
    %c0_i32 = arith.constant 0 : i32
    %c0_i32_0 = arith.constant 0 : i32
    %c0_i32_1 = arith.constant 0 : i32
    return %c0_i32, %c0_i32_0 : i32, i32
  }
  func.func @transform_26(%arg0: i32) -> (i32, i32) {
    %c0_i32 = arith.constant 0 : i32
    %c0_i32_0 = arith.constant 0 : i32
    %c0_i32_1 = arith.constant 0 : i32
    return %c0_i32, %c0_i32_0 : i32, i32
  }
  func.func @transform_27(%arg0: i32) -> (i32, i32) {
    %c0_i32 = arith.constant 0 : i32
    %c0_i32_0 = arith.constant 0 : i32
    %c0_i32_1 = arith.constant 0 : i32
    return %c0_i32, %c0_i32_0 : i32, i32
  }
  func.func @transform_28(%arg0: i32) -> (i32, i32) {
    %c0_i32 = arith.constant 0 : i32
    %c0_i32_0 = arith.constant 0 : i32
    %c0_i32_1 = arith.constant 0 : i32
    return %c0_i32, %c0_i32_0 : i32, i32
  }
  func.func @transform_29(%arg0: i32) -> (i32, i32) {
    %c0_i32 = arith.constant 0 : i32
    %c0_i32_0 = arith.constant 0 : i32
    %c0_i32_1 = arith.constant 0 : i32
    return %c0_i32, %c0_i32_0 : i32, i32
  }
  func.func @transform_30(%arg0: i32) -> (i32, i32) {
    %c0_i32 = arith.constant 0 : i32
    %c0_i32_0 = arith.constant 0 : i32
    %c0_i32_1 = arith.constant 0 : i32
    return %c0_i32, %c0_i32_0 : i32, i32
  }
  func.func @transform_31(%arg0: i32) -> (i32, i32) {
    %c0_i32 = arith.constant 0 : i32
    %c0_i32_0 = arith.constant 0 : i32
    %c0_i32_1 = arith.constant 0 : i32
    return %c0_i32, %c0_i32_0 : i32, i32
  }
  func.func @transform_32(%arg0: i32) -> (i32, i32) {
    %c0_i32 = arith.constant 0 : i32
    %c0_i32_0 = arith.constant 0 : i32
    %c0_i32_1 = arith.constant 0 : i32
    return %c0_i32, %c0_i32_0 : i32, i32
  }
  func.func @transform_33(%arg0: i32) -> (i32, i32) {
    %c0_i32 = arith.constant 0 : i32
    %c0_i32_0 = arith.constant 0 : i32
    %c0_i32_1 = arith.constant 0 : i32
    return %c0_i32, %c0_i32_0 : i32, i32
  }
  func.func @transform_34(%arg0: i32) -> (i32, i32) {
    %c0_i32 = arith.constant 0 : i32
    %c0_i32_0 = arith.constant 0 : i32
    %c0_i32_1 = arith.constant 0 : i32
    return %c0_i32, %c0_i32_0 : i32, i32
  }
  func.func @transform_35(%arg0: i32) -> (i32, i32) {
    %c0_i32 = arith.constant 0 : i32
    %c0_i32_0 = arith.constant 0 : i32
    %c0_i32_1 = arith.constant 0 : i32
    return %c0_i32, %c0_i32_0 : i32, i32
  }
  func.func @transform_36(%arg0: i32) -> (i32, i32) {
    %c0_i32 = arith.constant 0 : i32
    %c0_i32_0 = arith.constant 0 : i32
    %c0_i32_1 = arith.constant 0 : i32
    return %c0_i32, %c0_i32_0 : i32, i32
  }
  func.func @transform_37(%arg0: i32) -> (i32, i32) {
    %c0_i32 = arith.constant 0 : i32
    %c0_i32_0 = arith.constant 0 : i32
    %c0_i32_1 = arith.constant 0 : i32
    return %c0_i32, %c0_i32_0 : i32, i32
  }
  func.func @transform_38(%arg0: i32) -> (i32, i32) {
    %c0_i32 = arith.constant 0 : i32
    %c0_i32_0 = arith.constant 0 : i32
    %c0_i32_1 = arith.constant 0 : i32
    return %c0_i32, %c0_i32_0 : i32, i32
  }
  func.func @transform_39(%arg0: i32) -> (i32, i32) {
    %c0_i32 = arith.constant 0 : i32
    %c0_i32_0 = arith.constant 0 : i32
    %c0_i32_1 = arith.constant 0 : i32
    return %c0_i32, %c0_i32_0 : i32, i32
  }
  func.func @transform_40(%arg0: i32) -> (i32, i32) {
    %c0_i32 = arith.constant 0 : i32
    %c0_i32_0 = arith.constant 0 : i32
    %c0_i32_1 = arith.constant 0 : i32
    return %c0_i32, %c0_i32_0 : i32, i32
  }
  func.func @transform_41(%arg0: i32) -> (i32, i32) {
    %c0_i32 = arith.constant 0 : i32
    %c0_i32_0 = arith.constant 0 : i32
    %c0_i32_1 = arith.constant 0 : i32
    return %c0_i32, %c0_i32_0 : i32, i32
  }
  func.func @transform_42(%arg0: i32) -> (i32, i32) {
    %c0_i32 = arith.constant 0 : i32
    %c0_i32_0 = arith.constant 0 : i32
    %c0_i32_1 = arith.constant 0 : i32
    return %c0_i32, %c0_i32_0 : i32, i32
  }
  func.func @transform_43(%arg0: i32) -> (i32, i32) {
    %c0_i32 = arith.constant 0 : i32
    %c0_i32_0 = arith.constant 0 : i32
    %c0_i32_1 = arith.constant 0 : i32
    return %c0_i32, %c0_i32_0 : i32, i32
  }
  func.func @transform_44(%arg0: i32) -> (i32, i32) {
    %c0_i32 = arith.constant 0 : i32
    %c0_i32_0 = arith.constant 0 : i32
    %c0_i32_1 = arith.constant 0 : i32
    return %c0_i32, %c0_i32_0 : i32, i32
  }
  func.func @transform_45(%arg0: i32) -> (i32, i32) {
    %c0_i32 = arith.constant 0 : i32
    %c0_i32_0 = arith.constant 0 : i32
    %c0_i32_1 = arith.constant 0 : i32
    return %c0_i32, %c0_i32_0 : i32, i32
  }
  func.func @transform_46(%arg0: i32) -> (i32, i32) {
    %c0_i32 = arith.constant 0 : i32
    %c0_i32_0 = arith.constant 0 : i32
    %c0_i32_1 = arith.constant 0 : i32
    return %c0_i32, %c0_i32_0 : i32, i32
  }
  func.func @transform_47(%arg0: i32) -> (i32, i32) {
    %c0_i32 = arith.constant 0 : i32
    %c0_i32_0 = arith.constant 0 : i32
    %c0_i32_1 = arith.constant 0 : i32
    return %c0_i32, %c0_i32_0 : i32, i32
  }
  func.func @transform_48(%arg0: i32) -> (i32, i32) {
    %c0_i32 = arith.constant 0 : i32
    %c0_i32_0 = arith.constant 0 : i32
    %c0_i32_1 = arith.constant 0 : i32
    return %c0_i32, %c0_i32_0 : i32, i32
  }
  func.func @transform_49(%arg0: i32) -> (i32, i32) {
    %c0_i32 = arith.constant 0 : i32
    %c0_i32_0 = arith.constant 0 : i32
    %c0_i32_1 = arith.constant 0 : i32
    return %c0_i32, %c0_i32_0 : i32, i32
  }
  func.func @transform_50(%arg0: i32) -> (i32, i32) {
    %c0_i32 = arith.constant 0 : i32
    %c0_i32_0 = arith.constant 0 : i32
    %c0_i32_1 = arith.constant 0 : i32
    return %c0_i32, %c0_i32_0 : i32, i32
  }
  func.func @transform_51(%arg0: i32) -> (i32, i32) {
    %c0_i32 = arith.constant 0 : i32
    %c0_i32_0 = arith.constant 0 : i32
    %c0_i32_1 = arith.constant 0 : i32
    return %c0_i32, %c0_i32_0 : i32, i32
  }
  func.func @transform_52(%arg0: i32) -> (i32, i32) {
    %c0_i32 = arith.constant 0 : i32
    %c0_i32_0 = arith.constant 0 : i32
    %c0_i32_1 = arith.constant 0 : i32
    return %c0_i32, %c0_i32_0 : i32, i32
  }
  func.func @transform_53(%arg0: i32) -> (i32, i32) {
    %c0_i32 = arith.constant 0 : i32
    %c0_i32_0 = arith.constant 0 : i32
    %c0_i32_1 = arith.constant 0 : i32
    return %c0_i32, %c0_i32_0 : i32, i32
  }
  func.func @transform_54(%arg0: i32) -> (i32, i32) {
    %c0_i32 = arith.constant 0 : i32
    %c0_i32_0 = arith.constant 0 : i32
    %c0_i32_1 = arith.constant 0 : i32
    return %c0_i32, %c0_i32_0 : i32, i32
  }
  func.func @transform_55(%arg0: i32) -> (i32, i32) {
    %c0_i32 = arith.constant 0 : i32
    %c0_i32_0 = arith.constant 0 : i32
    %c0_i32_1 = arith.constant 0 : i32
    return %c0_i32, %c0_i32_0 : i32, i32
  }
  func.func @transform_56(%arg0: i32) -> (i32, i32) {
    %c0_i32 = arith.constant 0 : i32
    %c0_i32_0 = arith.constant 0 : i32
    %c0_i32_1 = arith.constant 0 : i32
    return %c0_i32, %c0_i32_0 : i32, i32
  }
  func.func @transform_57(%arg0: i32) -> (i32, i32) {
    %c0_i32 = arith.constant 0 : i32
    %c0_i32_0 = arith.constant 0 : i32
    %c0_i32_1 = arith.constant 0 : i32
    return %c0_i32, %c0_i32_0 : i32, i32
  }
  func.func @transform_58(%arg0: i32) -> (i32, i32) {
    %c0_i32 = arith.constant 0 : i32
    %c0_i32_0 = arith.constant 0 : i32
    %c0_i32_1 = arith.constant 0 : i32
    return %c0_i32, %c0_i32_0 : i32, i32
  }
  func.func @transform_59(%arg0: i32) -> (i32, i32) {
    %c0_i32 = arith.constant 0 : i32
    %c0_i32_0 = arith.constant 0 : i32
    %c0_i32_1 = arith.constant 0 : i32
    return %c0_i32, %c0_i32_0 : i32, i32
  }
  func.func @transform_60(%arg0: i32) -> (i32, i32) {
    %c0_i32 = arith.constant 0 : i32
    %c0_i32_0 = arith.constant 0 : i32
    %c0_i32_1 = arith.constant 0 : i32
    return %c0_i32, %c0_i32_0 : i32, i32
  }
  func.func @transform_61(%arg0: i32) -> (i32, i32, i32) {
    %c0_i32 = arith.constant 0 : i32
    %c0_i32_0 = arith.constant 0 : i32
    %c0_i32_1 = arith.constant 0 : i32
    %c0_i32_2 = arith.constant 0 : i32
    return %c0_i32, %c0_i32_0, %c0_i32_1 : i32, i32, i32
  }
  func.func @transform_62(%arg0: i32) -> (i32, i32, i32) {
    %c0_i32 = arith.constant 0 : i32
    %c0_i32_0 = arith.constant 0 : i32
    %c0_i32_1 = arith.constant 0 : i32
    %c0_i32_2 = arith.constant 0 : i32
    return %c0_i32, %c0_i32_0, %c0_i32_1 : i32, i32, i32
  }
  func.func @transform_63(%arg0: i32) -> (i32, i32, i32) {
    %c0_i32 = arith.constant 0 : i32
    %c0_i32_0 = arith.constant 0 : i32
    %c0_i32_1 = arith.constant 0 : i32
    %c0_i32_2 = arith.constant 0 : i32
    return %c0_i32, %c0_i32_0, %c0_i32_1 : i32, i32, i32
  }
  func.func @transform_64(%arg0: i32) -> (i32, i32, i32) {
    %c0_i32 = arith.constant 0 : i32
    %c0_i32_0 = arith.constant 0 : i32
    %c0_i32_1 = arith.constant 0 : i32
    %c0_i32_2 = arith.constant 0 : i32
    return %c0_i32, %c0_i32_0, %c0_i32_1 : i32, i32, i32
  }
  func.func @transform_65(%arg0: i32) -> (i32, i32, i32) {
    %c0_i32 = arith.constant 0 : i32
    %c0_i32_0 = arith.constant 0 : i32
    %c0_i32_1 = arith.constant 0 : i32
    %c0_i32_2 = arith.constant 0 : i32
    return %c0_i32, %c0_i32_0, %c0_i32_1 : i32, i32, i32
  }
  func.func @transform_66(%arg0: i32) -> (i32, i32, i32) {
    %c0_i32 = arith.constant 0 : i32
    %c0_i32_0 = arith.constant 0 : i32
    %c0_i32_1 = arith.constant 0 : i32
    %c0_i32_2 = arith.constant 0 : i32
    return %c0_i32, %c0_i32_0, %c0_i32_1 : i32, i32, i32
  }
  func.func @transform_67(%arg0: i32) -> (i32, i32, i32) {
    %c0_i32 = arith.constant 0 : i32
    %c0_i32_0 = arith.constant 0 : i32
    %c0_i32_1 = arith.constant 0 : i32
    return %arg0, %c0_i32, %c0_i32_0 : i32, i32, i32
  }
}

</mosaic_0001>

<bundles_post_ra>
// kernel: _lambda_.1
= control target key start
LH: loop header
LB: loop body
LE: loop exit
PB: predicated region body
PF: predicated region fallthrough
CT: control target
= control target key end

     0   :  { %s10675_s6 = smov 1   ;;  %s10676_s10 = smov 2   ;;  %s12212_s0 = inlined_call_operand.smem [shape: u32[68], index: -1, kind: input, shape index: {}] }
   0x1   :  { %s10785_s5 = sld [smem:[%s12212_s0]]   ;;  %s10677_s14 = smov 3  }
   0x2   :  { %s10790_s9 = sld [smem:[%s12212_s0 + %s10675_s6]]   ;;  %s10678_s18 = smov 4  }
   0x3   :  { %s10795_s13 = sld [smem:[%s12212_s0 + %s10676_s10]]   ;;  %s10679_s22 = smov 5  }
   0x4   :  { %s10800_s17 = sld [smem:[%s12212_s0 + %s10677_s14]]   ;;  %s10680_s26 = smov 6  }
   0x5   :  { %s10805_s21 = sld [smem:[%s12212_s0 + %s10678_s18]]   ;;  %s10681_s30 = smov 7  }
   0x6   :  { %s10810_s25 = sld [smem:[%s12212_s0 + %s10679_s22]]   ;;  %s10682_s4 = smov 8  }
   0x7   :  { %12277 = sst [smem:[#allocation44_spill]] %s10785_s5  ;;  %s10683_s10 = smov 9  }
   0x8   :  { %12278 = sst [smem:[#allocation45_spill]] %s10790_s9  ;;  %s10684_s15 = smov 10  }
   0x9   :  { %12279 = sst [smem:[#allocation46_spill]] %s10795_s13  ;;  %s10685_s20 = smov 11  }
   0xa   :  { %12280 = sst [smem:[#allocation47_spill]] %s10800_s17  ;;  %s10687_s1 = smov 13  }
   0xb   :  { %12281 = sst [smem:[#allocation48_spill]] %s10805_s21  ;;  %s10688_s7 = smov 14  }
   0xc   :  { %12282 = sst [smem:[#allocation49_spill]] %s10810_s25  ;;  %s10690_s22 = smov 16  }
   0xd   :  { %s10815_s29 = sld [smem:[%s12212_s0 + %s10680_s26]]   ;;  %s10686_s26 = smov 12  }
   0xe   :  { %s10820_s3 = sld [smem:[%s12212_s0 + %s10681_s30]]   ;;  %s10691_s28 = smov 17  }
   0xf   :  { %s10825_s8 = sld [smem:[%s12212_s0 + %s10682_s4]]  }
  0x10   :  { %s10830_s14 = sld [smem:[%s12212_s0 + %s10683_s10]]  }
  0x11   :  { %s10835_s19 = sld [smem:[%s12212_s0 + %s10684_s15]]   ;;  %s10689_s15 = smov 15  }
  0x12   :  { %s10840_s24 = sld [smem:[%s12212_s0 + %s10685_s20]]  }
  0x13   :  { %12283 = sst [smem:[#allocation50_spill]] %s10815_s29 }
  0x14   :  { %12284 = sst [smem:[#allocation51_spill]] %s10820_s3 }
  0x15   :  { %12285 = sst [smem:[#allocation52_spill]] %s10825_s8 }
  0x16   :  { %12286 = sst [smem:[#allocation53_spill]] %s10830_s14 }
  0x17   :  { %12287 = sst [smem:[#allocation54_spill]] %s10835_s19 }
  0x18   :  { %12288 = sst [smem:[#allocation55_spill]] %s10840_s24 }
  0x19   :  { %s10845_s30 = sld [smem:[%s12212_s0 + %s10686_s26]]  }
  0x1a   :  { %s10850_s6 = sld [smem:[%s12212_s0 + %s10687_s1]]  }
  0x1b   :  { %s10855_s12 = sld [smem:[%s12212_s0 + %s10688_s7]]   ;;  %s10692_s7 = smov 18  }
  0x1c   :  { %s10860_s20 = sld [smem:[%s12212_s0 + %s10689_s15]]   ;;  %s10693_s15 = smov 19  }
  0x1d   :  { %s10865_s27 = sld [smem:[%s12212_s0 + %s10690_s22]]   ;;  %s10694_s22 = smov 20  }
  0x1e   :  { %s10870_s4 = sld [smem:[%s12212_s0 + %s10691_s28]]   ;;  %s10695_s28 = smov 21  }
  0x1f   :  { %12289 = sst [smem:[#allocation56_spill]] %s10845_s30 }
  0x20   :  { %12290 = sst [smem:[#allocation57_spill]] %s10850_s6 }
  0x21   :  { %12291 = sst [smem:[#allocation58_spill]] %s10855_s12 }
  0x22   :  { %12292 = sst [smem:[#allocation59_spill]] %s10860_s20 }
  0x23   :  { %12293 = sst [smem:[#allocation60_spill]] %s10865_s27 }
  0x24   :  { %12294 = sst [smem:[#allocation61_spill]] %s10870_s4 }
  0x25   :  { %s10875_s6 = sld [smem:[%s12212_s0 + %s10692_s7]]   ;;  %s10696_s7 = smov 22  }
  0x26   :  { %s10880_s20 = sld [smem:[%s12212_s0 + %s10693_s15]]   ;;  %s10697_s15 = smov 23  }
  0x27   :  { %s10885_s27 = sld [smem:[%s12212_s0 + %s10694_s22]]   ;;  %s10698_s22 = smov 24  }
  0x28   :  { %s10890_s4 = sld [smem:[%s12212_s0 + %s10695_s28]]   ;;  %s10699_s28 = smov 25  }
  0x2b   :  { %12295 = sst [smem:[#allocation62_spill]] %s10875_s6 }
  0x2c   :  { %12296 = sst [smem:[#allocation63_spill]] %s10880_s20 }
  0x2d   :  { %12297 = sst [smem:[#allocation64_spill]] %s10885_s27 }
  0x2e   :  { %12298 = sst [smem:[#allocation65_spill]] %s10890_s4 }
  0x2f   :  { %s10895_s6 = sld [smem:[%s12212_s0 + %s10696_s7]]   ;;  %s10700_s7 = smov 26  }
  0x30   :  { %s10900_s20 = sld [smem:[%s12212_s0 + %s10697_s15]]   ;;  %s10701_s15 = smov 27  }
  0x31   :  { %s10905_s27 = sld [smem:[%s12212_s0 + %s10698_s22]]   ;;  %s10702_s22 = smov 28  }
  0x32   :  { %s10910_s4 = sld [smem:[%s12212_s0 + %s10699_s28]]   ;;  %s10703_s28 = smov 29  }
  0x35   :  { %12299 = sst [smem:[#allocation66_spill]] %s10895_s6 }
  0x36   :  { %12300 = sst [smem:[#allocation67_spill]] %s10900_s20 }
  0x37   :  { %12301 = sst [smem:[#allocation68_spill]] %s10905_s27 }
  0x38   :  { %12302 = sst [smem:[#allocation69_spill]] %s10910_s4 }
  0x39   :  { %s10915_s6 = sld [smem:[%s12212_s0 + %s10700_s7]]   ;;  %s10704_s7 = smov 30  }
  0x3a   :  { %s10920_s20 = sld [smem:[%s12212_s0 + %s10701_s15]]   ;;  %s10705_s15 = smov 31  }
  0x3b   :  { %s10925_s27 = sld [smem:[%s12212_s0 + %s10702_s22]]   ;;  %s10706_s22 = smov 32  }
  0x3c   :  { %s10930_s4 = sld [smem:[%s12212_s0 + %s10703_s28]]   ;;  %s10707_s28 = smov 33  }
  0x3f   :  { %12303 = sst [smem:[#allocation70_spill]] %s10915_s6 }
  0x40   :  { %12304 = sst [smem:[#allocation71_spill]] %s10920_s20 }
  0x41   :  { %12305 = sst [smem:[#allocation72_spill]] %s10925_s27 }
  0x42   :  { %12306 = sst [smem:[#allocation73_spill]] %s10930_s4 }
  0x43   :  { %s10935_s6 = sld [smem:[%s12212_s0 + %s10704_s7]]   ;;  %s10708_s7 = smov 34  }
  0x44   :  { %s10940_s20 = sld [smem:[%s12212_s0 + %s10705_s15]]   ;;  %s10709_s15 = smov 35  }
  0x45   :  { %s10945_s27 = sld [smem:[%s12212_s0 + %s10706_s22]]   ;;  %s10710_s22 = smov 36  }
  0x46   :  { %s10950_s4 = sld [smem:[%s12212_s0 + %s10707_s28]]   ;;  %s10711_s28 = smov 37  }
  0x47   :  { %s10955_s12 = sld [smem:[%s12212_s0 + %s10708_s7]]   ;;  %s10712_s7 = smov 38  }
  0x48   :  { %s10965_s24 = sld [smem:[%s12212_s0 + %s10710_s22]]   ;;  %s10714_s22 = smov 40  }
  0x49   :  { %12307 = sst [smem:[#allocation74_spill]] %s10935_s6 }
  0x4a   :  { %12308 = sst [smem:[#allocation75_spill]] %s10940_s20 }
  0x4b   :  { %s10960_s20 = sld [smem:[%s12212_s0 + %s10709_s15]]   ;;  %s10713_s15 = smov 39  }
  0x4c   :  { %12309 = sst [smem:[#allocation76_spill]] %s10950_s4 }
  0x4d   :  { %s10970_s4 = sld [smem:[%s12212_s0 + %s10711_s28]]   ;;  %s10715_s28 = smov 41  }
  0x4e   :  { %s10975_s19 = sld [smem:[%s12212_s0 + %s10712_s7]]   ;;  %s10716_s7 = smov 42  }
  0x4f   :  { %s10985_s30 = sld [smem:[%s12212_s0 + %s10714_s22]]   ;;  %s10718_s22 = smov 44  }
  0x50   :  { %s10990_s14 = sld [smem:[%s12212_s0 + %s10715_s28]]   ;;  %s10719_s28 = smov 45  }
  0x51   :  { %12310 = sst [smem:[#allocation77_spill]] %s10960_s20 }
  0x52   :  { %s10980_s20 = sld [smem:[%s12212_s0 + %s10713_s15]]   ;;  %s10717_s15 = smov 43  }
  0x53   :  { %12311 = sst [smem:[#allocation78_spill]] %s10970_s4 }
  0x54   :  { %s10995_s8 = sld [smem:[%s12212_s0 + %s10716_s7]]   ;;  %s10720_s7 = smov 46  }
  0x55   :  { %s11005_s3 = sld [smem:[%s12212_s0 + %s10718_s22]]   ;;  %s10722_s22 = smov 48  }
  0x56   :  { %12313 = sst [smem:[#allocation80_spill]] %s10990_s14 }
  0x57   :  { %s11010_s14 = sld [smem:[%s12212_s0 + %s10719_s28]]   ;;  %s10723_s28 = smov 49  }
  0x58   :  { %12312 = sst [smem:[#allocation79_spill]] %s10980_s20 }
  0x59   :  { %s11000_s20 = sld [smem:[%s12212_s0 + %s10717_s15]]   ;;  %s10721_s15 = smov 47  }
  0x5a   :  { %s11015_s25 = sld [smem:[%s12212_s0 + %s10720_s7]]   ;;  %s10724_s7 = smov 50  }
  0x5b   :  { %12314 = sst [smem:[#allocation81_spill]] %s11005_s3 }
  0x5c   :  { %s11020_s21 = sld [smem:[%s12212_s0 + %s10721_s15]]   ;;  %s10725_s15 = smov 51  }
  0x5d   :  { %12315 = sst [smem:[#allocation82_spill]] %s11010_s14 }
  0x5e   :  { %s11025_s29 = sld [smem:[%s12212_s0 + %s10722_s22]]   ;;  %s10726_s22 = smov 52  }
  0x5f   :  { %s11030_s14 = sld [smem:[%s12212_s0 + %s10723_s28]]   ;;  %s10727_s28 = smov 53  }
  0x60   :  { %12316 = sst [smem:[#allocation83_spill]] %s11015_s25 }
  0x61   :  { %s11035_s17 = sld [smem:[%s12212_s0 + %s10724_s7]]   ;;  %s10728_s7 = smov 54  }
  0x62   :  { %12317 = sst [smem:[#allocation84_spill]] %s11020_s21 }
  0x63   :  { %s11040_s21 = sld [smem:[%s12212_s0 + %s10725_s15]]   ;;  %s10729_s15 = smov 55  }
  0x64   :  { %s11045_s13 = sld [smem:[%s12212_s0 + %s10726_s22]]   ;;  %s10730_s22 = smov 56  }
  0x65   :  { %12318 = sst [smem:[#allocation85_spill]] %s11030_s14 }
  0x66   :  { %s11050_s14 = sld [smem:[%s12212_s0 + %s10727_s28]]   ;;  %s10731_s28 = smov 57  }
  0x67   :  { %12319 = sst [smem:[#allocation86_spill]] %s11035_s17 }
  0x68   :  { %s11055_s5 = sld [smem:[%s12212_s0 + %s10728_s7]]   ;;  %s10732_s7 = smov 58  }
  0x69   :  { %12320 = sst [smem:[#allocation87_spill]] %s11040_s21 }
  0x6a   :  { %s11060_s21 = sld [smem:[%s12212_s0 + %s10729_s15]]   ;;  %s10733_s15 = smov 59  }
  0x6b   :  { %s11065_s9 = sld [smem:[%s12212_s0 + %s10730_s22]]   ;;  %s10734_s22 = smov 60  }
  0x6c   :  { %12321 = sst [smem:[#allocation88_spill]] %s11050_s14 }
  0x6d   :  { %s11070_s14 = sld [smem:[%s12212_s0 + %s10731_s28]]   ;;  %s10735_s28 = smov 61  }
  0x6e   :  { %12322 = sst [smem:[#allocation89_spill]] %s11055_s5 }
  0x6f   :  { %s11075_s17 = sld [smem:[%s12212_s0 + %s10732_s7]]   ;;  %s10736_s7 = smov 62  }
  0x70   :  { %12323 = sst [smem:[#allocation90_spill]] %s11060_s21 }
  0x71   :  { %12324 = sst [smem:[#allocation91_spill]] %s11065_s9 }
  0x72   :  { %s11080_s21 = sld [smem:[%s12212_s0 + %s10733_s15]]   ;;  %s10737_s15 = smov 63  }
  0x73   :  { %s11085_s9 = sld [smem:[%s12212_s0 + %s10734_s22]]   ;;  %s10738_s22 = smov 64  }
  0x74   :  { %s11090_s25 = sld [smem:[%s12212_s0 + %s10735_s28]]   ;;  %s10739_s28 = smov 65  }
  0x75   :  { %12325 = sst [smem:[#allocation92_spill]] %s11075_s17 }
  0x76   :  { %s11095_s17 = sld [smem:[%s12212_s0 + %s10736_s7]]   ;;  %s10740_s7 = smov 66  }
  0x78   :  { %12326 = sst [smem:[#allocation93_spill]] %s11080_s21 }
  0x79   :  { %12327 = sst [smem:[#allocation94_spill]] %s11085_s9 }
  0x7a   :  { %12328 = sst [smem:[#allocation95_spill]] %s11090_s25 }
  0x7b   :  { %s11100_s21 = sld [smem:[%s12212_s0 + %s10737_s15]]   ;;  %s10741_s15 = smov 67  }
  0x7c   :  { %12329 = sst [smem:[#allocation96_spill]] %s11095_s17 }
  0x7d   :  { %s11105_s9 = sld [smem:[%s12212_s0 + %s10738_s22]]  }
  0x7e   :  { %s11110_s25 = sld [smem:[%s12212_s0 + %s10739_s28]]  }
  0x7f   :  { %s11115_s17 = sld [smem:[%s12212_s0 + %s10740_s7]]  }
  0x81   :  { %12330 = sst [smem:[#allocation97_spill]] %s11100_s21 }
  0x82   :  { %s11120_s21 = sld [smem:[%s12212_s0 + %s10741_s15]]  }
  0x83   :  { %140 = vsyncpa [#allocation3], 0 }
  0x84   :  { %141 = vsyncpa [#allocation5], 0 }
  0x85   :  { %142 = vsyncpa [#allocation8], 0 }
  0x86   :  { %143 = vsyncpa [#allocation11], 0 }
  0x87   :  { %144 = vsyncpa [#allocation14], 0 }
  0x88   :  { %145 = vsyncpa [#allocation17], 0 }
  0x89   :  { %146 = vsyncpa [#allocation20], 0 }
  0x8a   :  { %147 = vsyncpa [#allocation23], 0 }
  0x8b   :  { %148 = vsyncpa [#allocation26], 0 }
  0x8c   :  { %149 = vsyncpa [#allocation29], 0 }
  0x8d   :  { %150 = vsyncpa [#allocation32], 0  ;;  %s11122_s22 = smov 0  }
  0x8e LB: > { %s12331_s6 = sld [smem:[#allocation74_spill]]  ;;  %s12332_s5 = sld [smem:[#allocation89_spill]]  ;;  %s10673_s22 = sphi %s11122_s22, %s156_s22  }
  0x8f   : > { %s12333_s4 = sld [smem:[#allocation78_spill]]  ;;  %s12334_s3 = sld [smem:[#allocation81_spill]] }
  0x90   : > { %s10742_s0 = smov [#allocation4]   ;;  %s11128_s26 = sadd.s32 4294967295, %s10673_s22  }
  0x91   : > { %s1713_s23 = sshll.u32 %s10742_s0, 4  ;;  %p8216_p0 = scmp.ge.s32.totalorder %s10673_s22, 1  ;;  %s11133_s23 = int_to_ptr.vmem [resolvable:$true] %s1713_s23 }
  0x92   : > { %p1599_p1 = scmp.lt.s32.totalorder %s10673_s22, 3  ;;  %p12243_p2 = scmp.eq.s32.totalorder %s11128_s26, 0 }
  0x93   : > { %s10743_s1 = smov [#allocation7]   ;;  %s10744_s7 = smov [#allocation10]  }
  0x94   : > { %p11135_p3 = pnand %p8216_p0, %p1599_p1  ;;  %s1741_s2 = sshll.u32 %s10743_s1, 4  ;;  %s11141_s2 = int_to_ptr.vmem [resolvable:$true] %s1741_s2 }
  0x95   : > { %s1763_s10 = sshll.u32 %s10744_s7, 4  ;;  %s10745_s15 = smov [#allocation13]   ;;  %s11149_s10 = int_to_ptr.vmem [resolvable:$true] %s1763_s10 }
  0x96   : > { %s12335_s28 = scalar_select %p11135_p3, 1, 0 }
  0x97   : > { %p9640_p4 = pneg %p11135_p3  ;;  %s1791_s16 = sshll.u32 %s10745_s15, 4  ;;  %s11151_s16 = int_to_ptr.vmem [resolvable:$true] %s1791_s16 }
  0x98   : > { %s10063_s18 = scalar_lea.hbm %s10945_s27, 16 }
  0x99   : > { %p11145_p5 = pnand %p12243_p2, %p9640_p4  ;;  %p10064_p6 = scmp.ne.s32.totalorder %s10945_s27, %s10063_s18 }
  0x9a   : > { %p10070_p10 = scmp.lt.u32.totalorder %s10063_s18, %s10945_s27 }
  0x9b   : > { %p11157_p7 = pneg %p11145_p5 }
  0x9d   : > { %p10066_p8 = pnand %p11157_p7, %p10064_p6 }
  0x9f   : > { %p10067_p9 = pneg %p10066_p8 }
  0xa1   : > { %p10072_p11 = pnand %p10070_p10, %p10067_p9 }
  0xa3   : > { %10075 = shalt.err (!%p10072_p11)
}
  0xa4   : > { %s10076_s1 = scalar_lea.vmem %s11133_s23, 16  ;;  %s10083_s7 = scalar_lea.vmem %s11133_s23, 32 }
  0xa5   : > { %p10077_p12 = scmp.ne.s32.totalorder %s11133_s23, %s10076_s1  ;;  %p10084_p1 = scmp.lt.s32.totalorder %s11133_s23, %s11133_s23 }
  0xa6   : > { %p10085_p4 = scmp.lt.s32.totalorder %s10083_s7, %s10076_s1 }
  0xa7   : > { %p10079_p13 = pnand %p10077_p12, %p11157_p7 }
  0xa8   : > { %p10086_p2 = por %p10085_p4, %p10084_p1 }
  0xa9   : > { %p10080_p0 = pneg %p10079_p13 }
  0xab   : > { %p10087_p6 = pnand %p10086_p2, %p10080_p0 }
  0xad   : > { %10090 = shalt.err (!%p10087_p6)
}
  0xae   : > { %9646 = dma.hbm_to_vmem [thread:$0]  (!%p11145_p5), %s10945_s27, 16, %s11133_s23, [#allocation5]  }
  0xaf   : > { %s10091_s15 = scalar_lea.hbm %s10965_s24, 16 }
  0xb0   : > { %p10092_p8 = scmp.ne.s32.totalorder %s10965_s24, %s10091_s15  ;;  %p10098_p11 = scmp.lt.u32.totalorder %s10091_s15, %s10965_s24 }
  0xb2   : > { %p10094_p9 = pnand %p10092_p8, %p11157_p7 }
  0xb4   : > { %p10095_p10 = pneg %p10094_p9 }
  0xb6   : > { %p10100_p12 = pnand %p10098_p11, %p10095_p10 }
  0xb8   : > { %10103 = shalt.err (!%p10100_p12)
}
  0xb9   : > { %s10104_s18 = scalar_lea.vmem %s11141_s2, 16  ;;  %s10111_s1 = scalar_lea.vmem %s11141_s2, 32 }
  0xba   : > { %p10105_p2 = scmp.ne.s32.totalorder %s11141_s2, %s10104_s18  ;;  %p10112_p1 = scmp.lt.s32.totalorder %s11141_s2, %s11141_s2 }
  0xbb   : > { %p10113_p4 = scmp.lt.s32.totalorder %s10111_s1, %s10104_s18 }
  0xbc   : > { %p10107_p13 = pnand %p10105_p2, %p11157_p7 }
  0xbd   : > { %p10114_p6 = por %p10113_p4, %p10112_p1 }
  0xbe   : > { %p10108_p0 = pneg %p10107_p13 }
  0xc0   : > { %p10115_p8 = pnand %p10114_p6, %p10108_p0 }
  0xc2   : > { %10118 = shalt.err (!%p10115_p8)
}
  0xc3   : > { %9652 = dma.hbm_to_vmem [thread:$0]  (!%p11145_p5), %s10965_s24, 16, %s11141_s2, [#allocation8]  }
  0xc4   : > { %s10119_s23 = scalar_lea.hbm %s10975_s19, 16 }
  0xc5   : > { %p10120_p9 = scmp.ne.s32.totalorder %s10975_s19, %s10119_s23  ;;  %p10126_p12 = scmp.lt.u32.totalorder %s10119_s23, %s10975_s19 }
  0xc7   : > { %p10122_p10 = pnand %p10120_p9, %p11157_p7 }
  0xc9   : > { %p10123_p11 = pneg %p10122_p10 }
  0xcb   : > { %p10128_p2 = pnand %p10126_p12, %p10123_p11 }
  0xcd   : > { %10131 = shalt.err (!%p10128_p2)
}
  0xce   : > { %s10132_s7 = scalar_lea.vmem %s11149_s10, 16  ;;  %s10139_s15 = scalar_lea.vmem %s11149_s10, 32 }
  0xcf   : > { %p10133_p13 = scmp.ne.s32.totalorder %s11149_s10, %s10132_s7  ;;  %p10140_p4 = scmp.lt.s32.totalorder %s11149_s10, %s11149_s10 }
  0xd0   : > { %p10141_p6 = scmp.lt.s32.totalorder %s10139_s15, %s10132_s7 }
  0xd1   : > { %p10135_p0 = pnand %p10133_p13, %p11157_p7 }
  0xd2   : > { %p10142_p8 = por %p10141_p6, %p10140_p4 }
  0xd3   : > { %p10136_p1 = pneg %p10135_p0 }
  0xd5   : > { %p10143_p9 = pnand %p10142_p8, %p10136_p1 }
  0xd7   : > { %10146 = shalt.err (!%p10143_p9)
}
  0xd8   : > { %9658 = dma.hbm_to_vmem [thread:$0]  (!%p11145_p5), %s10975_s19, 16, %s11149_s10, [#allocation11]  }
  0xd9   : > { %s10147_s2 = scalar_lea.hbm %s10995_s8, 16 }
  0xda   : > { %p10148_p10 = scmp.ne.s32.totalorder %s10995_s8, %s10147_s2  ;;  %p10154_p2 = scmp.lt.u32.totalorder %s10147_s2, %s10995_s8 }
  0xdc   : > { %p10150_p11 = pnand %p10148_p10, %p11157_p7 }
  0xde   : > { %p10151_p12 = pneg %p10150_p11 }
  0xe0   : > { %p10156_p13 = pnand %p10154_p2, %p10151_p12 }
  0xe2   : > { %10159 = shalt.err (!%p10156_p13)
}
  0xe3   : > { %s10160_s18 = scalar_lea.vmem %s11151_s16, 16  ;;  %s10167_s1 = scalar_lea.vmem %s11151_s16, 32 }
  0xe4   : > { %p10161_p0 = scmp.ne.s32.totalorder %s11151_s16, %s10160_s18  ;;  %p10168_p6 = scmp.lt.s32.totalorder %s11151_s16, %s11151_s16 }
  0xe5   : > { %p10169_p8 = scmp.lt.s32.totalorder %s10167_s1, %s10160_s18 }
  0xe6   : > { %p10163_p1 = pnand %p10161_p0, %p11157_p7 }
  0xe7   : > { %p10170_p9 = por %p10169_p8, %p10168_p6 }
  0xe8   : > { %p10164_p4 = pneg %p10163_p1 }
  0xea   : > { %p10171_p10 = pnand %p10170_p9, %p10164_p4 }
  0xec   : > { %10174 = shalt.err (!%p10171_p10)
}
  0xed   : > { %9664 = dma.hbm_to_vmem [thread:$0]  (!%p11145_p5), %s10995_s8, 16, %s11151_s16, [#allocation14]  }
  0xee   : > { %s10746_s10 = smov [#allocation16]   ;;  %s10747_s7 = smov [#allocation19]  }
  0xef   : > { %s1813_s23 = sshll.u32 %s10746_s10, 4  ;;  %s1841_s15 = sshll.u32 %s10747_s7, 4  ;;  %s1814_s23 = int_to_ptr.vmem [resolvable:$true] %s1813_s23  ;;  %s1842_s15 = int_to_ptr.vmem [resolvable:$true] %s1841_s15 }
  0xf0   : > { %s10175_s2 = scalar_lea.hbm %s12334_s3, 16 }
  0xf1   : > { %p10176_p11 = scmp.ne.s32.totalorder %s12334_s3, %s10175_s2  ;;  %p10182_p13 = scmp.lt.u32.totalorder %s10175_s2, %s12334_s3 }
  0xf3   : > { %p10178_p12 = pnand %p10176_p11, %p11157_p7 }
  0xf5   : > { %p10179_p2 = pneg %p10178_p12 }
  0xf7   : > { %p10184_p0 = pnand %p10182_p13, %p10179_p2 }
  0xf9   : > { %10187 = shalt.err (!%p10184_p0)
}
  0xfa   : > { %s10188_s18 = scalar_lea.vmem %s1814_s23, 16  ;;  %s10195_s16 = scalar_lea.vmem %s1814_s23, 32 }
  0xfb   : > { %p10189_p1 = scmp.ne.s32.totalorder %s1814_s23, %s10188_s18  ;;  %p10196_p8 = scmp.lt.s32.totalorder %s1814_s23, %s1814_s23 }
  0xfc   : > { %p10197_p9 = scmp.lt.s32.totalorder %s10195_s16, %s10188_s18 }
  0xfd   : > { %p10191_p4 = pnand %p10189_p1, %p11157_p7 }
  0xfe   : > { %p10198_p10 = por %p10197_p9, %p10196_p8 }
  0xff   : > { %p10192_p6 = pneg %p10191_p4 }
 0x101   : > { %p10199_p3 = pnand %p10198_p10, %p10192_p6 }
 0x103   : > { %10202 = shalt.err (!%p10199_p3)
}
 0x104   : > { %9670 = dma.hbm_to_vmem [thread:$0]  (!%p11145_p5), %s12334_s3, 16, %s1814_s23, [#allocation17]  }
 0x105   : > { %s10203_s1 = scalar_lea.hbm %s11025_s29, 16 }
 0x106   : > { %p10204_p11 = scmp.ne.s32.totalorder %s11025_s29, %s10203_s1  ;;  %p10210_p13 = scmp.lt.u32.totalorder %s10203_s1, %s11025_s29 }
 0x108   : > { %p10206_p12 = pnand %p10204_p11, %p11157_p7 }
 0x10a   : > { %p10207_p2 = pneg %p10206_p12 }
 0x10c   : > { %p10212_p0 = pnand %p10210_p13, %p10207_p2 }
 0x10e   : > { %10215 = shalt.err (!%p10212_p0)
}
 0x10f   : > { %s10216_s10 = scalar_lea.vmem %s1842_s15, 16  ;;  %s10223_s7 = scalar_lea.vmem %s1842_s15, 32 }
 0x110   : > { %p10217_p3 = scmp.ne.s32.totalorder %s1842_s15, %s10216_s10  ;;  %p10224_p6 = scmp.lt.s32.totalorder %s1842_s15, %s1842_s15 }
 0x111   : > { %p10225_p8 = scmp.lt.s32.totalorder %s10223_s7, %s10216_s10 }
 0x112   : > { %p10219_p1 = pnand %p10217_p3, %p11157_p7 }
 0x113   : > { %p10226_p9 = por %p10225_p8, %p10224_p6 }
 0x114   : > { %p10220_p4 = pneg %p10219_p1 }
 0x116   : > { %p10227_p10 = pnand %p10226_p9, %p10220_p4 }
 0x118   : > { %10230 = shalt.err (!%p10227_p10)
}
 0x119   : > { %9676 = dma.hbm_to_vmem [thread:$0]  (!%p11145_p5), %s11025_s29, 16, %s1842_s15, [#allocation20]  }
 0x11a   : > { %s10748_s23 = smov [#allocation22]   ;;  %s10749_s18 = smov [#allocation25]  }
 0x11b   : > { %s1869_s2 = sshll.u32 %s10748_s23, 4  ;;  %s1891_s16 = sshll.u32 %s10749_s18, 4  ;;  %s1870_s2 = int_to_ptr.vmem [resolvable:$true] %s1869_s2  ;;  %s1892_s16 = int_to_ptr.vmem [resolvable:$true] %s1891_s16 }
 0x11c   : > { %s10231_s1 = scalar_lea.hbm %s11045_s13, 16 }
 0x11d   : > { %p10232_p11 = scmp.ne.s32.totalorder %s11045_s13, %s10231_s1  ;;  %p10238_p13 = scmp.lt.u32.totalorder %s10231_s1, %s11045_s13 }
 0x11f   : > { %p10234_p12 = pnand %p10232_p11, %p11157_p7 }
 0x121   : > { %p10235_p2 = pneg %p10234_p12 }
 0x123   : > { %p10240_p0 = pnand %p10238_p13, %p10235_p2 }
 0x125   : > { %10243 = shalt.err (!%p10240_p0)
}
 0x126   : > { %s10244_s10 = scalar_lea.vmem %s1870_s2, 16  ;;  %s10251_s15 = scalar_lea.vmem %s1870_s2, 32 }
 0x127   : > { %p10245_p3 = scmp.ne.s32.totalorder %s1870_s2, %s10244_s10  ;;  %p10252_p6 = scmp.lt.s32.totalorder %s1870_s2, %s1870_s2 }
 0x128   : > { %p10253_p8 = scmp.lt.s32.totalorder %s10251_s15, %s10244_s10 }
 0x129   : > { %p10247_p1 = pnand %p10245_p3, %p11157_p7 }
 0x12a   : > { %p10254_p9 = por %p10253_p8, %p10252_p6 }
 0x12b   : > { %p10248_p4 = pneg %p10247_p1 }
 0x12d   : > { %p10255_p10 = pnand %p10254_p9, %p10248_p4 }
 0x12f   : > { %10258 = shalt.err (!%p10255_p10)
}
 0x130   : > { %9682 = dma.hbm_to_vmem [thread:$0]  (!%p11145_p5), %s11045_s13, 16, %s1870_s2, [#allocation23]  }
 0x131   : > { %s10259_s7 = scalar_lea.hbm %s12332_s5, 16 }
 0x132   : > { %p10260_p11 = scmp.ne.s32.totalorder %s12332_s5, %s10259_s7  ;;  %p10266_p13 = scmp.lt.u32.totalorder %s10259_s7, %s12332_s5 }
 0x134   : > { %p10262_p12 = pnand %p10260_p11, %p11157_p7 }
 0x136   : > { %p10263_p2 = pneg %p10262_p12 }
 0x138   : > { %p10268_p0 = pnand %p10266_p13, %p10263_p2 }
 0x13a   : > { %10271 = shalt.err (!%p10268_p0)
}
 0x13b   : > { %s10272_s23 = scalar_lea.vmem %s1892_s16, 16  ;;  %s10279_s18 = scalar_lea.vmem %s1892_s16, 32 }
 0x13c   : > { %p10273_p3 = scmp.ne.s32.totalorder %s1892_s16, %s10272_s23  ;;  %p10280_p6 = scmp.lt.s32.totalorder %s1892_s16, %s1892_s16 }
 0x13d   : > { %p10281_p8 = scmp.lt.s32.totalorder %s10279_s18, %s10272_s23 }
 0x13e   : > { %p10275_p1 = pnand %p10273_p3, %p11157_p7 }
 0x13f   : > { %p10282_p9 = por %p10281_p8, %p10280_p6 }
 0x140   : > { %p10276_p4 = pneg %p10275_p1 }
 0x142   : > { %p10283_p10 = pnand %p10282_p9, %p10276_p4 }
 0x144   : > { %10286 = shalt.err (!%p10283_p10)
}
 0x145   : > { %9688 = dma.hbm_to_vmem [thread:$0]  (!%p11145_p5), %s12332_s5, 16, %s1892_s16, [#allocation26]  }
 0x146   : > { %s10750_s2 = smov [#allocation28]   ;;  %s10751_s10 = smov [#allocation2]  }
 0x147   : > { %s1916_s1 = sshll.u32 %s10750_s2, 4  ;;  %s1699_s15 = sshll.u32 %s10751_s10, 4  ;;  %s1917_s1 = int_to_ptr.vmem [resolvable:$true] %s1916_s1  ;;  %s1700_s15 = int_to_ptr.vmem [resolvable:$true] %s1699_s15 }
 0x148   : > { %s10287_s7 = scalar_lea.hbm %s11070_s14, 16 }
 0x149   : > { %p10288_p11 = scmp.ne.s32.totalorder %s11070_s14, %s10287_s7  ;;  %p10294_p13 = scmp.lt.u32.totalorder %s10287_s7, %s11070_s14 }
 0x14b   : > { %p10290_p12 = pnand %p10288_p11, %p11157_p7 }
 0x14d   : > { %p10291_p2 = pneg %p10290_p12 }
 0x14f   : > { %p10296_p0 = pnand %p10294_p13, %p10291_p2 }
 0x151   : > { %10299 = shalt.err (!%p10296_p0)
}
 0x152   : > { %s10300_s23 = scalar_lea.vmem %s1917_s1, 16  ;;  %s10307_s16 = scalar_lea.vmem %s1917_s1, 32 }
 0x153   : > { %p10301_p3 = scmp.ne.s32.totalorder %s1917_s1, %s10300_s23  ;;  %p10308_p6 = scmp.lt.s32.totalorder %s1917_s1, %s1917_s1 }
 0x154   : > { %p10309_p8 = scmp.lt.s32.totalorder %s10307_s16, %s10300_s23 }
 0x155   : > { %p10303_p1 = pnand %p10301_p3, %p11157_p7 }
 0x156   : > { %p10310_p9 = por %p10309_p8, %p10308_p6 }
 0x157   : > { %p10304_p4 = pneg %p10303_p1 }
 0x159   : > { %p10311_p10 = pnand %p10310_p9, %p10304_p4 }
 0x15b   : > { %10314 = shalt.err (!%p10311_p10)
}
 0x15c   : > { %9694 = dma.hbm_to_vmem [thread:$0]  (!%p11145_p5), %s11070_s14, 16, %s1917_s1, [#allocation29]  }
 0x15d   : > { %s10315_s18 = scalar_lea.hbm %s12331_s6, 16 }
 0x15e   : > { %p10316_p11 = scmp.ne.s32.totalorder %s12331_s6, %s10315_s18  ;;  %p10322_p13 = scmp.lt.u32.totalorder %s10315_s18, %s12331_s6 }
 0x160   : > { %p10318_p12 = pnand %p10316_p11, %p11157_p7 }
 0x162   : > { %p10319_p2 = pneg %p10318_p12 }
 0x164   : > { %p10324_p0 = pnand %p10322_p13, %p10319_p2 }
 0x166   : > { %10327 = shalt.err (!%p10324_p0)
}
 0x167   : > { %s10328_s2 = scalar_lea.vmem %s1700_s15, 16  ;;  %s10335_s10 = scalar_lea.vmem %s1700_s15, 32 }
 0x168   : > { %p10329_p3 = scmp.ne.s32.totalorder %s1700_s15, %s10328_s2  ;;  %p10336_p6 = scmp.lt.s32.totalorder %s1700_s15, %s1700_s15 }
 0x169   : > { %p10337_p8 = scmp.lt.s32.totalorder %s10335_s10, %s10328_s2 }
 0x16a   : > { %p10331_p1 = pnand %p10329_p3, %p11157_p7 }
 0x16b   : > { %p10338_p9 = por %p10337_p8, %p10336_p6 }
 0x16c   : > { %p10332_p4 = pneg %p10331_p1 }
 0x16e   : > { %p10339_p10 = pnand %p10338_p9, %p10332_p4 }
 0x170   : > { %10342 = shalt.err (!%p10339_p10)
}
 0x171   : > { %9643 = dma.hbm_to_vmem [thread:$0]  (!%p11145_p5), %s12331_s6, 16, %s1700_s15, [#allocation3]  }
 0x172   : > { %s10752_s1 = smov [#allocation6]   ;;  %s10753_s23 = smov [#allocation9]  }
 0x173   : > { %s1727_s7 = sshll.u32 %s10752_s1, 4  ;;  %s1752_s16 = sshll.u32 %s10753_s23, 4  ;;  %s1728_s7 = int_to_ptr.vmem [resolvable:$true] %s1727_s7  ;;  %s1753_s16 = int_to_ptr.vmem [resolvable:$true] %s1752_s16 }
 0x174   : > { %s10343_s18 = scalar_lea.hbm %s10955_s12, 16 }
 0x175   : > { %p10344_p11 = scmp.ne.s32.totalorder %s10955_s12, %s10343_s18  ;;  %p10350_p13 = scmp.lt.u32.totalorder %s10343_s18, %s10955_s12 }
 0x177   : > { %p10346_p12 = pnand %p10344_p11, %p11157_p7 }
 0x179   : > { %p10347_p2 = pneg %p10346_p12 }
 0x17b   : > { %p10352_p0 = pnand %p10350_p13, %p10347_p2 }
 0x17d   : > { %10355 = shalt.err (!%p10352_p0)
}
 0x17e   : > { %s10356_s2 = scalar_lea.vmem %s1728_s7, 16  ;;  %s10363_s15 = scalar_lea.vmem %s1728_s7, 32 }
 0x17f   : > { %p10357_p3 = scmp.ne.s32.totalorder %s1728_s7, %s10356_s2  ;;  %p10364_p6 = scmp.lt.s32.totalorder %s1728_s7, %s1728_s7 }
 0x180   : > { %p10365_p8 = scmp.lt.s32.totalorder %s10363_s15, %s10356_s2 }
 0x181   : > { %p10359_p1 = pnand %p10357_p3, %p11157_p7 }
 0x182   : > { %p10366_p9 = por %p10365_p8, %p10364_p6 }
 0x183   : > { %p10360_p4 = pneg %p10359_p1 }
 0x185   : > { %p10367_p10 = pnand %p10366_p9, %p10360_p4 }
 0x187   : > { %10370 = shalt.err (!%p10367_p10)
}
 0x188   : > { %9649 = dma.hbm_to_vmem [thread:$0]  (!%p11145_p5), %s10955_s12, 16, %s1728_s7, [#allocation5]  }
 0x189   : > { %s10371_s10 = scalar_lea.hbm %s12333_s4, 16 }
 0x18a   : > { %p10372_p11 = scmp.ne.s32.totalorder %s12333_s4, %s10371_s10  ;;  %p10378_p13 = scmp.lt.u32.totalorder %s10371_s10, %s12333_s4 }
 0x18c   : > { %p10374_p12 = pnand %p10372_p11, %p11157_p7 }
 0x18e   : > { %p10375_p2 = pneg %p10374_p12 }
 0x190   : > { %p10380_p0 = pnand %p10378_p13, %p10375_p2 }
 0x192   : > { %10383 = shalt.err (!%p10380_p0)
}
 0x193   : > { %s10384_s1 = scalar_lea.vmem %s1753_s16, 16  ;;  %s10391_s23 = scalar_lea.vmem %s1753_s16, 32 }
 0x194   : > { %p10385_p3 = scmp.ne.s32.totalorder %s1753_s16, %s10384_s1  ;;  %p10392_p6 = scmp.lt.s32.totalorder %s1753_s16, %s1753_s16 }
 0x195   : > { %p10393_p8 = scmp.lt.s32.totalorder %s10391_s23, %s10384_s1 }
 0x196   : > { %p10387_p1 = pnand %p10385_p3, %p11157_p7 }
 0x197   : > { %p10394_p9 = por %p10393_p8, %p10392_p6 }
 0x198   : > { %p10388_p4 = pneg %p10387_p1 }
 0x19a   : > { %p10395_p10 = pnand %p10394_p9, %p10388_p4 }
 0x19c   : > { %10398 = shalt.err (!%p10395_p10)
}
 0x19d   : > { %9655 = dma.hbm_to_vmem [thread:$0]  (!%p11145_p5), %s12333_s4, 16, %s1753_s16, [#allocation8]  }
 0x19e   : > { %s10754_s7 = smov [#allocation12]   ;;  %s10755_s2 = smov [#allocation15]  }
 0x19f   : > { %s1777_s18 = sshll.u32 %s10754_s7, 4  ;;  %s1802_s15 = sshll.u32 %s10755_s2, 4  ;;  %s1778_s18 = int_to_ptr.vmem [resolvable:$true] %s1777_s18  ;;  %s1803_s15 = int_to_ptr.vmem [resolvable:$true] %s1802_s15 }
 0x1a0   : > { %s10399_s10 = scalar_lea.hbm %s10985_s30, 16 }
 0x1a1   : > { %p10400_p11 = scmp.ne.s32.totalorder %s10985_s30, %s10399_s10  ;;  %p10406_p13 = scmp.lt.u32.totalorder %s10399_s10, %s10985_s30 }
 0x1a3   : > { %p10402_p12 = pnand %p10400_p11, %p11157_p7 }
 0x1a5   : > { %p10403_p2 = pneg %p10402_p12 }
 0x1a7   : > { %p10408_p0 = pnand %p10406_p13, %p10403_p2 }
 0x1a9   : > { %10411 = shalt.err (!%p10408_p0)
}
 0x1aa   : > { %s10412_s1 = scalar_lea.vmem %s1778_s18, 16  ;;  %s10419_s16 = scalar_lea.vmem %s1778_s18, 32 }
 0x1ab   : > { %p10413_p3 = scmp.ne.s32.totalorder %s1778_s18, %s10412_s1  ;;  %p10420_p6 = scmp.lt.s32.totalorder %s1778_s18, %s1778_s18 }
 0x1ac   : > { %p10421_p8 = scmp.lt.s32.totalorder %s10419_s16, %s10412_s1 }
 0x1ad   : > { %p10415_p1 = pnand %p10413_p3, %p11157_p7 }
 0x1ae   : > { %p10422_p9 = por %p10421_p8, %p10420_p6 }
 0x1af   : > { %p10416_p4 = pneg %p10415_p1 }
 0x1b1   : > { %p10423_p10 = pnand %p10422_p9, %p10416_p4 }
 0x1b3   : > { %10426 = shalt.err (!%p10423_p10)
}
 0x1b4   : > { %9661 = dma.hbm_to_vmem [thread:$0]  (!%p11145_p5), %s10985_s30, 16, %s1778_s18, [#allocation11]  }
 0x1b5   : > { %s10427_s23 = scalar_lea.hbm %s11000_s20, 16 }
 0x1b6   : > { %p10428_p11 = scmp.ne.s32.totalorder %s11000_s20, %s10427_s23  ;;  %p10434_p13 = scmp.lt.u32.totalorder %s10427_s23, %s11000_s20 }
 0x1b8   : > { %p10430_p12 = pnand %p10428_p11, %p11157_p7 }
 0x1ba   : > { %p10431_p2 = pneg %p10430_p12 }
 0x1bc   : > { %p10436_p0 = pnand %p10434_p13, %p10431_p2 }
 0x1be   : > { %10439 = shalt.err (!%p10436_p0)
}
 0x1bf   : > { %s10440_s7 = scalar_lea.vmem %s1803_s15, 16  ;;  %s10447_s2 = scalar_lea.vmem %s1803_s15, 32 }
 0x1c0   : > { %p10441_p3 = scmp.ne.s32.totalorder %s1803_s15, %s10440_s7  ;;  %p10448_p6 = scmp.lt.s32.totalorder %s1803_s15, %s1803_s15 }
 0x1c1   : > { %p10449_p8 = scmp.lt.s32.totalorder %s10447_s2, %s10440_s7 }
 0x1c2   : > { %p10443_p1 = pnand %p10441_p3, %p11157_p7 }
 0x1c3   : > { %p10450_p9 = por %p10449_p8, %p10448_p6 }
 0x1c4   : > { %p10444_p4 = pneg %p10443_p1 }
 0x1c6   : > { %p10451_p10 = pnand %p10450_p9, %p10444_p4 }
 0x1c8   : > { %10454 = shalt.err (!%p10451_p10)
}
 0x1c9   : > { %s12338_s18 = sld [smem:[#allocation83_spill]]  ;;  %s10756_s10 = smov [#allocation18]  }
 0x1ca   : > { %9667 = dma.hbm_to_vmem [thread:$0]  (!%p11145_p5), %s11000_s20, 16, %s1803_s15, [#allocation14]  }
 0x1cb   : > { %s1827_s1 = sshll.u32 %s10756_s10, 4  ;;  %s10757_s16 = smov [#allocation21]   ;;  %s1828_s1 = int_to_ptr.vmem [resolvable:$true] %s1827_s1 }
 0x1cc   : > { %s1855_s23 = sshll.u32 %s10757_s16, 4  ;;  %s1856_s23 = int_to_ptr.vmem [resolvable:$true] %s1855_s23 }
 0x1cf   : > { %s10455_s3 = scalar_lea.hbm %s12338_s18, 16 }
 0x1d0   : > { %p10456_p11 = scmp.ne.s32.totalorder %s12338_s18, %s10455_s3  ;;  %p10462_p13 = scmp.lt.u32.totalorder %s10455_s3, %s12338_s18 }
 0x1d2   : > { %p10458_p12 = pnand %p10456_p11, %p11157_p7 }
 0x1d4   : > { %p10459_p2 = pneg %p10458_p12 }
 0x1d6   : > { %p10464_p0 = pnand %p10462_p13, %p10459_p2 }
 0x1d8   : > { %10467 = shalt.err (!%p10464_p0)
}
 0x1d9   : > { %s10468_s7 = scalar_lea.vmem %s1828_s1, 16  ;;  %s10475_s15 = scalar_lea.vmem %s1828_s1, 32 }
 0x1da   : > { %p10469_p3 = scmp.ne.s32.totalorder %s1828_s1, %s10468_s7  ;;  %p10476_p6 = scmp.lt.s32.totalorder %s1828_s1, %s1828_s1 }
 0x1db   : > { %p10477_p8 = scmp.lt.s32.totalorder %s10475_s15, %s10468_s7 }
 0x1dc   : > { %p10471_p1 = pnand %p10469_p3, %p11157_p7 }
 0x1dd   : > { %p10478_p9 = por %p10477_p8, %p10476_p6 }
 0x1de   : > { %p10472_p4 = pneg %p10471_p1 }
 0x1e0   : > { %p10479_p10 = pnand %p10478_p9, %p10472_p4 }
 0x1e2   : > { %10482 = shalt.err (!%p10479_p10)
}
 0x1e3   : > { %s12339_s2 = sld [smem:[#allocation86_spill]] }
 0x1e4   : > { %9673 = dma.hbm_to_vmem [thread:$0]  (!%p11145_p5), %s12338_s18, 16, %s1828_s1, [#allocation17]  }
 0x1e9   : > { %s10483_s3 = scalar_lea.hbm %s12339_s2, 16 }
 0x1ea   : > { %p10484_p11 = scmp.ne.s32.totalorder %s12339_s2, %s10483_s3  ;;  %p10490_p13 = scmp.lt.u32.totalorder %s10483_s3, %s12339_s2 }
 0x1ec   : > { %p10486_p12 = pnand %p10484_p11, %p11157_p7 }
 0x1ee   : > { %p10487_p2 = pneg %p10486_p12 }
 0x1f0   : > { %p10492_p0 = pnand %p10490_p13, %p10487_p2 }
 0x1f2   : > { %10495 = shalt.err (!%p10492_p0)
}
 0x1f3   : > { %s10496_s10 = scalar_lea.vmem %s1856_s23, 16  ;;  %s10503_s16 = scalar_lea.vmem %s1856_s23, 32 }
 0x1f4   : > { %p10497_p3 = scmp.ne.s32.totalorder %s1856_s23, %s10496_s10  ;;  %p10504_p6 = scmp.lt.s32.totalorder %s1856_s23, %s1856_s23 }
 0x1f5   : > { %p10505_p8 = scmp.lt.s32.totalorder %s10503_s16, %s10496_s10 }
 0x1f6   : > { %p10499_p1 = pnand %p10497_p3, %p11157_p7 }
 0x1f7   : > { %p10506_p9 = por %p10505_p8, %p10504_p6 }
 0x1f8   : > { %p10500_p4 = pneg %p10499_p1 }
 0x1fa   : > { %p10507_p10 = pnand %p10506_p9, %p10500_p4 }
 0x1fc   : > { %10510 = shalt.err (!%p10507_p10)
}
 0x1fd   : > { %s12340_s1 = sld [smem:[#allocation88_spill]]  ;;  %s10758_s7 = smov [#allocation24]  }
 0x1fe   : > { %9679 = dma.hbm_to_vmem [thread:$0]  (!%p11145_p5), %s12339_s2, 16, %s1856_s23, [#allocation20]  }
 0x1ff   : > { %s1880_s15 = sshll.u32 %s10758_s7, 4  ;;  %s10759_s3 = smov [#allocation27]   ;;  %s1881_s15 = int_to_ptr.vmem [resolvable:$true] %s1880_s15 }
 0x200   : > { %s1905_s4 = sshll.u32 %s10759_s3, 4  ;;  %s1906_s4 = int_to_ptr.vmem [resolvable:$true] %s1905_s4 }
 0x203   : > { %s10511_s5 = scalar_lea.hbm %s12340_s1, 16 }
 0x204   : > { %p10512_p11 = scmp.ne.s32.totalorder %s12340_s1, %s10511_s5  ;;  %p10518_p13 = scmp.lt.u32.totalorder %s10511_s5, %s12340_s1 }
 0x206   : > { %p10514_p12 = pnand %p10512_p11, %p11157_p7 }
 0x208   : > { %p10515_p2 = pneg %p10514_p12 }
 0x20a   : > { %p10520_p0 = pnand %p10518_p13, %p10515_p2 }
 0x20c   : > { %10523 = shalt.err (!%p10520_p0)
}
 0x20d   : > { %s10524_s10 = scalar_lea.vmem %s1881_s15, 16  ;;  %s10531_s23 = scalar_lea.vmem %s1881_s15, 32 }
 0x20e   : > { %p10525_p3 = scmp.ne.s32.totalorder %s1881_s15, %s10524_s10  ;;  %p10532_p6 = scmp.lt.s32.totalorder %s1881_s15, %s1881_s15 }
 0x20f   : > { %p10533_p8 = scmp.lt.s32.totalorder %s10531_s23, %s10524_s10 }
 0x210   : > { %p10527_p1 = pnand %p10525_p3, %p11157_p7 }
 0x211   : > { %p10534_p9 = por %p10533_p8, %p10532_p6 }
 0x212   : > { %p10528_p4 = pneg %p10527_p1 }
 0x214   : > { %p10535_p10 = pnand %p10534_p9, %p10528_p4 }
 0x216   : > { %10538 = shalt.err (!%p10535_p10)
}
 0x217   : > { %s12341_s16 = sld [smem:[#allocation91_spill]] }
 0x218   : > { %9685 = dma.hbm_to_vmem [thread:$0]  (!%p11145_p5), %s12340_s1, 16, %s1881_s15, [#allocation23]  }
 0x21d   : > { %s10539_s5 = scalar_lea.hbm %s12341_s16, 16 }
 0x21e   : > { %p10540_p11 = scmp.ne.s32.totalorder %s12341_s16, %s10539_s5  ;;  %p10546_p13 = scmp.lt.u32.totalorder %s10539_s5, %s12341_s16 }
 0x220   : > { %p10542_p12 = pnand %p10540_p11, %p11157_p7 }
 0x222   : > { %p10543_p2 = pneg %p10542_p12 }
 0x224   : > { %p10548_p0 = pnand %p10546_p13, %p10543_p2 }
 0x226   : > { %10551 = shalt.err (!%p10548_p0)
}
 0x227   : > { %s10552_s7 = scalar_lea.vmem %s1906_s4, 16  ;;  %s10559_s3 = scalar_lea.vmem %s1906_s4, 32 }
 0x228   : > { %p10553_p3 = scmp.ne.s32.totalorder %s1906_s4, %s10552_s7  ;;  %p10560_p6 = scmp.lt.s32.totalorder %s1906_s4, %s1906_s4 }
 0x229   : > { %p10561_p8 = scmp.lt.s32.totalorder %s10559_s3, %s10552_s7 }
 0x22a   : > { %p10555_p1 = pnand %p10553_p3, %p11157_p7 }
 0x22b   : > { %p10562_p9 = por %p10561_p8, %p10560_p6 }
 0x22c   : > { %p10556_p4 = pneg %p10555_p1 }
 0x22e   : > { %p10563_p10 = pnand %p10562_p9, %p10556_p4 }
 0x230   : > { %10566 = shalt.err (!%p10563_p10)
}
 0x231   : > { %s12342_s15 = sld [smem:[#allocation92_spill]]  ;;  %s10760_s10 = smov [#allocation30]  }
 0x232   : > { %9691 = dma.hbm_to_vmem [thread:$0]  (!%p11145_p5), %s12341_s16, 16, %s1906_s4, [#allocation26]  }
 0x233   : > { %s1927_s23 = sshll.u32 %s10760_s10, 4  ;;  %s10761_s5 = smov [#allocation31]   ;;  %s1928_s23 = int_to_ptr.vmem [resolvable:$true] %s1927_s23 }
 0x234   : > { %s1941_s1 = sshll.u32 %s10761_s5, 4  ;;  %s1942_s1 = int_to_ptr.vmem [resolvable:$true] %s1941_s1 }
 0x237   : > { %s10567_s2 = scalar_lea.hbm %s12342_s15, 16 }
 0x238   : > { %p10568_p11 = scmp.ne.s32.totalorder %s12342_s15, %s10567_s2  ;;  %p10574_p13 = scmp.lt.u32.totalorder %s10567_s2, %s12342_s15 }
 0x23a   : > { %p10570_p12 = pnand %p10568_p11, %p11157_p7 }
 0x23c   : > { %p10571_p2 = pneg %p10570_p12 }
 0x23e   : > { %p10576_p0 = pnand %p10574_p13, %p10571_p2 }
 0x240   : > { %10579 = shalt.err (!%p10576_p0)
}
 0x241   : > { %s10580_s7 = scalar_lea.vmem %s1928_s23, 16  ;;  %s10587_s4 = scalar_lea.vmem %s1928_s23, 32 }
 0x242   : > { %p10581_p3 = scmp.ne.s32.totalorder %s1928_s23, %s10580_s7  ;;  %p10588_p6 = scmp.lt.s32.totalorder %s1928_s23, %s1928_s23 }
 0x243   : > { %p10589_p8 = scmp.lt.s32.totalorder %s10587_s4, %s10580_s7 }
 0x244   : > { %p10583_p1 = pnand %p10581_p3, %p11157_p7 }
 0x245   : > { %p10590_p9 = por %p10589_p8, %p10588_p6 }
 0x246   : > { %p10584_p4 = pneg %p10583_p1 }
 0x248   : > { %p10591_p10 = pnand %p10590_p9, %p10584_p4 }
 0x24a   : > { %10594 = shalt.err (!%p10591_p10)
}
 0x24b   : > { %s12343_s3 = sld [smem:[#allocation94_spill]] }
 0x24c   : > { %9697 = dma.hbm_to_vmem [thread:$0]  (!%p11145_p5), %s12342_s15, 16, %s1928_s23, [#allocation29]  }
 0x251   : > { %s10595_s2 = scalar_lea.hbm %s12343_s3, 16 }
 0x252   : > { %p10596_p11 = scmp.ne.s32.totalorder %s12343_s3, %s10595_s2  ;;  %p10602_p13 = scmp.lt.u32.totalorder %s10595_s2, %s12343_s3 }
 0x254   : > { %p10598_p12 = pnand %p10596_p11, %p11157_p7 }
 0x256   : > { %p10599_p2 = pneg %p10598_p12 }
 0x258   : > { %p10604_p0 = pnand %p10602_p13, %p10599_p2 }
 0x25a   : > { %10607 = shalt.err (!%p10604_p0)
}
 0x25b   : > { %s10608_s10 = scalar_lea.vmem %s1942_s1, 16  ;;  %s10615_s5 = scalar_lea.vmem %s1942_s1, 32 }
 0x25c   : > { %p10609_p3 = scmp.ne.s32.totalorder %s1942_s1, %s10608_s10  ;;  %p10616_p6 = scmp.lt.s32.totalorder %s1942_s1, %s1942_s1 }
 0x25d   : > { %p10617_p8 = scmp.lt.s32.totalorder %s10615_s5, %s10608_s10 }
 0x25e   : > { %p10611_p1 = pnand %p10609_p3, %p11157_p7 }
 0x25f   : > { %p10618_p9 = por %p10617_p8, %p10616_p6 }
 0x260   : > { %p10612_p4 = pneg %p10611_p1 }
 0x262   : > { %p10619_p10 = pnand %p10618_p9, %p10612_p4 }
 0x264   : > { %10622 = shalt.err (!%p10619_p10)
}
 0x265   : > { %9700 = dma.hbm_to_vmem [thread:$0]  (!%p11145_p5), %s12343_s3, 16, %s1942_s1, [#allocation32]  }
 0x266   : > { %p12344_p11 = scmp.ne.s32.totalorder %s12335_s28, 0 }
 0x267   : > { %p12345_p12 = scmp.eq.s32.totalorder (!%p12344_p11), %s11128_s26, 0 }
 0x268   : > { %1980 = sbr.rel (%p12344_p11) target bundleno = 11172 (0x2ba4), region = 288 }
 0x26f   : > { %10628 = dma.done.wait (%p12345_p12), [#allocation3], 16   ;;  %p12346_p2 = pmov %p12345_p12 }
 0x271   : > { %10630 = vsyncadd (%p12346_p2), [#allocation3], 4294967280  ;;  %p12347_p7 = pmov %p12346_p2 }
 0x272   : > { %p12348_p13 = pmov %p12346_p2 }
 0x273   : > { %10632 = dma.done.wait (%p12347_p7), [#allocation5], 32  }
 0x274   : > { %10634 = vsyncadd (%p12348_p13), [#allocation5], 4294967264  ;;  %p12349_p0 = pmov %p12346_p2 }
 0x276   : > { %10636 = dma.done.wait (%p12349_p0), [#allocation8], 32   ;;  %p12350_p5 = pmov %p12349_p0 }
 0x277   : > { %p12351_p3 = pmov %p12349_p0 }
 0x278   : > { %10638 = vsyncadd (%p12350_p5), [#allocation8], 4294967264 }
 0x279   : > { %10640 = dma.done.wait (%p12351_p3), [#allocation11], 32   ;;  %p12352_p1 = pmov %p12349_p0 }
 0x27a   : > { %p12353_p4 = pmov %p12349_p0 }
 0x27b   : > { %10642 = vsyncadd (%p12352_p1), [#allocation11], 4294967264 }
 0x27c   : > { %10644 = dma.done.wait (%p12353_p4), [#allocation14], 32   ;;  %p12354_p6 = pmov %p12349_p0 }
 0x27d   : > { %p12355_p8 = pmov %p12349_p0 }
 0x27e   : > { %10646 = vsyncadd (%p12354_p6), [#allocation14], 4294967264 }
 0x27f   : > { %10648 = dma.done.wait (%p12355_p8), [#allocation17], 32   ;;  %p12356_p9 = pmov %p12349_p0 }
 0x280   : > { %p12357_p10 = pmov %p12349_p0 }
 0x281   : > { %10650 = vsyncadd (%p12356_p9), [#allocation17], 4294967264 }
 0x282   : > { %10652 = dma.done.wait (%p12357_p10), [#allocation20], 32   ;;  %p12358_p11 = pmov %p12349_p0 }
 0x283   : > { %p12359_p12 = pmov %p12349_p0 }
 0x284   : > { %10654 = vsyncadd (%p12358_p11), [#allocation20], 4294967264 }
 0x285   : > { %10656 = dma.done.wait (%p12359_p12), [#allocation23], 32   ;;  %p12360_p2 = pmov %p12349_p0 }
 0x286   : > { %p12361_p7 = pmov %p12349_p0 }
 0x287   : > { %10658 = vsyncadd (%p12360_p2), [#allocation23], 4294967264 }
 0x288   : > { %10660 = dma.done.wait (%p12361_p7), [#allocation26], 32   ;;  %p12362_p13 = pmov %p12349_p0 }
 0x28a   : > { %10662 = vsyncadd (%p12362_p13), [#allocation26], 4294967264 }
 0x28b   : > { %10664 = dma.done.wait (%p12349_p0), [#allocation29], 32   ;;  %p12363_p5 = pmov %p12349_p0 }
 0x28c   : > { %p12364_p3 = pmov %p12349_p0 }
 0x28d   : > { %10666 = vsyncadd (%p12363_p5), [#allocation29], 4294967264 }
 0x28e   : > { %10668 = dma.done.wait (%p12364_p3), [#allocation32], 16   ;;  %p12365_p1 = pmov %p12349_p0 }
 0x28f   : > { %s12366_s28 = sld [smem:[#allocation45_spill]]  ;;  %s12367_s11 = sld [smem:[#allocation44_spill]]  ;;  %v10762_v0 = vmov 0.0|0.0   ;;  %vm2253_vm0 = vcmask 523264   ;;  %vm2341_vm1 = vcmask 261120   ;;  %vm2488_vm2 = vcmask 130048  }
 0x290   : > { %10670 = vsyncadd (%p12365_p1), [#allocation32], 4294967280  ;;  %9224 = vmatprep.subr.bf16.mxu1 %v10762_v0  ;;  %p2208_p4 = scmp.lt.s32.totalorder %s11128_s26, 1  ;;  %s12368_s23 = sld [smem:[#allocation46_spill]]  ;;  %vm10769_vm4 = vmmov 0   ;;  %vm3626_vm5 = vcmask 36864  }
 0x291   : > { %s12369_s7 = sld [smem:[#allocation47_spill]]  ;;  %s12370_s4 = sld [smem:[#allocation50_spill]]  ;;  %vm11514_vm3 = vmpackc.low %vm2488_vm2, %vm2488_vm2  ;;  %vm3644_vm6 = vcmask 1044480   ;;  %vm3640_vm7 = vcmask 39936   ;;  %vm4040_vm8 = vcmask 258048   ;;  %vm4415_vm9 = vcmask 126976  }
 0x292   : > { %s12422_s26 = smov (!%p2208_p4, %s11128_s26), 1  ;;  %s12371_s2 = sld [smem:[#allocation48_spill]]  ;;  %vm7015_vm13 = vcmask 64512   ;;  %vm7755_vm15 = vcmask 31744  }
 0x293   : > { %s8480_s0 = sshll.u32 %s12422_s26, 5  ;;  %s12372_s10 = sld [smem:[#allocation49_spill]] }
 0x294   : > { %s12373_s5 = sld [smem:[#allocation51_spill]]  ;;  %s12388_s3 = sld [smem:[#allocation68_spill]] }
 0x295   : > { %v2222_v1 = vld [vmem:[%s12366_s28] sm:$0xff]  ;;  %v2223_v2 = vld [vmem:[%s12366_s28 + $0x8] sm:$0xff]  ;;  %v2224_v3 = vld [vmem:[%s12366_s28 + $0x10] sm:$0xff]  ;;  %s11443_s1 = scalar_lea.vmem %s12367_s11, %s8480_s0  ;;  %s12254_s11 = smov 96  }
 0x296   : > { %v9225_v4 = vpack.c.bf16 %v2223_v2, %v2222_v1  ;;  %v2225_v5 = vld [vmem:[%s12366_s28 + $0x18] sm:$0xff]  ;;  %v2226_v7 = vld [vmem:[%s12366_s28 + $0x20] sm:$0xff]  ;;  %v2227_v8 = vld [vmem:[%s12366_s28 + $0x28] sm:$0xff]  ;;  %s12255_s0 = smov 80   ;;  %s12399_s6 = sld [smem:[#allocation70_spill]] }
 0x297   : > { %v9228_v6 = vpack.c.bf16 %v2225_v5, %v2224_v3  ;;  %v9231_v9 = vpack.c.bf16 %v2227_v8, %v2226_v7  ;;  %v2228_v10 = vld [vmem:[%s12366_s28 + $0x30] sm:$0xff]  ;;  %v2229_v11 = vld [vmem:[%s12366_s28 + $0x38] sm:$0xff]  ;;  %v2219_v12 = vld [vmem:[%s11443_s1 + $0x8] sm:$0xff] }
 0x298   : > { %9226 = vmatpush1.bf16.msra.mxu1 %v9225_v4  ;;  %8264 = vmatprep.mubr.msk.f32.mxu1 %vm2253_vm0, %v2219_v12  ;;  %v9234_v13 = vpack.c.bf16 %v2229_v11, %v2228_v10  ;;  %v2230_v14 = vld [vmem:[%s12366_s28 + $0x40] sm:$0xff]  ;;  %v2231_v15 = vld [vmem:[%s12366_s28 + $0x48] sm:$0xff]  ;;  %v2232_v17 = vld [vmem:[%s12366_s28 + $0x50] sm:$0xff] }
 0x299   : > { %9227 = vmatprep.subr.bf16.mxu1 %v10762_v0  ;;  %v9237_v16 = vpack.c.bf16 %v2231_v15, %v2230_v14  ;;  %v2233_v18 = vld [vmem:[%s12366_s28 + $0x58] sm:$0xff]  ;;  %v2234_v20 = vld [vmem:[%s12366_s28 + $0x60] sm:$0xff]  ;;  %v2235_v21 = vld [vmem:[%s12366_s28 + $0x68] sm:$0xff] }
 0x29a   : > { %v9240_v19 = vpack.c.bf16 %v2233_v18, %v2232_v17  ;;  %v9243_v22 = vpack.c.bf16 %v2235_v21, %v2234_v20  ;;  %v2236_v23 = vld [vmem:[%s12366_s28 + $0x70] sm:$0xff]  ;;  %v2237_v24 = vld [vmem:[%s12366_s28 + $0x78] sm:$0xff]  ;;  %v2238_v26 = vld [vmem:[%s12366_s28 + $0x80] sm:$0xff] }
 0x29b   : > { %v9246_v25 = vpack.c.bf16 %v2237_v24, %v2236_v23  ;;  %v2239_v27 = vld [vmem:[%s12366_s28 + $0x88] sm:$0xff]  ;;  %v2240_v29 = vld [vmem:[%s12366_s28 + $0x90] sm:$0xff]  ;;  %v2241_v30 = vld [vmem:[%s12366_s28 + $0x98] sm:$0xff] }
 0x29c   : > { %9229 = vmatpush1.bf16.msra.mxu1 %v9228_v6  ;;  %v9249_v28 = vpack.c.bf16 %v2239_v27, %v2238_v26  ;;  %v9252_v31 = vpack.c.bf16 %v2241_v30, %v2240_v29  ;;  %v2242_v32 = vld [vmem:[%s12366_s28 + $0xa0] sm:$0xff]  ;;  %v2243_v33 = vld [vmem:[%s12366_s28 + $0xa8] sm:$0xff]  ;;  %v2244_v35 = vld [vmem:[%s12366_s28 + $0xb0] sm:$0xff] }
 0x29d   : > { %9230 = vmatprep.subr.bf16.mxu1 %v10762_v0  ;;  %v9255_v34 = vpack.c.bf16 %v2243_v33, %v2242_v32  ;;  %v2245_v36 = vld [vmem:[%s12366_s28 + $0xb8] sm:$0xff]  ;;  %v2218_v38 = vld [vmem:[%s11443_s1] sm:$0xff]  ;;  %v2220_v40 = vld [vmem:[%s11443_s1 + $0x10] sm:$0xff] }
 0x29e   : > { %v9258_v37 = vpack.c.bf16 %v2245_v36, %v2244_v35  ;;  %v2221_v39 = vld [vmem:[%s11443_s1 + $0x18] sm:$0xff]  ;;  %v8263_v41 = vld [vmem:[%s12368_s23] ss:$0 sm:$0xff]  ;;  %v2336_v48 = vld [vmem:[%s12369_s7 + $0x8] sm:$0xff]  ;;  %s12252_s1 = smov 112   ;;  %s12250_s23 = smov 64  }
 0x29f   : > { %v2335_v43 = vld [vmem:[%s12369_s7] sm:$0xff]  ;;  %v2386_v2 = vld [vmem:[%s12370_s4 + $0x8] sm:$0xff]  ;;  %v2387_v3 = vld [vmem:[%s12370_s4 + $0x10] sm:$0xff] }
 0x2a0   : > { %9232 = vmatpush1.bf16.msra.mxu1 %v9231_v9  ;;  %v2385_v1 = vld [vmem:[%s12370_s4] sm:$0xff]  ;;  %v2388_v5 = vld [vmem:[%s12370_s4 + $0x18] sm:$0xff]  ;;  %s12391_s4 = smov 112  }
 0x2a1   : > { %9233 = vmatprep.subr.bf16.mxu1 %v10762_v0  ;;  %v9260_v4 = vpack.c.bf16 %v2386_v2, %v2385_v1  ;;  %v9264_v6 = vpack.c.bf16 %v2388_v5, %v2387_v3  ;;  %v8266_v14 = vld [vmem:[%s12371_s2] ss:$0 sm:$0xff]  ;;  %s12251_s2 = smov 48  }
 0x2a2   : > { %v8268_v23 = vld [vmem:[%s12373_s5] ss:$0 sm:$0xff]  ;;  %s12377_s5 = sld [smem:[#allocation53_spill]] }
 0x2a4   : > { %9235 = vmatpush1.bf16.msra.mxu1 %v9234_v13 }
 0x2a5   : > { %9236 = vmatprep.subr.bf16.mxu1 %v10762_v0 }
 0x2a8   : > { %9238 = vmatpush1.bf16.msra.mxu1 %v9237_v16  ;;  %v8267_v16 = vld [vmem:[%s12372_s10] ss:$0 sm:$0xff]  ;;  %s12376_s10 = sld [smem:[#allocation52_spill]] }
 0x2a9   : > { %9239 = vmatprep.subr.bf16.mxu1 %v10762_v0 }
 0x2ac   : > { %9241 = vmatpush1.bf16.msra.mxu1 %v9240_v19 }
 0x2ad   : > { %9242 = vmatprep.subr.bf16.mxu1 %v10762_v0 }
 0x2b0   : > { %9244 = vmatpush1.bf16.msra.mxu1 %v9243_v22 }
 0x2b1   : > { %9245 = vmatprep.subr.bf16.mxu1 %v10762_v0 }
 0x2b4   : > { %9247 = vmatpush1.bf16.msra.mxu1 %v9246_v25 }
 0x2b5   : > { %9248 = vmatprep.subr.bf16.mxu1 %v10762_v0 }
 0x2b8   : > { %9250 = vmatpush1.bf16.msra.mxu1 %v9249_v28 }
 0x2b9   : > { %9251 = vmatprep.subr.bf16.mxu1 %v10762_v0 }
 0x2bc   : > { %9253 = vmatpush1.bf16.msra.mxu1 %v9252_v31 }
 0x2bd   : > { %9254 = vmatprep.subr.bf16.mxu1 %v10762_v0 }
 0x2c0   : > { %9256 = vmatpush1.bf16.msra.mxu1 %v9255_v34 }
 0x2c1   : > { %9257 = vmatprep.subr.bf16.mxu1 %v10762_v0 }
 0x2c4   : > { %9259 = vmatpush1.bf16.msra.mxu1 %v9258_v37 }
 0x2c5   : > { %9261 = vmatprep.subr.bf16.mxu1 %v9260_v4 }
 0x2c7   : > { %2325 = vmatmul.mubr.f32.vlgmr.msra.gmra.mrb[0].mxu1 %v2218_v38 }
 0x2c8   : > { %8265 = vmatprep.mubr.msk.f32.mxu1 %vm2253_vm0, %v2221_v39  ;;  %9263 = vmatpush3.bf16.msra.mxu1 %v9260_v4 }
 0x2c9   : > { %9265 = vmatprep.subr.bf16.mxu1 %v9264_v6 }
 0x2cb   : > { %2330 = vmatmul.mubr.f32.gmra.mrb[2].mxu1 %v2220_v40 }
 0x2cc   : > { %9267 = vmatpush3.bf16.msra.mxu1 %v9264_v6 }
 0x39a   : > { %v2326_v42 = vpop.f32.mrb[0].mxu1 }
 0x39b   : > { %v2327_v44 = vadd.f32 %v8263_v41, %v2326_v42  ;;  %v2328_v45 = vpop.f32.mrb[1].mxu1 }
 0x39d   : > { %v11481_v46 = vadd.f32 %v2335_v43, %v2327_v44 }
 0x39e   : > { %v2331_v47 = vpop.f32.mrb[2].mxu1 }
 0x39f   : > { %v2332_v49 = vadd.f32 %v8263_v41, %v2331_v47  ;;  %v2333_v50 = vpop.f32.mrb[3].mxu1  ;;  %v2342_v51 = vsel %vm2341_vm1, %v11481_v46, 0.0 }
 0x3a0   : > { %2343 = vadd.xlane.f32.xlu0 %v2342_v51 }
 0x3a1   : > { %v11486_v52 = vadd.f32 %v2336_v48, %v2332_v49 }
 0x3a3   : > { %v2345_v53 = vsel %vm2341_vm1, %v11486_v52, 0.0 }
 0x3a4   : > { %2346 = vadd.xlane.f32.xlu0 %v2345_v53 }
 0x42d   : > { %v2344_v54 = vpop.xlane.xlu0 %2343 }
 0x42e   : > { %v2349_v55 = vmul.f32 0.03125, %v2344_v54 }
 0x430   : > { %v2351_v56 = vsub.f32 %v11481_v46, %v2349_v55 }
 0x431   : > { %v2347_v57 = vpop.xlane.xlu0 %2346 }
 0x432   : > { %v2350_v58 = vmul.f32 0.03125, %v2347_v57  ;;  %v2353_v59 = vmul.f32 %v2351_v56, %v2351_v56 }
 0x434   : > { %v2352_v60 = vsub.f32 %v11486_v52, %v2350_v58  ;;  %v2355_v61 = vsel %vm2341_vm1, %v2353_v59, 0.0 }
 0x435   : > { %2356 = vadd.xlane.f32.xlu1 %v2355_v61 }
 0x436   : > { %v2354_v62 = vmul.f32 %v2352_v60, %v2352_v60 }
 0x438   : > { %v2358_v63 = vsel %vm2341_vm1, %v2354_v62, 0.0 }
 0x439   : > { %2359 = vadd.xlane.f32.xlu1 %v2358_v63 }
 0x4c2   : > { %v2357_v7 = vpop.xlane.xlu1 %2356 }
 0x4c3   : > { %v2361_v8 = vmul.f32 0.03125, %v2357_v7 }
 0x4c5   : > { %v2363_v9 = vadd.f32 1e-06, %v2361_v8 }
 0x4c6   : > { %v2360_v10 = vpop.xlane.xlu1 %2359 }
 0x4c7   : > { %9941 = vrsqrt.f32 %v2363_v9  ;;  %v2362_v11 = vmul.f32 0.03125, %v2360_v10 }
 0x4c9   : > { %v2364_v12 = vadd.f32 1e-06, %v2362_v11 }
 0x4cb   : > { %9943 = vrsqrt.f32 %v2364_v12 }
 0x4d1   : > { %v9942_v13 = vpop.eup %9941 }
 0x4d2   : > { %v2367_v15 = vmul.f32 %v9942_v13, %v2351_v56 }
 0x4d4   : > { %v2375_v17 = vmul.f32 %v8266_v14, %v2367_v15 }
 0x4d5   : > { %v9944_v18 = vpop.eup %9943 }
 0x4d6   : > { %v2368_v19 = vmul.f32 %v9944_v18, %v2352_v60  ;;  %v2383_v20 = vadd.f32 %v8267_v16, %v2375_v17 }
 0x4d8   : > { %v2376_v21 = vmul.f32 %v8266_v14, %v2368_v19  ;;  %8758 = vmatprep.mubr.msk.f32.mxu1 %vm2341_vm1, %v2383_v20 }
 0x4da   : > { %v2384_v22 = vadd.f32 %v8267_v16, %v2376_v21 }
 0x4dc   : > { %8759 = vmatmul.mubr.msk.f32.vlgmr.msra.gmra.mrb[4].mxu1 %vm2341_vm1, %v2384_v22 }
 0x5af   : > { %v8760_v24 = vpop.f32.mrb[4].mxu1 }
 0x5b0   : > { %v2474_v25 = vadd.f32 %v8760_v24, %v8268_v23  ;;  %v2468_v26 = vpop.f32.mrb[5].mxu1 }
 0x5b1   : > { %v2469_v27 = vadd.f32 %v8268_v23, %v2468_v26 }
 0x5b3   : > { %8765 = vmatprep.mubr.msk.f32.mxu1 %vm2488_vm2, %v2469_v27  ;;  %v11504_v28 = vpack.i.bf16 %v2474_v25, %v2469_v27 }
 0x5b5   : > { %9852 = vrot.lane.b32.xlu0 %v11504_v28, %s12254_s11  ;;  %s12385_s11 = sld [smem:[#allocation67_spill]] }
 0x5b9   : > { %9862 = vrot.lane.b32.xlu0 %v11504_v28, %s12255_s0  ;;  %s12386_s0 = sld [smem:[#allocation66_spill]] }
 0x5bd   : > { %2683 = vrot.lane.b32.xlu0 %v2469_v27, %s12252_s1  ;;  %v2479_v27 = vld [vmem:[%s12376_s10 + $0x10] sm:$0xff] }
 0x5c1   : > { %2685 = vrot.lane.b32.xlu0 %v2474_v25, %s12252_s1  ;;  %s12381_s1 = sld [smem:[#allocation58_spill]] }
 0x627   : > { %v9853_v29 = vpop.permute.xlu0 %9852 }
 0x628   : > { %v9855_v30 = vunpack.i.h.bf16 %v9853_v29  ;;  %v9854_v31 = vunpack.i.l.bf16 %v9853_v29 }
 0x62a   : > { %v9268_v33 = vpack.c.bf16 %v9855_v30, %v9854_v31 }
 0x62b   : > { %v9863_v54 = vpop.permute.xlu0 %9862 }
 0x62c   : > { %9270 = vmatprep.subr.msk.bf16.mxu1 %vm11514_vm3, %v9268_v33  ;;  %v9865_v56 = vunpack.i.h.bf16 %v9863_v54  ;;  %v9864_v57 = vunpack.i.l.bf16 %v9863_v54 }
 0x62d   : > { %9273 = vmatpush3.bf16.xpose.msk.msra.mxu1 %vm11514_vm3, %v9268_v33 }
 0x62e   : > { %v9278_v61 = vpack.c.bf16 %v9865_v56, %v9864_v57 }
 0x62f   : > { %v2684_v3 = vpop.permute.xlu0 %2683 }
 0x633   : > { %v2686_v4 = vpop.permute.xlu0 %2685 }
 0x634   : > { %8766 = vmatmul.mubr.msk.f32.vlgmr.msra.gmra.mrb[6].mxu1 %vm2488_vm2, %v2474_v25 }
 0x707   : > { %v8767_v34 = vpop.f32.mrb[6].mxu1 }
 0x708   : > { %v2563_v35 = vpop.f32.mrb[7].mxu1  ;;  %v2573_v37 = vmul.f32 0.25, %v8767_v34 }
 0x709   : > { %v2572_v36 = vmul.f32 0.25, %v2563_v35 }
 0x70a   : > { %v2577_v39 = vsel %vm2488_vm2, %v2573_v37, -inf }
 0x70b   : > { %v2574_v38 = vsel %vm2488_vm2, %v2572_v36, -inf }
 0x70c   : > { %2575 = vmax.xlane.f32.xlu1 %v2574_v38  ;;  %v2478_v38 = vld [vmem:[%s12376_s10 + $0x8] sm:$0xff] }
 0x710   : > { %2578 = vmax.xlane.f32.xlu1 %v2577_v39 }
 0x799   : > { %v2576_v40 = vpop.xlane.xlu1 %2575 }
 0x79a   : > { %v2580_v41 = vsub.f32 %v2572_v36, %v2576_v40 }
 0x79c   : > { %v2582_v44 = vmul.f32 1.442695, %v2580_v41 }
 0x79d   : > { %v2579_v42 = vpop.xlane.xlu1 %2578 }
 0x79e   : > { %v2581_v43 = vsub.f32 %v2573_v37, %v2579_v42  ;;  %v2477_v37 = vld [vmem:[%s12376_s10] sm:$0xff] }
 0x79f   : > { %v9292_v39 = vpack.c.bf16 %v2478_v38, %v2477_v37  ;;  %v8287_v42 = vld [vmem:[%s12377_s5] ss:$0 sm:$0xff]  ;;  %s12379_s5 = sld [smem:[#allocation54_spill]] }
 0x7a0   : > { %v2584_v45 = vmul.f32 1.442695, %v2581_v43 }
 0x7a2   : > { %9945 = vpow2.f32 %v2584_v45 }
 0x7a3   : > { %9947 = vpow2.f32 %v2582_v44 }
 0x7ac   : > { %v9946_v47 = vpop.eup %9945 }
 0x7ad   : > { %v2589_v48 = vsel %vm2488_vm2, %v9946_v47, 0.0  ;;  %v9948_v49 = vpop.eup %9947 }
 0x7ae   : > { %2590 = vadd.xlane.f32.xlu1 %v2589_v48  ;;  %v2586_v50 = vsel %vm2488_vm2, %v9948_v49, 0.0 }
 0x7b2   : > { %2587 = vadd.xlane.f32.xlu1 %v2586_v50 }
 0x7c3   : > { %9857 = vrot.lane.b32.xlu1 %v11504_v28, %s12250_s23  ;;  %s12378_s23 = sld [smem:[#allocation56_spill]] }
 0x83b   : > { %v2591_v51 = vpop.xlane.xlu1 %2590 }
 0x83c   : > { %9949 = vrcp.f32 %v2591_v51 }
 0x83f   : > { %v2588_v53 = vpop.xlane.xlu1 %2587 }
 0x840   : > { %9951 = vrcp.f32 %v2588_v53 }
 0x843   : > { %v9858_v55 = vpop.permute.xlu1 %9857 }
 0x844   : > { %v9860_v58 = vunpack.i.h.bf16 %v9858_v55  ;;  %v9859_v59 = vunpack.i.l.bf16 %v9858_v55 }
 0x846   : > { %v9274_v60 = vpack.c.bf16 %v9860_v58, %v9859_v59  ;;  %v9950_v62 = vpop.eup %9949 }
 0x847   : > { %v2595_v2 = vmul.f32 %v9950_v62, %v9946_v47  ;;  %v3102_v62 = vld [vmem:[%s12378_s23 + $0x8] sm:$0xff] }
 0x848   : > { %9275 = vmatprep.subr.bf16.mxu1 %v9274_v60 }
 0x849   : > { %9277 = vmatpush3.bf16.msra.mxu1 %v9274_v60 }
 0x84a   : > { %v9952_v63 = vpop.eup %9951  ;;  %9280 = vmatprep.subr.msk.bf16.mxu1 %vm11514_vm3, %v9278_v61 }
 0x84b   : > { %v2593_v1 = vmul.f32 %v9952_v63, %v9948_v49 }
 0x84d   : > { %8772 = vmatprep.mubr.msk.f32.mxu1 %vm2488_vm2, %v2593_v1  ;;  %v3103_v1 = vld [vmem:[%s12378_s23 + $0x10] sm:$0xff] }
 0x84e   : > { %8773 = vmatmul.mubr.msk.f32.vlgmr.msra.gmra.mrb[8].mxu1 %vm2488_vm2, %v2595_v2  ;;  %v3104_v2 = vld [vmem:[%s12378_s23 + $0x18] sm:$0xff] }
 0x84f   : > { %8779 = vmatprep.mubr.msk.f32.mxu1 %vm2488_vm2, %v2684_v3  ;;  %v9300_v3 = vpack.c.bf16 %v3104_v2, %v3103_v1  ;;  %v10768_v1 = vmov 0.0  }
 0x852   : > { %9283 = vmatpush3.bf16.xpose.msk.msra.mxu1 %vm11514_vm3, %v9278_v61  ;;  %v3101_v61 = vld [vmem:[%s12378_s23] sm:$0xff] }
 0x853   : > { %v9296_v63 = vpack.c.bf16 %v3102_v62, %v3101_v61 }
 0x859   : > { %8780 = vmatmul.mubr.msk.f32.vlgmr.msra.gmra.mrb[10].mxu1 %vm2488_vm2, %v2686_v4 }
 0x921   : > { %v8774_v5 = vpop.f32.mrb[8].mxu1 }
 0x922   : > { %v2674_v6 = vpop.f32.mrb[9].mxu1 }
 0x92c   : > { %v8781_v7 = vpop.f32.mrb[10].mxu1 }
 0x92d   : > { %v2775_v8 = vmul.f32 0.25, %v8781_v7  ;;  %v2765_v9 = vpop.f32.mrb[11].mxu1 }
 0x92e   : > { %v2774_v10 = vmul.f32 0.25, %v2765_v9 }
 0x92f   : > { %v2779_v11 = vsel %vm2488_vm2, %v2775_v8, -inf }
 0x930   : > { %2780 = vmax.xlane.f32.xlu0 %v2779_v11  ;;  %v2776_v12 = vsel %vm2488_vm2, %v2774_v10, -inf  ;;  %v8288_v11 = vld [vmem:[%s12379_s5] ss:$0 sm:$0xff]  ;;  %s12382_s5 = sld [smem:[#allocation60_spill]] }
 0x931   : > { %2777 = vmax.xlane.f32.xlu1 %v2776_v12 }
 0x936   : > { %v3311_v61 = vld [vmem:[%s12382_s5 + $0x10] sm:$0xff]  ;;  %v3312_v62 = vld [vmem:[%s12382_s5 + $0x18] sm:$0xff] }
 0x942   : > { %9867 = vrot.lane.b32.xlu1 %v11504_v28, %s12251_s2  ;;  %v2480_v28 = vld [vmem:[%s12376_s10 + $0x18] sm:$0xff]  ;;  %s12380_s2 = sld [smem:[#allocation55_spill]] }
 0x943   : > { %v9288_v29 = vpack.c.bf16 %v2480_v28, %v2479_v27  ;;  %v3216_v27 = vld [vmem:[%s12381_s1 + $0x28] sm:$0xff] }
 0x9bd   : > { %v2781_v13 = vpop.xlane.xlu0 %2780 }
 0x9be   : > { %v2783_v14 = vsub.f32 %v2775_v8, %v2781_v13  ;;  %v2778_v15 = vpop.xlane.xlu1 %2777  ;;  %v8289_v13 = vld [vmem:[%s12380_s2] ss:$0 sm:$0xff]  ;;  %s12383_s2 = sld [smem:[#allocation57_spill]] }
 0x9bf   : > { %v2782_v16 = vsub.f32 %v2774_v10, %v2778_v15 }
 0x9c0   : > { %v2786_v17 = vmul.f32 1.442695, %v2783_v14 }
 0x9c1   : > { %v2784_v18 = vmul.f32 1.442695, %v2782_v16 }
 0x9c2   : > { %v9868_v19 = vpop.permute.xlu1 %9867 }
 0x9c3   : > { %9953 = vpow2.f32 %v2784_v18  ;;  %v9870_v20 = vunpack.i.h.bf16 %v9868_v19  ;;  %v9869_v21 = vunpack.i.l.bf16 %v9868_v19 }
 0x9c4   : > { %9955 = vpow2.f32 %v2786_v17 }
 0x9c5   : > { %v9284_v22 = vpack.c.bf16 %v9870_v20, %v9869_v21  ;;  %v3211_v20 = vld [vmem:[%s12381_s1] sm:$0xff]  ;;  %v3212_v21 = vld [vmem:[%s12381_s1 + $0x8] sm:$0xff] }
 0x9c7   : > { %9285 = vmatprep.subr.bf16.mxu1 %v9284_v22 }
 0x9c8   : > { %9287 = vmatpush3.bf16.msra.mxu1 %v9284_v22  ;;  %v3213_v22 = vld [vmem:[%s12381_s1 + $0x10] sm:$0xff] }
 0x9c9   : > { %9289 = vmatprep.subr.bf16.mxu1 %v9288_v29 }
 0x9cd   : > { %v9954_v23 = vpop.eup %9953 }
 0x9ce   : > { %v2788_v24 = vsel %vm2488_vm2, %v9954_v23, 0.0  ;;  %v9956_v25 = vpop.eup %9955 }
 0x9cf   : > { %2789 = vadd.xlane.f32.xlu0 %v2788_v24  ;;  %v2791_v26 = vsel %vm2488_vm2, %v9956_v25, 0.0  ;;  %v3214_v24 = vld [vmem:[%s12381_s1 + $0x18] sm:$0xff] }
 0x9d3   : > { %2792 = vadd.xlane.f32.xlu0 %v2791_v26  ;;  %v3215_v26 = vld [vmem:[%s12381_s1 + $0x20] sm:$0xff] }
 0x9d4   : > { %v9312_v28 = vpack.c.bf16 %v3216_v27, %v3215_v26 }
 0xa5c   : > { %v2790_v30 = vpop.xlane.xlu0 %2789 }
 0xa5d   : > { %9957 = vrcp.f32 %v2790_v30  ;;  %v3218_v30 = vld [vmem:[%s12381_s1 + $0x38] sm:$0xff] }
 0xa60   : > { %v2793_v31 = vpop.xlane.xlu0 %2792 }
 0xa61   : > { %9959 = vrcp.f32 %v2793_v31 }
 0xa67   : > { %v9958_v33 = vpop.eup %9957 }
 0xa68   : > { %v2795_v34 = vmul.f32 %v9958_v33, %v9954_v23  ;;  %v9304_v23 = vpack.c.bf16 %v3212_v21, %v3211_v20  ;;  %v3309_v33 = vld [vmem:[%s12382_s5] sm:$0xff] }
 0xa6a   : > { %8786 = vmatprep.mubr.msk.f32.mxu1 %vm2488_vm2, %v2795_v34  ;;  %9305 = vmatprep.subr.bf16.mxu0 %v9304_v23  ;;  %v3310_v34 = vld [vmem:[%s12382_s5 + $0x8] sm:$0xff]  ;;  %s12398_s5 = sld [smem:[#allocation64_spill]] }
 0xa6b   : > { %v9960_v35 = vpop.eup %9959  ;;  %9307 = vmatpush3.bf16.msra.mxu0 %v9304_v23 }
 0xa6c   : > { %v2797_v36 = vmul.f32 %v9960_v35, %v9956_v25  ;;  %v9308_v25 = vpack.c.bf16 %v3214_v24, %v3213_v22  ;;  %v9320_v35 = vpack.c.bf16 %v3310_v34, %v3309_v33 }
 0xa6e   : > { %8787 = vmatmul.mubr.msk.f32.vlgmr.msra.gmra.mrb[12].mxu1 %vm2488_vm2, %v2797_v36  ;;  %9309 = vmatprep.subr.bf16.mxu0 %v9308_v25  ;;  %v8290_v36 = vld [vmem:[%s12383_s2] ss:$0 sm:$0xff]  ;;  %s12384_s2 = sld [smem:[#allocation59_spill]] }
 0xa6f   : > { %9291 = vmatpush3.bf16.msra.mxu1 %v9288_v29  ;;  %v3217_v29 = vld [vmem:[%s12381_s1 + $0x30] sm:$0xff]  ;;  %9311 = vmatpush3.bf16.msra.mxu0 %v9308_v25  ;;  %s12387_s1 = sld [smem:[#allocation61_spill]] }
 0xa70   : > { %9293 = vmatprep.subr.bf16.mxu1 %v9292_v39  ;;  %9313 = vmatprep.subr.bf16.mxu0 %v9312_v28  ;;  %v9316_v31 = vpack.c.bf16 %v3218_v30, %v3217_v29 }
 0xa73   : > { %9315 = vmatpush3.bf16.msra.mxu0 %v9312_v28 }
 0xa74   : > { %9317 = vmatprep.subr.bf16.mxu0 %v9316_v31  ;;  %v8293_v2 = vld [vmem:[%s12384_s2] ss:$0 sm:$0xff]  ;;  %s12389_s2 = smov 80  }
 0xa77   : > { %9319 = vmatpush3.bf16.msra.mxu0 %v9316_v31 }
 0xa78   : > { %8855 = vmatprep.subr.mxu0 %v10768_v1 }
 0xb41   : > { %v8788_v40 = vpop.f32.mrb[12].mxu1 }
 0xb42   : > { %v2876_v41 = vpop.f32.mrb[13].mxu1 }
 0xb43   : > { %8793 = vmatprep.mubr.msk.f32.mxu1 %vm2488_vm2, %v2876_v41 }
 0xb44   : > { %8794 = vmatmul.mubr.msk.f32.vlgmr.msra.gmra.mrb[14].mxu1 %vm2488_vm2, %v8788_v40 }
 0xb45   : > { %9295 = vmatpush3.bf16.msra.mxu1 %v9292_v39  ;;  %8800 = vmatprep.mubr.msk.f32.mxu1 %vm2488_vm2, %v2674_v6 }
 0xb46   : > { %9297 = vmatprep.subr.bf16.mxu1 %v9296_v63 }
 0xb4c   : > { %8801 = vmatmul.mubr.msk.f32.vlgmr.msra.gmra.mrb[14].mxu1 %vm2488_vm2, %v8774_v5 }
 0xb4d   : > { %9299 = vmatpush3.bf16.msra.mxu1 %v9296_v63  ;;  %v9324_v63 = vpack.c.bf16 %v3312_v62, %v3311_v61 }
 0xb4e   : > { %9301 = vmatprep.subr.bf16.mxu1 %v9300_v3 }
 0xb51   : > { %9303 = vmatpush3.bf16.msra.mxu1 %v9300_v3 }
 0xb52   : > { %9321 = vmatprep.subr.bf16.mxu1 %v9320_v35 }
 0xc1f   : > { %v8802_v43 = vpop.f32.mrb[14].mxu1 }
 0xc20   : > { %v3038_v44 = vpop.f32.mrb[15].mxu1  ;;  %v3054_v45 = vadd.f32 %v8802_v43, %v8287_v42 }
 0xc21   : > { %v3053_v47 = vadd.f32 %v8287_v42, %v3038_v44 }
 0xc22   : > { %v11558_v49 = vadd.f32 %v3054_v45, %v11486_v52 }
 0xc23   : > { %v11555_v48 = vadd.f32 %v3053_v47, %v11481_v46 }
 0xc24   : > { %v3062_v51 = vsel %vm2341_vm1, %v11558_v49, 0.0 }
 0xc25   : > { %v3059_v50 = vsel %vm2341_vm1, %v11555_v48, 0.0 }
 0xc26   : > { %3060 = vadd.xlane.f32.xlu0 %v3059_v50 }
 0xc2a   : > { %3063 = vadd.xlane.f32.xlu0 %v3062_v51 }
 0xcb3   : > { %v3061_v53 = vpop.xlane.xlu0 %3060 }
 0xcb4   : > { %v3065_v54 = vmul.f32 0.03125, %v3061_v53 }
 0xcb6   : > { %v3067_v55 = vsub.f32 %v11555_v48, %v3065_v54 }
 0xcb7   : > { %v3064_v46 = vpop.xlane.xlu0 %3063 }
 0xcb8   : > { %v3066_v56 = vmul.f32 0.03125, %v3064_v46  ;;  %v3069_v52 = vmul.f32 %v3067_v55, %v3067_v55 }
 0xcba   : > { %v3068_v57 = vsub.f32 %v11558_v49, %v3066_v56  ;;  %v3071_v58 = vsel %vm2341_vm1, %v3069_v52, 0.0 }
 0xcbb   : > { %3072 = vadd.xlane.f32.xlu0 %v3071_v58 }
 0xcbc   : > { %v3070_v59 = vmul.f32 %v3068_v57, %v3068_v57 }
 0xcbe   : > { %v3074_v60 = vsel %vm2341_vm1, %v3070_v59, 0.0 }
 0xcbf   : > { %3075 = vadd.xlane.f32.xlu0 %v3074_v60 }
 0xd48   : > { %v3073_v4 = vpop.xlane.xlu0 %3072 }
 0xd49   : > { %v3077_v5 = vmul.f32 0.03125, %v3073_v4 }
 0xd4b   : > { %v3079_v6 = vadd.f32 1e-06, %v3077_v5 }
 0xd4c   : > { %v3076_v7 = vpop.xlane.xlu0 %3075 }
 0xd4d   : > { %9961 = vrsqrt.f32 %v3079_v6  ;;  %v3078_v8 = vmul.f32 0.03125, %v3076_v7  ;;  %v3459_v6 = vld [vmem:[%s12385_s11] sm:$0xff]  ;;  %v3460_v7 = vld [vmem:[%s12385_s11 + $0x8] sm:$0xff] }
 0xd4f   : > { %v3080_v9 = vadd.f32 1e-06, %v3078_v8 }
 0xd51   : > { %9963 = vrsqrt.f32 %v3080_v9 }
 0xd57   : > { %v9962_v10 = vpop.eup %9961 }
 0xd58   : > { %v3083_v12 = vmul.f32 %v9962_v10, %v3067_v55  ;;  %v9329_v10 = vpack.c.bf16 %v3460_v7, %v3459_v6 }
 0xd5a   : > { %v3091_v14 = vmul.f32 %v8288_v11, %v3083_v12  ;;  %v3461_v12 = vld [vmem:[%s12385_s11 + $0x10] sm:$0xff] }
 0xd5b   : > { %v9964_v15 = vpop.eup %9963 }
 0xd5c   : > { %v3084_v16 = vmul.f32 %v9964_v15, %v3068_v57  ;;  %v3099_v17 = vadd.f32 %v8289_v13, %v3091_v14 }
 0xd5e   : > { %v3092_v18 = vmul.f32 %v8288_v11, %v3084_v16  ;;  %8811 = vmatprep.mubr.msk.f32.mxu1 %vm2341_vm1, %v3099_v17 }
 0xd60   : > { %v3100_v19 = vadd.f32 %v8289_v13, %v3092_v18  ;;  %v3462_v13 = vld [vmem:[%s12385_s11 + $0x18] sm:$0xff]  ;;  %v8302_v18 = vld [vmem:[%s12388_s3] ss:$0 sm:$0xff]  ;;  %s12392_s3 = smov 48  }
 0xd61   : > { %v9332_v14 = vpack.c.bf16 %v3462_v13, %v3461_v12 }
 0xd62   : > { %8812 = vmatmul.mubr.msk.f32.vlgmr.msra.gmra.mrb[16].mxu1 %vm2341_vm1, %v3100_v19 }
 0xd63   : > { %9323 = vmatpush3.bf16.msra.mxu1 %v9320_v35 }
 0xd64   : > { %9325 = vmatprep.subr.bf16.mxu1 %v9324_v63 }
 0xd67   : > { %9327 = vmatpush3.bf16.msra.mxu1 %v9324_v63 }
 0xd68   : > { %9328 = vmatprep.subr.bf16.mxu1 %v10762_v0 }
 0xe35   : > { %v8813_v37 = vpop.f32.mrb[16].mxu1 }
 0xe36   : > { %v3190_v38 = vadd.f32 %v8813_v37, %v8290_v36  ;;  %v3184_v39 = vpop.f32.mrb[17].mxu1 }
 0xe37   : > { %v3185_v40 = vadd.f32 %v8290_v36, %v3184_v39 }
 0xe38   : > { %v3194_v41 = vmul.f32 %v3190_v38, %v3190_v38 }
 0xe39   : > { %v3193_v42 = vmul.f32 %v3185_v40, %v3185_v40 }
 0xe3a   : > { %v3196_v43 = vmul.f32 %v3194_v41, %v3190_v38 }
 0xe3b   : > { %v3195_v44 = vmul.f32 %v3193_v42, %v3185_v40 }
 0xe3c   : > { %v3198_v45 = vmul.f32 0.044715, %v3196_v43 }
 0xe3d   : > { %v3197_v47 = vmul.f32 0.044715, %v3195_v44 }
 0xe3e   : > { %v3200_v50 = vadd.f32 %v3198_v45, %v3190_v38 }
 0xe3f   : > { %v3199_v51 = vadd.f32 %v3197_v47, %v3185_v40 }
 0xe40   : > { %v3202_v53 = vmul.f32 0.7978846, %v3200_v50 }
 0xe41   : > { %v3201_v54 = vmul.f32 0.7978846, %v3199_v51 }
 0xe42   : > { %9965 = vtanh.f32 %v3202_v53 }
 0xe43   : > { %9967 = vtanh.f32 %v3201_v54 }
 0xe4c   : > { %v9966_v55 = vpop.eup %9965 }
 0xe4d   : > { %v9968_v46 = vpop.eup %9967  ;;  %v3206_v56 = vadd.f32 1.0, %v9966_v55 }
 0xe4e   : > { %v3205_v52 = vadd.f32 1.0, %v9968_v46 }
 0xe4f   : > { %v3208_v57 = vmul.f32 0.5, %v3206_v56 }
 0xe50   : > { %v3207_v58 = vmul.f32 0.5, %v3205_v52 }
 0xe51   : > { %v3210_v60 = vmul.f32 %v3208_v57, %v3190_v38 }
 0xe52   : > { %v3209_v59 = vmul.f32 %v3207_v58, %v3185_v40 }
 0xe54   : > { %8830 = vmatprep.mubr.msk.f32.mxu0 %vm2253_vm0, %v3209_v59 }
 0xe55   : > { %8831 = vmatmul.mubr.msk.f32.vlgmr.msra.gmra.mrb[0].mxu0 %vm2253_vm0, %v3210_v60 }
 0xe56   : > { %8857 = vmatprep.mubr.msk.f32.mxu0 %vm10769_vm4, %v10768_v1 }
 0xf28   : > { %v8832_v3 = vpop.f32.mrb[0].mxu0 }
 0xf29   : > { %v3304_v4 = vadd.f32 %v8832_v3, %v8293_v2  ;;  %v3298_v5 = vpop.f32.mrb[1].mxu0 }
 0xf2a   : > { %v3299_v8 = vadd.f32 %v8293_v2, %v3298_v5 }
 0xf2b   : > { %v3308_v11 = vadd.f32 %v3304_v4, %v11558_v49  ;;  %v8296_v49 = vld [vmem:[%s12387_s1] ss:$0 sm:$0xff]  ;;  %s12393_s1 = smov 64  }
 0xf2c   : > { %v3307_v9 = vadd.f32 %v3299_v8, %v11555_v48  ;;  %v11608_v48 = vld [vmem:[%s12386_s0] sm:$0x1f]  ;;  %s12390_s0 = smov 96  }
 0xf2e   : > { %8841 = vmatprep.mubr.msk.f32.mxu1 %vm2341_vm1, %v3307_v9 }
 0xf2f   : > { %8842 = vmatmul.mubr.msk.f32.vlgmr.msra.gmra.mrb[18].mxu1 %vm2341_vm1, %v3308_v11 }
 0xf30   : > { %9330 = vmatpush3.bf16.msra.mxu1 %v9329_v10  ;;  %8852 = vmatprep.mubr.msk.f32.mxu1 %vm10769_vm4, %v10768_v1 }
 0xf31   : > { %9331 = vmatprep.subr.bf16.mxu1 %v10762_v0 }
 0xf34   : > { %9333 = vmatpush3.bf16.msra.mxu1 %v9332_v14 }
 0xf35   : > { %8860 = vmatprep.subr.mxu1 %v10768_v1 }
 0xf37   : > { %8853 = vmatmul.mubr.msk.f32.vlgmr.msra.gmra.mrb[20].mxu1 %vm2341_vm1, %v11608_v48 }
 0xf38   : > { %8862 = vmatprep.mubr.msk.f32.mxu1 %vm10769_vm4, %v10768_v1 }
0x1002   : > { %v8843_v15 = vpop.f32.mrb[18].mxu1 }
0x1003   : > { %v3392_v16 = vpop.f32.mrb[19].mxu1  ;;  %v11635_v34 = vadd.f32 %v8843_v15, %v8296_v49 }
0x1004   : > { %v11616_v17 = vadd.f32 %v8296_v49, %v3392_v16 }
0x1005   : > { %v3406_v35 = vsel %vm2341_vm1, %v11635_v34, 0.0 }
0x1006   : > { %v3403_v47 = vsel %vm2341_vm1, %v11616_v17, 0.0 }
0x100a   : > { %v3539_v19 = vpop.f32.mrb[20].mxu1 }
0x100b   : > { %v3540_v20 = vadd.f32 %v8302_v18, %v3539_v19  ;;  %v8854_v21 = vpop.f32.mrb[21].mxu1  ;;  %v3454_v18 = vld [vmem:[%s12398_s5] sm:$0xff] }
0x100d   : > { %3719 = vrot.lane.b32.xlu0 %v3540_v20, %s12389_s2  ;;  %3549 = vrot.lane.b32.xlu1 %v3540_v20, %s12390_s0  ;;  %s12394_s2 = sld [smem:[#allocation69_spill]]  ;;  %s12395_s0 = sld [smem:[#allocation62_spill]] }
0x1011   : > { %3717 = vrot.lane.b32.xlu1 %v3540_v20, %s12391_s4 }
0x1013   : > { %v3543_v62 = vld [vmem:[%s12394_s2] sm:$0xff]  ;;  %v3544_v63 = vld [vmem:[%s12394_s2 + $0x8] sm:$0xff]  ;;  %v3545_v3 = vld [vmem:[%s12394_s2 + $0x10] sm:$0xff] }
0x1014   : > { %v9338_v2 = vpack.c.bf16 %v3544_v63, %v3543_v62  ;;  %v3546_v4 = vld [vmem:[%s12394_s2 + $0x18] sm:$0xff]  ;;  %v8299_v11 = vld [vmem:[%s12395_s0] ss:$0 sm:$0xff]  ;;  %s12400_s0 = sld [smem:[#allocation75_spill]]  ;;  %s12413_s2 = sld [smem:[#allocation97_spill]] }
0x1015   : > { %v9335_v5 = vpack.c.bf16 %v3546_v4, %v3545_v3 }
0x107f   : > { %v3550_v22 = vpop.permute.xlu1 %3549  ;;  %v3720_v23 = vpop.permute.xlu0 %3719 }
0x1080   : > { %8856 = vmatpush3.xpose.msk.msra.mxu0 %vm2488_vm2, %v3550_v22 }
0x1081   : > { %8865 = vmatprep.subr.mxu0 %v10768_v1 }
0x1083   : > { %8858 = vmatmul.mubr.msk.f32.vlgmr.msra.gmra.mrb[2].mxu0 %vm2488_vm2, %v3540_v20  ;;  %v3718_v24 = vpop.permute.xlu1 %3717 }
0x1084   : > { %8866 = vmatpush3.xpose.msk.msra.mxu0 %vm2488_vm2, %v3720_v23  ;;  %8867 = vmatprep.mubr.msk.f32.mxu0 %vm10769_vm4, %v10768_v1 }
0x1085   : > { %9334 = vmatprep.subr.bf16.mxu0 %v10762_v0 }
0x1087   : > { %8868 = vmatmul.mubr.msk.f32.vlgmr.msra.gmra.mrb[4].mxu0 %vm2488_vm2, %v3718_v24 }
0x1088   : > { %8879 = vmatprep.mubr.msk.f32.mxu0 %vm10769_vm4, %v10768_v1  ;;  %9336 = vmatpush3.bf16.msra.mxu0 %v9335_v5 }
0x1089   : > { %9340 = vmatprep.subr.bf16.mxu0 %v10762_v0 }
0x1156   : > { %v3621_v25 = vpop.f32.mrb[2].mxu0 }
0x1157   : > { %v3625_v26 = vmul.f32 0.25, %v3621_v25  ;;  %v8859_v27 = vpop.f32.mrb[3].mxu0 }
0x1159   : > { %v3627_v28 = vsel %vm3626_vm5, %v3625_v26, -inf }
0x115a   : > { %3628 = vmax.xlane.f32.xlu1 %v3627_v28  ;;  %v3791_v29 = vpop.f32.mrb[4].mxu0 }
0x115b   : > { %v3795_v30 = vmul.f32 0.25, %v3791_v29  ;;  %v8869_v31 = vpop.f32.mrb[5].mxu0 }
0x115d   : > { %v3796_v33 = vsel %vm3626_vm5, %v3795_v30, -inf }
0x115e   : > { %3797 = vmax.xlane.f32.xlu0 %v3796_v33 }
0x1174   : > { %3807 = vrot.lane.b32.xlu0 %v3540_v20, %s12392_s3  ;;  %s12396_s3 = sld [smem:[#allocation63_spill]] }
0x117a   : > { %v8300_v13 = vld [vmem:[%s12396_s3] ss:$0 sm:$0xff]  ;;  %s12402_s3 = sld [smem:[#allocation76_spill]] }
0x1180   : > { %v4245_v4 = vld [vmem:[%s12402_s3 + $0x8] sm:$0xff] }
0x1193   : > { %3407 = vadd.xlane.f32.xlu0 %v3406_v35 }
0x11e7   : > { %v3629_v36 = vpop.xlane.xlu1 %3628 }
0x11e8   : > { %v3630_v37 = vsub.f32 %v3625_v26, %v3629_v36  ;;  %v8314_v26 = vld [vmem:[%s12399_s6] ss:$0 sm:$0xff]  ;;  %s12401_s6 = sld [smem:[#allocation73_spill]] }
0x11ea   : > { %v3631_v38 = vmul.f32 1.442695, %v3630_v37 }
0x11eb   : > { %v3798_v39 = vpop.xlane.xlu0 %3797 }
0x11ec   : > { %9969 = vpow2.f32 %v3631_v38  ;;  %v3799_v40 = vsub.f32 %v3795_v30, %v3798_v39  ;;  %v4152_v38 = vld [vmem:[%s12400_s0] sm:$0xff]  ;;  %v4153_v39 = vld [vmem:[%s12400_s0 + $0x8] sm:$0xff] }
0x11ee   : > { %v3800_v41 = vmul.f32 1.442695, %v3799_v40  ;;  %v9346_v40 = vpack.c.bf16 %v4153_v39, %v4152_v38  ;;  %v4070_v62 = vld [vmem:[%s12401_s6 + $0x10] sm:$0xff]  ;;  %v4071_v63 = vld [vmem:[%s12401_s6 + $0x18] sm:$0xff] }
0x11ef   : > { %v3808_v46 = vpop.permute.xlu0 %3807  ;;  %v9344_v3 = vpack.c.bf16 %v4071_v63, %v4070_v62 }
0x11f0   : > { %9971 = vpow2.f32 %v3800_v41  ;;  %v4154_v41 = vld [vmem:[%s12400_s0 + $0x10] sm:$0xff] }
0x11f6   : > { %v9970_v42 = vpop.eup %9969 }
0x11f7   : > { %v3633_v43 = vsel %vm3626_vm5, %v9970_v42, 0.0 }
0x11f8   : > { %3634 = vadd.xlane.f32.xlu1 %v3633_v43 }
0x11fa   : > { %v9972_v44 = vpop.eup %9971 }
0x11fb   : > { %v3802_v45 = vsel %vm3626_vm5, %v9972_v44, 0.0 }
0x11fc   : > { %3803 = vadd.xlane.f32.xlu1 %v3802_v45 }
0x120d   : > { %3638 = vrot.lane.b32.xlu1 %v3540_v20, %s12393_s1  ;;  %s12397_s1 = sld [smem:[#allocation65_spill]] }
0x1213   : > { %v8301_v15 = vld [vmem:[%s12397_s1] ss:$0 sm:$0xff]  ;;  %s12403_s1 = sld [smem:[#allocation71_spill]] }
0x1220   : > { %v3408_v6 = vpop.xlane.xlu0 %3407 }
0x1221   : > { %v3410_v25 = vmul.f32 0.03125, %v3408_v6 }
0x1223   : > { %v3412_v30 = vsub.f32 %v11635_v34, %v3410_v25 }
0x1225   : > { %v3414_v36 = vmul.f32 %v3412_v30, %v3412_v30 }
0x1227   : > { %v3418_v37 = vsel %vm2341_vm1, %v3414_v36, 0.0 }
0x1231   : > { %3404 = vadd.xlane.f32.xlu1 %v3403_v47 }
0x1285   : > { %v3635_v50 = vpop.xlane.xlu1 %3634 }
0x1286   : > { %9973 = vrcp.f32 %v3635_v50 }
0x1289   : > { %v3804_v51 = vpop.xlane.xlu1 %3803 }
0x128a   : > { %9975 = vrcp.f32 %v3804_v51 }
0x128d   : > { %v3639_v53 = vpop.permute.xlu1 %3638 }
0x128e   : > { %8861 = vmatpush3.msk.msra.mxu1 %vm3644_vm6, %v3639_v53 }
0x128f   : > { %8870 = vmatprep.subr.mxu1 %v10768_v1 }
0x1290   : > { %v9974_v54 = vpop.eup %9973 }
0x1291   : > { %v3637_v55 = vmul.f32 %v9974_v54, %v9970_v42  ;;  %v4155_v42 = vld [vmem:[%s12400_s0 + $0x18] sm:$0xff]  ;;  %s12404_s0 = sld [smem:[#allocation72_spill]] }
0x1292   : > { %v9350_v43 = vpack.c.bf16 %v4155_v42, %v4154_v41 }
0x1293   : > { %8863 = vmatmul.mubr.msk.f32.vlgmr.msra.gmra.mrb[22].mxu1 %vm3640_vm7, %v3637_v55 }
0x1294   : > { %v9976_v56 = vpop.eup %9975  ;;  %8871 = vmatpush3.msk.msra.mxu1 %vm3644_vm6, %v3808_v46  ;;  %8872 = vmatprep.mubr.msk.f32.mxu1 %vm10769_vm4, %v10768_v1 }
0x1295   : > { %v3806_v52 = vmul.f32 %v9976_v56, %v9972_v44  ;;  %9337 = vmatprep.subr.bf16.mxu1 %v10762_v0 }
0x1297   : > { %8873 = vmatmul.mubr.msk.f32.vlgmr.msra.gmra.mrb[24].mxu1 %vm3640_vm7, %v3806_v52  ;;  %v3455_v52 = vld [vmem:[%s12398_s5 + $0x8] sm:$0xff] }
0x1298   : > { %8886 = vmatprep.mubr.msk.f32.mxu1 %vm10769_vm4, %v10768_v1  ;;  %9339 = vmatpush3.bf16.msra.mxu1 %v9338_v2  ;;  %v4244_v2 = vld [vmem:[%s12402_s3] sm:$0xff] }
0x1299   : > { %9347 = vmatprep.subr.bf16.mxu1 %v9346_v40  ;;  %v9354_v5 = vpack.c.bf16 %v4245_v4, %v4244_v2 }
0x12be   : > { %v3405_v57 = vpop.xlane.xlu1 %3404 }
0x12bf   : > { %v3409_v58 = vmul.f32 0.03125, %v3405_v57 }
0x12c1   : > { %v3411_v59 = vsub.f32 %v11616_v17, %v3409_v58 }
0x12c3   : > { %v3413_v60 = vmul.f32 %v3411_v59, %v3411_v59 }
0x12c5   : > { %v3415_v61 = vsel %vm2341_vm1, %v3413_v60, 0.0  ;;  %v4069_v60 = vld [vmem:[%s12401_s6 + $0x8] sm:$0xff] }
0x12c6   : > { %3416 = vadd.xlane.f32.xlu0 %v3415_v61 }
0x1353   : > { %v3417_v7 = vpop.xlane.xlu0 %3416 }
0x1354   : > { %v3421_v8 = vmul.f32 0.03125, %v3417_v7 }
0x1356   : > { %v3423_v9 = vadd.f32 1e-06, %v3421_v8 }
0x1358   : > { %9977 = vrsqrt.f32 %v3423_v9 }
0x1362   : > { %v9978_v10 = vpop.eup %9977 }
0x1363   : > { %v3427_v12 = vmul.f32 %v9978_v10, %v3411_v59  ;;  %v4068_v59 = vld [vmem:[%s12401_s6] sm:$0xff] }
0x1364   : > { %v9341_v61 = vpack.c.bf16 %v4069_v60, %v4068_v59  ;;  %v8315_v10 = vld [vmem:[%s12403_s1] ss:$0 sm:$0xff]  ;;  %s12406_s1 = sld [smem:[#allocation79_spill]] }
0x1365   : > { %v3435_v14 = vmul.f32 %v8299_v11, %v3427_v12  ;;  %v8316_v12 = vld [vmem:[%s12404_s0] ss:$0 sm:$0xff]  ;;  %s12405_s0 = sld [smem:[#allocation77_spill]] }
0x1366   : > { %v3713_v49 = vpop.f32.mrb[22].mxu1 }
0x1367   : > { %v8864_v16 = vpop.f32.mrb[23].mxu1  ;;  %8887 = vmatmul.mubr.msk.f32.vlgmr.msra.gmra.mrb[26].mxu1 %vm2488_vm2, %v3713_v49  ;;  %v3443_v17 = vadd.f32 %v8300_v13, %v3435_v14  ;;  %v4247_v14 = vld [vmem:[%s12402_s3 + $0x18] sm:$0xff] }
0x1368   : > { %9349 = vmatpush3.bf16.msra.mxu1 %v9346_v40 }
0x1369   : > { %v3452_v19 = vadd.f32 %v8301_v15, %v3443_v17  ;;  %9351 = vmatprep.subr.bf16.mxu1 %v9350_v43  ;;  %v8319_v17 = vld [vmem:[#allocation4] ss:$0 sm:$0xff] }
0x136a   : > { %v3880_v20 = vpop.f32.mrb[24].mxu1 }
0x136b   : > { %v8874_v21 = vpop.f32.mrb[25].mxu1  ;;  %8880 = vmatmul.mubr.msk.f32.vlgmr.msra.gmra.mrb[6].mxu0 %vm2488_vm2, %v3880_v20  ;;  %v11667_v22 = vadd.f32 %v3454_v18, %v3452_v19  ;;  %v4330_v62 = vld [vmem:[%s12405_s0] sm:$0xff]  ;;  %v4331_v63 = vld [vmem:[%s12405_s0 + $0x8] sm:$0xff] }
0x136c   : > { %8897 = vmatprep.mubr.msk.f32.mxu0 %vm10769_vm4, %v10768_v1  ;;  %9353 = vmatpush3.bf16.msra.mxu1 %v9350_v43  ;;  %v9380_v2 = vpack.c.bf16 %v4331_v63, %v4330_v62 }
0x136d   : > { %8908 = vmatprep.mubr.msk.f32.mxu1 %vm2341_vm1, %v11667_v22  ;;  %9362 = vmatprep.subr.bf16.mxu1 %v10762_v0 }
0x136e   : > { %9342 = vmatpush3.bf16.msra.mxu0 %v9341_v61 }
0x136f   : > { %9343 = vmatprep.subr.bf16.mxu0 %v10762_v0 }
0x1372   : > { %9345 = vmatpush3.bf16.msra.mxu0 %v9344_v3 }
0x1373   : > { %9355 = vmatprep.subr.bf16.mxu0 %v9354_v5 }
0x143a   : > { %v4026_v23 = vpop.f32.mrb[26].mxu1 }
0x143b   : > { %v8888_v24 = vpop.f32.mrb[27].mxu1 }
0x143e   : > { %v3953_v27 = vpop.f32.mrb[6].mxu0 }
0x143f   : > { %v4027_v28 = vadd.f32 %v4026_v23, %v3953_v27  ;;  %v8881_v29 = vpop.f32.mrb[7].mxu0 }
0x1441   : > { %v4036_v31 = vadd.f32 %v8314_v26, %v4027_v28  ;;  %v8317_v28 = vld [vmem:[#allocation2] ss:$0 sm:$0xff] }
0x1443   : > { %v4037_v33 = vadd.f32 %v4036_v31, %v11608_v48 }
0x1445   : > { %v4041_v35 = vsel %vm4040_vm8, %v4037_v33, 0.0 }
0x1446   : > { %4042 = vadd.xlane.f32.xlu1 %v4041_v35  ;;  %v8322_v35 = vld [vmem:[#allocation6] ss:$0 sm:$0xff] }
0x144a   : > { %3419 = vadd.xlane.f32.xlu1 %v3418_v37 }
0x14d3   : > { %v4043_v48 = vpop.xlane.xlu1 %4042 }
0x14d4   : > { %v4044_v34 = vmul.f32 0.03125, %v4043_v48 }
0x14d6   : > { %v4045_v44 = vsub.f32 %v4037_v33, %v4044_v34 }
0x14d7   : > { %v3420_v45 = vpop.xlane.xlu1 %3419 }
0x14d8   : > { %v3422_v47 = vmul.f32 0.03125, %v3420_v45  ;;  %v4046_v50 = vmul.f32 %v4045_v44, %v4045_v44 }
0x14da   : > { %v3424_v51 = vadd.f32 1e-06, %v3422_v47  ;;  %v4047_v53 = vsel %vm4040_vm8, %v4046_v50, 0.0 }
0x14db   : > { %4048 = vadd.xlane.f32.xlu0 %v4047_v53 }
0x14dc   : > { %9979 = vrsqrt.f32 %v3424_v51 }
0x14e6   : > { %v9980_v54 = vpop.eup %9979 }
0x14e7   : > { %v3428_v55 = vmul.f32 %v9980_v54, %v3412_v30 }
0x14e9   : > { %v3436_v46 = vmul.f32 %v8299_v11, %v3428_v55 }
0x14eb   : > { %v3444_v56 = vadd.f32 %v8300_v13, %v3436_v46  ;;  %v4246_v13 = vld [vmem:[%s12402_s3 + $0x10] sm:$0xff]  ;;  %s12414_s3 = sld [smem:[#allocation96_spill]] }
0x14ec   : > { %v9358_v16 = vpack.c.bf16 %v4247_v14, %v4246_v13 }
0x14ed   : > { %v3453_v57 = vadd.f32 %v8301_v15, %v3444_v56 }
0x14ef   : > { %v11685_v58 = vadd.f32 %v3455_v52, %v3453_v57 }
0x14f1   : > { %8909 = vmatmul.mubr.msk.f32.vlgmr.msra.gmra.mrb[28].mxu1 %vm2341_vm1, %v11685_v58 }
0x14f2   : > { %8926 = vmatprep.mubr.msk.f32.mxu1 %vm10769_vm4, %v10768_v1 }
0x1568   : > { %v4049_v6 = vpop.xlane.xlu0 %4048 }
0x1569   : > { %v4050_v7 = vmul.f32 0.03125, %v4049_v6 }
0x156b   : > { %v4051_v8 = vadd.f32 1e-06, %v4050_v7 }
0x156d   : > { %9981 = vrsqrt.f32 %v4051_v8 }
0x1577   : > { %v9982_v9 = vpop.eup %9981 }
0x1578   : > { %v4053_v11 = vmul.f32 %v9982_v9, %v4045_v44 }
0x157a   : > { %v4060_v49 = vmul.f32 %v8315_v10, %v4053_v11  ;;  %v4332_v10 = vld [vmem:[%s12405_s0 + $0x10] sm:$0xff]  ;;  %v4333_v11 = vld [vmem:[%s12405_s0 + $0x18] sm:$0xff]  ;;  %s12407_s0 = sld [smem:[#allocation80_spill]] }
0x157b   : > { %v9377_v13 = vpack.c.bf16 %v4333_v11, %v4332_v10  ;;  %v8340_v11 = vld [vmem:[#allocation13] ss:$0 sm:$0xff] }
0x157c   : > { %v11702_v15 = vadd.f32 %v8316_v12, %v4060_v49 }
0x157e   : > { %8898 = vmatmul.mubr.msk.f32.vlgmr.msra.gmra.mrb[8].mxu0 %vm2341_vm1, %v11702_v15 }
0x157f   : > { %9357 = vmatpush3.bf16.msra.mxu0 %v9354_v5  ;;  %8919 = vmatprep.mubr.msk.f32.mxu0 %vm2341_vm1, %v11667_v22 }
0x1580   : > { %9359 = vmatprep.subr.bf16.mxu0 %v9358_v16 }
0x1583   : > { %9361 = vmatpush3.bf16.msra.mxu0 %v9358_v16 }
0x1584   : > { %9366 = vmatprep.subr.bf16.mxu0 %v10762_v0 }
0x1586   : > { %8920 = vmatmul.mubr.msk.f32.vlgmr.msra.gmra.mrb[10].mxu0 %vm2341_vm1, %v11685_v58 }
0x1587   : > { %8933 = vmatprep.mubr.msk.f32.mxu0 %vm10769_vm4, %v10768_v1 }
0x15c4   : > { %v8910_v18 = vpop.f32.mrb[28].mxu1 }
0x15c5   : > { %v4241_v19 = vadd.f32 %v8910_v18, %v8319_v17  ;;  %v4235_v20 = vpop.f32.mrb[29].mxu1 }
0x15c6   : > { %v4236_v21 = vadd.f32 %v8319_v17, %v4235_v20 }
0x15c8   : > { %v9871_v23 = vpack.i.bf16 %v4241_v19, %v4236_v21  ;;  %v9363_v24 = vpack.c.bf16 %v4241_v19, %v4236_v21  ;;  %v8335_v21 = vld [vmem:[#allocation7] ss:$0 sm:$0xff] }
0x15ca   : > { %9872 = vrot.lane.b32.xlu1 %v9871_v23, %s12391_s4  ;;  %9365 = vmatpush3.bf16.xpose.msk.msra.mxu1 %vm11514_vm3, %v9363_v24 }
0x15cb   : > { %9369 = vmatprep.subr.bf16.mxu1 %v10762_v0 }
0x163c   : > { %v9873_v25 = vpop.permute.xlu1 %9872 }
0x163d   : > { %v9875_v26 = vunpack.i.h.bf16 %v9873_v25  ;;  %v9874_v27 = vunpack.i.l.bf16 %v9873_v25 }
0x163f   : > { %v9370_v33 = vpack.c.bf16 %v9875_v26, %v9874_v27 }
0x1651   : > { %v4148_v29 = vpop.f32.mrb[8].mxu0 }
0x1652   : > { %v4149_v30 = vadd.f32 %v8317_v28, %v4148_v29  ;;  %v8899_v31 = vpop.f32.mrb[9].mxu0 }
0x1654   : > { %4500 = vrot.lane.b32.xlu0 %v4149_v30, %s12391_s4  ;;  %8927 = vmatmul.mubr.msk.f32.vlgmr.msra.gmra.mrb[30].mxu1 %vm2488_vm2, %v4149_v30 }
0x1655   : > { %9372 = vmatpush3.bf16.xpose.msk.msra.mxu1 %vm11514_vm3, %v9370_v33  ;;  %8940 = vmatprep.mubr.msk.f32.mxu1 %vm10769_vm4, %v10768_v1 }
0x1656   : > { %9379 = vmatprep.subr.bf16.mxu1 %v10762_v0 }
0x1659   : > { %v8921_v36 = vpop.f32.mrb[10].mxu0 }
0x165a   : > { %v4327_v37 = vadd.f32 %v8921_v36, %v8322_v35  ;;  %v4321_v38 = vpop.f32.mrb[11].mxu0  ;;  %v4858_v36 = vld [vmem:[%s12406_s1] sm:$0xff] }
0x165b   : > { %v4322_v39 = vadd.f32 %v8322_v35, %v4321_v38 }
0x165d   : > { %v9876_v40 = vpack.i.bf16 %v4327_v37, %v4322_v39  ;;  %v9367_v41 = vpack.c.bf16 %v4327_v37, %v4322_v39  ;;  %v4859_v37 = vld [vmem:[%s12406_s1 + $0x8] sm:$0xff]  ;;  %v4860_v39 = vld [vmem:[%s12406_s1 + $0x10] sm:$0xff] }
0x165e   : > { %v9383_v38 = vpack.c.bf16 %v4859_v37, %v4858_v36 }
0x165f   : > { %9368 = vmatpush3.bf16.msra.mxu0 %v9367_v41 }
0x1660   : > { %9373 = vmatprep.subr.bf16.mxu0 %v10762_v0 }
0x16c6   : > { %v4501_v42 = vpop.permute.xlu0 %4500 }
0x16c7   : > { %8941 = vmatmul.mubr.msk.f32.vlgmr.msra.gmra.mrb[32].mxu1 %vm2488_vm2, %v4501_v42 }
0x16c8   : > { %8961 = vmatprep.mubr.msk.f32.mxu1 %vm10769_vm4, %v10768_v1  ;;  %9381 = vmatpush3.bf16.msra.mxu1 %v9380_v2 }
0x16c9   : > { %9414 = vmatprep.subr.bf16.mxu1 %v10762_v0 }
0x1727   : > { %v4410_v32 = vpop.f32.mrb[30].mxu1 }
0x1728   : > { %v4414_v43 = vmul.f32 0.25, %v4410_v32  ;;  %v8928_v48 = vpop.f32.mrb[31].mxu1 }
0x1729   : > { %v8336_v48 = vld [vmem:[#allocation9] ss:$0 sm:$0xff] }
0x172a   : > { %v4416_v34 = vsel %vm4415_vm9, %v4414_v43, -inf }
0x172b   : > { %4417 = vmax.xlane.f32.xlu1 %v4416_v34 }
0x179a   : > { %v4578_v44 = vpop.f32.mrb[32].mxu1 }
0x179b   : > { %v4582_v45 = vmul.f32 0.25, %v4578_v44  ;;  %v8942_v47 = vpop.f32.mrb[33].mxu1  ;;  %v4943_v44 = vld [vmem:[%s12407_s0] sm:$0xff] }
0x179c   : > { %v8337_v47 = vld [vmem:[#allocation10] ss:$0 sm:$0xff] }
0x179d   : > { %v4583_v50 = vsel %vm4415_vm9, %v4582_v45, -inf }
0x179e   : > { %4584 = vmax.xlane.f32.xlu0 %v4583_v50 }
0x17b8   : > { %v4418_v51 = vpop.xlane.xlu1 %4417 }
0x17b9   : > { %v4419_v53 = vsub.f32 %v4414_v43, %v4418_v51 }
0x17bb   : > { %v4420_v54 = vmul.f32 1.442695, %v4419_v53 }
0x17bd   : > { %9983 = vpow2.f32 %v4420_v54  ;;  %v4945_v54 = vld [vmem:[%s12407_s0 + $0x10] sm:$0xff] }
0x17c7   : > { %v9984_v55 = vpop.eup %9983 }
0x17c8   : > { %v4422_v46 = vsel %vm4415_vm9, %v9984_v55, 0.0 }
0x17c9   : > { %4423 = vadd.xlane.f32.xlu1 %v4422_v46 }
0x17da   : > { %9877 = vrot.lane.b32.xlu1 %v9876_v40, %s12391_s4  ;;  %v4861_v40 = vld [vmem:[%s12406_s1 + $0x18] sm:$0xff]  ;;  %s12408_s1 = sld [smem:[#allocation82_spill]] }
0x17e0   : > { %v5061_v62 = vld [vmem:[%s12408_s1] sm:$0xff]  ;;  %v5062_v63 = vld [vmem:[%s12408_s1 + $0x8] sm:$0xff] }
0x17e1   : > { %v9400_v2 = vpack.c.bf16 %v5062_v63, %v5061_v62 }
0x182b   : > { %v4585_v56 = vpop.xlane.xlu0 %4584 }
0x182c   : > { %v4586_v52 = vsub.f32 %v4582_v45, %v4585_v56  ;;  %v4944_v45 = vld [vmem:[%s12407_s0 + $0x8] sm:$0xff]  ;;  %v4947_v56 = vld [vmem:[%s12407_s0 + $0x20] sm:$0xff] }
0x182d   : > { %v9389_v51 = vpack.c.bf16 %v4944_v45, %v4943_v44  ;;  %v8343_v44 = vld [vmem:[#allocation16] ss:$0 sm:$0xff] }
0x182e   : > { %v4587_v57 = vmul.f32 1.442695, %v4586_v52  ;;  %v4948_v52 = vld [vmem:[%s12407_s0 + $0x28] sm:$0xff] }
0x1830   : > { %9985 = vpow2.f32 %v4587_v57  ;;  %v9395_v57 = vpack.c.bf16 %v4948_v52, %v4947_v56 }
0x183a   : > { %v9986_v59 = vpop.eup %9985 }
0x183b   : > { %v4589_v60 = vsel %vm4415_vm9, %v9986_v59, 0.0 }
0x183c   : > { %4590 = vadd.xlane.f32.xlu0 %v4589_v60  ;;  %v4950_v60 = vld [vmem:[%s12407_s0 + $0x38] sm:$0xff] }
0x1856   : > { %v4424_v61 = vpop.xlane.xlu1 %4423 }
0x1857   : > { %9987 = vrcp.f32 %v4424_v61 }
0x185a   : > { %v9878_v3 = vpop.permute.xlu1 %9877 }
0x185b   : > { %v9880_v4 = vunpack.i.h.bf16 %v9878_v3  ;;  %v9879_v5 = vunpack.i.l.bf16 %v9878_v3  ;;  %v8338_v3 = vld [vmem:[#allocation12] ss:$0 sm:$0xff] }
0x185d   : > { %v9374_v8 = vpack.c.bf16 %v9880_v4, %v9879_v5  ;;  %v5063_v5 = vld [vmem:[%s12408_s1 + $0x10] sm:$0xff] }
0x1861   : > { %v9988_v6 = vpop.eup %9987 }
0x1862   : > { %v4426_v7 = vmul.f32 %v9988_v6, %v9984_v55  ;;  %v4946_v55 = vld [vmem:[%s12407_s0 + $0x18] sm:$0xff] }
0x1863   : > { %v9392_v46 = vpack.c.bf16 %v4946_v55, %v4945_v54  ;;  %v5064_v6 = vld [vmem:[%s12408_s1 + $0x18] sm:$0xff]  ;;  %s12410_s1 = sld [smem:[#allocation85_spill]] }
0x1864   : > { %8934 = vmatmul.mubr.msk.f32.vlgmr.msra.gmra.mrb[12].mxu0 %vm2488_vm2, %v4426_v7  ;;  %v9404_v10 = vpack.c.bf16 %v5064_v6, %v5063_v5 }
0x1865   : > { %9375 = vmatpush3.bf16.msra.mxu0 %v9374_v8  ;;  %8947 = vmatprep.mubr.msk.f32.mxu0 %vm10769_vm4, %v10768_v1 }
0x1866   : > { %9376 = vmatprep.subr.bf16.mxu0 %v10762_v0 }
0x18c9   : > { %v4591_v9 = vpop.xlane.xlu0 %4590 }
0x18ca   : > { %9989 = vrcp.f32 %v4591_v9 }
0x18d4   : > { %v9990_v12 = vpop.eup %9989 }
0x18d5   : > { %v4593_v14 = vmul.f32 %v9990_v12, %v9986_v59  ;;  %v4949_v59 = vld [vmem:[%s12407_s0 + $0x30] sm:$0xff]  ;;  %s12409_s0 = sld [smem:[#allocation84_spill]] }
0x18d6   : > { %v9398_v61 = vpack.c.bf16 %v4950_v60, %v4949_v59 }
0x18d7   : > { %8948 = vmatmul.mubr.msk.f32.vlgmr.msra.gmra.mrb[14].mxu0 %vm2488_vm2, %v4593_v14 }
0x18d8   : > { %9378 = vmatpush3.bf16.msra.mxu0 %v9377_v13  ;;  %8954 = vmatprep.mubr.msk.f32.mxu0 %vm10769_vm4, %v10768_v1 }
0x18d9   : > { %9382 = vmatprep.subr.bf16.mxu0 %v10762_v0 }
0x18db   : > { %v5149_v36 = vld [vmem:[%s12409_s0 + $0x10] sm:$0xff]  ;;  %v5150_v37 = vld [vmem:[%s12409_s0 + $0x18] sm:$0xff] }
0x1937   : > { %v4496_v49 = vpop.f32.mrb[12].mxu0 }
0x1938   : > { %v8935_v16 = vpop.f32.mrb[13].mxu0  ;;  %8962 = vmatmul.mubr.msk.f32.vlgmr.msra.gmra.mrb[34].mxu1 %vm2488_vm2, %v4496_v49 }
0x1939   : > { %9024 = vmatprep.mubr.msk.f32.mxu1 %vm10769_vm4, %v10768_v1 }
0x19aa   : > { %v4671_v17 = vpop.f32.mrb[14].mxu0 }
0x19ab   : > { %v8949_v18 = vpop.f32.mrb[15].mxu0  ;;  %8955 = vmatmul.mubr.msk.f32.vlgmr.msra.gmra.mrb[16].mxu0 %vm2488_vm2, %v4671_v17  ;;  %v8344_v17 = vld [vmem:[#allocation18] ss:$0 sm:$0xff] }
0x19ac   : > { %8972 = vmatprep.mubr.msk.f32.mxu0 %vm10769_vm4, %v10768_v1  ;;  %9384 = vmatpush3.bf16.msra.mxu0 %v9383_v38  ;;  %v5233_v38 = vld [vmem:[%s12410_s1 + $0x10] sm:$0xff] }
0x19ad   : > { %9385 = vmatprep.subr.bf16.mxu0 %v10762_v0 }
0x1a0b   : > { %v4817_v19 = vpop.f32.mrb[34].mxu1 }
0x1a0c   : > { %v8963_v20 = vpop.f32.mrb[35].mxu1 }
0x1a7e   : > { %v4744_v23 = vpop.f32.mrb[16].mxu0 }
0x1a7f   : > { %v4818_v24 = vadd.f32 %v4817_v19, %v4744_v23  ;;  %v8956_v25 = vpop.f32.mrb[17].mxu0 }
0x1a81   : > { %v4827_v26 = vadd.f32 %v8335_v21, %v4818_v24 }
0x1a83   : > { %v4828_v27 = vadd.f32 %v4827_v26, %v11702_v15  ;;  %v9386_v15 = vpack.c.bf16 %v4861_v40, %v4860_v39  ;;  %v9412_v39 = vpack.c.bf16 %v5150_v37, %v5149_v36  ;;  %v5234_v40 = vld [vmem:[%s12410_s1 + $0x18] sm:$0xff] }
0x1a85   : > { %v4831_v28 = vsel %vm4040_vm8, %v4828_v27, 0.0  ;;  %9387 = vmatpush3.bf16.msra.mxu0 %v9386_v15  ;;  %v9418_v15 = vpack.c.bf16 %v5234_v40, %v5233_v38 }
0x1a86   : > { %4832 = vadd.xlane.f32.xlu0 %v4831_v28  ;;  %9388 = vmatprep.subr.bf16.mxu0 %v10762_v0  ;;  %v5147_v28 = vld [vmem:[%s12409_s0] sm:$0xff] }
0x1b13   : > { %v4833_v29 = vpop.xlane.xlu0 %4832 }
0x1b14   : > { %v4834_v30 = vmul.f32 0.03125, %v4833_v29  ;;  %v5148_v29 = vld [vmem:[%s12409_s0 + $0x8] sm:$0xff]  ;;  %s12411_s0 = sld [smem:[#allocation87_spill]] }
0x1b16   : > { %v4835_v31 = vsub.f32 %v4828_v27, %v4834_v30  ;;  %v5231_v30 = vld [vmem:[%s12410_s1] sm:$0xff] }
0x1b18   : > { %v4836_v33 = vmul.f32 %v4835_v31, %v4835_v31 }
0x1b1a   : > { %v4837_v35 = vsel %vm4040_vm8, %v4836_v33, 0.0  ;;  %v5232_v33 = vld [vmem:[%s12410_s1 + $0x8] sm:$0xff]  ;;  %s12412_s1 = sld [smem:[#allocation95_spill]]  ;;  %v5314_v40 = vld [vmem:[%s12411_s0 + $0x10] sm:$0xff] }
0x1b1b   : > { %4838 = vadd.xlane.f32.xlu0 %v4837_v35  ;;  %v9415_v35 = vpack.c.bf16 %v5232_v33, %v5231_v30 }
0x1b1d   : > { %9416 = vmatpush3.bf16.msra.mxu1 %v9415_v35 }
0x1b1e   : > { %9417 = vmatprep.subr.bf16.mxu1 %v10762_v0 }
0x1b21   : > { %9419 = vmatpush3.bf16.msra.mxu1 %v9418_v15  ;;  %v5315_v15 = vld [vmem:[%s12411_s0 + $0x18] sm:$0xff] }
0x1ba8   : > { %v4839_v41 = vpop.xlane.xlu0 %4838 }
0x1ba9   : > { %v4840_v42 = vmul.f32 0.03125, %v4839_v41 }
0x1bab   : > { %v4841_v32 = vadd.f32 1e-06, %v4840_v42 }
0x1bad   : > { %9991 = vrsqrt.f32 %v4841_v32 }
0x1bb7   : > { %v9992_v43 = vpop.eup %9991 }
0x1bb8   : > { %v4843_v34 = vmul.f32 %v9992_v43, %v4835_v31  ;;  %v9409_v31 = vpack.c.bf16 %v5148_v29, %v5147_v28 }
0x1bba   : > { %v4850_v50 = vmul.f32 %v8336_v48, %v4843_v34  ;;  %v8342_v48 = vld [vmem:[#allocation15] ss:$0 sm:$0xff] }
0x1bbc   : > { %v4857_v53 = vadd.f32 %v8337_v47, %v4850_v50  ;;  %v8347_v50 = vld [vmem:[#allocation19] ss:$0 sm:$0xff] }
0x1bbe   : > { %8973 = vmatmul.mubr.msk.f32.vlgmr.msra.gmra.mrb[18].mxu0 %vm2341_vm1, %v4857_v53 }
0x1bbf   : > { %9390 = vmatpush3.bf16.msra.mxu0 %v9389_v51  ;;  %8991 = vmatprep.mubr.msk.f32.mxu0 %vm10769_vm4, %v10768_v1  ;;  %v8349_v51 = vld [vmem:[#allocation21] ss:$0 sm:$0xff] }
0x1bc0   : > { %9391 = vmatprep.subr.bf16.mxu0 %v10762_v0 }
0x1bc3   : > { %9393 = vmatpush3.bf16.msra.mxu0 %v9392_v46 }
0x1bc4   : > { %9394 = vmatprep.subr.bf16.mxu0 %v10762_v0 }
0x1bc7   : > { %9396 = vmatpush3.bf16.msra.mxu0 %v9395_v57 }
0x1bc8   : > { %9397 = vmatprep.subr.bf16.mxu0 %v10762_v0 }
0x1bcb   : > { %9399 = vmatpush3.bf16.msra.mxu0 %v9398_v61 }
0x1bcc   : > { %9401 = vmatprep.subr.bf16.mxu0 %v9400_v2 }
0x1c91   : > { %v4938_v4 = vpop.f32.mrb[18].mxu0 }
0x1c92   : > { %v4939_v7 = vadd.f32 %v8338_v3, %v4938_v4  ;;  %v8974_v8 = vpop.f32.mrb[19].mxu0 }
0x1c94   : > { %v4942_v9 = vmax.f32 %v4939_v7, 0.0 }
0x1c96   : > { %8992 = vmatmul.mubr.msk.f32.vlgmr.msra.gmra.mrb[20].mxu0 %vm2253_vm0, %v4942_v9  ;;  %vm12166_vm0 = vmpackc.low %vm7755_vm15, %vm7755_vm15 }
0x1c97   : > { %9403 = vmatpush3.bf16.msra.mxu0 %v9400_v2  ;;  %9002 = vmatprep.mubr.msk.f32.mxu0 %vm2341_vm1, %v11667_v22 }
0x1c98   : > { %9405 = vmatprep.subr.bf16.mxu0 %v9404_v10 }
0x1c9b   : > { %9407 = vmatpush3.bf16.msra.mxu0 %v9404_v10 }
0x1c9c   : > { %9408 = vmatprep.subr.bf16.mxu0 %v10762_v0 }
0x1c9e   : > { %9003 = vmatmul.mubr.msk.f32.vlgmr.msra.gmra.mrb[22].mxu0 %vm2341_vm1, %v11685_v58 }
0x1c9f   : > { %9013 = vmatprep.mubr.msk.f32.mxu0 %vm10769_vm4, %v10768_v1  ;;  %9410 = vmatpush3.bf16.msra.mxu0 %v9409_v31 }
0x1ca0   : > { %9411 = vmatprep.subr.bf16.mxu0 %v10762_v0 }
0x1ca3   : > { %9413 = vmatpush3.bf16.msra.mxu0 %v9412_v39 }
0x1d69   : > { %v5027_v12 = vpop.f32.mrb[20].mxu0 }
0x1d6a   : > { %v5028_v13 = vadd.f32 %v8340_v11, %v5027_v12  ;;  %v8993_v14 = vpop.f32.mrb[21].mxu0 }
0x1d6c   : > { %v5031_v49 = vadd.f32 %v5028_v13, %v4857_v53 }
0x1d6e   : > { %v5034_v16 = vsel %vm4040_vm8, %v5031_v49, 0.0 }
0x1d6f   : > { %5035 = vadd.xlane.f32.xlu0 %v5034_v16 }
0x1d71   : > { %v9004_v18 = vpop.f32.mrb[22].mxu0 }
0x1d72   : > { %v5144_v19 = vadd.f32 %v9004_v18, %v8344_v17  ;;  %v5138_v20 = vpop.f32.mrb[23].mxu0 }
0x1d73   : > { %v5139_v27 = vadd.f32 %v8344_v17, %v5138_v20 }
0x1dfc   : > { %v5036_v21 = vpop.xlane.xlu0 %5035 }
0x1dfd   : > { %v5037_v23 = vmul.f32 0.03125, %v5036_v21 }
0x1dff   : > { %v5038_v24 = vsub.f32 %v5031_v49, %v5037_v23 }
0x1e01   : > { %v5039_v25 = vmul.f32 %v5038_v24, %v5038_v24 }
0x1e03   : > { %v5040_v26 = vsel %vm4040_vm8, %v5039_v25, 0.0 }
0x1e04   : > { %5041 = vadd.xlane.f32.xlu0 %v5040_v26 }
0x1e1a   : > { %5509 = vrot.lane.b32.xlu0 %v5139_v27, %s12391_s4 }
0x1e91   : > { %v5042_v41 = vpop.xlane.xlu0 %5041 }
0x1e92   : > { %v5043_v42 = vmul.f32 0.03125, %v5042_v41  ;;  %v9420_v41 = vpack.c.bf16 %v5315_v15, %v5314_v40 }
0x1e94   : > { %v5044_v32 = vadd.f32 1e-06, %v5043_v42 }
0x1e95   : > { %v5510_v57 = vpop.permute.xlu0 %5509 }
0x1e96   : > { %9993 = vrsqrt.f32 %v5044_v32 }
0x1ea0   : > { %v9994_v43 = vpop.eup %9993 }
0x1ea1   : > { %v5046_v34 = vmul.f32 %v9994_v43, %v5038_v24 }
0x1ea3   : > { %v5053_v45 = vmul.f32 %v8342_v48, %v5046_v34 }
0x1ea5   : > { %v11800_v47 = vadd.f32 %v8343_v44, %v5053_v45  ;;  %v5923_v44 = vld [vmem:[%s12412_s1] sm:$0xff]  ;;  %v5924_v45 = vld [vmem:[%s12412_s1 + $0x8] sm:$0xff] }
0x1ea7   : > { %9014 = vmatmul.mubr.msk.f32.vlgmr.msra.gmra.mrb[24].mxu0 %vm2341_vm1, %v11800_v47  ;;  %9025 = vmatmul.mubr.msk.f32.vlgmr.msra.gmra.mrb[36].mxu1 %vm2341_vm1, %v11800_v47 }
0x1ea8   : > { %9029 = vmatprep.mubr.msk.f32.mxu0 %vm2488_vm2, %v5139_v27 }
0x1f7a   : > { %v5227_v53 = vpop.f32.mrb[24].mxu0  ;;  %v5308_v54 = vpop.f32.mrb[36].mxu1 }
0x1f7b   : > { %v5228_v55 = vadd.f32 %v8347_v50, %v5227_v53  ;;  %v5309_v46 = vadd.f32 %v8349_v51, %v5308_v54  ;;  %v9015_v56 = vpop.f32.mrb[25].mxu0  ;;  %v9026_v52 = vpop.f32.mrb[37].mxu1  ;;  %v9429_v51 = vpack.c.bf16 %v5924_v45, %v5923_v44  ;;  %v5925_v54 = vld [vmem:[%s12412_s1 + $0x10] sm:$0xff]  ;;  %v8393_v44 = vld [vmem:[%s12412_s1 + $0x40] sm:$0xff]  ;;  %v8394_v45 = vld [vmem:[%s12412_s1 + $0x48] sm:$0xff] }
0x1f7c   : > { %v5928_v56 = vrot.slane %v11800_v47, 1  ;;  %v5312_v52 = vld [vmem:[%s12411_s0] sm:$0xff] }
0x1f7d   : > { %5513 = vrot.lane.b32.xlu1 %v5228_v55, %s12391_s4  ;;  %9027 = vmatprep.subr.msk.mxu0 %vm2488_vm2, %v5228_v55 }
0x1f7e   : > { %9032 = vmatprep.subr.msk.mxu1 %vm3644_vm6, %v5309_v46  ;;  %9028 = vmatpush3.xpose.msk.msra.mxu0 %vm2488_vm2, %v5228_v55  ;;  %v5926_v55 = vld [vmem:[%s12412_s1 + $0x18] sm:$0xff] }
0x1f7f   : > { %9033 = vmatpush3.msk.msra.mxu1 %vm3644_vm6, %v5309_v46 }
0x1f81   : > { %5511 = vrot.lane.b32.xlu1 %v5144_v19, %s12391_s4  ;;  %9030 = vmatmul.mubr.msk.f32.vlgmr.msra.gmra.mrb[26].mxu0 %vm2488_vm2, %v5144_v19 }
0x1f82   : > { %9039 = vmatprep.mubr.msk.f32.mxu0 %vm2488_vm2, %v5510_v57  ;;  %v5313_v57 = vld [vmem:[%s12411_s0 + $0x8] sm:$0xff]  ;;  %s12415_s0 = sld [smem:[#allocation90_spill]] }
0x1fef   : > { %v5514_v59 = vpop.permute.xlu1 %5513 }
0x1ff0   : > { %9037 = vmatprep.subr.msk.mxu0 %vm2488_vm2, %v5514_v59 }
0x1ff1   : > { %9038 = vmatpush3.xpose.msk.msra.mxu0 %vm2488_vm2, %v5514_v59  ;;  %v9424_v59 = vpack.c.bf16 %v5313_v57, %v5312_v52  ;;  %v6426_v57 = vrot.slane %v11800_v47, 3 }
0x1ff2   : > { %9421 = vmatprep.subr.bf16.mxu0 %v9420_v41 }
0x1ff3   : > { %v5512_v60 = vpop.permute.xlu1 %5511 }
0x1ff4   : > { %9040 = vmatmul.mubr.msk.f32.vlgmr.msra.gmra.mrb[28].mxu0 %vm2488_vm2, %v5512_v60 }
0x1ff5   : > { %9423 = vmatpush3.bf16.msra.mxu0 %v9420_v41 }
0x1ff6   : > { %9425 = vmatprep.subr.bf16.mxu0 %v9424_v59 }
0x2054   : > { %v9031_v61 = vpop.f32.mrb[26].mxu0 }
0x2055   : > { %v5402_v62 = vmul.f32 0.25, %v9031_v61  ;;  %v5392_v63 = vpop.f32.mrb[27].mxu0 }
0x2056   : > { %v5401_v2 = vmul.f32 0.25, %v5392_v63 }
0x2057   : > { %v5406_v3 = vsel %vm3640_vm7, %v5402_v62, -inf }
0x2058   : > { %5407 = vmax.xlane.f32.xlu0 %v5406_v3  ;;  %v5403_v4 = vsel %vm3640_vm7, %v5401_v2, -inf  ;;  %v6003_v3 = vld [vmem:[%s12413_s2 + $0x8] sm:$0xff] }
0x2059   : > { %5404 = vmax.xlane.f32.xlu1 %v5403_v4 }
0x20c7   : > { %v9041_v5 = vpop.f32.mrb[28].mxu0 }
0x20c8   : > { %v5587_v6 = vpop.f32.mrb[29].mxu0  ;;  %v5597_v8 = vmul.f32 0.25, %v9041_v5 }
0x20c9   : > { %v5596_v7 = vmul.f32 0.25, %v5587_v6 }
0x20ca   : > { %v5601_v10 = vsel %vm3640_vm7, %v5597_v8, -inf }
0x20cb   : > { %v5598_v9 = vsel %vm3640_vm7, %v5596_v7, -inf }
0x20cc   : > { %5599 = vmax.xlane.f32.xlu1 %v5598_v9  ;;  %v5927_v9 = vld [vmem:[%s12414_s3] sm:$0x1] }
0x20d0   : > { %5602 = vmax.xlane.f32.xlu1 %v5601_v10 }
0x20e5   : > { %v5408_v11 = vpop.xlane.xlu0 %5407 }
0x20e6   : > { %v5410_v12 = vsub.f32 %v5402_v62, %v5408_v11  ;;  %v5405_v13 = vpop.xlane.xlu1 %5404 }
0x20e7   : > { %v5409_v14 = vsub.f32 %v5401_v2, %v5405_v13  ;;  %v6002_v2 = vld [vmem:[%s12413_s2] sm:$0xff]  ;;  %v8375_v13 = vld [vmem:[%s12412_s1 + $0x28] sm:$0xff] }
0x20e8   : > { %v5413_v49 = vmul.f32 1.442695, %v5410_v12  ;;  %v9435_v5 = vpack.c.bf16 %v6003_v3, %v6002_v2  ;;  %v8374_v12 = vld [vmem:[%s12412_s1 + $0x20] sm:$0xff] }
0x20e9   : > { %v5411_v16 = vmul.f32 1.442695, %v5409_v14  ;;  %v9447_v14 = vpack.c.bf16 %v8375_v13, %v8374_v12 }
0x20ea   : > { %9995 = vpow2.f32 %v5413_v49 }
0x20eb   : > { %9997 = vpow2.f32 %v5411_v16  ;;  %v8376_v16 = vld [vmem:[%s12412_s1 + $0x30] sm:$0xff] }
0x20f4   : > { %v9996_v17 = vpop.eup %9995 }
0x20f5   : > { %v9998_v18 = vpop.eup %9997  ;;  %v5418_v19 = vsel %vm3640_vm7, %v9996_v17, 0.0 }
0x20f6   : > { %5419 = vadd.xlane.f32.xlu0 %v5418_v19  ;;  %v5415_v20 = vsel %vm3640_vm7, %v9998_v18, 0.0  ;;  %v6175_v19 = vrot.slane %v11800_v47, 2 }
0x20f7   : > { %5416 = vadd.xlane.f32.xlu1 %v5415_v20  ;;  %v6081_v20 = vld [vmem:[%s11110_s25] sm:$0xff] }
0x2159   : > { %v5600_v21 = vpop.xlane.xlu1 %5599 }
0x215a   : > { %v5604_v23 = vsub.f32 %v5596_v7, %v5600_v21  ;;  %v6004_v7 = vld [vmem:[%s12413_s2 + $0x10] sm:$0xff]  ;;  %v6082_v21 = vld [vmem:[%s11110_s25 + $0x8] sm:$0xff] }
0x215c   : > { %v5606_v24 = vmul.f32 1.442695, %v5604_v23  ;;  %v9441_v23 = vpack.c.bf16 %v6082_v21, %v6081_v20 }
0x215d   : > { %v5603_v25 = vpop.xlane.xlu1 %5602 }
0x215e   : > { %9999 = vpow2.f32 %v5606_v24  ;;  %v5605_v26 = vsub.f32 %v5597_v8, %v5603_v25  ;;  %v6005_v8 = vld [vmem:[%s12413_s2 + $0x18] sm:$0xff]  ;;  %v6083_v24 = vld [vmem:[%s11110_s25 + $0x10] sm:$0xff] }
0x215f   : > { %v9438_v10 = vpack.c.bf16 %v6005_v8, %v6004_v7  ;;  %v6084_v25 = vld [vmem:[%s11110_s25 + $0x18] sm:$0xff] }
0x2160   : > { %v5608_v27 = vmul.f32 1.442695, %v5605_v26  ;;  %v9444_v26 = vpack.c.bf16 %v6084_v25, %v6083_v24  ;;  %v8401_v24 = vld [vmem:[%s12413_s2 + $0x50] sm:$0xff]  ;;  %v8402_v25 = vld [vmem:[%s12413_s2 + $0x58] sm:$0xff] }
0x2162   : > { %10001 = vpow2.f32 %v5608_v27  ;;  %v8367_v27 = vld [vmem:[#allocation22] ss:$0 sm:$0xff] }
0x2168   : > { %v10000_v28 = vpop.eup %9999 }
0x2169   : > { %v5610_v29 = vsel %vm3640_vm7, %v10000_v28, 0.0 }
0x216a   : > { %5611 = vadd.xlane.f32.xlu1 %v5610_v29 }
0x216c   : > { %v10002_v30 = vpop.eup %10001 }
0x216d   : > { %v5613_v31 = vsel %vm3640_vm7, %v10002_v30, 0.0 }
0x216e   : > { %5614 = vadd.xlane.f32.xlu0 %v5613_v31 }
0x217b   : > { %5620 = vrot.lane.b32.xlu1 %v5309_v46, %s12391_s4  ;;  %v9432_v46 = vpack.c.bf16 %v5926_v55, %v5925_v54  ;;  %v9465_v54 = vpack.c.bf16 %v8394_v45, %v8393_v44  ;;  %v6085_v44 = vld [vmem:[%s11115_s17] sm:$0x1] }
0x2183   : > { %v5420_v33 = vpop.xlane.xlu0 %5419 }
0x2184   : > { %10003 = vrcp.f32 %v5420_v33  ;;  %v5417_v35 = vpop.xlane.xlu1 %5416 }
0x2185   : > { %10005 = vrcp.f32 %v5417_v35  ;;  %v6006_v35 = vld [vmem:[%s11105_s9] sm:$0x1] }
0x218e   : > { %v10004_v36 = vpop.eup %10003 }
0x218f   : > { %v10006_v37 = vpop.eup %10005  ;;  %v5424_v39 = vmul.f32 %v10004_v36, %v9996_v17  ;;  %v8377_v17 = vld [vmem:[%s12412_s1 + $0x38] sm:$0xff] }
0x2190   : > { %v5422_v38 = vmul.f32 %v10006_v37, %v9998_v18  ;;  %v9450_v18 = vpack.c.bf16 %v8377_v17, %v8376_v16  ;;  %v8399_v16 = vld [vmem:[%s12413_s2 + $0x40] sm:$0xff]  ;;  %v8400_v17 = vld [vmem:[%s12413_s2 + $0x48] sm:$0xff] }
0x2191   : > { %v9471_v21 = vpack.c.bf16 %v8400_v17, %v8399_v16  ;;  %v8421_v16 = vld [vmem:[%s12413_s2 + $0x78] sm:$0xff]  ;;  %v6921_v17 = vld [vmem:[%s12415_s0] sm:$0xff] }
0x2192   : > { %9034 = vmatprep.mubr.msk.f32.mxu1 %vm3640_vm7, %v5422_v38  ;;  %v8380_v38 = vld [vmem:[%s12413_s2 + $0x20] sm:$0xff] }
0x2193   : > { %9035 = vmatmul.mubr.msk.f32.vlgmr.msra.gmra.mrb[38].mxu1 %vm3640_vm7, %v5424_v39  ;;  %v8381_v39 = vld [vmem:[%s12413_s2 + $0x28] sm:$0xff] }
0x21f7   : > { %v5612_v42 = vpop.xlane.xlu1 %5611 }
0x21f8   : > { %10007 = vrcp.f32 %v5612_v42 }
0x21fb   : > { %v5615_v32 = vpop.xlane.xlu0 %5614  ;;  %v5621_v43 = vpop.permute.xlu1 %5620 }
0x21fc   : > { %10009 = vrcp.f32 %v5615_v32  ;;  %9042 = vmatprep.subr.msk.mxu1 %vm3644_vm6, %v5621_v43  ;;  %v9453_v32 = vpack.c.bf16 %v8381_v39, %v8380_v38  ;;  %v8415_v38 = vld [vmem:[%s12412_s1 + $0x78] sm:$0xff] }
0x21fd   : > { %9043 = vmatpush3.msk.msra.mxu1 %vm3644_vm6, %v5621_v43 }
0x21fe   : > { %9428 = vmatprep.subr.bf16.mxu1 %v10762_v0 }
0x2202   : > { %v10008_v48 = vpop.eup %10007 }
0x2203   : > { %v5617_v34 = vmul.f32 %v10008_v48, %v10000_v28  ;;  %v8383_v48 = vld [vmem:[%s12413_s2 + $0x38] sm:$0xff] }
0x2205   : > { %9044 = vmatprep.mubr.msk.f32.mxu1 %vm3640_vm7, %v5617_v34 }
0x2206   : > { %v10010_v50 = vpop.eup %10009 }
0x2207   : > { %v5619_v53 = vmul.f32 %v10010_v50, %v10002_v30 }
0x2209   : > { %9045 = vmatmul.mubr.msk.f32.vlgmr.msra.gmra.mrb[40].mxu1 %vm3640_vm7, %v5619_v53 }
0x220a   : > { %9430 = vmatpush3.bf16.msra.mxu1 %v9429_v51  ;;  %9069 = vmatprep.mubr.msk.f32.mxu1 %vm10769_vm4, %v10768_v1 }
0x220b   : > { %9431 = vmatprep.subr.bf16.mxu1 %v10762_v0 }
0x220e   : > { %9433 = vmatpush3.bf16.msra.mxu1 %v9432_v46  ;;  %v8395_v46 = vld [vmem:[%s12412_s1 + $0x50] sm:$0xff] }
0x220f   : > { %9440 = vmatprep.subr.bf16.mxu1 %v10762_v0 }
0x2211   : > { %9070 = vmatmul.mubr.msk.f32.vlgmr.msra.gmra.mrb[42].mxu1 %vm2341_vm1, %v5928_v56  ;;  %v8396_v56 = vld [vmem:[%s12412_s1 + $0x58] sm:$0xff] }
0x2212   : > { %9091 = vmatprep.mubr.msk.f32.mxu1 %vm10769_vm4, %v10768_v1  ;;  %9442 = vmatpush3.bf16.msra.mxu1 %v9441_v23  ;;  %v9468_v52 = vpack.c.bf16 %v8396_v56, %v8395_v46 }
0x2213   : > { %9443 = vmatprep.subr.bf16.mxu1 %v10762_v0 }
0x2216   : > { %9445 = vmatpush3.bf16.msra.mxu1 %v9444_v26  ;;  %v8397_v26 = vld [vmem:[%s12414_s3 + $0x2] sm:$0x1] }
0x2217   : > { %9452 = vmatprep.subr.bf16.mxu1 %v10762_v0 }
0x2266   : > { %v9036_v60 = vpop.f32.mrb[38].mxu1 }
0x2267   : > { %v5500_v61 = vpop.f32.mrb[39].mxu1 }
0x22dc   : > { %v9046_v62 = vpop.f32.mrb[40].mxu1 }
0x22dd   : > { %v5696_v63 = vpop.f32.mrb[41].mxu1 }
0x22de   : > { %9051 = vmatprep.mubr.msk.f32.mxu0 %vm2488_vm2, %v5696_v63  ;;  %v8389_v63 = vld [vmem:[%s11110_s25 + $0x38] sm:$0xff] }
0x22df   : > { %9052 = vmatmul.mubr.msk.f32.vlgmr.msra.gmra.mrb[30].mxu0 %vm2488_vm2, %v9046_v62  ;;  %v8388_v62 = vld [vmem:[%s11110_s25 + $0x30] sm:$0xff] }
0x22e0   : > { %9427 = vmatpush3.bf16.msra.mxu0 %v9424_v59  ;;  %9058 = vmatprep.mubr.msk.f32.mxu0 %vm2488_vm2, %v5500_v61  ;;  %v8386_v59 = vld [vmem:[%s11110_s25 + $0x20] sm:$0xff]  ;;  %v9462_v2 = vpack.c.bf16 %v8389_v63, %v8388_v62 }
0x22e1   : > { %9434 = vmatprep.subr.bf16.mxu0 %v10762_v0 }
0x22e4   : > { %v5997_v4 = vpop.f32.mrb[42].mxu1 }
0x22e5   : > { %v9071_v6 = vpop.f32.mrb[43].mxu1  ;;  %v5998_v11 = vadd.f32 %v5997_v4, %v5927_v9 }
0x22e7   : > { %9059 = vmatmul.mubr.msk.f32.vlgmr.msra.gmra.mrb[30].mxu0 %vm2488_vm2, %v9036_v60  ;;  %v6001_v49 = vmax.f32 %v5998_v11, 0.0  ;;  %v8387_v60 = vld [vmem:[%s11110_s25 + $0x28] sm:$0xff] }
0x22e8   : > { %9436 = vmatpush3.bf16.msra.mxu0 %v9435_v5  ;;  %9080 = vmatprep.mubr.msk.f32.mxu0 %vm10769_vm4, %v10768_v1  ;;  %v9459_v61 = vpack.c.bf16 %v8387_v60, %v8386_v59 }
0x22e9   : > { %9437 = vmatprep.subr.bf16.mxu0 %v10762_v0 }
0x22ec   : > { %9439 = vmatpush3.bf16.msra.mxu0 %v9438_v10 }
0x22ed   : > { %9446 = vmatprep.subr.bf16.mxu0 %v10762_v0 }
0x22ef   : > { %9081 = vmatmul.mubr.msk.f32.vlgmr.msra.gmra.mrb[32].mxu0 %vm2341_vm1, %v6001_v49  ;;  %v8384_v49 = vld [vmem:[%s11105_s9 + $0x1] sm:$0x1] }
0x22f0   : > { %9448 = vmatpush3.bf16.msra.mxu0 %v9447_v14  ;;  %9102 = vmatprep.mubr.msk.f32.mxu0 %vm10769_vm4, %v10768_v1 }
0x22f1   : > { %9449 = vmatprep.subr.bf16.mxu0 %v10762_v0 }
0x22f4   : > { %9451 = vmatpush3.bf16.msra.mxu0 %v9450_v18 }
0x22f5   : > { %9458 = vmatprep.subr.bf16.mxu0 %v10762_v0 }
0x22f7   : > { %9103 = vmatmul.mubr.msk.f32.vlgmr.msra.gmra.mrb[34].mxu0 %vm2341_vm1, %v6175_v19 }
0x22f8   : > { %9124 = vmatprep.mubr.msk.f32.mxu0 %vm10769_vm4, %v10768_v1  ;;  %9460 = vmatpush3.bf16.msra.mxu0 %v9459_v61 }
0x22f9   : > { %9461 = vmatprep.subr.bf16.mxu0 %v10762_v0 }
0x22fc   : > { %9463 = vmatpush3.bf16.msra.mxu0 %v9462_v2 }
0x22fd   : > { %9470 = vmatprep.subr.bf16.mxu0 %v10762_v0 }
0x23ba   : > { %v9060_v28 = vpop.f32.mrb[30].mxu0 }
0x23bb   : > { %v5858_v29 = vpop.f32.mrb[31].mxu0  ;;  %v5874_v30 = vadd.f32 %v9060_v28, %v8367_v27  ;;  %v8412_v28 = vld [vmem:[%s12412_s1 + $0x60] sm:$0xff] }
0x23bc   : > { %v5873_v31 = vadd.f32 %v8367_v27, %v5858_v29  ;;  %v9474_v27 = vpack.c.bf16 %v8402_v25, %v8401_v24  ;;  %v8413_v29 = vld [vmem:[%s12412_s1 + $0x68] sm:$0xff] }
0x23bd   : > { %v5876_v37 = vadd.f32 %v5874_v30, %v11685_v58  ;;  %v8378_v58 = vld [vmem:[%s12414_s3 + $0x1] sm:$0x1] }
0x23be   : > { %v5875_v33 = vadd.f32 %v5873_v31, %v11667_v22  ;;  %v8382_v22 = vld [vmem:[%s12413_s2 + $0x30] sm:$0xff] }
0x23bf   : > { %v5882_v42 = vsel %vm2341_vm1, %v5876_v37, 0.0  ;;  %v9456_v34 = vpack.c.bf16 %v8383_v48, %v8382_v22  ;;  %v5921_v48 = vlaneseq }
0x23c0   : > { %v5879_v36 = vsel %vm2341_vm1, %v5875_v33, 0.0 }
0x23c1   : > { %5880 = vadd.xlane.f32.xlu0 %v5879_v36 }
0x23c2   : > { %v6076_v40 = vpop.f32.mrb[32].mxu0 }
0x23c3   : > { %v6077_v15 = vadd.f32 %v6076_v40, %v6006_v35  ;;  %v9082_v41 = vpop.f32.mrb[33].mxu0  ;;  %v9483_v35 = vpack.c.bf16 %v8413_v29, %v8412_v28  ;;  %v6677_v40 = vrot.slane %v11800_v47, 4  ;;  %v6923_v28 = vld [vmem:[%s12415_s0 + $0x10] sm:$0xff]  ;;  %v6924_v29 = vld [vmem:[%s12415_s0 + $0x18] sm:$0xff] }
0x23c4   : > { %v8406_v41 = vld [vmem:[%s11110_s25 + $0x48] sm:$0xff] }
0x23c5   : > { %v6080_v43 = vmax.f32 %v6077_v15, 0.0  ;;  %5883 = vadd.xlane.f32.xlu0 %v5882_v42  ;;  %v8405_v15 = vld [vmem:[%s11110_s25 + $0x40] sm:$0xff] }
0x23c6   : > { %v9477_v42 = vpack.c.bf16 %v8406_v41, %v8405_v15  ;;  %v8426_v41 = vld [vmem:[%s11110_s25 + $0x70] sm:$0xff] }
0x23c7   : > { %9092 = vmatmul.mubr.msk.f32.vlgmr.msra.gmra.mrb[44].mxu1 %vm2341_vm1, %v6080_v43  ;;  %v8408_v43 = vld [vmem:[%s11110_s25 + $0x58] sm:$0xff] }
0x23c8   : > { %9454 = vmatpush3.bf16.msra.mxu1 %v9453_v32  ;;  %9113 = vmatprep.mubr.msk.f32.mxu1 %vm10769_vm4, %v10768_v1  ;;  %v8407_v32 = vld [vmem:[%s11110_s25 + $0x50] sm:$0xff] }
0x23c9   : > { %9455 = vmatprep.subr.bf16.mxu1 %v10762_v0  ;;  %v9480_v22 = vpack.c.bf16 %v8408_v43, %v8407_v32  ;;  %v8409_v43 = vld [vmem:[%s11115_s17 + $0x2] sm:$0x1] }
0x23ca   : > { %v6244_v50 = vpop.f32.mrb[34].mxu0 }
0x23cb   : > { %v6245_v51 = vadd.f32 %v8378_v58, %v6244_v50  ;;  %v9104_v53 = vpop.f32.mrb[35].mxu0 }
0x23cc   : > { %9457 = vmatpush3.bf16.msra.mxu1 %v9456_v34  ;;  %v11957_v34 = vshrl.u32 %v5921_v48, 7 }
0x23cd   : > { %v6248_v55 = vmax.f32 %v6245_v51, 0.0  ;;  %9464 = vmatprep.subr.bf16.mxu1 %v10762_v0 }
0x23ce   : > { %v11961_v53 = vsub.s32 0, %v11957_v34  ;;  %vm6159_vm10 = vcmp.eq.s32.totalorder %v11957_v34, 0  ;;  %vm6410_vm11 = vcmp.eq.s32.totalorder %v11957_v34, 1  ;;  %vm6661_vm12 = vcmp.eq.s32.totalorder %v11957_v34, 2 }
0x23cf   : > { %9114 = vmatmul.mubr.msk.f32.vlgmr.msra.gmra.mrb[46].mxu1 %vm2341_vm1, %v6248_v55  ;;  %v8390_v55 = vld [vmem:[%s11115_s17 + $0x1] sm:$0x1]  ;;  %v8373_v59 = vsel %vm6159_vm10, 1.0, %v10768_v1  ;;  %v8392_v61 = vsel %vm6410_vm11, 1.0, %v10768_v1  ;;  %vm6912_vm14 = vcmp.eq.s32.totalorder %v11957_v34, 3 }
0x23d0   : > { %9466 = vmatpush3.bf16.msra.mxu1 %v9465_v54  ;;  %9135 = vmatprep.mubr.msk.f32.mxu1 %vm10769_vm4, %v10768_v1 }
0x23d1   : > { %9467 = vmatprep.subr.bf16.mxu1 %v10762_v0 }
0x23d4   : > { %9469 = vmatpush3.bf16.msra.mxu1 %v9468_v52 }
0x23d5   : > { %9476 = vmatprep.subr.bf16.mxu1 %v10762_v0 }
0x23d7   : > { %9136 = vmatmul.mubr.msk.f32.vlgmr.msra.gmra.mrb[48].mxu1 %vm2341_vm1, %v6426_v57 }
0x23d8   : > { %9157 = vmatprep.mubr.msk.f32.mxu1 %vm10769_vm4, %v10768_v1  ;;  %9478 = vmatpush3.bf16.msra.mxu1 %v9477_v42  ;;  %v8427_v42 = vld [vmem:[%s11110_s25 + $0x78] sm:$0xff] }
0x23d9   : > { %9479 = vmatprep.subr.bf16.mxu1 %v10762_v0  ;;  %v9498_v32 = vpack.c.bf16 %v8427_v42, %v8426_v41 }
0x23dc   : > { %9481 = vmatpush3.bf16.msra.mxu1 %v9480_v22 }
0x23dd   : > { %9488 = vmatprep.subr.bf16.mxu1 %v10762_v0 }
0x244e   : > { %v5881_v3 = vpop.xlane.xlu0 %5880 }
0x244f   : > { %v5885_v4 = vmul.f32 0.03125, %v5881_v3  ;;  %v8403_v3 = vld [vmem:[%s11105_s9 + $0x2] sm:$0x1] }
0x2451   : > { %v11917_v5 = vsub.f32 %v5875_v33, %v5885_v4 }
0x2452   : > { %v5884_v6 = vpop.xlane.xlu0 %5883 }
0x2453   : > { %v5886_v7 = vmul.f32 0.03125, %v5884_v6  ;;  %v5889_v8 = vmul.f32 %v11917_v5, %v11917_v5  ;;  %v8418_v6 = vld [vmem:[%s12413_s2 + $0x60] sm:$0xff] }
0x2455   : > { %v11921_v9 = vsub.f32 %v5876_v37, %v5886_v7  ;;  %v5891_v10 = vsel %vm2341_vm1, %v5889_v8, 0.0  ;;  %v8414_v37 = vld [vmem:[%s12412_s1 + $0x70] sm:$0xff]  ;;  %v8419_v7 = vld [vmem:[%s12413_s2 + $0x68] sm:$0xff]  ;;  %s12275_s1 = smov 104  }
0x2456   : > { %5892 = vadd.xlane.f32.xlu0 %v5891_v10  ;;  %v9486_v39 = vpack.c.bf16 %v8415_v38, %v8414_v37 }
0x2457   : > { %v5890_v11 = vmul.f32 %v11921_v9, %v11921_v9 }
0x2459   : > { %v5894_v12 = vsel %vm2341_vm1, %v5890_v11, 0.0 }
0x245a   : > { %5895 = vadd.xlane.f32.xlu0 %v5894_v12 }
0x249a   : > { %v6155_v13 = vpop.f32.mrb[44].mxu1 }
0x249b   : > { %v9093_v14 = vpop.f32.mrb[45].mxu1  ;;  %v6156_v51 = vadd.f32 %v6155_v13, %v6085_v44  ;;  %v9489_v13 = vpack.c.bf16 %v8419_v7, %v8418_v6 }
0x249d   : > { %v6165_v56 = vrot.slane %v6156_v51, %v11961_v53 }
0x249f   : > { %v6166_v63 = vmul.f32 %v8373_v59, %v6165_v56  ;;  %v8431_v56 = vld [vmem:[#allocation27] ss:$0 sm:$0xff] }
0x24a2   : > { %v6325_v18 = vpop.f32.mrb[46].mxu1 }
0x24a3   : > { %v6326_v19 = vadd.f32 %v8384_v49, %v6325_v18  ;;  %v9115_v20 = vpop.f32.mrb[47].mxu1  ;;  %v8420_v49 = vld [vmem:[%s12413_s2 + $0x70] sm:$0xff]  ;;  %v6922_v18 = vld [vmem:[%s12415_s0 + $0x8] sm:$0xff]  ;;  %s12273_s0 = smov 120  }
0x24a4   : > { %v8368_v20 = vld [vmem:[#allocation24] ss:$0 sm:$0xff]  ;;  %v9500_v24 = vpack.c.bf16 %v6922_v18, %v6921_v17  ;;  %v8430_v17 = vsel %vm6912_vm14, 1.0, %v10768_v1 }
0x24a5   : > { %v6329_v23 = vmax.f32 %v6326_v19, 0.0 }
0x24a7   : > { %9125 = vmatmul.mubr.msk.f32.vlgmr.msra.gmra.mrb[36].mxu0 %vm2341_vm1, %v6329_v23  ;;  %v9492_v23 = vpack.c.bf16 %v8421_v16, %v8420_v49 }
0x24a8   : > { %9472 = vmatpush3.bf16.msra.mxu0 %v9471_v21  ;;  %9146 = vmatprep.mubr.msk.f32.mxu0 %vm10769_vm4, %v10768_v1  ;;  %v8416_v21 = vld [vmem:[%s12414_s3 + $0x3] sm:$0x1] }
0x24a9   : > { %9473 = vmatprep.subr.bf16.mxu0 %v10762_v0 }
0x24aa   : > { %v6495_v30 = vpop.f32.mrb[48].mxu1 }
0x24ab   : > { %v6496_v31 = vadd.f32 %v8397_v26, %v6495_v30  ;;  %v9137_v33 = vpop.f32.mrb[49].mxu1 }
0x24ac   : > { %9475 = vmatpush3.bf16.msra.mxu0 %v9474_v27 }
0x24ad   : > { %v6499_v36 = vmax.f32 %v6496_v31, 0.0  ;;  %9482 = vmatprep.subr.bf16.mxu0 %v10762_v0 }
0x24af   : > { %9147 = vmatmul.mubr.msk.f32.vlgmr.msra.gmra.mrb[38].mxu0 %vm2341_vm1, %v6499_v36  ;;  %v9504_v36 = vpack.c.bf16 %v6924_v29, %v6923_v28 }
0x24b0   : > { %9484 = vmatpush3.bf16.msra.mxu0 %v9483_v35  ;;  %9168 = vmatprep.mubr.msk.f32.mxu0 %vm10769_vm4, %v10768_v1 }
0x24b1   : > { %9485 = vmatprep.subr.bf16.mxu0 %v10762_v0 }
0x24b4   : > { %9487 = vmatpush3.bf16.msra.mxu0 %v9486_v39 }
0x24b5   : > { %9494 = vmatprep.subr.bf16.mxu0 %v10762_v0 }
0x24b7   : > { %9169 = vmatmul.mubr.msk.f32.vlgmr.msra.gmra.mrb[40].mxu0 %vm2341_vm1, %v6677_v40  ;;  %v8424_v40 = vld [vmem:[%s11110_s25 + $0x60] sm:$0xff] }
0x24b8   : > { %9190 = vmatprep.mubr.msk.f32.mxu0 %vm10769_vm4, %v10768_v1 }
0x24e3   : > { %v5893_v47 = vpop.xlane.xlu0 %5892 }
0x24e4   : > { %v5897_v58 = vmul.f32 0.03125, %v5893_v47 }
0x24e6   : > { %v5899_v45 = vadd.f32 1e-06, %v5897_v58  ;;  %v8411_v58 = vsel %vm6661_vm12, 1.0, %v10768_v1 }
0x24e7   : > { %v5896_v50 = vpop.xlane.xlu0 %5895 }
0x24e8   : > { %v5898_v54 = vmul.f32 0.03125, %v5896_v50  ;;  %10011 = vrsqrt.f32 %v5899_v45  ;;  %v8422_v50 = vld [vmem:[%s11105_s9 + $0x3] sm:$0x1] }
0x24ea   : > { %v5900_v60 = vadd.f32 1e-06, %v5898_v54 }
0x24ec   : > { %10013 = vrsqrt.f32 %v5900_v60 }
0x24f2   : > { %v10012_v10 = vpop.eup %10011 }
0x24f3   : > { %v5903_v19 = vmul.f32 %v10012_v10, %v11917_v5  ;;  %v8369_v5 = vld [vmem:[#allocation25] ss:$0 sm:$0xff] }
0x24f5   : > { %v5911_v27 = vmul.f32 %v8368_v20, %v5903_v19 }
0x24f6   : > { %v10014_v25 = vpop.eup %10013 }
0x24f7   : > { %v5904_v33 = vmul.f32 %v10014_v25, %v11921_v9  ;;  %v5919_v37 = vadd.f32 %v8369_v5, %v5911_v27  ;;  %v8425_v9 = vld [vmem:[%s11110_s25 + $0x68] sm:$0xff] }
0x24f8   : > { %v9495_v15 = vpack.c.bf16 %v8425_v9, %v8424_v40 }
0x24f9   : > { %v5912_v38 = vmul.f32 %v8368_v20, %v5904_v33 }
0x24fa   : > { %9496 = vmatpush3.bf16.msra.mxu0 %v9495_v15 }
0x24fb   : > { %v5920_v39 = vadd.f32 %v8369_v5, %v5912_v38  ;;  %9497 = vmatprep.subr.bf16.mxu0 %v10762_v0 }
0x24fe   : > { %9499 = vmatpush3.bf16.msra.mxu0 %v9498_v32 }
0x257a   : > { %v6406_v46 = vpop.f32.mrb[36].mxu0 }
0x257b   : > { %v6407_v52 = vadd.f32 %v8390_v55, %v6406_v46  ;;  %v9126_v57 = vpop.f32.mrb[37].mxu0 }
0x257d   : > { %v6416_v62 = vrot.slane %v6407_v52, %v11961_v53 }
0x257f   : > { %v6417_v2 = vmul.f32 %v8392_v61, %v6416_v62 }
0x2581   : > { %v6418_v4 = vadd.f32 %v6417_v2, %v6166_v63 }
0x2582   : > { %v6576_v8 = vpop.f32.mrb[38].mxu0 }
0x2583   : > { %v6577_v11 = vadd.f32 %v8403_v3, %v6576_v8  ;;  %v9148_v12 = vpop.f32.mrb[39].mxu0 }
0x2585   : > { %v6580_v14 = vmax.f32 %v6577_v11, 0.0 }
0x2587   : > { %9158 = vmatmul.mubr.msk.f32.vlgmr.msra.gmra.mrb[50].mxu1 %vm2341_vm1, %v6580_v14 }
0x2588   : > { %9490 = vmatpush3.bf16.msra.mxu1 %v9489_v13  ;;  %9179 = vmatprep.mubr.msk.f32.mxu1 %vm10769_vm4, %v10768_v1  ;;  %v8428_v13 = vld [vmem:[%s11115_s17 + $0x3] sm:$0x1] }
0x2589   : > { %9491 = vmatprep.subr.bf16.mxu1 %v10762_v0 }
0x258a   : > { %v6746_v26 = vpop.f32.mrb[40].mxu0 }
0x258b   : > { %v6747_v30 = vadd.f32 %v8416_v21, %v6746_v26  ;;  %v9170_v31 = vpop.f32.mrb[41].mxu0 }
0x258c   : > { %9493 = vmatpush3.bf16.msra.mxu1 %v9492_v23 }
0x258d   : > { %v6750_v35 = vmax.f32 %v6747_v30, 0.0  ;;  %9501 = vmatprep.subr.bf16.mxu1 %v9500_v24 }
0x258f   : > { %9180 = vmatmul.mubr.msk.f32.vlgmr.msra.gmra.mrb[52].mxu1 %vm2341_vm1, %v6750_v35 }
0x2590   : > { %9503 = vmatpush3.bf16.msra.mxu1 %v9500_v24  ;;  %9201 = vmatprep.mubr.msk.f32.mxu1 %vm2341_vm1, %v5919_v37 }
0x2591   : > { %9505 = vmatprep.subr.bf16.mxu1 %v9504_v36 }
0x2594   : > { %9507 = vmatpush3.bf16.msra.mxu1 %v9504_v36 }
0x2597   : > { %9202 = vmatmul.mubr.msk.f32.vlgmr.msra.gmra.mrb[54].mxu1 %vm2341_vm1, %v5920_v39 }
0x265a   : > { %v6657_v22 = vpop.f32.mrb[50].mxu1 }
0x265b   : > { %v6658_v47 = vadd.f32 %v8409_v43, %v6657_v22  ;;  %v9159_v48 = vpop.f32.mrb[51].mxu1  ;;  %v12068_v43 = vld [vmem:[#allocation28] ss:$0 sm:$0xff]  ;;  %v12071_v22 = vld [vmem:[#allocation30] ss:$0 sm:$0xff] }
0x265d   : > { %v6667_v44 = vrot.slane %v6658_v47, %v11961_v53 }
0x265f   : > { %v6668_v45 = vmul.f32 %v8411_v58, %v6667_v44 }
0x2661   : > { %v6669_v51 = vadd.f32 %v6668_v45, %v6418_v4 }
0x2662   : > { %v6827_v54 = vpop.f32.mrb[52].mxu1 }
0x2663   : > { %v6828_v55 = vadd.f32 %v8422_v50, %v6827_v54  ;;  %v9181_v0 = vpop.f32.mrb[53].mxu1 }
0x2665   : > { %v6831_v46 = vmax.f32 %v6828_v55, 0.0 }
0x2667   : > { %9191 = vmatmul.mubr.msk.f32.vlgmr.msra.gmra.mrb[42].mxu0 %vm2341_vm1, %v6831_v46 }
0x266a   : > { %v9203_v52 = vpop.f32.mrb[54].mxu1 }
0x266b   : > { %v12000_v57 = vadd.f32 %v9203_v52, %v8431_v56  ;;  %v7004_v59 = vpop.f32.mrb[55].mxu1 }
0x266c   : > { %v12002_v60 = vadd.f32 %v8431_v56, %v7004_v59 }
0x266d   : > { %7188 = vrot.lane.b32.xlu0 %v12000_v57, %s12273_s0  ;;  %v7019_v32 = vsel %vm7015_vm13, %v12000_v57, 0.0 }
0x266e   : > { %7186 = vrot.lane.b32.xlu1 %v12002_v60, %s12273_s0  ;;  %v7016_v42 = vsel %vm7015_vm13, %v12002_v60, 0.0 }
0x2672   : > { %7357 = vrot.lane.b32.xlu1 %v12002_v60, %s12391_s4 }
0x2676   : > { %7359 = vrot.lane.b32.xlu1 %v12000_v57, %s12391_s4 }
0x267a   : > { %7528 = vrot.lane.b32.xlu1 %v12002_v60, %s12275_s1 }
0x267e   : > { %7530 = vrot.lane.b32.xlu1 %v12000_v57, %s12275_s1 }
0x26df   : > { %v7189_v61 = vpop.permute.xlu0 %7188 }
0x26e0   : > { %v7187_v62 = vpop.permute.xlu1 %7186  ;;  %v7195_v63 = vsel %vm7015_vm13, %v7189_v61, 0.0 }
0x26e1   : > { %7196 = vadd.xlane.f32.xlu0 %v7195_v63  ;;  %v7192_v2 = vsel %vm7015_vm13, %v7187_v62, 0.0 }
0x26e2   : > { %7193 = vadd.xlane.f32.xlu1 %v7192_v2 }
0x26e4   : > { %v7358_v3 = vpop.permute.xlu1 %7357 }
0x26e5   : > { %v7363_v4 = vsel %vm7015_vm13, %v7358_v3, 0.0 }
0x26e6   : > { %7364 = vadd.xlane.f32.xlu0 %v7363_v4 }
0x26e8   : > { %v7360_v6 = vpop.permute.xlu1 %7359 }
0x26e9   : > { %v7366_v7 = vsel %vm7015_vm13, %v7360_v6, 0.0 }
0x26ea   : > { %7367 = vadd.xlane.f32.xlu1 %v7366_v7 }
0x26ec   : > { %v7529_v8 = vpop.permute.xlu1 %7528 }
0x26ed   : > { %v7534_v10 = vsel %vm7015_vm13, %v7529_v8, 0.0 }
0x26ee   : > { %7535 = vadd.xlane.f32.xlu0 %v7534_v10 }
0x26f0   : > { %v7531_v11 = vpop.permute.xlu1 %7530 }
0x26f1   : > { %v7537_v12 = vsel %vm7015_vm13, %v7531_v11, 0.0 }
0x26f2   : > { %7538 = vadd.xlane.f32.xlu1 %v7537_v12 }
0x273a   : > { %v6908_v14 = vpop.f32.mrb[42].mxu0 }
0x273b   : > { %v6909_v49 = vadd.f32 %v8428_v13, %v6908_v14  ;;  %v9192_v16 = vpop.f32.mrb[43].mxu0 }
0x273d   : > { %v6918_v18 = vrot.slane %v6909_v49, %v11961_v53 }
0x273f   : > { %v6919_v19 = vmul.f32 %v8430_v17, %v6918_v18 }
0x2741   : > { %v12026_v20 = vadd.f32 %v6919_v19, %v6669_v51 }
0x276e   : > { %v7197_v21 = vpop.xlane.xlu0 %7196 }
0x276f   : > { %v7199_v23 = vmul.f32 0.125, %v7197_v21  ;;  %v7194_v24 = vpop.xlane.xlu1 %7193 }
0x2770   : > { %v7198_v25 = vmul.f32 0.125, %v7194_v24 }
0x2771   : > { %v12029_v26 = vsub.f32 %v12000_v57, %v7199_v23 }
0x2772   : > { %v12032_v27 = vsub.f32 %v12002_v60, %v7198_v25 }
0x2773   : > { %v7203_v34 = vmul.f32 %v12029_v26, %v12029_v26  ;;  %v7365_v53 = vpop.xlane.xlu0 %7364 }
0x2774   : > { %v7202_v1 = vmul.f32 %v12032_v27, %v12032_v27  ;;  %v7369_v37 = vmul.f32 0.125, %v7365_v53 }
0x2775   : > { %7208 = vrot.lane.b32.xlu1 %v7203_v34, %s12273_s0 }
0x2776   : > { %7206 = vrot.lane.b32.xlu0 %v7202_v1, %s12273_s0  ;;  %v12056_v9 = vsub.f32 %v12002_v60, %v7369_v37  ;;  %s10772_s0 = smov 8  }
0x2777   : > { %v7368_v28 = vpop.xlane.xlu1 %7367 }
0x2778   : > { %v7370_v29 = vmul.f32 0.125, %v7368_v28  ;;  %v7373_v41 = vmul.f32 %v12056_v9, %v12056_v9 }
0x277a   : > { %v12041_v30 = vsub.f32 %v12000_v57, %v7370_v29 }
0x277b   : > { %v7536_v31 = vpop.xlane.xlu0 %7535 }
0x277c   : > { %v7540_v5 = vmul.f32 0.125, %v7536_v31  ;;  %v7374_v33 = vmul.f32 %v12041_v30, %v12041_v30 }
0x277e   : > { %v12046_v35 = vsub.f32 %v12002_v60, %v7540_v5  ;;  %7379 = vrot.lane.b32.xlu1 %v7374_v33, %s12391_s4 }
0x277f   : > { %v7539_v36 = vpop.xlane.xlu1 %7538 }
0x2780   : > { %v7541_v38 = vmul.f32 0.125, %v7539_v36  ;;  %v7544_v39 = vmul.f32 %v12046_v35, %v12046_v35 }
0x2782   : > { %v12052_v40 = vsub.f32 %v12000_v57, %v7541_v38  ;;  %7548 = vrot.lane.b32.xlu0 %v7544_v39, %s12275_s1 }
0x2784   : > { %v7545_v15 = vmul.f32 %v12052_v40, %v12052_v40 }
0x2786   : > { %7550 = vrot.lane.b32.xlu1 %v7545_v15, %s12275_s1  ;;  %s10773_s1 = smov 16  }
0x278a   : > { %7377 = vrot.lane.b32.xlu1 %v7373_v41, %s12391_s4 }
0x27a1   : > { %7017 = vadd.xlane.f32.xlu0 %v7016_v42 }
0x27ae   : > { %7020 = vadd.xlane.f32.xlu1 %v7019_v32 }
0x27b7   : > { %7226 = vrot.lane.b32.xlu0 %v12068_v43, %s10772_s0 }
0x27bf   : > { %7231 = vrot.lane.b32.xlu1 %v12071_v22, %s10772_s0  ;;  %s10774_s0 = smov 24  }
0x27c3   : > { %7397 = vrot.lane.b32.xlu1 %v12068_v43, %s10773_s1 }
0x27c7   : > { %7402 = vrot.lane.b32.xlu1 %v12071_v22, %s10773_s1  ;;  %s12416_s1 = sld [smem:[#allocation93_spill]] }
0x27cd   : > { %v12099_v11 = vld [vmem:[%s12416_s1] sm:$0xff]  ;;  %s12418_s1 = smov 104  }
0x27ce   : > { %9204 = vmatprep.subr.mxu0 %v12099_v11  ;;  %9209 = vmatprep.subr.mxu1 %v12099_v11 }
0x27cf   : > { %9205 = vmatpush3.msra.mxu0 %v12099_v11  ;;  %9210 = vmatpush3.msra.mxu1 %v12099_v11 }
0x27d0   : > { %9214 = vmatprep.subr.mxu0 %v12099_v11  ;;  %9219 = vmatprep.subr.mxu1 %v12099_v11 }
0x27e7   : > { %v7209_v47 = vpop.permute.xlu1 %7208 }
0x27e8   : > { %v7215_v48 = vsel %vm7015_vm13, %v7209_v47, 0.0  ;;  %v7207_v58 = vpop.permute.xlu0 %7206 }
0x27e9   : > { %7216 = vadd.xlane.f32.xlu0 %v7215_v48  ;;  %v7212_v44 = vsel %vm7015_vm13, %v7207_v58, 0.0 }
0x27ed   : > { %7213 = vadd.xlane.f32.xlu0 %v7212_v44 }
0x27f0   : > { %v7380_v45 = vpop.permute.xlu1 %7379 }
0x27f1   : > { %v7386_v50 = vsel %vm7015_vm13, %v7380_v45, 0.0 }
0x27f2   : > { %7387 = vadd.xlane.f32.xlu1 %v7386_v50 }
0x27f4   : > { %v7549_v46 = vpop.permute.xlu0 %7548 }
0x27f5   : > { %v7554_v56 = vsel %vm7015_vm13, %v7549_v46, 0.0 }
0x27f8   : > { %v7551_v51 = vpop.permute.xlu1 %7550 }
0x27f9   : > { %v7557_v54 = vsel %vm7015_vm13, %v7551_v51, 0.0 }
0x27fa   : > { %7558 = vadd.xlane.f32.xlu1 %v7557_v54 }
0x27fc   : > { %v7378_v55 = vpop.permute.xlu1 %7377 }
0x27fd   : > { %v7383_v0 = vsel %vm7015_vm13, %v7378_v55, 0.0 }
0x27fe   : > { %7384 = vadd.xlane.f32.xlu0 %v7383_v0 }
0x2802   : > { %7555 = vadd.xlane.f32.xlu0 %v7554_v56 }
0x280b   : > { %7573 = vrot.lane.b32.xlu1 %v12071_v22, %s10774_s0 }
0x2818   : > { %7568 = vrot.lane.b32.xlu0 %v12068_v43, %s10774_s0  ;;  %s12417_s0 = smov 120  }
0x282e   : > { %v7018_v52 = vpop.xlane.xlu0 %7017 }
0x282f   : > { %v7023_v59 = vmul.f32 0.125, %v7018_v52 }
0x2831   : > { %v12085_v61 = vsub.f32 %v12002_v60, %v7023_v59 }
0x2832   : > { %v7227_v60 = vpop.permute.xlu0 %7226 }
0x2833   : > { %v7027_v62 = vmul.f32 %v12085_v61, %v12085_v61 }
0x2835   : > { %v7029_v63 = vsel %vm7015_vm13, %v7027_v62, 0.0 }
0x2837   : > { %7030 = vadd.xlane.f32.xlu0 %v7029_v63 }
0x283b   : > { %v7021_v2 = vpop.xlane.xlu1 %7020 }
0x283c   : > { %v7024_v3 = vmul.f32 0.125, %v7021_v2 }
0x283e   : > { %v12091_v4 = vsub.f32 %v12000_v57, %v7024_v3 }
0x283f   : > { %v7232_v8 = vpop.permute.xlu1 %7231 }
0x2840   : > { %v7028_v6 = vmul.f32 %v12091_v4, %v12091_v4 }
0x2842   : > { %v7032_v7 = vsel %vm7015_vm13, %v7028_v6, 0.0 }
0x2843   : > { %7033 = vadd.xlane.f32.xlu1 %v7032_v7  ;;  %v12096_v10 = vpop.permute.xlu1 %7397 }
0x2847   : > { %v12107_v49 = vpop.permute.xlu1 %7402 }
0x2876   : > { %v7217_v12 = vpop.xlane.xlu0 %7216 }
0x2877   : > { %v7219_v13 = vmul.f32 0.125, %v7217_v12 }
0x2879   : > { %v7221_v57 = vadd.f32 1e-06, %v7219_v13 }
0x287a   : > { %v7214_v14 = vpop.xlane.xlu0 %7213 }
0x287b   : > { %10015 = vrsqrt.f32 %v7221_v57  ;;  %v7218_v16 = vmul.f32 0.125, %v7214_v14 }
0x287d   : > { %v7220_v17 = vadd.f32 1e-06, %v7218_v16 }
0x287f   : > { %10017 = vrsqrt.f32 %v7220_v17  ;;  %v7388_v18 = vpop.xlane.xlu1 %7387 }
0x2880   : > { %v7390_v19 = vmul.f32 0.125, %v7388_v18 }
0x2882   : > { %v7392_v21 = vadd.f32 1e-06, %v7390_v19 }
0x2884   : > { %10019 = vrsqrt.f32 %v7392_v21 }
0x2885   : > { %v10016_v23 = vpop.eup %10015 }
0x2886   : > { %v7225_v24 = vmul.f32 %v10016_v23, %v12029_v26 }
0x2887   : > { %v7559_v25 = vpop.xlane.xlu1 %7558 }
0x2888   : > { %v7230_v34 = vmul.f32 %v7227_v60, %v7225_v24  ;;  %v7561_v1 = vmul.f32 0.125, %v7559_v25 }
0x2889   : > { %v10018_v53 = vpop.eup %10017 }
0x288a   : > { %v7224_v28 = vmul.f32 %v10018_v53, %v12032_v27  ;;  %v7563_v29 = vadd.f32 1e-06, %v7561_v1  ;;  %v7235_v31 = vadd.f32 %v7232_v8, %v7230_v34 }
0x288b   : > { %v7385_v5 = vpop.xlane.xlu0 %7384  ;;  %v7574_v59 = vpop.permute.xlu1 %7573 }
0x288c   : > { %10021 = vrsqrt.f32 %v7563_v29  ;;  %v7389_v33 = vmul.f32 0.125, %v7385_v5  ;;  %v7237_v36 = vmul.f32 %v7235_v31, %v7235_v31  ;;  %v7229_v37 = vmul.f32 %v7227_v60, %v7224_v28 }
0x288e   : > { %v10020_v38 = vpop.eup %10019  ;;  %v7391_v39 = vadd.f32 1e-06, %v7389_v33  ;;  %v7239_v15 = vmul.f32 %v7237_v36, %v7235_v31  ;;  %v7234_v41 = vadd.f32 %v7232_v8, %v7229_v37 }
0x288f   : > { %v7396_v42 = vmul.f32 %v10020_v38, %v12041_v30  ;;  %v7556_v26 = vpop.xlane.xlu0 %7555 }
0x2890   : > { %10023 = vrsqrt.f32 %v7391_v39  ;;  %v7560_v32 = vmul.f32 0.125, %v7556_v26  ;;  %v7241_v47 = vmul.f32 0.044715, %v7239_v15  ;;  %v7236_v48 = vmul.f32 %v7234_v41, %v7234_v41 }
0x2891   : > { %v7401_v27 = vmul.f32 %v12096_v10, %v7396_v42 }
0x2892   : > { %v7562_v58 = vadd.f32 1e-06, %v7560_v32  ;;  %v7243_v44 = vadd.f32 %v7241_v47, %v7235_v31  ;;  %v7238_v45 = vmul.f32 %v7236_v48, %v7234_v41 }
0x2893   : > { %v7406_v50 = vadd.f32 %v12107_v49, %v7401_v27  ;;  %v7569_v46 = vpop.permute.xlu0 %7568 }
0x2894   : > { %10025 = vrsqrt.f32 %v7562_v58  ;;  %v7245_v51 = vmul.f32 0.7978846, %v7243_v44  ;;  %v7240_v54 = vmul.f32 0.044715, %v7238_v45 }
0x2895   : > { %v7408_v55 = vmul.f32 %v7406_v50, %v7406_v50 }
0x2896   : > { %v10022_v0 = vpop.eup %10021  ;;  %10027 = vtanh.f32 %v7245_v51  ;;  %v7242_v30 = vadd.f32 %v7240_v54, %v7234_v41 }
0x2897   : > { %v7567_v56 = vmul.f32 %v10022_v0, %v12052_v40  ;;  %v7410_v52 = vmul.f32 %v7408_v55, %v7406_v50 }
0x2898   : > { %v7244_v62 = vmul.f32 0.7978846, %v7242_v30 }
0x2899   : > { %v7572_v63 = vmul.f32 %v7569_v46, %v7567_v56  ;;  %v7412_v2 = vmul.f32 0.044715, %v7410_v52 }
0x289a   : > { %v10024_v3 = vpop.eup %10023  ;;  %10029 = vtanh.f32 %v7244_v62 }
0x289b   : > { %v7395_v6 = vmul.f32 %v10024_v3, %v12056_v9  ;;  %v7577_v7 = vadd.f32 %v7574_v59, %v7572_v63  ;;  %v7414_v8 = vadd.f32 %v7412_v2, %v7406_v50 }
0x289d   : > { %v7400_v60 = vmul.f32 %v12096_v10, %v7395_v6  ;;  %v7579_v12 = vmul.f32 %v7577_v7, %v7577_v7  ;;  %v7416_v13 = vmul.f32 0.7978846, %v7414_v8 }
0x289e   : > { %v10026_v57 = vpop.eup %10025 }
0x289f   : > { %v7566_v14 = vmul.f32 %v10026_v57, %v12046_v35  ;;  %v7581_v16 = vmul.f32 %v7579_v12, %v7577_v7  ;;  %10031 = vtanh.f32 %v7416_v13  ;;  %v7405_v40 = vadd.f32 %v12107_v49, %v7400_v60 }
0x28a0   : > { %v10028_v17 = vpop.eup %10027 }
0x28a1   : > { %v7571_v18 = vmul.f32 %v7569_v46, %v7566_v14  ;;  %v7583_v19 = vmul.f32 0.044715, %v7581_v16  ;;  %v7249_v21 = vadd.f32 1.0, %v10028_v17  ;;  %v7407_v23 = vmul.f32 %v7405_v40, %v7405_v40 }
0x28a3   : > { %v7576_v24 = vadd.f32 %v7574_v59, %v7571_v18  ;;  %v7585_v9 = vadd.f32 %v7583_v19, %v7577_v7  ;;  %v7251_v25 = vmul.f32 0.5, %v7249_v21  ;;  %v7409_v34 = vmul.f32 %v7407_v23, %v7405_v40 }
0x28a4   : > { %v10030_v1 = vpop.eup %10029 }
0x28a5   : > { %v7578_v10 = vmul.f32 %v7576_v24, %v7576_v24  ;;  %v7587_v53 = vmul.f32 0.7978846, %v7585_v9  ;;  %v7253_v28 = vmul.f32 %v7251_v25, %v7235_v31  ;;  %v7248_v29 = vadd.f32 1.0, %v10030_v1 }
0x28a6   : > { %v7411_v5 = vmul.f32 0.044715, %v7409_v34 }
0x28a7   : > { %v7580_v35 = vmul.f32 %v7578_v10, %v7576_v24  ;;  %10033 = vtanh.f32 %v7587_v53  ;;  %7258 = vrot.lane.b32.xlu1 %v7253_v28, %s12417_s0  ;;  %v7250_v49 = vmul.f32 0.5, %v7248_v29 }
0x28a8   : > { %v7413_v33 = vadd.f32 %v7411_v5, %v7405_v40 }
0x28a9   : > { %v10032_v36 = vpop.eup %10031  ;;  %v7582_v37 = vmul.f32 0.044715, %v7580_v35  ;;  %v7252_v38 = vmul.f32 %v7250_v49, %v7234_v41  ;;  %v8436_v35 = vld [vmem:[#allocation31] ss:$0 sm:$0xff] }
0x28aa   : > { %v7420_v39 = vadd.f32 1.0, %v10032_v36  ;;  %v7415_v15 = vmul.f32 0.7978846, %v7413_v33 }
0x28ab   : > { %v7584_v42 = vadd.f32 %v7582_v37, %v7576_v24  ;;  %7256 = vrot.lane.b32.xlu0 %v7252_v38, %s12417_s0 }
0x28ac   : > { %v7422_v26 = vmul.f32 0.5, %v7420_v39  ;;  %10035 = vtanh.f32 %v7415_v15 }
0x28ad   : > { %v7586_v32 = vmul.f32 0.7978846, %v7584_v42 }
0x28ae   : > { %v7424_v31 = vmul.f32 %v7422_v26, %v7406_v50 }
0x28af   : > { %10037 = vtanh.f32 %v7586_v32 }
0x28b0   : > { %7429 = vrot.lane.b32.xlu1 %v7424_v31, %s12391_s4 }
0x28b1   : > { %v10034_v47 = vpop.eup %10033 }
0x28b2   : > { %v7591_v48 = vadd.f32 1.0, %v10034_v47 }
0x28b4   : > { %v7593_v27 = vmul.f32 0.5, %v7591_v48 }
0x28b6   : > { %v10036_v58 = vpop.eup %10035  ;;  %v7595_v44 = vmul.f32 %v7593_v27, %v7577_v7 }
0x28b7   : > { %v7419_v45 = vadd.f32 1.0, %v10036_v58 }
0x28b8   : > { %7600 = vrot.lane.b32.xlu1 %v7595_v44, %s12418_s1 }
0x28b9   : > { %v10038_v41 = vpop.eup %10037  ;;  %v7421_v51 = vmul.f32 0.5, %v7419_v45 }
0x28ba   : > { %v7590_v54 = vadd.f32 1.0, %v10038_v41 }
0x28bb   : > { %v7423_v55 = vmul.f32 %v7421_v51, %v7405_v40 }
0x28bc   : > { %v7592_v0 = vmul.f32 0.5, %v7590_v54 }
0x28bd   : > { %7427 = vrot.lane.b32.xlu0 %v7423_v55, %s12391_s4  ;;  %s10775_s4 = smov 116  }
0x28be   : > { %v7594_v46 = vmul.f32 %v7592_v0, %v7576_v24 }
0x28c1   : > { %7598 = vrot.lane.b32.xlu0 %v7594_v46, %s12418_s1  ;;  %s10776_s1 = smov 124  }
0x28c4   : > { %v7031_v50 = vpop.xlane.xlu0 %7030 }
0x28c5   : > { %v7035_v30 = vmul.f32 0.125, %v7031_v50 }
0x28c7   : > { %v7037_v56 = vadd.f32 1e-06, %v7035_v30 }
0x28c9   : > { %10039 = vrsqrt.f32 %v7037_v56 }
0x28d0   : > { %v7034_v52 = vpop.xlane.xlu1 %7033 }
0x28d1   : > { %v7036_v59 = vmul.f32 0.125, %v7034_v52 }
0x28d3   : > { %v10040_v62 = vpop.eup %10039  ;;  %v7038_v63 = vadd.f32 1e-06, %v7036_v59 }
0x28d4   : > { %v7041_v2 = vmul.f32 %v10040_v62, %v12085_v61 }
0x28d5   : > { %10041 = vrsqrt.f32 %v7038_v63 }
0x28d6   : > { %v7049_v3 = vmul.f32 %v12068_v43, %v7041_v2 }
0x28d8   : > { %v7057_v6 = vadd.f32 %v12071_v22, %v7049_v3 }
0x28da   : > { %v7059_v7 = vmul.f32 %v7057_v6, %v7057_v6 }
0x28dc   : > { %v7061_v8 = vmul.f32 %v7059_v7, %v7057_v6 }
0x28de   : > { %v7063_v60 = vmul.f32 0.044715, %v7061_v8 }
0x28df   : > { %v10042_v12 = vpop.eup %10041 }
0x28e0   : > { %v7042_v13 = vmul.f32 %v10042_v12, %v12091_v4  ;;  %v7065_v57 = vadd.f32 %v7063_v60, %v7057_v6 }
0x28e2   : > { %v7050_v14 = vmul.f32 %v12068_v43, %v7042_v13  ;;  %v7067_v16 = vmul.f32 0.7978846, %v7065_v57 }
0x28e4   : > { %v7058_v40 = vadd.f32 %v12071_v22, %v7050_v14  ;;  %10043 = vtanh.f32 %v7067_v16 }
0x28e6   : > { %v7060_v17 = vmul.f32 %v7058_v40, %v7058_v40 }
0x28e8   : > { %v7062_v61 = vmul.f32 %v7060_v17, %v7058_v40 }
0x28ea   : > { %v7064_v18 = vmul.f32 0.044715, %v7062_v61 }
0x28ec   : > { %v7066_v19 = vadd.f32 %v7064_v18, %v7058_v40 }
0x28ee   : > { %v10044_v21 = vpop.eup %10043  ;;  %v7068_v23 = vmul.f32 0.7978846, %v7066_v19 }
0x28ef   : > { %v7071_v24 = vadd.f32 1.0, %v10044_v21 }
0x28f0   : > { %10045 = vtanh.f32 %v7068_v23 }
0x28f1   : > { %v7073_v9 = vmul.f32 0.5, %v7071_v24 }
0x28f3   : > { %v7075_v25 = vmul.f32 %v7073_v9, %v7057_v6 }
0x28f5   : > { %9206 = vmatprep.mubr.msk.f32.mxu0 %vm7015_vm13, %v7075_v25 }
0x28fa   : > { %v10046_v4 = vpop.eup %10045 }
0x28fb   : > { %v7072_v34 = vadd.f32 1.0, %v10046_v4 }
0x28fd   : > { %v7074_v1 = vmul.f32 0.5, %v7072_v34 }
0x28ff   : > { %v7076_v43 = vmul.f32 %v7074_v1, %v7058_v40 }
0x2901   : > { %9207 = vmatmul.mubr.msk.f32.vlgmr.msra.gmra.mrb[44].mxu0 %vm7015_vm13, %v7076_v43 }
0x2902   : > { %9215 = vmatpush3.msra.mxu0 %v12099_v11 }
0x2919   : > { %v7259_v10 = vpop.permute.xlu1 %7258 }
0x291d   : > { %v7257_v22 = vpop.permute.xlu0 %7256 }
0x291e   : > { %9211 = vmatprep.mubr.msk.f32.mxu1 %vm7015_vm13, %v7257_v22 }
0x291f   : > { %9212 = vmatmul.mubr.msk.f32.vlgmr.msra.gmra.mrb[56].mxu1 %vm7015_vm13, %v7259_v10 }
0x2920   : > { %9220 = vmatpush3.msra.mxu1 %v12099_v11 }
0x2922   : > { %v7430_v28 = vpop.permute.xlu1 %7429 }
0x292a   : > { %v7601_v5 = vpop.permute.xlu1 %7600 }
0x292f   : > { %v7428_v53 = vpop.permute.xlu0 %7427 }
0x2930   : > { %9216 = vmatprep.mubr.msk.f32.mxu0 %vm7015_vm13, %v7428_v53 }
0x2931   : > { %9217 = vmatmul.mubr.msk.f32.vlgmr.msra.gmra.mrb[46].mxu0 %vm7015_vm13, %v7430_v28 }
0x2932   : > { %8748 = vmatprep.mubr.msk.f32.mxu0 %vm7755_vm15, %v12026_v20 }
0x2933   : > { %v7599_v29 = vpop.permute.xlu0 %7598 }
0x2934   : > { %9221 = vmatprep.mubr.msk.f32.mxu1 %vm7015_vm13, %v7599_v29 }
0x2935   : > { %9222 = vmatmul.mubr.msk.f32.vlgmr.msra.gmra.mrb[58].mxu1 %vm7015_vm13, %v7601_v5 }
0x29d4   : > { %v9208_v49 = vpop.f32.mrb[44].mxu0 }
0x29d5   : > { %v7163_v33 = vadd.f32 %v9208_v49, %v8436_v35  ;;  %v7157_v11 = vpop.f32.mrb[45].mxu0 }
0x29d6   : > { %v7158_v36 = vadd.f32 %v8436_v35, %v7157_v11 }
0x29d7   : > { %v7167_v37 = vmul.f32 %v7163_v33, %v7163_v33 }
0x29d8   : > { %v7166_v38 = vmul.f32 %v7158_v36, %v7158_v36 }
0x29d9   : > { %v7169_v39 = vmul.f32 %v7167_v37, %v7163_v33 }
0x29da   : > { %v7168_v15 = vmul.f32 %v7166_v38, %v7158_v36 }
0x29db   : > { %v7171_v42 = vmul.f32 0.044715, %v7169_v39 }
0x29dc   : > { %v7170_v26 = vmul.f32 0.044715, %v7168_v15 }
0x29dd   : > { %v7173_v32 = vadd.f32 %v7171_v42, %v7163_v33 }
0x29de   : > { %v7172_v31 = vadd.f32 %v7170_v26, %v7158_v36 }
0x29df   : > { %v7175_v47 = vmul.f32 0.7978846, %v7173_v32 }
0x29e0   : > { %v7174_v48 = vmul.f32 0.7978846, %v7172_v31 }
0x29e1   : > { %10047 = vtanh.f32 %v7175_v47 }
0x29e2   : > { %10049 = vtanh.f32 %v7174_v48 }
0x29eb   : > { %v10048_v27 = vpop.eup %10047 }
0x29ec   : > { %v10050_v58 = vpop.eup %10049  ;;  %v7179_v44 = vadd.f32 1.0, %v10048_v27 }
0x29ed   : > { %v7178_v45 = vadd.f32 1.0, %v10050_v58 }
0x29ee   : > { %v7181_v41 = vmul.f32 0.5, %v7179_v44 }
0x29ef   : > { %v7180_v51 = vmul.f32 0.5, %v7178_v45 }
0x29f0   : > { %v12143_v54 = vmul.f32 %v7181_v41, %v7163_v33 }
0x29f1   : > { %v12145_v55 = vmul.f32 %v7180_v51, %v7158_v36 }
0x29f2   : > { %v9213_v0 = vpop.f32.mrb[56].mxu1 }
0x29f3   : > { %v7336_v46 = vadd.f32 %v9213_v0, %v8436_v35  ;;  %v7330_v50 = vpop.f32.mrb[57].mxu1  ;;  %v12149_v30 = vpack.i.bf16 %v12143_v54, %v12145_v55  ;;  %v9511_v52 = vpack.c.bf16 %v12143_v54, %v12145_v55 }
0x29f4   : > { %v7331_v56 = vadd.f32 %v8436_v35, %v7330_v50 }
0x29f5   : > { %v7340_v59 = vmul.f32 %v7336_v46, %v7336_v46  ;;  %9882 = vrot.lane.b32.xlu0 %v12149_v30, %s12417_s0 }
0x29f6   : > { %v7339_v62 = vmul.f32 %v7331_v56, %v7331_v56 }
0x29f7   : > { %v7342_v63 = vmul.f32 %v7340_v59, %v7336_v46 }
0x29f8   : > { %v7341_v2 = vmul.f32 %v7339_v62, %v7331_v56 }
0x29f9   : > { %v7344_v3 = vmul.f32 0.044715, %v7342_v63 }
0x29fa   : > { %v7343_v6 = vmul.f32 0.044715, %v7341_v2 }
0x29fb   : > { %v7346_v7 = vadd.f32 %v7344_v3, %v7336_v46 }
0x29fc   : > { %v7345_v8 = vadd.f32 %v7343_v6, %v7331_v56 }
0x29fd   : > { %v7348_v60 = vmul.f32 0.7978846, %v7346_v7 }
0x29fe   : > { %v7347_v12 = vmul.f32 0.7978846, %v7345_v8 }
0x29ff   : > { %10051 = vtanh.f32 %v7348_v60 }
0x2a00   : > { %10053 = vtanh.f32 %v7347_v12 }
0x2a04   : > { %v9218_v13 = vpop.f32.mrb[46].mxu0 }
0x2a05   : > { %v7507_v57 = vadd.f32 %v9218_v13, %v8436_v35  ;;  %v7501_v14 = vpop.f32.mrb[47].mxu0 }
0x2a06   : > { %v7502_v16 = vadd.f32 %v8436_v35, %v7501_v14 }
0x2a07   : > { %v7511_v40 = vmul.f32 %v7507_v57, %v7507_v57 }
0x2a08   : > { %v7510_v17 = vmul.f32 %v7502_v16, %v7502_v16  ;;  %v9223_v61 = vpop.f32.mrb[58].mxu1 }
0x2a09   : > { %v10052_v18 = vpop.eup %10051  ;;  %v7513_v19 = vmul.f32 %v7511_v40, %v7507_v57  ;;  %v7678_v21 = vadd.f32 %v9223_v61, %v8436_v35  ;;  %v7672_v23 = vpop.f32.mrb[59].mxu1 }
0x2a0a   : > { %v10054_v24 = vpop.eup %10053  ;;  %v7352_v9 = vadd.f32 1.0, %v10052_v18  ;;  %v7512_v25 = vmul.f32 %v7510_v17, %v7502_v16  ;;  %v7673_v4 = vadd.f32 %v8436_v35, %v7672_v23 }
0x2a0b   : > { %v7351_v34 = vadd.f32 1.0, %v10054_v24  ;;  %v7515_v1 = vmul.f32 0.044715, %v7513_v19  ;;  %v7682_v43 = vmul.f32 %v7678_v21, %v7678_v21 }
0x2a0c   : > { %v7354_v22 = vmul.f32 0.5, %v7352_v9  ;;  %v7514_v10 = vmul.f32 0.044715, %v7512_v25  ;;  %v7681_v53 = vmul.f32 %v7673_v4, %v7673_v4 }
0x2a0d   : > { %v7353_v28 = vmul.f32 0.5, %v7351_v34  ;;  %v7517_v29 = vadd.f32 %v7515_v1, %v7507_v57  ;;  %v7684_v5 = vmul.f32 %v7682_v43, %v7678_v21 }
0x2a0e   : > { %v12155_v49 = vmul.f32 %v7354_v22, %v7336_v46  ;;  %v7516_v33 = vadd.f32 %v7514_v10, %v7502_v16  ;;  %v7683_v11 = vmul.f32 %v7681_v53, %v7673_v4 }
0x2a0f   : > { %v7355_v36 = vmul.f32 %v7353_v28, %v7331_v56  ;;  %v7519_v37 = vmul.f32 0.7978846, %v7517_v29  ;;  %v7686_v38 = vmul.f32 0.044715, %v7684_v5 }
0x2a10   : > { %v7518_v39 = vmul.f32 0.7978846, %v7516_v33  ;;  %v7685_v15 = vmul.f32 0.044715, %v7683_v11 }
0x2a11   : > { %10055 = vtanh.f32 %v7519_v37  ;;  %v7688_v35 = vadd.f32 %v7686_v38, %v7678_v21  ;;  %v9886_v42 = vpack.i.bf16 %v12155_v49, %v7355_v36  ;;  %v9517_v32 = vpack.c.bf16 %v12155_v49, %v7355_v36 }
0x2a12   : > { %10057 = vtanh.f32 %v7518_v39  ;;  %v7687_v26 = vadd.f32 %v7685_v15, %v7673_v4 }
0x2a13   : > { %v7690_v31 = vmul.f32 0.7978846, %v7688_v35  ;;  %9887 = vrot.lane.b32.xlu1 %v9886_v42, %s12417_s0 }
0x2a14   : > { %v7689_v47 = vmul.f32 0.7978846, %v7687_v26 }
0x2a15   : > { %10059 = vtanh.f32 %v7690_v31 }
0x2a16   : > { %10061 = vtanh.f32 %v7689_v47 }
0x2a1b   : > { %v10056_v48 = vpop.eup %10055 }
0x2a1c   : > { %v10058_v27 = vpop.eup %10057  ;;  %v7523_v58 = vadd.f32 1.0, %v10056_v48 }
0x2a1d   : > { %v7522_v44 = vadd.f32 1.0, %v10058_v27 }
0x2a1e   : > { %v7525_v45 = vmul.f32 0.5, %v7523_v58 }
0x2a1f   : > { %v10060_v41 = vpop.eup %10059  ;;  %v7524_v51 = vmul.f32 0.5, %v7522_v44 }
0x2a20   : > { %v10062_v0 = vpop.eup %10061  ;;  %v7527_v46 = vmul.f32 %v7525_v45, %v7507_v57  ;;  %v7694_v50 = vadd.f32 1.0, %v10060_v41 }
0x2a21   : > { %v7526_v56 = vmul.f32 %v7524_v51, %v7502_v16  ;;  %v7693_v59 = vadd.f32 1.0, %v10062_v0 }
0x2a22   : > { %v7696_v62 = vmul.f32 0.5, %v7694_v50 }
0x2a23   : > { %v7695_v63 = vmul.f32 0.5, %v7693_v59  ;;  %v9891_v2 = vpack.i.bf16 %v7527_v46, %v7526_v56  ;;  %v9523_v6 = vpack.c.bf16 %v7527_v46, %v7526_v56 }
0x2a24   : > { %v7698_v3 = vmul.f32 %v7696_v62, %v7678_v21 }
0x2a25   : > { %v7697_v7 = vmul.f32 %v7695_v63, %v7673_v4  ;;  %9892 = vrot.lane.b32.xlu0 %v9891_v2, %s12417_s0 }
0x2a27   : > { %v9896_v8 = vpack.i.bf16 %v7698_v3, %v7697_v7  ;;  %v9529_v60 = vpack.c.bf16 %v7698_v3, %v7697_v7 }
0x2a29   : > { %9902 = vrot.lane.b32.xlu0 %v12149_v30, %s10775_s4  ;;  %9897 = vrot.lane.b32.xlu1 %v9896_v8, %s12417_s0  ;;  %s8481_s0 = sshll.u32 %s12422_s26, 3 }
0x2a2d   : > { %9912 = vrot.lane.b32.xlu0 %v9886_v42, %s10775_s4  ;;  %9907 = vrot.lane.b32.xlu1 %v12149_v30, %s10776_s1 }
0x2a31   : > { %9922 = vrot.lane.b32.xlu0 %v9891_v2, %s10775_s4  ;;  %9917 = vrot.lane.b32.xlu1 %v9886_v42, %s10776_s1 }
0x2a35   : > { %9932 = vrot.lane.b32.xlu0 %v9896_v8, %s10775_s4  ;;  %9927 = vrot.lane.b32.xlu1 %v9891_v2, %s10776_s1  ;;  %s2217_s4 = scalar_lea.vmem %s11120_s21, %s8481_s0 }
0x2a39   : > { %9937 = vrot.lane.b32.xlu1 %v9896_v8, %s10776_s1 }
0x2a67   : > { %v9883_v12 = vpop.permute.xlu0 %9882 }
0x2a68   : > { %v9885_v13 = vunpack.i.h.bf16 %v9883_v12  ;;  %v9884_v57 = vunpack.i.l.bf16 %v9883_v12 }
0x2a6a   : > { %v9508_v16 = vpack.c.bf16 %v9885_v13, %v9884_v57 }
0x2a6c   : > { %9510 = vmatprep.subr.msk.bf16.mxu0 %vm12166_vm0, %v9508_v16 }
0x2a6d   : > { %9513 = vmatpush3.bf16.xpose.msk.msra.mxu0 %vm12166_vm0, %v9511_v52 }
0x2a85   : > { %v9888_v30 = vpop.permute.xlu1 %9887 }
0x2a86   : > { %v9890_v40 = vunpack.i.h.bf16 %v9888_v30  ;;  %v9889_v17 = vunpack.i.l.bf16 %v9888_v30 }
0x2a88   : > { %v9514_v61 = vpack.c.bf16 %v9890_v40, %v9889_v17 }
0x2a8a   : > { %9516 = vmatprep.subr.msk.bf16.mxu0 %vm12166_vm0, %v9514_v61 }
0x2a8b   : > { %9519 = vmatpush3.bf16.xpose.msk.msra.mxu0 %vm12166_vm0, %v9517_v32 }
0x2a97   : > { %v9893_v18 = vpop.permute.xlu0 %9892 }
0x2a98   : > { %v9895_v19 = vunpack.i.h.bf16 %v9893_v18  ;;  %v9894_v21 = vunpack.i.l.bf16 %v9893_v18 }
0x2a9a   : > { %v9520_v23 = vpack.c.bf16 %v9895_v19, %v9894_v21 }
0x2a9b   : > { %v9898_v24 = vpop.permute.xlu1 %9897  ;;  %v9903_v55 = vpop.permute.xlu0 %9902 }
0x2a9c   : > { %v9900_v9 = vunpack.i.h.bf16 %v9898_v24  ;;  %v9899_v54 = vunpack.i.l.bf16 %v9898_v24  ;;  %9522 = vmatprep.subr.msk.bf16.mxu0 %vm12166_vm0, %v9520_v23  ;;  %v9905_v25 = vunpack.i.h.bf16 %v9903_v55  ;;  %v9904_v4 = vunpack.i.l.bf16 %v9903_v55 }
0x2a9d   : > { %9525 = vmatpush3.bf16.xpose.msk.msra.mxu0 %vm12166_vm0, %v9523_v6 }
0x2a9e   : > { %v9526_v52 = vpack.c.bf16 %v9900_v9, %v9899_v54  ;;  %v9532_v34 = vpack.c.bf16 %v9905_v25, %v9904_v4 }
0x2a9f   : > { %v9908_v1 = vpop.permute.xlu1 %9907  ;;  %v9913_v43 = vpop.permute.xlu0 %9912 }
0x2aa0   : > { %9528 = vmatprep.subr.msk.bf16.mxu0 %vm12166_vm0, %v9526_v52  ;;  %v9910_v22 = vunpack.i.h.bf16 %v9908_v1  ;;  %v9909_v10 = vunpack.i.l.bf16 %v9908_v1  ;;  %v9915_v53 = vunpack.i.h.bf16 %v9913_v43  ;;  %v9914_v28 = vunpack.i.l.bf16 %v9913_v43 }
0x2aa2   : > { %v9535_v29 = vpack.c.bf16 %v9910_v22, %v9909_v10  ;;  %v9538_v5 = vpack.c.bf16 %v9915_v53, %v9914_v28 }
0x2aa3   : > { %v9918_v49 = vpop.permute.xlu1 %9917  ;;  %v9923_v33 = vpop.permute.xlu0 %9922 }
0x2aa4   : > { %v9920_v11 = vunpack.i.h.bf16 %v9918_v49  ;;  %v9919_v36 = vunpack.i.l.bf16 %v9918_v49  ;;  %v9925_v37 = vunpack.i.h.bf16 %v9923_v33  ;;  %v9924_v38 = vunpack.i.l.bf16 %v9923_v33 }
0x2aa5   : > { %9531 = vmatpush3.bf16.xpose.msk.msra.mxu0 %vm12166_vm0, %v9529_v60 }
0x2aa6   : > { %9534 = vmatprep.subr.msk.bf16.mxu0 %vm12166_vm0, %v9532_v34  ;;  %v9541_v39 = vpack.c.bf16 %v9920_v11, %v9919_v36  ;;  %v9544_v15 = vpack.c.bf16 %v9925_v37, %v9924_v38 }
0x2aa7   : > { %v9928_v35 = vpop.permute.xlu1 %9927  ;;  %v9933_v42 = vpop.permute.xlu0 %9932 }
0x2aa8   : > { %v9930_v26 = vunpack.i.h.bf16 %v9928_v35  ;;  %v9929_v32 = vunpack.i.l.bf16 %v9928_v35  ;;  %v9935_v31 = vunpack.i.h.bf16 %v9933_v42  ;;  %v9934_v47 = vunpack.i.l.bf16 %v9933_v42 }
0x2aaa   : > { %v9547_v48 = vpack.c.bf16 %v9930_v26, %v9929_v32  ;;  %v9550_v27 = vpack.c.bf16 %v9935_v31, %v9934_v47 }
0x2aab   : > { %v9938_v58 = vpop.permute.xlu1 %9937 }
0x2aac   : > { %v9940_v44 = vunpack.i.h.bf16 %v9938_v58  ;;  %v9939_v45 = vunpack.i.l.bf16 %v9938_v58 }
0x2aad   : > { %9537 = vmatpush3.bf16.xpose.msk.msra.mxu0 %vm12166_vm0, %v9535_v29 }
0x2aae   : > { %9540 = vmatprep.subr.msk.bf16.mxu0 %vm12166_vm0, %v9538_v5  ;;  %v9553_v41 = vpack.c.bf16 %v9940_v44, %v9939_v45 }
0x2ab5   : > { %9543 = vmatpush3.bf16.xpose.msk.msra.mxu0 %vm12166_vm0, %v9541_v39 }
0x2ab6   : > { %9546 = vmatprep.subr.msk.bf16.mxu0 %vm12166_vm0, %v9544_v15 }
0x2abd   : > { %9549 = vmatpush3.bf16.xpose.msk.msra.mxu0 %vm12166_vm0, %v9547_v48 }
0x2abe   : > { %9552 = vmatprep.subr.msk.bf16.mxu0 %vm12166_vm0, %v9550_v27 }
0x2ac5   : > { %9555 = vmatpush3.bf16.xpose.msk.msra.mxu0 %vm12166_vm0, %v9553_v41 }
0x2acc   : > { %8749 = vmatmul.mubr.msk.f32.vlgmr.msra.gmra.mrb[48].mxu0 %vm7755_vm15, %v12026_v20 }
0x2b9f   : > { %v7889_v51 = vpop.f32.mrb[48].mxu0 }
0x2ba0   : > { %v7891_v0 = vpop.f32.mrb[49].mxu0 }
0x2ba1   : > { %v7896_v46 = vcombine.low %v7889_v51, %v7891_v0 }
0x2ba3   : > { %7898 = vst [vmem:[%s2217_s4] sm:$0xff] %v7896_v46 }
0x2ba4 PF: > { %s156_s22 = sadd.s32 1, %s10673_s22  }
0x2ba5   : > { %p153_p6 = scmp.ge.s32.totalorder %s156_s22, 4  }
0x2ba7   :  { %155 = sbr.rel (!%p153_p6) target bundleno = 142 (0x8e), region = 484 }
0x2bae   :  { %7920 = vsyncpa [#allocation3], 1 }
0x2baf   :  { %7922 = vsyncpa [#allocation3 + $0x1], 1 }
0x2bb0   :  { %7923 = vsyncpa [#allocation5], 1 }
0x2bb1   :  { %7924 = vsyncpa [#allocation8], 1 }
0x2bb2   :  { %7925 = vsyncpa [#allocation11], 1 }
0x2bb3   :  { %7926 = vsyncpa [#allocation14], 1 }
0x2bb4   :  { %7927 = vsyncpa [#allocation17], 1 }
0x2bb5   :  { %7928 = vsyncpa [#allocation20], 1 }
0x2bb6   :  { %7929 = vsyncpa [#allocation23], 1 }
0x2bb7   :  { %7930 = vsyncpa [#allocation26], 1 }
0x2bb8   :  { %7931 = vsyncpa [#allocation29], 1 }
0x2bb9   :  { %7932 = vsyncpa [#allocation32], 1 }

</bundles_post_ra>
